<compile_context>
chip_gen: v7x
topology: tpu7x:2x2x1
jax: 0.10.0
libtpu: 0.0.40
codegen_flags: <defaults>
</compile_context>

<pallas_src>
import jax
import jax.numpy as jnp
from jax.experimental import pallas as pl
from jax.experimental.pallas import tpu as pltpu

EPS = 1e-5


# ---------------------------------------------------------------------------
# Fused Pallas kernel: conv3x3 + BN + ReLU  ->  polyphase convT(s=2) + BN + ReLU
# ---------------------------------------------------------------------------
def _decoder_block_kernel(x_ref, w1_ref, s1_ref, b1_ref, w2_ref, s2_ref, b2_ref,
                          o_ref, y1p_ref):
    nb, hp2, wp2, cin = x_ref.shape
    h, w = hp2 - 2, wp2 - 2
    cmid = y1p_ref.shape[-1]
    cout = s2_ref.shape[-1]
    m_rows = nb * h * w

    # ---- stage 1: Conv2d(k=3, p=1) with folded BN + ReLU --------------------
    # 9 accumulated (M, Cin) x (Cin, Cmid) bf16 matmuls with an f32 accumulator:
    # no (M, 9*Cin) patch matrix, no lane concat.
    acc1 = None
    for ky in range(3):
        for kx in range(3):
            tap = x_ref[:, ky:ky + h, kx:kx + w, :].reshape(m_rows, cin)
            d = jnp.dot(tap, w1_ref[3 * ky + kx],
                        preferred_element_type=jnp.float32)
            acc1 = d if acc1 is None else acc1 + d
    y1 = jnp.maximum(acc1 * s1_ref[...] + b1_ref[...], 0.0)      # f32 epilogue
    y1_bf = y1.astype(jnp.bfloat16)                              # MXU operand dtype

    # ---- stage 2: ConvTranspose2d(k=3, s=2, p=1, op=1) via polyphase --------
    # y1 stays in a VMEM scratch padded by one zero row/col at bottom/right for
    # the "m+1"/"n+1" taps.  Only the pad row/col are zeroed (every step, so the
    # kernel is also correct when a megacore core never executes program_id 0).
    y1p_ref[:, h:h + 1, :, :] = jnp.zeros((nb, 1, w + 1, cmid), y1p_ref.dtype)
    y1p_ref[:, :, w:w + 1, :] = jnp.zeros((nb, h + 1, 1, cmid), y1p_ref.dtype)
    y1p_ref[:, 0:h, 0:w, :] = y1_bf.reshape(nb, h, w, cmid)

    y00 = y1_bf                                                   # y1[m,   n  ]
    y01 = y1p_ref[:, 0:h, 1:w + 1, :].reshape(m_rows, cmid)       # y1[m,   n+1]
    y10 = y1p_ref[:, 1:h + 1, 0:w, :].reshape(m_rows, cmid)       # y1[m+1, n  ]
    y11 = y1p_ref[:, 1:h + 1, 1:w + 1, :].reshape(m_rows, cmid)   # y1[m+1, n+1]

    def mm(a, k):
        return jnp.dot(a, w2_ref[k], preferred_element_type=jnp.float32)

    # Only the 9 nonzero (tap, parity) weight blocks are used (dense form = 16).
    p0 = mm(y00, 0)                                               # out[2m,   2n  ]
    p1 = mm(y00, 1) + mm(y01, 2)                                  # out[2m,   2n+1]
    p2 = mm(y00, 3) + mm(y10, 4)                                  # out[2m+1, 2n  ]
    p3 = mm(y00, 5) + mm(y01, 6) + mm(y10, 7) + mm(y11, 8)        # out[2m+1, 2n+1]

    s2 = s2_ref[...]
    b2 = b2_ref[...]
    outs = [jnp.maximum(p * s2 + b2, 0.0) for p in (p0, p1, p2, p3)]   # f32 epilogue

    # Lane-dense store: rows = (b, m), lanes = (n, parity, cout) so the stored
    # block's last dim is W*4*Cout (>= 128) instead of 4*Cout masked stores.
    cat = jnp.concatenate(outs, axis=-1)                          # (M, 4*Cout)
    cat3 = cat.reshape(nb * h, w, 4 * cout)
    row = jnp.concatenate([cat3[:, j, :] for j in range(w)], axis=-1)
    o_ref[...] = row.astype(o_ref.dtype)                          # (NB*H, W*4*Cout)


# ---------------------------------------------------------------------------
# Wrapper: weight/BN folding (XLA, tiny), one pallas_call, free layout fix-up
# ---------------------------------------------------------------------------
def _fold_bn(gamma, beta, mean, var, conv_bias):
    scale = gamma / jnp.sqrt(var + EPS)
    shift = beta + scale * (conv_bias - mean)
    return scale, shift


def _pick_batch_block(n, hw, target_rows=2048):
    """Fold as many images per grid step as useful, but keep >=2 parallel steps
    when the batch allows it (v7x megacore has 2 TensorCores)."""
    nb = max(1, min(n, target_rows // max(hw, 1)))
    if n >= 2:
        nb = max(1, min(nb, n // 2))
    while n % nb:          # avoid a ragged final batch block
        nb -= 1
    return nb


def decoder_block_forward(x_nchw, params):
    n, cin, h, w = x_nchw.shape
    cmid = params["conv1_w"].shape[0]
    cout = params["convt_w"].shape[1]
    nb = _pick_batch_block(n, h * w)

    # NHWC + 1-pixel spatial halo for the 3x3 / pad=1 conv; bf16 activations.
    x = jnp.transpose(x_nchw, (0, 2, 3, 1))
    xp = jnp.pad(x, ((0, 0), (1, 1), (1, 1), (0, 0))).astype(jnp.bfloat16)

    # Stage-1 weight as 9 per-tap (Cin, Cmid) matrices, tap index t = 3*ky + kx.
    w1 = jnp.transpose(params["conv1_w"], (2, 3, 1, 0)).reshape(9, cin, cmid)
    w1 = w1.astype(jnp.bfloat16)
    s1, b1 = _fold_bn(params["bn1_gamma"], params["bn1_beta"],
                      params["bn1_mean"], params["bn1_var"], params["conv1_b"])

    # Stage-2 polyphase weights: only the 9 nonzero (tap, parity) blocks.
    # convt_w: (Cmid, Cout, 3, 3).  Parity p = 2*py + px; taps are the 4 shifts
    # of y1: (m,n), (m,n+1), (m+1,n), (m+1,n+1).
    wt = params["convt_w"]
    tap = lambda ky, kx: wt[:, :, ky, kx]                        # (Cmid, Cout)
    w2 = jnp.stack([
        tap(1, 1),                                               # p0 <- y(m,  n  )
        tap(1, 2), tap(1, 0),                                    # p1 <- y00, y01
        tap(2, 1), tap(0, 1),                                    # p2 <- y00, y10
        tap(2, 2), tap(2, 0), tap(0, 2), tap(0, 0),              # p3 <- y00,y01,y10,y11
    ], axis=0).astype(jnp.bfloat16)                              # (9, Cmid, Cout)
    s2, b2 = _fold_bn(params["bn2_gamma"], params["bn2_beta"],
                      params["bn2_mean"], params["bn2_var"], params["convt_b"])

    out2d = pl.pallas_call(
        _decoder_block_kernel,
        out_shape=jax.ShapeDtypeStruct((n * h, w * 4 * cout), jnp.float32),
        grid=(n // nb,),
        in_specs=[
            pl.BlockSpec((nb, h + 2, w + 2, cin), lambda i: (i, 0, 0, 0)),
            pl.BlockSpec((9, cin, cmid), lambda i: (0, 0, 0)),
            pl.BlockSpec((1, cmid), lambda i: (0, 0)),
            pl.BlockSpec((1, cmid), lambda i: (0, 0)),
            pl.BlockSpec((9, cmid, cout), lambda i: (0, 0, 0)),
            pl.BlockSpec((1, cout), lambda i: (0, 0)),
            pl.BlockSpec((1, cout), lambda i: (0, 0)),
        ],
        out_specs=pl.BlockSpec((nb * h, w * 4 * cout), lambda i: (i, 0)),
        scratch_shapes=[pltpu.VMEM((nb, h + 1, w + 1, cmid), jnp.bfloat16)],
        compiler_params=pltpu.CompilerParams(
            dimension_semantics=("parallel",),
            vmem_limit_bytes=32 * 1024 * 1024),
    )(xp, w1, s1[None, :], b1[None, :], w2, s2[None, :], b2[None, :])

    # (N*H, W*4*Cout) has the same HBM layout as the old (N, H*W, 4*Cout); the
    # parity de-interleave is folded into the NHWC->NCHW transpose we need anyway.
    out = out2d.reshape(n, h, w, 2, 2, cout)          # [b, m, n', py, px, c]
    out = jnp.transpose(out, (0, 5, 1, 3, 2, 4))      # [b, c, m, py, n', px]
    return out.reshape(n, cout, 2 * h, 2 * w)


# ---------------------------------------------------------------------------
# Pure-JAX reference (XLA convolutions) for verification
# ---------------------------------------------------------------------------
def ref_forward(x_nchw, params):
    def bn(x, g, b, m, v):
        g, b, m, v = (t[None, :, None, None] for t in (g, b, m, v))
        return g * (x - m) / jnp.sqrt(v + EPS) + b

    y = jax.lax.conv_general_dilated(
        x_nchw, params["conv1_w"], (1, 1), ((1, 1), (1, 1)),
        dimension_numbers=("NCHW", "OIHW", "NCHW"))
    y = y + params["conv1_b"][None, :, None, None]
    y = jnp.maximum(bn(y, params["bn1_gamma"], params["bn1_beta"],
                       params["bn1_mean"], params["bn1_var"]), 0.0)

    wt = params["convt_w"]
    w2 = jnp.transpose(wt[:, :, ::-1, ::-1], (1, 0, 2, 3))  # (cout, cmid, 3, 3)
    y = jax.lax.conv_general_dilated(
        y, w2, (1, 1), ((1, 2), (1, 2)), lhs_dilation=(2, 2),
        dimension_numbers=("NCHW", "OIHW", "NCHW"))
    y = y + params["convt_b"][None, :, None, None]
    y = jnp.maximum(bn(y, params["bn2_gamma"], params["bn2_beta"],
                       params["bn2_mean"], params["bn2_var"]), 0.0)
    return y


# ---------------------------------------------------------------------------
# Deterministic parameter init (synthetic; matches module __init__ shapes)
# ---------------------------------------------------------------------------
def init_params(key, cin, cmid, cout):
    ks = jax.random.split(key, 12)
    f32 = jnp.float32
    return {
        "conv1_w": 0.1 * jax.random.normal(ks[0], (cmid, cin, 3, 3), f32),
        "conv1_b": 0.1 * jax.random.normal(ks[1], (cmid,), f32),
        "bn1_gamma": 1.0 + 0.1 * jax.random.normal(ks[2], (cmid,), f32),
        "bn1_beta": 0.1 * jax.random.normal(ks[3], (cmid,), f32),
        "bn1_mean": 0.1 * jax.random.normal(ks[4], (cmid,), f32),
        "bn1_var": jax.random.uniform(ks[5], (cmid,), f32, 0.5, 1.5),
        "convt_w": 0.1 * jax.random.normal(ks[6], (cmid, cout, 3, 3), f32),
        "convt_b": 0.1 * jax.random.normal(ks[7], (cout,), f32),
        "bn2_gamma": 1.0 + 0.1 * jax.random.normal(ks[8], (cout,), f32),
        "bn2_beta": 0.1 * jax.random.normal(ks[9], (cout,), f32),
        "bn2_mean": 0.1 * jax.random.normal(ks[10], (cout,), f32),
        "bn2_var": jax.random.uniform(ks[11], (cout,), f32, 0.5, 1.5),
    }


def _check(n, cin, cmid, cout, h, w, kx, kp):
    x = jax.random.normal(kx, (n, cin, h, w), jnp.float32)
    params = init_params(kp, cin, cmid, cout)
    out = jax.block_until_ready(jax.jit(decoder_block_forward)(x, params))
    ref = jax.block_until_ready(ref_forward(x, params))
    assert out.shape == (n, cout, 2 * h, 2 * w), out.shape
    err = float(jnp.max(jnp.abs(out - ref)))
    # bf16 MXU operands with f32 accumulation -> loosened tolerance vs f32 reference.
    assert jnp.allclose(out, ref, atol=5e-2, rtol=5e-2), err


if __name__ == "__main__":
    key = jax.random.PRNGKey(0)
    k1, k2, k3, k4 = jax.random.split(key, 4)

    # case 1: toy shape (square spatial), NB=1, grid=(2,) "parallel"
    _check(2, 4, 8, 4, 16, 16, k1, k2)

    # case 2: H != W, unequal channel counts, batch-block folding (NB=2)
    _check(4, 3, 16, 8, 8, 16, k3, k4)

    print("KERNEL_OK")
</pallas_src>

<mosaic_0001>
module attributes {stable_mosaic.version = 11 : i64} {
  func.func @_decoder_block_kernel(%arg0: i32, %arg1: memref<1x18x18x4xbf16, #tpu.memory_space<vmem>>, %arg2: memref<9x4x8xbf16, #tpu.memory_space<vmem>>, %arg3: memref<1x8xf32, #tpu.memory_space<vmem>>, %arg4: memref<1x8xf32, #tpu.memory_space<vmem>>, %arg5: memref<9x8x4xbf16, #tpu.memory_space<vmem>>, %arg6: memref<1x4xf32, #tpu.memory_space<vmem>>, %arg7: memref<1x4xf32, #tpu.memory_space<vmem>>, %arg8: memref<16x256xf32, #tpu.memory_space<vmem>>, %arg9: memref<1x17x17x8xbf16, #tpu.memory_space<vmem>>) attributes {dimension_semantics = [#tpu.dimension_semantics<parallel>], iteration_bounds = array<i64: 2>, scalar_prefetch = 0 : i64, scratch_operands = 1 : i64, tpu.core_type = #tpu.core_type<tc>, window_params = [{transform_indices = @transform_0, window_bounds = array<i64: 1, 18, 18, 4>}, {pipeline_mode = #tpu.pipeline_mode<synchronous>, transform_indices = @transform_1, window_bounds = array<i64: 9, 4, 8>}, {pipeline_mode = #tpu.pipeline_mode<synchronous>, transform_indices = @transform_2, window_bounds = array<i64: 1, 8>}, {pipeline_mode = #tpu.pipeline_mode<synchronous>, transform_indices = @transform_3, window_bounds = array<i64: 1, 8>}, {pipeline_mode = #tpu.pipeline_mode<synchronous>, transform_indices = @transform_4, window_bounds = array<i64: 9, 8, 4>}, {pipeline_mode = #tpu.pipeline_mode<synchronous>, transform_indices = @transform_5, window_bounds = array<i64: 1, 4>}, {pipeline_mode = #tpu.pipeline_mode<synchronous>, transform_indices = @transform_6, window_bounds = array<i64: 1, 4>}, {transform_indices = @transform_7, window_bounds = array<i64: 16, 256>}]} {
    %c0 = arith.constant 0 : index
    %c0_0 = arith.constant 0 : index
    %c0_1 = arith.constant 0 : index
    %c0_2 = arith.constant 0 : index
    %0 = vector.load %arg1[%c0, %c0_0, %c0_1, %c0_2] : memref<1x18x18x4xbf16, #tpu.memory_space<vmem>>, vector<1x16x16x4xbf16>
    %1 = vector.shape_cast %0 : vector<1x16x16x4xbf16> to vector<256x4xbf16>
    %c0_3 = arith.constant 0 : index
    %c0_4 = arith.constant 0 : index
    %c0_5 = arith.constant 0 : index
    %2 = vector.load %arg2[%c0_3, %c0_4, %c0_5] : memref<9x4x8xbf16, #tpu.memory_space<vmem>>, vector<1x4x8xbf16>
    %3 = vector.shape_cast %2 : vector<1x4x8xbf16> to vector<4x8xbf16>
    %cst = arith.constant dense<0.000000e+00> : vector<256x8xf32>
    %4 = tpu.matmul %1, %3, %cst {dimension_numbers = #tpu.dot_dimension_numbers<[1], [0], [0], [1], [0, 0, 1, 1], [], []>} : vector<256x4xbf16>, vector<4x8xbf16>, vector<256x8xf32> -> vector<256x8xf32>
    %c0_6 = arith.constant 0 : index
    %c0_7 = arith.constant 0 : index
    %c1 = arith.constant 1 : index
    %c0_8 = arith.constant 0 : index
    %5 = vector.load %arg1[%c0_6, %c0_7, %c1, %c0_8] : memref<1x18x18x4xbf16, #tpu.memory_space<vmem>>, vector<1x16x16x4xbf16>
    %6 = vector.shape_cast %5 : vector<1x16x16x4xbf16> to vector<256x4xbf16>
    %c1_9 = arith.constant 1 : index
    %c0_10 = arith.constant 0 : index
    %c0_11 = arith.constant 0 : index
    %7 = vector.load %arg2[%c1_9, %c0_10, %c0_11] : memref<9x4x8xbf16, #tpu.memory_space<vmem>>, vector<1x4x8xbf16>
    %8 = vector.shape_cast %7 : vector<1x4x8xbf16> to vector<4x8xbf16>
    %cst_12 = arith.constant dense<0.000000e+00> : vector<256x8xf32>
    %9 = tpu.matmul %6, %8, %cst_12 {dimension_numbers = #tpu.dot_dimension_numbers<[1], [0], [0], [1], [0, 0, 1, 1], [], []>} : vector<256x4xbf16>, vector<4x8xbf16>, vector<256x8xf32> -> vector<256x8xf32>
    %10 = arith.addf %4, %9 : vector<256x8xf32>
    %c0_13 = arith.constant 0 : index
    %c0_14 = arith.constant 0 : index
    %c2 = arith.constant 2 : index
    %c0_15 = arith.constant 0 : index
    %11 = vector.load %arg1[%c0_13, %c0_14, %c2, %c0_15] : memref<1x18x18x4xbf16, #tpu.memory_space<vmem>>, vector<1x16x16x4xbf16>
    %12 = vector.shape_cast %11 : vector<1x16x16x4xbf16> to vector<256x4xbf16>
    %c2_16 = arith.constant 2 : index
    %c0_17 = arith.constant 0 : index
    %c0_18 = arith.constant 0 : index
    %13 = vector.load %arg2[%c2_16, %c0_17, %c0_18] : memref<9x4x8xbf16, #tpu.memory_space<vmem>>, vector<1x4x8xbf16>
    %14 = vector.shape_cast %13 : vector<1x4x8xbf16> to vector<4x8xbf16>
    %cst_19 = arith.constant dense<0.000000e+00> : vector<256x8xf32>
    %15 = tpu.matmul %12, %14, %cst_19 {dimension_numbers = #tpu.dot_dimension_numbers<[1], [0], [0], [1], [0, 0, 1, 1], [], []>} : vector<256x4xbf16>, vector<4x8xbf16>, vector<256x8xf32> -> vector<256x8xf32>
    %16 = arith.addf %10, %15 : vector<256x8xf32>
    %c0_20 = arith.constant 0 : index
    %c1_21 = arith.constant 1 : index
    %c0_22 = arith.constant 0 : index
    %c0_23 = arith.constant 0 : index
    %17 = vector.load %arg1[%c0_20, %c1_21, %c0_22, %c0_23] : memref<1x18x18x4xbf16, #tpu.memory_space<vmem>>, vector<1x16x16x4xbf16>
    %18 = vector.shape_cast %17 : vector<1x16x16x4xbf16> to vector<256x4xbf16>
    %c3 = arith.constant 3 : index
    %c0_24 = arith.constant 0 : index
    %c0_25 = arith.constant 0 : index
    %19 = vector.load %arg2[%c3, %c0_24, %c0_25] : memref<9x4x8xbf16, #tpu.memory_space<vmem>>, vector<1x4x8xbf16>
    %20 = vector.shape_cast %19 : vector<1x4x8xbf16> to vector<4x8xbf16>
    %cst_26 = arith.constant dense<0.000000e+00> : vector<256x8xf32>
    %21 = tpu.matmul %18, %20, %cst_26 {dimension_numbers = #tpu.dot_dimension_numbers<[1], [0], [0], [1], [0, 0, 1, 1], [], []>} : vector<256x4xbf16>, vector<4x8xbf16>, vector<256x8xf32> -> vector<256x8xf32>
    %22 = arith.addf %16, %21 : vector<256x8xf32>
    %c0_27 = arith.constant 0 : index
    %c1_28 = arith.constant 1 : index
    %c1_29 = arith.constant 1 : index
    %c0_30 = arith.constant 0 : index
    %23 = vector.load %arg1[%c0_27, %c1_28, %c1_29, %c0_30] : memref<1x18x18x4xbf16, #tpu.memory_space<vmem>>, vector<1x16x16x4xbf16>
    %24 = vector.shape_cast %23 : vector<1x16x16x4xbf16> to vector<256x4xbf16>
    %c4 = arith.constant 4 : index
    %c0_31 = arith.constant 0 : index
    %c0_32 = arith.constant 0 : index
    %25 = vector.load %arg2[%c4, %c0_31, %c0_32] : memref<9x4x8xbf16, #tpu.memory_space<vmem>>, vector<1x4x8xbf16>
    %26 = vector.shape_cast %25 : vector<1x4x8xbf16> to vector<4x8xbf16>
    %cst_33 = arith.constant dense<0.000000e+00> : vector<256x8xf32>
    %27 = tpu.matmul %24, %26, %cst_33 {dimension_numbers = #tpu.dot_dimension_numbers<[1], [0], [0], [1], [0, 0, 1, 1], [], []>} : vector<256x4xbf16>, vector<4x8xbf16>, vector<256x8xf32> -> vector<256x8xf32>
    %28 = arith.addf %22, %27 : vector<256x8xf32>
    %c0_34 = arith.constant 0 : index
    %c1_35 = arith.constant 1 : index
    %c2_36 = arith.constant 2 : index
    %c0_37 = arith.constant 0 : index
    %29 = vector.load %arg1[%c0_34, %c1_35, %c2_36, %c0_37] : memref<1x18x18x4xbf16, #tpu.memory_space<vmem>>, vector<1x16x16x4xbf16>
    %30 = vector.shape_cast %29 : vector<1x16x16x4xbf16> to vector<256x4xbf16>
    %c5 = arith.constant 5 : index
    %c0_38 = arith.constant 0 : index
    %c0_39 = arith.constant 0 : index
    %31 = vector.load %arg2[%c5, %c0_38, %c0_39] : memref<9x4x8xbf16, #tpu.memory_space<vmem>>, vector<1x4x8xbf16>
    %32 = vector.shape_cast %31 : vector<1x4x8xbf16> to vector<4x8xbf16>
    %cst_40 = arith.constant dense<0.000000e+00> : vector<256x8xf32>
    %33 = tpu.matmul %30, %32, %cst_40 {dimension_numbers = #tpu.dot_dimension_numbers<[1], [0], [0], [1], [0, 0, 1, 1], [], []>} : vector<256x4xbf16>, vector<4x8xbf16>, vector<256x8xf32> -> vector<256x8xf32>
    %34 = arith.addf %28, %33 : vector<256x8xf32>
    %c0_41 = arith.constant 0 : index
    %c2_42 = arith.constant 2 : index
    %c0_43 = arith.constant 0 : index
    %c0_44 = arith.constant 0 : index
    %35 = vector.load %arg1[%c0_41, %c2_42, %c0_43, %c0_44] : memref<1x18x18x4xbf16, #tpu.memory_space<vmem>>, vector<1x16x16x4xbf16>
    %36 = vector.shape_cast %35 : vector<1x16x16x4xbf16> to vector<256x4xbf16>
    %c6 = arith.constant 6 : index
    %c0_45 = arith.constant 0 : index
    %c0_46 = arith.constant 0 : index
    %37 = vector.load %arg2[%c6, %c0_45, %c0_46] : memref<9x4x8xbf16, #tpu.memory_space<vmem>>, vector<1x4x8xbf16>
    %38 = vector.shape_cast %37 : vector<1x4x8xbf16> to vector<4x8xbf16>
    %cst_47 = arith.constant dense<0.000000e+00> : vector<256x8xf32>
    %39 = tpu.matmul %36, %38, %cst_47 {dimension_numbers = #tpu.dot_dimension_numbers<[1], [0], [0], [1], [0, 0, 1, 1], [], []>} : vector<256x4xbf16>, vector<4x8xbf16>, vector<256x8xf32> -> vector<256x8xf32>
    %40 = arith.addf %34, %39 : vector<256x8xf32>
    %c0_48 = arith.constant 0 : index
    %c2_49 = arith.constant 2 : index
    %c1_50 = arith.constant 1 : index
    %c0_51 = arith.constant 0 : index
    %41 = vector.load %arg1[%c0_48, %c2_49, %c1_50, %c0_51] : memref<1x18x18x4xbf16, #tpu.memory_space<vmem>>, vector<1x16x16x4xbf16>
    %42 = vector.shape_cast %41 : vector<1x16x16x4xbf16> to vector<256x4xbf16>
    %c7 = arith.constant 7 : index
    %c0_52 = arith.constant 0 : index
    %c0_53 = arith.constant 0 : index
    %43 = vector.load %arg2[%c7, %c0_52, %c0_53] : memref<9x4x8xbf16, #tpu.memory_space<vmem>>, vector<1x4x8xbf16>
    %44 = vector.shape_cast %43 : vector<1x4x8xbf16> to vector<4x8xbf16>
    %cst_54 = arith.constant dense<0.000000e+00> : vector<256x8xf32>
    %45 = tpu.matmul %42, %44, %cst_54 {dimension_numbers = #tpu.dot_dimension_numbers<[1], [0], [0], [1], [0, 0, 1, 1], [], []>} : vector<256x4xbf16>, vector<4x8xbf16>, vector<256x8xf32> -> vector<256x8xf32>
    %46 = arith.addf %40, %45 : vector<256x8xf32>
    %c0_55 = arith.constant 0 : index
    %c2_56 = arith.constant 2 : index
    %c2_57 = arith.constant 2 : index
    %c0_58 = arith.constant 0 : index
    %47 = vector.load %arg1[%c0_55, %c2_56, %c2_57, %c0_58] : memref<1x18x18x4xbf16, #tpu.memory_space<vmem>>, vector<1x16x16x4xbf16>
    %48 = vector.shape_cast %47 : vector<1x16x16x4xbf16> to vector<256x4xbf16>
    %c8 = arith.constant 8 : index
    %c0_59 = arith.constant 0 : index
    %c0_60 = arith.constant 0 : index
    %49 = vector.load %arg2[%c8, %c0_59, %c0_60] : memref<9x4x8xbf16, #tpu.memory_space<vmem>>, vector<1x4x8xbf16>
    %50 = vector.shape_cast %49 : vector<1x4x8xbf16> to vector<4x8xbf16>
    %cst_61 = arith.constant dense<0.000000e+00> : vector<256x8xf32>
    %51 = tpu.matmul %48, %50, %cst_61 {dimension_numbers = #tpu.dot_dimension_numbers<[1], [0], [0], [1], [0, 0, 1, 1], [], []>} : vector<256x4xbf16>, vector<4x8xbf16>, vector<256x8xf32> -> vector<256x8xf32>
    %52 = arith.addf %46, %51 : vector<256x8xf32>
    %c0_62 = arith.constant 0 : index
    %c0_63 = arith.constant 0 : index
    %53 = vector.load %arg3[%c0_62, %c0_63] : memref<1x8xf32, #tpu.memory_space<vmem>>, vector<1x8xf32>
    %54 = vector.broadcast %53 : vector<1x8xf32> to vector<256x8xf32>
    %55 = arith.mulf %52, %54 : vector<256x8xf32>
    %c0_64 = arith.constant 0 : index
    %c0_65 = arith.constant 0 : index
    %56 = vector.load %arg4[%c0_64, %c0_65] : memref<1x8xf32, #tpu.memory_space<vmem>>, vector<1x8xf32>
    %57 = vector.broadcast %56 : vector<1x8xf32> to vector<256x8xf32>
    %58 = arith.addf %55, %57 : vector<256x8xf32>
    %cst_66 = arith.constant 0.000000e+00 : f32
    %59 = vector.broadcast %cst_66 : f32 to vector<256x8xf32>
    %60 = arith.maximumf %58, %59 : vector<256x8xf32>
    %61 = arith.truncf %60 : vector<256x8xf32> to vector<256x8xbf16>
    %cst_67 = arith.constant 0.000000e+00 : bf16
    %62 = vector.broadcast %cst_67 : bf16 to vector<1x1x17x8xbf16>
    %c0_68 = arith.constant 0 : index
    %c16 = arith.constant 16 : index
    %c0_69 = arith.constant 0 : index
    %c0_70 = arith.constant 0 : index
    %63 = vector.load %arg9[%c0_68, %c16, %c0_69, %c0_70] : memref<1x17x17x8xbf16, #tpu.memory_space<vmem>>, vector<1x1x17x8xbf16>
    tpu.vector_store %arg9[%c0_68, %c16, %c0_69, %c0_70], %62 {strides = array<i32>} : memref<1x17x17x8xbf16, #tpu.memory_space<vmem>>, vector<1x1x17x8xbf16>,
    %cst_71 = arith.constant 0.000000e+00 : bf16
    %64 = vector.broadcast %cst_71 : bf16 to vector<1x17x1x8xbf16>
    %c0_72 = arith.constant 0 : index
    %c0_73 = arith.constant 0 : index
    %c16_74 = arith.constant 16 : index
    %c0_75 = arith.constant 0 : index
    %65 = vector.load %arg9[%c0_72, %c0_73, %c16_74, %c0_75] : memref<1x17x17x8xbf16, #tpu.memory_space<vmem>>, vector<1x17x1x8xbf16>
    tpu.vector_store %arg9[%c0_72, %c0_73, %c16_74, %c0_75], %64 {strides = array<i32>} : memref<1x17x17x8xbf16, #tpu.memory_space<vmem>>, vector<1x17x1x8xbf16>,
    %66 = vector.shape_cast %61 : vector<256x8xbf16> to vector<1x16x16x8xbf16>
    %c0_76 = arith.constant 0 : index
    %c0_77 = arith.constant 0 : index
    %c0_78 = arith.constant 0 : index
    %c0_79 = arith.constant 0 : index
    %67 = vector.load %arg9[%c0_76, %c0_77, %c0_78, %c0_79] : memref<1x17x17x8xbf16, #tpu.memory_space<vmem>>, vector<1x16x16x8xbf16>
    tpu.vector_store %arg9[%c0_76, %c0_77, %c0_78, %c0_79], %66 {strides = array<i32>} : memref<1x17x17x8xbf16, #tpu.memory_space<vmem>>, vector<1x16x16x8xbf16>,
    %c0_80 = arith.constant 0 : index
    %c0_81 = arith.constant 0 : index
    %c1_82 = arith.constant 1 : index
    %c0_83 = arith.constant 0 : index
    %68 = vector.load %arg9[%c0_80, %c0_81, %c1_82, %c0_83] : memref<1x17x17x8xbf16, #tpu.memory_space<vmem>>, vector<1x16x16x8xbf16>
    %69 = vector.shape_cast %68 : vector<1x16x16x8xbf16> to vector<256x8xbf16>
    %c0_84 = arith.constant 0 : index
    %c1_85 = arith.constant 1 : index
    %c0_86 = arith.constant 0 : index
    %c0_87 = arith.constant 0 : index
    %70 = vector.load %arg9[%c0_84, %c1_85, %c0_86, %c0_87] : memref<1x17x17x8xbf16, #tpu.memory_space<vmem>>, vector<1x16x16x8xbf16>
    %71 = vector.shape_cast %70 : vector<1x16x16x8xbf16> to vector<256x8xbf16>
    %c0_88 = arith.constant 0 : index
    %c1_89 = arith.constant 1 : index
    %c1_90 = arith.constant 1 : index
    %c0_91 = arith.constant 0 : index
    %72 = vector.load %arg9[%c0_88, %c1_89, %c1_90, %c0_91] : memref<1x17x17x8xbf16, #tpu.memory_space<vmem>>, vector<1x16x16x8xbf16>
    %73 = vector.shape_cast %72 : vector<1x16x16x8xbf16> to vector<256x8xbf16>
    %c0_92 = arith.constant 0 : index
    %c0_93 = arith.constant 0 : index
    %c0_94 = arith.constant 0 : index
    %74 = vector.load %arg5[%c0_92, %c0_93, %c0_94] : memref<9x8x4xbf16, #tpu.memory_space<vmem>>, vector<1x8x4xbf16>
    %75 = vector.shape_cast %74 : vector<1x8x4xbf16> to vector<8x4xbf16>
    %cst_95 = arith.constant dense<0.000000e+00> : vector<256x4xf32>
    %76 = tpu.matmul %61, %75, %cst_95 {dimension_numbers = #tpu.dot_dimension_numbers<[1], [0], [0], [1], [0, 0, 1, 1], [], []>} : vector<256x8xbf16>, vector<8x4xbf16>, vector<256x4xf32> -> vector<256x4xf32>
    %c1_96 = arith.constant 1 : index
    %c0_97 = arith.constant 0 : index
    %c0_98 = arith.constant 0 : index
    %77 = vector.load %arg5[%c1_96, %c0_97, %c0_98] : memref<9x8x4xbf16, #tpu.memory_space<vmem>>, vector<1x8x4xbf16>
    %78 = vector.shape_cast %77 : vector<1x8x4xbf16> to vector<8x4xbf16>
    %cst_99 = arith.constant dense<0.000000e+00> : vector<256x4xf32>
    %79 = tpu.matmul %61, %78, %cst_99 {dimension_numbers = #tpu.dot_dimension_numbers<[1], [0], [0], [1], [0, 0, 1, 1], [], []>} : vector<256x8xbf16>, vector<8x4xbf16>, vector<256x4xf32> -> vector<256x4xf32>
    %c2_100 = arith.constant 2 : index
    %c0_101 = arith.constant 0 : index
    %c0_102 = arith.constant 0 : index
    %80 = vector.load %arg5[%c2_100, %c0_101, %c0_102] : memref<9x8x4xbf16, #tpu.memory_space<vmem>>, vector<1x8x4xbf16>
    %81 = vector.shape_cast %80 : vector<1x8x4xbf16> to vector<8x4xbf16>
    %cst_103 = arith.constant dense<0.000000e+00> : vector<256x4xf32>
    %82 = tpu.matmul %69, %81, %cst_103 {dimension_numbers = #tpu.dot_dimension_numbers<[1], [0], [0], [1], [0, 0, 1, 1], [], []>} : vector<256x8xbf16>, vector<8x4xbf16>, vector<256x4xf32> -> vector<256x4xf32>
    %83 = arith.addf %79, %82 : vector<256x4xf32>
    %c3_104 = arith.constant 3 : index
    %c0_105 = arith.constant 0 : index
    %c0_106 = arith.constant 0 : index
    %84 = vector.load %arg5[%c3_104, %c0_105, %c0_106] : memref<9x8x4xbf16, #tpu.memory_space<vmem>>, vector<1x8x4xbf16>
    %85 = vector.shape_cast %84 : vector<1x8x4xbf16> to vector<8x4xbf16>
    %cst_107 = arith.constant dense<0.000000e+00> : vector<256x4xf32>
    %86 = tpu.matmul %61, %85, %cst_107 {dimension_numbers = #tpu.dot_dimension_numbers<[1], [0], [0], [1], [0, 0, 1, 1], [], []>} : vector<256x8xbf16>, vector<8x4xbf16>, vector<256x4xf32> -> vector<256x4xf32>
    %c4_108 = arith.constant 4 : index
    %c0_109 = arith.constant 0 : index
    %c0_110 = arith.constant 0 : index
    %87 = vector.load %arg5[%c4_108, %c0_109, %c0_110] : memref<9x8x4xbf16, #tpu.memory_space<vmem>>, vector<1x8x4xbf16>
    %88 = vector.shape_cast %87 : vector<1x8x4xbf16> to vector<8x4xbf16>
    %cst_111 = arith.constant dense<0.000000e+00> : vector<256x4xf32>
    %89 = tpu.matmul %71, %88, %cst_111 {dimension_numbers = #tpu.dot_dimension_numbers<[1], [0], [0], [1], [0, 0, 1, 1], [], []>} : vector<256x8xbf16>, vector<8x4xbf16>, vector<256x4xf32> -> vector<256x4xf32>
    %90 = arith.addf %86, %89 : vector<256x4xf32>
    %c5_112 = arith.constant 5 : index
    %c0_113 = arith.constant 0 : index
    %c0_114 = arith.constant 0 : index
    %91 = vector.load %arg5[%c5_112, %c0_113, %c0_114] : memref<9x8x4xbf16, #tpu.memory_space<vmem>>, vector<1x8x4xbf16>
    %92 = vector.shape_cast %91 : vector<1x8x4xbf16> to vector<8x4xbf16>
    %cst_115 = arith.constant dense<0.000000e+00> : vector<256x4xf32>
    %93 = tpu.matmul %61, %92, %cst_115 {dimension_numbers = #tpu.dot_dimension_numbers<[1], [0], [0], [1], [0, 0, 1, 1], [], []>} : vector<256x8xbf16>, vector<8x4xbf16>, vector<256x4xf32> -> vector<256x4xf32>
    %c6_116 = arith.constant 6 : index
    %c0_117 = arith.constant 0 : index
    %c0_118 = arith.constant 0 : index
    %94 = vector.load %arg5[%c6_116, %c0_117, %c0_118] : memref<9x8x4xbf16, #tpu.memory_space<vmem>>, vector<1x8x4xbf16>
    %95 = vector.shape_cast %94 : vector<1x8x4xbf16> to vector<8x4xbf16>
    %cst_119 = arith.constant dense<0.000000e+00> : vector<256x4xf32>
    %96 = tpu.matmul %69, %95, %cst_119 {dimension_numbers = #tpu.dot_dimension_numbers<[1], [0], [0], [1], [0, 0, 1, 1], [], []>} : vector<256x8xbf16>, vector<8x4xbf16>, vector<256x4xf32> -> vector<256x4xf32>
    %97 = arith.addf %93, %96 : vector<256x4xf32>
    %c7_120 = arith.constant 7 : index
    %c0_121 = arith.constant 0 : index
    %c0_122 = arith.constant 0 : index
    %98 = vector.load %arg5[%c7_120, %c0_121, %c0_122] : memref<9x8x4xbf16, #tpu.memory_space<vmem>>, vector<1x8x4xbf16>
    %99 = vector.shape_cast %98 : vector<1x8x4xbf16> to vector<8x4xbf16>
    %cst_123 = arith.constant dense<0.000000e+00> : vector<256x4xf32>
    %100 = tpu.matmul %71, %99, %cst_123 {dimension_numbers = #tpu.dot_dimension_numbers<[1], [0], [0], [1], [0, 0, 1, 1], [], []>} : vector<256x8xbf16>, vector<8x4xbf16>, vector<256x4xf32> -> vector<256x4xf32>
    %101 = arith.addf %97, %100 : vector<256x4xf32>
    %c8_124 = arith.constant 8 : index
    %c0_125 = arith.constant 0 : index
    %c0_126 = arith.constant 0 : index
    %102 = vector.load %arg5[%c8_124, %c0_125, %c0_126] : memref<9x8x4xbf16, #tpu.memory_space<vmem>>, vector<1x8x4xbf16>
    %103 = vector.shape_cast %102 : vector<1x8x4xbf16> to vector<8x4xbf16>
    %cst_127 = arith.constant dense<0.000000e+00> : vector<256x4xf32>
    %104 = tpu.matmul %73, %103, %cst_127 {dimension_numbers = #tpu.dot_dimension_numbers<[1], [0], [0], [1], [0, 0, 1, 1], [], []>} : vector<256x8xbf16>, vector<8x4xbf16>, vector<256x4xf32> -> vector<256x4xf32>
    %105 = arith.addf %101, %104 : vector<256x4xf32>
    %c0_128 = arith.constant 0 : index
    %c0_129 = arith.constant 0 : index
    %106 = vector.load %arg6[%c0_128, %c0_129] : memref<1x4xf32, #tpu.memory_space<vmem>>, vector<1x4xf32>
    %c0_130 = arith.constant 0 : index
    %c0_131 = arith.constant 0 : index
    %107 = vector.load %arg7[%c0_130, %c0_131] : memref<1x4xf32, #tpu.memory_space<vmem>>, vector<1x4xf32>
    %108 = vector.broadcast %106 : vector<1x4xf32> to vector<256x4xf32>
    %109 = arith.mulf %76, %108 : vector<256x4xf32>
    %110 = vector.broadcast %107 : vector<1x4xf32> to vector<256x4xf32>
    %111 = arith.addf %109, %110 : vector<256x4xf32>
    %cst_132 = arith.constant 0.000000e+00 : f32
    %112 = vector.broadcast %cst_132 : f32 to vector<256x4xf32>
    %113 = arith.maximumf %111, %112 : vector<256x4xf32>
    %114 = vector.broadcast %106 : vector<1x4xf32> to vector<256x4xf32>
    %115 = arith.mulf %83, %114 : vector<256x4xf32>
    %116 = vector.broadcast %107 : vector<1x4xf32> to vector<256x4xf32>
    %117 = arith.addf %115, %116 : vector<256x4xf32>
    %cst_133 = arith.constant 0.000000e+00 : f32
    %118 = vector.broadcast %cst_133 : f32 to vector<256x4xf32>
    %119 = arith.maximumf %117, %118 : vector<256x4xf32>
    %120 = vector.broadcast %106 : vector<1x4xf32> to vector<256x4xf32>
    %121 = arith.mulf %90, %120 : vector<256x4xf32>
    %122 = vector.broadcast %107 : vector<1x4xf32> to vector<256x4xf32>
    %123 = arith.addf %121, %122 : vector<256x4xf32>
    %cst_134 = arith.constant 0.000000e+00 : f32
    %124 = vector.broadcast %cst_134 : f32 to vector<256x4xf32>
    %125 = arith.maximumf %123, %124 : vector<256x4xf32>
    %126 = vector.broadcast %106 : vector<1x4xf32> to vector<256x4xf32>
    %127 = arith.mulf %105, %126 : vector<256x4xf32>
    %128 = vector.broadcast %107 : vector<1x4xf32> to vector<256x4xf32>
    %129 = arith.addf %127, %128 : vector<256x4xf32>
    %cst_135 = arith.constant 0.000000e+00 : f32
    %130 = vector.broadcast %cst_135 : f32 to vector<256x4xf32>
    %131 = arith.maximumf %129, %130 : vector<256x4xf32>
    %132 = tpu.concatenate %113, %119, %125, %131 in 1 : vector<256x4xf32>, vector<256x4xf32>, vector<256x4xf32>, vector<256x4xf32> -> vector<256x16xf32>
    %133 = vector.shape_cast %132 : vector<256x16xf32> to vector<16x16x16xf32>
    %134 = vector.extract_strided_slice %133 {offsets = [0, 0, 0], sizes = [16, 1, 16], strides = [1, 1, 1]} : vector<16x16x16xf32> to vector<16x1x16xf32>
    %135 = vector.shape_cast %134 : vector<16x1x16xf32> to vector<16x16xf32>
    %136 = vector.extract_strided_slice %133 {offsets = [0, 1, 0], sizes = [16, 1, 16], strides = [1, 1, 1]} : vector<16x16x16xf32> to vector<16x1x16xf32>
    %137 = vector.shape_cast %136 : vector<16x1x16xf32> to vector<16x16xf32>
    %138 = vector.extract_strided_slice %133 {offsets = [0, 2, 0], sizes = [16, 1, 16], strides = [1, 1, 1]} : vector<16x16x16xf32> to vector<16x1x16xf32>
    %139 = vector.shape_cast %138 : vector<16x1x16xf32> to vector<16x16xf32>
    %140 = vector.extract_strided_slice %133 {offsets = [0, 3, 0], sizes = [16, 1, 16], strides = [1, 1, 1]} : vector<16x16x16xf32> to vector<16x1x16xf32>
    %141 = vector.shape_cast %140 : vector<16x1x16xf32> to vector<16x16xf32>
    %142 = vector.extract_strided_slice %133 {offsets = [0, 4, 0], sizes = [16, 1, 16], strides = [1, 1, 1]} : vector<16x16x16xf32> to vector<16x1x16xf32>
    %143 = vector.shape_cast %142 : vector<16x1x16xf32> to vector<16x16xf32>
    %144 = vector.extract_strided_slice %133 {offsets = [0, 5, 0], sizes = [16, 1, 16], strides = [1, 1, 1]} : vector<16x16x16xf32> to vector<16x1x16xf32>
    %145 = vector.shape_cast %144 : vector<16x1x16xf32> to vector<16x16xf32>
    %146 = vector.extract_strided_slice %133 {offsets = [0, 6, 0], sizes = [16, 1, 16], strides = [1, 1, 1]} : vector<16x16x16xf32> to vector<16x1x16xf32>
    %147 = vector.shape_cast %146 : vector<16x1x16xf32> to vector<16x16xf32>
    %148 = vector.extract_strided_slice %133 {offsets = [0, 7, 0], sizes = [16, 1, 16], strides = [1, 1, 1]} : vector<16x16x16xf32> to vector<16x1x16xf32>
    %149 = vector.shape_cast %148 : vector<16x1x16xf32> to vector<16x16xf32>
    %150 = vector.extract_strided_slice %133 {offsets = [0, 8, 0], sizes = [16, 1, 16], strides = [1, 1, 1]} : vector<16x16x16xf32> to vector<16x1x16xf32>
    %151 = vector.shape_cast %150 : vector<16x1x16xf32> to vector<16x16xf32>
    %152 = vector.extract_strided_slice %133 {offsets = [0, 9, 0], sizes = [16, 1, 16], strides = [1, 1, 1]} : vector<16x16x16xf32> to vector<16x1x16xf32>
    %153 = vector.shape_cast %152 : vector<16x1x16xf32> to vector<16x16xf32>
    %154 = vector.extract_strided_slice %133 {offsets = [0, 10, 0], sizes = [16, 1, 16], strides = [1, 1, 1]} : vector<16x16x16xf32> to vector<16x1x16xf32>
    %155 = vector.shape_cast %154 : vector<16x1x16xf32> to vector<16x16xf32>
    %156 = vector.extract_strided_slice %133 {offsets = [0, 11, 0], sizes = [16, 1, 16], strides = [1, 1, 1]} : vector<16x16x16xf32> to vector<16x1x16xf32>
    %157 = vector.shape_cast %156 : vector<16x1x16xf32> to vector<16x16xf32>
    %158 = vector.extract_strided_slice %133 {offsets = [0, 12, 0], sizes = [16, 1, 16], strides = [1, 1, 1]} : vector<16x16x16xf32> to vector<16x1x16xf32>
    %159 = vector.shape_cast %158 : vector<16x1x16xf32> to vector<16x16xf32>
    %160 = vector.extract_strided_slice %133 {offsets = [0, 13, 0], sizes = [16, 1, 16], strides = [1, 1, 1]} : vector<16x16x16xf32> to vector<16x1x16xf32>
    %161 = vector.shape_cast %160 : vector<16x1x16xf32> to vector<16x16xf32>
    %162 = vector.extract_strided_slice %133 {offsets = [0, 14, 0], sizes = [16, 1, 16], strides = [1, 1, 1]} : vector<16x16x16xf32> to vector<16x1x16xf32>
    %163 = vector.shape_cast %162 : vector<16x1x16xf32> to vector<16x16xf32>
    %164 = vector.extract_strided_slice %133 {offsets = [0, 15, 0], sizes = [16, 1, 16], strides = [1, 1, 1]} : vector<16x16x16xf32> to vector<16x1x16xf32>
    %165 = vector.shape_cast %164 : vector<16x1x16xf32> to vector<16x16xf32>
    %166 = tpu.concatenate %135, %137, %139, %141, %143, %145, %147, %149, %151, %153, %155, %157, %159, %161, %163, %165 in 1 : vector<16x16xf32>, vector<16x16xf32>, vector<16x16xf32>, vector<16x16xf32>, vector<16x16xf32>, vector<16x16xf32>, vector<16x16xf32>, vector<16x16xf32>, vector<16x16xf32>, vector<16x16xf32>, vector<16x16xf32>, vector<16x16xf32>, vector<16x16xf32>, vector<16x16xf32>, vector<16x16xf32>, vector<16x16xf32> -> vector<16x256xf32>
    %c0_136 = arith.constant 0 : index
    %c0_137 = arith.constant 0 : index
    %167 = vector.load %arg8[%c0_136, %c0_137] : memref<16x256xf32, #tpu.memory_space<vmem>>, vector<16x256xf32>
    tpu.vector_store %arg8[%c0_136, %c0_137], %166 {strides = array<i32>} : memref<16x256xf32, #tpu.memory_space<vmem>>, vector<16x256xf32>,
    return
  }
  func.func @transform_0(%arg0: i32) -> (i32, i32, i32, i32) {
    %c0_i32 = arith.constant 0 : i32
    %c0_i32_0 = arith.constant 0 : i32
    %c0_i32_1 = arith.constant 0 : i32
    %c0_i32_2 = arith.constant 0 : i32
    return %arg0, %c0_i32, %c0_i32_0, %c0_i32_1 : i32, i32, i32, i32
  }
  func.func @transform_1(%arg0: i32) -> (i32, i32, i32) {
    %c0_i32 = arith.constant 0 : i32
    %c0_i32_0 = arith.constant 0 : i32
    %c0_i32_1 = arith.constant 0 : i32
    %c0_i32_2 = arith.constant 0 : i32
    return %c0_i32, %c0_i32_0, %c0_i32_1 : i32, i32, i32
  }
  func.func @transform_2(%arg0: i32) -> (i32, i32) {
    %c0_i32 = arith.constant 0 : i32
    %c0_i32_0 = arith.constant 0 : i32
    %c0_i32_1 = arith.constant 0 : i32
    return %c0_i32, %c0_i32_0 : i32, i32
  }
  func.func @transform_3(%arg0: i32) -> (i32, i32) {
    %c0_i32 = arith.constant 0 : i32
    %c0_i32_0 = arith.constant 0 : i32
    %c0_i32_1 = arith.constant 0 : i32
    return %c0_i32, %c0_i32_0 : i32, i32
  }
  func.func @transform_4(%arg0: i32) -> (i32, i32, i32) {
    %c0_i32 = arith.constant 0 : i32
    %c0_i32_0 = arith.constant 0 : i32
    %c0_i32_1 = arith.constant 0 : i32
    %c0_i32_2 = arith.constant 0 : i32
    return %c0_i32, %c0_i32_0, %c0_i32_1 : i32, i32, i32
  }
  func.func @transform_5(%arg0: i32) -> (i32, i32) {
    %c0_i32 = arith.constant 0 : i32
    %c0_i32_0 = arith.constant 0 : i32
    %c0_i32_1 = arith.constant 0 : i32
    return %c0_i32, %c0_i32_0 : i32, i32
  }
  func.func @transform_6(%arg0: i32) -> (i32, i32) {
    %c0_i32 = arith.constant 0 : i32
    %c0_i32_0 = arith.constant 0 : i32
    %c0_i32_1 = arith.constant 0 : i32
    return %c0_i32, %c0_i32_0 : i32, i32
  }
  func.func @transform_7(%arg0: i32) -> (i32, i32) {
    %c0_i32 = arith.constant 0 : i32
    %c0_i32_0 = arith.constant 0 : i32
    return %arg0, %c0_i32 : i32, i32
  }
}

</mosaic_0001>

<bundles_post_ra>
// kernel: decoder_block_forward.1
= control target key start
LH: loop header
LB: loop body
LE: loop exit
PB: predicated region body
PF: predicated region fallthrough
CT: control target
= control target key end

     0   :  { %s11833_s24 = smov 0   ;;  %s16370_s0 = inlined_call_operand.vmem [shape: bf16[2,18,18,4], index: 0, kind: input, shape index: {}]   ;;  %s16371_s1 = inlined_call_operand.vmem [shape: bf16[9,4,8], index: 1, kind: input, shape index: {}]   ;;  %s16372_s2 = inlined_call_operand.vmem [shape: f32[1,8], index: 2, kind: input, shape index: {}]   ;;  %s16373_s3 = inlined_call_operand.vmem [shape: f32[1,8], index: 3, kind: input, shape index: {}]   ;;  %s16374_s4 = inlined_call_operand.vmem [shape: bf16[9,8,4], index: 4, kind: input, shape index: {}]   ;;  %s16375_s5 = inlined_call_operand.vmem [shape: f32[1,4], index: 5, kind: input, shape index: {}]   ;;  %s16376_s6 = inlined_call_operand.vmem [shape: f32[1,4], index: 6, kind: input, shape index: {}]   ;;  %s16377_s7 = inlined_call_operand.vmem [shape: f32[32,256], index: 7, kind: output, shape index: {}]  }
   0x1 LB: > { %s11839_s25 = sadd.s32 4294967295, %s11780_s24   ;;  %p9520_p0 = scmp.ge.s32.totalorder %s11780_s24, 1  ;;  %s11780_s24 = sphi %s11833_s24, %s17_s24  }
   0x2   : > { %p237_p1 = scmp.lt.s32.totalorder %s11780_s24, 3 }
   0x4   : > { %p238_p2 = pnand %p9520_p0, %p237_p1 }
   0x6   : > { %241 = sbr.rel (%p238_p2) target bundleno = 1863 (0x747), region = 48 }
   0xd   : > { %v9525_v0 = vld [vmem:[%s16371_s1 + $0x2] sm:$0x3]  ;;  %vm818_vm0 = vcmask 1041408   ;;  %p270_p3 = scmp.lt.s32.totalorder %s11839_s25, 1  ;;  %v315_v2 = vld [vmem:[%s16371_s1] sm:$0x3] }
   0xe   : > { %11666 = vmatprep.subr.msk.bf16.mxu0 %vm818_vm0, %v9525_v0  ;;  %v820_v1 = vsel %vm818_vm0, %v9525_v0, 0  ;;  %vm332_vm1 = vsmask.f32 3328  ;;  %vm333_vm2 = vsmask.f32 7440  ;;  %vm769_vm3 = vcmask 31744  }
   0xf   : > { %10639 = vmatpush3.bf16.msra.mxu0 %v820_v1  ;;  %s271_s30 = scalar_select %p270_p3, %s11839_s25, 1  ;;  %v11880_v14 = vsel %vm818_vm0, %v315_v2, 0  ;;  %vm11892_vm4 = vmor %vm332_vm1, %vm333_vm2  ;;  %v16480_v28 = vmov 0  ;;  %vm1323_vm5 = vcmask 1042432   ;;  %vm1324_vm6 = vcmask 1046532  }
  0x10   : > { %11667 = vmatprep.subr.msk.bf16.mxu0 %vm818_vm0, %v315_v2  ;;  %v16481_v28 = vsel %vm11892_vm4, 4294967295, %v16480_v28  ;;  %vm12207_vm7 = vmor %vm1323_vm5, %vm1324_vm6  ;;  %vm6088_vm8 = vcmask 1043456   ;;  %vm4972_vm9 = vcmask 57344   ;;  %vm4973_vm10 = vsmask.f32 256  ;;  %s11785_s16 = smov 12  }
  0x11   : > { %s11684_s8 = smul.u32 216, %s271_s30  ;;  %16482 = vst [vmem:[#allocation3_spill] sm:$0xff] %v16481_v28  ;;  %vm13599_vm11 = vmand %vm4972_vm9, %vm4973_vm10  ;;  %vm4969_vm12 = vcmask 60416   ;;  %vm6039_vm13 = vcmask 64512   ;;  %vm8811_vm14 = vcmask 97280   ;;  %vm8861_vm15 = vcmask 1041409  }
  0x12   : > { %vm8867_vm1 = vcmask 1043459   ;;  %vm8870_vm2 = vcmask 1044484   ;;  %vm8879_vm5 = vcmask 1047559   ;;  %s11786_s17 = smov 96   ;;  %s11787_s18 = smov 16   ;;  %vm9419_vm6 = vcmask 130048  }
  0x13   : > { %s11857_s11 = scalar_lea.vmem %s16370_s0, %s11684_s8  ;;  %s11783_s8 = smov 4   ;;  %vm9428_vm9 = vcmask 523264   ;;  %vm9431_vm10 = vcmask 654336  }
  0x14   : > { %v11860_v3 = vld [vmem:[%s11857_s11] sm:$0xf]  ;;  %v11863_v4 = vld [vmem:[%s11857_s11 + $0x4] sm:$0xf]  ;;  %v316_v5 = vld [vmem:[%s11857_s11 + $0x8] sm:$0x1] }
  0x15   : > { %v336_v6 = vshrl.u32 %v11860_v3, 16  ;;  %v339_v7 = vshll.u32 %v11860_v3, 16  ;;  %v345_v8 = vshll.u32 %v11863_v4, 16  ;;  %v349_v9 = vshrl.u32 %v11863_v4, 16  ;;  %v11871_v10 = vld [vmem:[%s11857_s11 + $0xc] sm:$0xf] }
  0x16   : > { %v355_v11 = vshll.u32 %v316_v5, 16  ;;  %v11874_v12 = vld [vmem:[%s11857_s11 + $0x10] sm:$0xf]  ;;  %v11877_v13 = vld [vmem:[%s11857_s11 + $0x14] sm:$0x1]  ;;  %v360_v20 = vshrl.u32 %v11871_v10, 16 }
  0x17   : > { %v338_v15 = vrot.slane %v336_v6, 4  ;;  %v341_v16 = vrot.slane %v339_v7, 5  ;;  %v347_v17 = vrot.slane %v345_v8, 5  ;;  %v351_v18 = vrot.slane %v349_v9, 4  ;;  %v11888_v27 = vld [vmem:[%s11857_s11 + $0x18] sm:$0xf] }
  0x18   : > { %v357_v19 = vrot.slane %v355_v11, 5  ;;  %v363_v21 = vshll.u32 %v11871_v10, 16  ;;  %v369_v22 = vshll.u32 %v11874_v12, 16  ;;  %v373_v25 = vshrl.u32 %v11874_v12, 16  ;;  %v11897_v32 = vld [vmem:[%s11857_s11 + $0x1c] sm:$0xf] }
  0x19   : > { %v342_v23 = vor.u32 %v341_v16, %v338_v15  ;;  %v352_v24 = vor.u32 %v351_v18, %v347_v17  ;;  %v379_v26 = vshll.u32 %v11877_v13, 16  ;;  %v362_v29 = vrot.slane %v360_v20, 4  ;;  %v318_v40 = vld [vmem:[%s11857_s11 + $0x20] sm:$0x1]  ;;  %v11911_v47 = vld [vmem:[%s11857_s11 + $0x24] sm:$0xf] }
  0x1a   : > { %v365_v30 = vrot.slane %v363_v21, 5  ;;  %v371_v31 = vrot.slane %v369_v22, 5  ;;  %v375_v36 = vrot.slane %v373_v25, 4  ;;  %v384_v41 = vshrl.u32 %v11888_v27, 16  ;;  %v11914_v52 = vld [vmem:[%s11857_s11 + $0x28] sm:$0xf] }
  0x1b   : > { %v343_v34 = vrot.slane %v342_v23, 4  ;;  %v353_v35 = vrot.slane %v352_v24, 4  ;;  %v381_v39 = vrot.slane %v379_v26, 5  ;;  %v387_v42 = vshll.u32 %v11888_v27, 16  ;;  %v11921_v59 = vld [vmem:[%s11857_s11 + $0x2c] sm:$0x1] }
  0x1c   : > { %v366_v38 = vor.u32 %v365_v30, %v362_v29  ;;  %v376_v45 = vor.u32 %v375_v36, %v371_v31  ;;  %v393_v46 = vshll.u32 %v11897_v32, 16  ;;  %v386_v50 = vrot.slane %v384_v41, 4  ;;  %v11929_v2 = vld [vmem:[%s11857_s11 + $0x30] sm:$0xf]  ;;  %v11932_v9 = vld [vmem:[%s11857_s11 + $0x34] sm:$0xf] }
  0x1d   : > { %v348_v43 = vsel %vm11892_vm4, %v343_v34, %v347_v17  ;;  %v358_v44 = vsel %vm11892_vm4, %v353_v35, %v357_v19  ;;  %v389_v51 = vrot.slane %v387_v42, 5  ;;  %v397_v55 = vshrl.u32 %v11897_v32, 16  ;;  %v11939_v18 = vld [vmem:[%s16371_s1 + $0x4] sm:$0x3]  ;;  %v11945_v21 = vld [vmem:[%s11857_s11 + $0x38] sm:$0x1] }
  0x1e   : > { %v9526_v48 = vcombine.low %v348_v43, %v358_v44  ;;  %v367_v49 = vrot.slane %v366_v38, 4  ;;  %v377_v53 = vrot.slane %v376_v45, 4  ;;  %v395_v54 = vrot.slane %v393_v46, 5  ;;  %v11953_v36 = vld [vmem:[%s11857_s11 + $0x3c] sm:$0xf]  ;;  %s11788_s19 = smov 32  }
  0x1f   : > { %v403_v56 = vshll.u32 %v318_v40, 16  ;;  %v390_v58 = vor.u32 %v389_v51, %v386_v50  ;;  %v408_v60 = vshrl.u32 %v11911_v47, 16  ;;  %v411_v61 = vshll.u32 %v11911_v47, 16  ;;  %v11961_v41 = vld [vmem:[%s11857_s11 + $0x40] sm:$0xf]  ;;  %s11789_s20 = smov 48  }
  0x20   : > { %10640 = vmatprep.mubr.msk.bf16.mxu0 %vm769_vm3, %v9526_v48  ;;  %v372_v57 = vsel %vm11892_vm4, %v367_v49, %v371_v31  ;;  %v382_v62 = vsel %vm11892_vm4, %v377_v53, %v381_v39  ;;  %v399_v63 = vrot.slane %v397_v55, 4  ;;  %v417_v1 = vshll.u32 %v11914_v52, 16  ;;  %v11966_v46 = vld [vmem:[%s11857_s11 + $0x44] sm:$0x1]  ;;  %s11790_s21 = smov 64   ;;  %s11791_s22 = smov 80  }
  0x21   : > { %v405_v0 = vrot.slane %v403_v56, 5  ;;  %v9527_v5 = vcombine.low %v372_v57, %v382_v62  ;;  %v391_v6 = vrot.slane %v390_v58, 4  ;;  %v410_v7 = vrot.slane %v408_v60, 4  ;;  %v11974_v57 = vld [vmem:[%s11857_s11 + $0x48] sm:$0xf]  ;;  %s11792_s23 = smov 112  }
  0x22   : > { %v413_v8 = vrot.slane %v411_v61, 5  ;;  %v400_v11 = vor.u32 %v399_v63, %v395_v54  ;;  %v419_v15 = vrot.slane %v417_v1, 5  ;;  %v421_v16 = vshrl.u32 %v11914_v52, 16  ;;  %v11980_v63 = vld [vmem:[%s11857_s11 + $0x4c] sm:$0xf]  ;;  %s9522_s26 = sshll.u32 %s11839_s25, 1 }
  0x23   : > { %v427_v17 = vshll.u32 %v11921_v59, 16  ;;  %10641 = vmatmul.mubr.msk.bf16.vlgmr.msra.gmra.mrb[0].mxu0 %vm769_vm3, %v9527_v5  ;;  %v396_v19 = vsel %vm11892_vm4, %v391_v6, %v395_v54  ;;  %v432_v22 = vshrl.u32 %v11929_v2, 16  ;;  %v435_v23 = vshll.u32 %v11929_v2, 16  ;;  %p276_p4 = scmp.lt.s32.totalorder %s9522_s26, 3 }
  0x24   : > { %v414_v20 = vor.u32 %v413_v8, %v410_v7  ;;  %10673 = vmatpush3.bf16.msra.mxu0 %v11880_v14  ;;  %v401_v24 = vrot.slane %v400_v11, 4  ;;  %v423_v25 = vrot.slane %v421_v16, 4  ;;  %v441_v29 = vshll.u32 %v11932_v9, 16 }
  0x25   : > { %v429_v26 = vrot.slane %v427_v17, 5  ;;  %v434_v31 = vrot.slane %v432_v22, 4  ;;  %v437_v34 = vrot.slane %v435_v23, 5  ;;  %v445_v35 = vshrl.u32 %v11932_v9, 16  ;;  %11668 = vmatprep.subr.msk.bf16.mxu0 %vm818_vm0, %v11939_v18  ;;  %v11995_v23 = vld [vmem:[%s11857_s11 + $0x54] sm:$0xf] }
  0x26   : > { %v415_v30 = vrot.slane %v414_v20, 4  ;;  %v406_v38 = vsel %vm11892_vm4, %v401_v24, %v405_v0  ;;  %v424_v14 = vor.u32 %v423_v25, %v419_v15  ;;  %v443_v39 = vrot.slane %v441_v29, 5  ;;  %s16835_s26 = smov (!%p276_p4, %s9522_s26), 3 }
  0x27   : > { %v451_v40 = vshll.u32 %v11945_v21, 16  ;;  %v9528_v42 = vcombine.low %v396_v19, %v406_v38  ;;  %v438_v44 = vor.u32 %v437_v34, %v434_v31  ;;  %v447_v45 = vrot.slane %v445_v35, 4  ;;  %s10299_s25 = sshll.u32 %s16835_s26, 4 }
  0x28   : > { %v420_v43 = vsel %vm11892_vm4, %v415_v30, %v419_v15  ;;  %v425_v48 = vrot.slane %v424_v14, 4  ;;  %v456_v50 = vshrl.u32 %v11953_v36, 16  ;;  %v459_v51 = vshll.u32 %v11953_v36, 16  ;;  %v11985_v15 = vld [vmem:[%s11857_s11 + $0x50] sm:$0x1]  ;;  %s16325_s29 = scalar_lea.vmem %s16377_s7, %s10299_s25 }
  0x29   : > { %v453_v49 = vrot.slane %v451_v40, 5  ;;  %10644 = vmatprep.mubr.msk.bf16.mxu0 %vm769_vm3, %v9528_v42  ;;  %v439_v53 = vrot.slane %v438_v44, 4  ;;  %v448_v54 = vor.u32 %v447_v45, %v443_v39  ;;  %v465_v55 = vshll.u32 %v11961_v41, 16  ;;  %v11998_v30 = vld [vmem:[%s11857_s11 + $0x58] sm:$0xf] }
  0x2a   : > { %v469_v56 = vshrl.u32 %v11961_v41, 16  ;;  %v430_v58 = vsel %vm11892_vm4, %v425_v48, %v429_v26  ;;  %v458_v60 = vrot.slane %v456_v50, 4  ;;  %v461_v61 = vrot.slane %v459_v51, 5  ;;  %v12007_v48 = vld [vmem:[%s11857_s11 + $0x5c] sm:$0x1] }
  0x2b   : > { %v475_v62 = vshll.u32 %v11966_v46, 16  ;;  %v9529_v0 = vcombine.low %v420_v43, %v430_v58  ;;  %v444_v1 = vsel %vm11892_vm4, %v439_v53, %v443_v39  ;;  %v449_v5 = vrot.slane %v448_v54, 4  ;;  %16483 = vst [vmem:[#allocation4_spill] sm:$0xff] %v12007_v48  ;;  %v12011_v50 = vld [vmem:[%s11857_s11 + $0x60] sm:$0xf] }
  0x2c   : > { %v467_v6 = vrot.slane %v465_v55, 5  ;;  %v462_v7 = vor.u32 %v461_v61, %v458_v60  ;;  %v471_v8 = vrot.slane %v469_v56, 4  ;;  %v480_v16 = vshrl.u32 %v11974_v57, 16  ;;  %v12017_v56 = vld [vmem:[%s11857_s11 + $0x64] sm:$0xf] }
  0x2d   : > { %v477_v11 = vrot.slane %v475_v62, 5  ;;  %10645 = vmatmul.mubr.msk.bf16.gmra.mrb[4].mxu0 %vm769_vm3, %v9529_v0  ;;  %v454_v17 = vsel %vm11892_vm4, %v449_v5, %v453_v49  ;;  %v483_v19 = vshll.u32 %v11974_v57, 16  ;;  %v489_v20 = vshll.u32 %v11980_v63, 16 }
  0x2e   : > { %v493_v22 = vshrl.u32 %v11980_v63, 16  ;;  %v9530_v24 = vcombine.low %v444_v1, %v454_v17  ;;  %v463_v25 = vrot.slane %v462_v7, 4  ;;  %v472_v26 = vor.u32 %v471_v8, %v467_v6 }
  0x2f   : > { %v482_v29 = vrot.slane %v480_v16, 4  ;;  %v485_v31 = vrot.slane %v483_v19, 5  ;;  %v491_v34 = vrot.slane %v489_v20, 5  ;;  %v499_v38 = vshll.u32 %v11985_v15, 16  ;;  %v12032_v19 = vld [vmem:[%s11857_s11 + $0x6c] sm:$0xf] }
  0x30   : > { %v495_v35 = vrot.slane %v493_v22, 4  ;;  %10648 = vmatprep.mubr.msk.bf16.mxu0 %vm769_vm3, %v9530_v24  ;;  %v468_v14 = vsel %vm11892_vm4, %v463_v25, %v467_v6  ;;  %v473_v39 = vrot.slane %v472_v26, 4  ;;  %v504_v40 = vshrl.u32 %v11995_v23, 16  ;;  %v12035_v26 = vld [vmem:[%s11857_s11 + $0x70] sm:$0xf] }
  0x31   : > { %v507_v42 = vshll.u32 %v11995_v23, 16  ;;  %v486_v43 = vor.u32 %v485_v31, %v482_v29  ;;  %v501_v45 = vrot.slane %v499_v38, 5  ;;  %v513_v49 = vshll.u32 %v11998_v30, 16 }
  0x32   : > { %v496_v44 = vor.u32 %v495_v35, %v491_v34  ;;  %v478_v51 = vsel %vm11892_vm4, %v473_v39, %v477_v11  ;;  %v506_v53 = vrot.slane %v504_v40, 4  ;;  %v517_v55 = vshrl.u32 %v11998_v30, 16  ;;  %v12027_v11 = vld [vmem:[%s11857_s11 + $0x68] sm:$0x1]  ;;  %v12043_v40 = vld [vmem:[%s11857_s11 + $0x74] sm:$0x1] }
  0x33   : > { %v509_v54 = vrot.slane %v507_v42, 5  ;;  %v9531_v58 = vcombine.low %v468_v14, %v478_v51  ;;  %v487_v60 = vrot.slane %v486_v43, 4  ;;  %v515_v62 = vrot.slane %v513_v49, 5  ;;  %16484 = vst [vmem:[#allocation5_spill] sm:$0xff] %v12027_v11  ;;  %16485 = vst [vmem:[#allocation6_spill] sm:$0xff] %v12043_v40 }
  0x34   : > { %v497_v61 = vrot.slane %v496_v44, 4  ;;  %v519_v1 = vrot.slane %v517_v55, 4  ;;  %v523_v5 = vshll.u32 %v12007_v48, 16  ;;  %v528_v6 = vshrl.u32 %v12011_v50, 16  ;;  %v12049_v51 = vld [vmem:[%s11857_s11 + $0x78] sm:$0xf] }
  0x35   : > { %v510_v0 = vor.u32 %v509_v54, %v506_v53  ;;  %10649 = vmatmul.mubr.msk.bf16.gmra.mrb[8].mxu0 %vm769_vm3, %v9531_v58  ;;  %v492_v7 = vsel %vm11892_vm4, %v487_v60, %v491_v34  ;;  %v531_v16 = vshll.u32 %v12011_v50, 16  ;;  %v537_v17 = vshll.u32 %v12017_v56, 16 }
  0x36   : > { %v502_v8 = vsel %vm11892_vm4, %v497_v61, %v501_v45  ;;  %v520_v24 = vor.u32 %v519_v1, %v515_v62  ;;  %v525_v25 = vrot.slane %v523_v5, 5  ;;  %v530_v29 = vrot.slane %v528_v6, 4  ;;  %v12055_v1 = vld [vmem:[%s11857_s11 + $0x7c] sm:$0xf]  ;;  %v12058_v5 = vld [vmem:[%s11857_s11 + $0x80] sm:$0x1] }
  0x37   : > { %v9532_v20 = vcombine.low %v492_v7, %v502_v8  ;;  %v511_v22 = vrot.slane %v510_v0, 4  ;;  %v533_v31 = vrot.slane %v531_v16, 5  ;;  %v539_v34 = vrot.slane %v537_v17, 5  ;;  %16486 = vst [vmem:[#allocation7_spill] sm:$0xff] %v12058_v5  ;;  %v12063_v17 = vld [vmem:[%s11857_s11 + $0x84] sm:$0xf] }
  0x38   : > { %v541_v35 = vshrl.u32 %v12017_v56, 16  ;;  %v521_v14 = vrot.slane %v520_v24, 4  ;;  %v547_v39 = vshll.u32 %v12027_v11, 16  ;;  %v552_v42 = vshrl.u32 %v12032_v19, 16 }
  0x39   : > { %10652 = vmatprep.mubr.msk.bf16.mxu0 %vm769_vm3, %v9532_v20  ;;  %v516_v38 = vsel %vm11892_vm4, %v511_v22, %v515_v62  ;;  %v534_v43 = vor.u32 %v533_v31, %v530_v29  ;;  %v555_v45 = vshll.u32 %v12032_v19, 16  ;;  %v561_v49 = vshll.u32 %v12035_v26, 16  ;;  %v12070_v29 = vld [vmem:[%s11857_s11 + $0x88] sm:$0xf] }
  0x3a   : > { %v543_v44 = vrot.slane %v541_v35, 4  ;;  %v526_v53 = vsel %vm11892_vm4, %v521_v14, %v525_v25  ;;  %v549_v54 = vrot.slane %v547_v39, 5  ;;  %v554_v55 = vrot.slane %v552_v42, 4 }
  0x3b   : > { %v565_v58 = vshrl.u32 %v12035_v26, 16  ;;  %v9533_v60 = vcombine.low %v516_v38, %v526_v53  ;;  %v535_v61 = vrot.slane %v534_v43, 4  ;;  %v557_v0 = vrot.slane %v555_v45, 5 }
  0x3c   : > { %v544_v62 = vor.u32 %v543_v44, %v539_v34  ;;  %v563_v6 = vrot.slane %v561_v49, 5  ;;  %v571_v8 = vshll.u32 %v12043_v40, 16  ;;  %v576_v16 = vshrl.u32 %v12049_v51, 16  ;;  %v12077_v44 = vld [vmem:[%s11857_s11 + $0x8c] sm:$0x1] }
  0x3d   : > { %v567_v7 = vrot.slane %v565_v58, 4  ;;  %10653 = vmatmul.mubr.msk.bf16.gmra.mrb[12].mxu0 %vm769_vm3, %v9533_v60  ;;  %v540_v20 = vsel %vm11892_vm4, %v535_v61, %v539_v34  ;;  %v558_v24 = vor.u32 %v557_v0, %v554_v55  ;;  %v579_v25 = vshll.u32 %v12049_v51, 16  ;;  %16487 = vst [vmem:[#allocation8_spill] sm:$0xff] %v12077_v44  ;;  %v12081_v58 = vld [vmem:[%s11857_s11 + $0x90] sm:$0xf] }
  0x3e   : > { %v545_v22 = vrot.slane %v544_v62, 4  ;;  %v573_v35 = vrot.slane %v571_v8, 5  ;;  %v578_v38 = vrot.slane %v576_v16, 4  ;;  %v585_v14 = vshll.u32 %v12055_v1, 16  ;;  %v12087_v0 = vld [vmem:[%s11857_s11 + $0x94] sm:$0xf] }
  0x3f   : > { %v568_v31 = vor.u32 %v567_v7, %v563_v6  ;;  %v559_v42 = vrot.slane %v558_v24, 4  ;;  %v581_v43 = vrot.slane %v579_v25, 5  ;;  %v589_v34 = vshrl.u32 %v12055_v1, 16  ;;  %v12154_v40 = vld [vmem:[%s11857_s11 + $0xbc] sm:$0x1] }
  0x40   : > { %v550_v39 = vsel %vm11892_vm4, %v545_v22, %v549_v54  ;;  %v587_v53 = vrot.slane %v585_v14, 5  ;;  %v595_v55 = vshll.u32 %v12058_v5, 16  ;;  %v600_v54 = vshrl.u32 %v12063_v17, 16 }
  0x41   : > { %v9534_v45 = vcombine.low %v540_v20, %v550_v39  ;;  %v569_v49 = vrot.slane %v568_v31, 4  ;;  %v564_v60 = vsel %vm11892_vm4, %v559_v42, %v563_v6  ;;  %v582_v61 = vor.u32 %v581_v43, %v578_v38  ;;  %v12097_v42 = vld [vmem:[%s11857_s11 + $0x98] sm:$0x1]  ;;  %v12100_v43 = vld [vmem:[%s11857_s11 + $0x9c] sm:$0xf] }
  0x42   : > { %v591_v62 = vrot.slane %v589_v34, 4  ;;  %v597_v8 = vrot.slane %v595_v55, 5  ;;  %v603_v16 = vshll.u32 %v12063_v17, 16  ;;  %v609_v20 = vshll.u32 %v12070_v29, 16  ;;  %16488 = vst [vmem:[#allocation9_spill] sm:$0xff] %v12097_v42 }
  0x43   : > { %10656 = vmatprep.mubr.msk.bf16.mxu0 %vm769_vm3, %v9534_v45  ;;  %v574_v7 = vsel %vm11892_vm4, %v569_v49, %v573_v35  ;;  %v583_v6 = vrot.slane %v582_v61, 4  ;;  %v602_v25 = vrot.slane %v600_v54, 4  ;;  %v613_v14 = vshrl.u32 %v12070_v29, 16 }
  0x44   : > { %v9535_v22 = vcombine.low %v564_v60, %v574_v7  ;;  %v592_v24 = vor.u32 %v591_v62, %v587_v53  ;;  %v605_v31 = vrot.slane %v603_v16, 5  ;;  %v611_v38 = vrot.slane %v609_v20, 5 }
  0x45   : > { %v619_v39 = vshll.u32 %v12077_v44, 16  ;;  %v588_v35 = vsel %vm11892_vm4, %v583_v6, %v587_v53  ;;  %v624_v45 = vshrl.u32 %v12081_v58, 16  ;;  %v627_v49 = vshll.u32 %v12081_v58, 16  ;;  %v12112_v53 = vld [vmem:[%s11857_s11 + $0xa0] sm:$0xf] }
  0x46   : > { %10657 = vmatmul.mubr.msk.bf16.gmra.mrb[16].mxu0 %vm769_vm3, %v9535_v22  ;;  %v593_v34 = vrot.slane %v592_v24, 4  ;;  %v606_v55 = vor.u32 %v605_v31, %v602_v25  ;;  %v615_v60 = vrot.slane %v613_v14, 4  ;;  %v633_v62 = vshll.u32 %v12087_v0, 16  ;;  %v12115_v25 = vld [vmem:[%s11857_s11 + $0xa4] sm:$0x1] }
  0x47   : > { %v621_v61 = vrot.slane %v619_v39, 5  ;;  %v626_v7 = vrot.slane %v624_v45, 4  ;;  %v629_v16 = vrot.slane %v627_v49, 5  ;;  %v637_v20 = vshrl.u32 %v12087_v0, 16  ;;  %16489 = vst [vmem:[#allocation10_spill] sm:$0xff] %v12115_v25 }
  0x48   : > { %v598_v54 = vsel %vm11892_vm4, %v593_v34, %v597_v8  ;;  %v607_v6 = vrot.slane %v606_v55, 4  ;;  %v616_v24 = vor.u32 %v615_v60, %v611_v38  ;;  %v635_v33 = vrot.slane %v633_v62, 5  ;;  %v12120_v8 = vld [vmem:[%s11857_s11 + $0xa8] sm:$0xf]  ;;  %v12128_v55 = vld [vmem:[%s11857_s11 + $0xac] sm:$0xf] }
  0x49   : > { %v9536_v22 = vcombine.low %v588_v35, %v598_v54  ;;  %v630_v31 = vor.u32 %v629_v16, %v626_v7  ;;  %v639_v14 = vrot.slane %v637_v20, 4  ;;  %v643_v39 = vshll.u32 %v12097_v42, 16 }
  0x4a   : > { %v648_v37 = vshrl.u32 %v12100_v43, 16  ;;  %v612_v34 = vsel %vm11892_vm4, %v607_v6, %v611_v38  ;;  %v617_v35 = vrot.slane %v616_v24, 4  ;;  %v651_v45 = vshll.u32 %v12100_v43, 16  ;;  %v12134_v38 = vld [vmem:[%s11857_s11 + $0xb0] sm:$0x1] }
  0x4b   : > { %10660 = vmatprep.mubr.msk.bf16.mxu0 %vm769_vm3, %v9536_v22  ;;  %v657_v49 = vshll.u32 %v12112_v53, 16  ;;  %v631_v60 = vrot.slane %v630_v31, 4  ;;  %v640_v62 = vor.u32 %v639_v14, %v635_v33  ;;  %v645_v54 = vrot.slane %v643_v39, 5  ;;  %16490 = vst [vmem:[#allocation11_spill] sm:$0xff] %v12134_v38 }
  0x4c   : > { %v650_v7 = vrot.slane %v648_v37, 4  ;;  %v622_v16 = vsel %vm11892_vm4, %v617_v35, %v621_v61  ;;  %v653_v20 = vrot.slane %v651_v45, 5  ;;  %v661_v22 = vshrl.u32 %v12112_v53, 16 }
  0x4d   : > { %v659_v42 = vrot.slane %v657_v49, 5  ;;  %v9537_v6 = vcombine.low %v612_v34, %v622_v16  ;;  %v636_v24 = vsel %vm11892_vm4, %v631_v60, %v635_v33  ;;  %v641_v44 = vrot.slane %v640_v62, 4  ;;  %v12147_v49 = vld [vmem:[%s11857_s11 + $0xb4] sm:$0xf] }
  0x4e   : > { %v667_v31 = vshll.u32 %v12115_v25, 16  ;;  %v654_v14 = vor.u32 %v653_v20, %v650_v7  ;;  %v663_v37 = vrot.slane %v661_v22, 4  ;;  %v672_v39 = vshrl.u32 %v12120_v8, 16  ;;  %v12150_v20 = vld [vmem:[%s11857_s11 + $0xb8] sm:$0xf] }
  0x4f   : > { %v675_v61 = vshll.u32 %v12120_v8, 16  ;;  %10661 = vmatmul.mubr.msk.bf16.gmra.mrb[20].mxu0 %vm769_vm3, %v9537_v6  ;;  %v646_v35 = vsel %vm11892_vm4, %v641_v44, %v645_v54  ;;  %v681_v45 = vshll.u32 %v12128_v55, 16  ;;  %v685_v33 = vshrl.u32 %v12128_v55, 16 }
  0x50   : > { %v669_v34 = vrot.slane %v667_v31, 5  ;;  %v9538_v60 = vcombine.low %v636_v24, %v646_v35  ;;  %v655_v62 = vrot.slane %v654_v14, 4  ;;  %v664_v7 = vor.u32 %v663_v37, %v659_v42 }
  0x51   : > { %v674_v16 = vrot.slane %v672_v39, 4  ;;  %v677_v22 = vrot.slane %v675_v61, 5  ;;  %v683_v25 = vrot.slane %v681_v45, 5  ;;  %v687_v5 = vrot.slane %v685_v33, 4 }
  0x52   : > { %v691_v6 = vshll.u32 %v12134_v38, 16  ;;  %10664 = vmatprep.mubr.msk.bf16.mxu0 %vm769_vm3, %v9538_v60  ;;  %v660_v44 = vsel %vm11892_vm4, %v655_v62, %v659_v42  ;;  %v665_v54 = vrot.slane %v664_v7, 4  ;;  %v696_v24 = vshrl.u32 %v12147_v49, 16 }
  0x53   : > { %v699_v31 = vshll.u32 %v12147_v49, 16  ;;  %v678_v14 = vor.u32 %v677_v22, %v674_v16  ;;  %v688_v37 = vor.u32 %v687_v5, %v683_v25  ;;  %v705_v61 = vshll.u32 %v12150_v20, 16 }
  0x54   : > { %v693_v39 = vrot.slane %v691_v6, 5  ;;  %v670_v35 = vsel %vm11892_vm4, %v665_v54, %v669_v34  ;;  %v698_v45 = vrot.slane %v696_v24, 4  ;;  %v709_v60 = vshrl.u32 %v12150_v20, 16 }
  0x55   : > { %v701_v33 = vrot.slane %v699_v31, 5  ;;  %v9539_v38 = vcombine.low %v660_v44, %v670_v35  ;;  %v679_v11 = vrot.slane %v678_v14, 4  ;;  %v689_v42 = vrot.slane %v688_v37, 4  ;;  %v1284_v35 = vld [vmem:[%s11857_s11 + $0x6c] sm:$0xe] }
  0x56   : > { %v707_v62 = vrot.slane %v705_v61, 5  ;;  %v711_v48 = vrot.slane %v709_v60, 4  ;;  %v715_v16 = vshll.u32 %v12154_v40, 16  ;;  %v9559_v5 = vcombine.low %v11871_v10, %v11874_v12 }
  0x57   : > { %v702_v7 = vor.u32 %v701_v33, %v698_v45  ;;  %v1338_v22 = vrot.slane %v11877_v13, 5  ;;  %10665 = vmatmul.mubr.msk.bf16.gmra.mrb[24].mxu0 %vm769_vm3, %v9539_v38  ;;  %v684_v34 = vsel %vm11892_vm4, %v679_v11, %v683_v25  ;;  %v694_v6 = vsel %vm11892_vm4, %v689_v42, %v693_v39  ;;  %v1276_v25 = vld [vmem:[%s11857_s11 + $0xc] sm:$0xe]  ;;  %v1283_v33 = vld [vmem:[%s11857_s11 + $0x60] sm:$0xe] }
  0x58   : > { %v9561_v44 = vcombine.low %v11911_v47, %v11914_v52  ;;  %v9540_v54 = vcombine.low %v684_v34, %v694_v6  ;;  %v712_v31 = vor.u32 %v711_v48, %v707_v62  ;;  %v717_v14 = vrot.slane %v715_v16, 5  ;;  %v1278_v6 = vld [vmem:[%s11857_s11 + $0x24] sm:$0xe]  ;;  %v1287_v38 = vld [vmem:[%s11857_s11 + $0x90] sm:$0xe] }
  0x59   : > { %v703_v24 = vrot.slane %v702_v7, 4  ;;  %v9562_v37 = vcombine.low %v11929_v2, %v11932_v9  ;;  %v1279_v7 = vld [vmem:[%s11857_s11 + $0x30] sm:$0xe]  ;;  %v1359_v60 = vrot.slane %v11945_v21, 5  ;;  %v16501_v2 = vld [vmem:[#allocation9_spill] sm:$0xff] }
  0x5a   : > { %10668 = vmatprep.mubr.msk.bf16.mxu0 %vm769_vm3, %v9540_v54  ;;  %v713_v39 = vrot.slane %v712_v31, 4  ;;  %v16493_v31 = vrot.slane %v11874_v12, 5 }
  0x5b   : > { %v708_v48 = vsel %vm11892_vm4, %v703_v24, %v707_v62  ;;  %v9591_v24 = vrot.slane %v1276_v25, 9  ;;  %v9593_v25 = vrot.slane %v1278_v6, 9  ;;  %v9594_v6 = vrot.slane %v1279_v7, 9 }
  0x5c   : > { %v718_v62 = vsel %vm11892_vm4, %v713_v39, %v717_v14  ;;  %v1337_v14 = vrot.slane %v16493_v31, 4  ;;  %v16494_v39 = vcombine.low %v11860_v3, %v11863_v4  ;;  %v1281_v4 = vld [vmem:[%s11857_s11 + $0x48] sm:$0xe]  ;;  %v9560_v3 = vcombine.low %v11888_v27, %v11897_v32 }
  0x5d   : > { %v9541_v34 = vcombine.low %v708_v48, %v718_v62  ;;  %v16495_v48 = vmov %v16493_v31  ;;  %v1349_v31 = vrot.slane %v11914_v52, 5  ;;  %v1366_v32 = vrot.slane %v11966_v46, 5 }
  0x5e   : > { %v12222_v62 = vsel %vm12207_vm7, %v9591_v24, %v16495_v48  ;;  %v12226_v16 = vsel %vm12207_vm7, %v1337_v14, %v1338_v22  ;;  %v1352_v24 = vrot.slane %v11921_v59, 5  ;;  %v1282_v48 = vld [vmem:[%s11857_s11 + $0x54] sm:$0xe]  ;;  %v1537_v22 = vsel %vm818_vm0, %v11939_v18, 0 }
  0x5f   : > { %10669 = vmatmul.mubr.msk.bf16.gmra.mrb[28].mxu0 %vm769_vm3, %v9541_v34  ;;  %v1280_v34 = vld [vmem:[%s11857_s11 + $0x3c] sm:$0xe]  ;;  %v1351_v42 = vrot.slane %v1349_v31, 4  ;;  %v1356_v14 = vrot.slane %v11932_v9, 5  ;;  %v1363_v18 = vrot.slane %v11961_v41, 5  ;;  %v1373_v46 = vrot.slane %v11985_v15, 5 }
  0x60   : > { %10674 = vmatprep.mubr.msk.bf16.mxu0 %vm769_vm3, %v16494_v39  ;;  %v12236_v39 = vsel %vm12207_vm7, %v9593_v25, %v1349_v31  ;;  %v12249_v25 = vld [vmem:[%s16371_s1 + $0x6] sm:$0x3]  ;;  %v9595_v31 = vrot.slane %v1280_v34, 9  ;;  %v9596_v34 = vrot.slane %v1281_v4, 9  ;;  %v1415_v9 = vrot.slane %v16501_v2, 5 }
  0x61   : > { %v12253_v59 = vsel %vm12207_vm7, %v1351_v42, %v1352_v24  ;;  %v12260_v21 = vsel %vm12207_vm7, %v9594_v6, %v1356_v14  ;;  %v1358_v27 = vrot.slane %v1356_v14, 4  ;;  %v1365_v42 = vrot.slane %v1363_v18, 4  ;;  %v16502_v2 = vld [vmem:[#allocation10_spill] sm:$0xff] }
  0x62   : > { %v12266_v45 = vsel %vm12207_vm7, %v9595_v31, %v1363_v18  ;;  %v1370_v24 = vrot.slane %v11980_v63, 5  ;;  %v9597_v14 = vrot.slane %v1282_v48, 9  ;;  %v1377_v31 = vrot.slane %v11998_v30, 5 }
  0x63   : > { %v12276_v6 = vsel %vm12207_vm7, %v1358_v27, %v1359_v60  ;;  %v12285_v10 = vsel %vm12207_vm7, %v1365_v42, %v1366_v32  ;;  %v1285_v60 = vld [vmem:[%s11857_s11 + $0x78] sm:$0xe]  ;;  %v1286_v27 = vld [vmem:[%s11857_s11 + $0x84] sm:$0xe]  ;;  %v9598_v42 = vrot.slane %v1283_v33, 9  ;;  %v1422_v47 = vrot.slane %v16502_v2, 5 }
  0x64   : > { %v12289_v12 = vsel %vm12207_vm7, %v9596_v34, %v1370_v24  ;;  %v1379_v48 = vrot.slane %v1377_v31, 4  ;;  %v1384_v34 = vrot.slane %v12017_v56, 5  ;;  %v16504_v2 = vcombine.low %v11953_v36, %v11961_v41 }
  0x66   : > { %v12319_v33 = vsel %vm12207_vm7, %v9598_v42, %v1384_v34  ;;  %v9601_v42 = vrot.slane %v1286_v27, 9 }
  0x67   : > { %10675 = vmatmul.mubr.msk.bf16.vlgmr.msra.gmra.mrb[0].mxu0 %vm769_vm3, %v9559_v5  ;;  %v1372_v5 = vrot.slane %v1370_v24, 4  ;;  %v16497_v24 = vld [vmem:[#allocation5_spill] sm:$0xff] }
  0x68   : > { %10707 = vmatpush3.bf16.msra.mxu0 %v1537_v22  ;;  %10678 = vmatprep.mubr.msk.bf16.mxu0 %vm769_vm3, %v9560_v3  ;;  %v12298_v3 = vsel %vm12207_vm7, %v9597_v14, %v1377_v31  ;;  %v16496_v22 = vld [vmem:[#allocation4_spill] sm:$0xff]  ;;  %v1387_v4 = vrot.slane %v16497_v24, 5  ;;  %v9599_v31 = vrot.slane %v1284_v35, 9  ;;  %v16498_v24 = vld [vmem:[#allocation6_spill] sm:$0xff]  ;;  %v1398_v35 = vrot.slane %v12055_v1, 5 }
  0x69   : > { %11669 = vmatprep.subr.msk.bf16.mxu0 %vm818_vm0, %v12249_v25  ;;  %v1380_v18 = vrot.slane %v16496_v22, 5  ;;  %v12304_v32 = vsel %vm12207_vm7, %v1372_v5, %v1373_v46  ;;  %v1391_v22 = vrot.slane %v12035_v26, 5  ;;  %v1386_v5 = vrot.slane %v1384_v34, 4  ;;  %v16499_v46 = vld [vmem:[#allocation7_spill] sm:$0xff] }
  0x6a   : > { %v1394_v7 = vrot.slane %v16498_v24, 5  ;;  %v1401_v11 = vrot.slane %v16499_v46, 5  ;;  %v1405_v34 = vrot.slane %v12070_v29, 5  ;;  %v1400_v27 = vrot.slane %v1398_v35, 4 }
  0x6b   : > { %v12312_v14 = vsel %vm12207_vm7, %v1379_v48, %v1380_v18  ;;  %v12324_v15 = vsel %vm12207_vm7, %v9599_v31, %v1391_v22  ;;  %v1393_v48 = vrot.slane %v1391_v22, 4  ;;  %v9600_v18 = vrot.slane %v1285_v60, 9  ;;  %v1288_v22 = vld [vmem:[%s11857_s11 + $0x9c] sm:$0xe] }
  0x6c   : > { %v12329_v61 = vsel %vm12207_vm7, %v1386_v5, %v1387_v4  ;;  %v12357_v52 = vsel %vm12207_vm7, %v9601_v42, %v1405_v34  ;;  %v12362_v5 = vsel %vm12207_vm7, %v1400_v27, %v1401_v11  ;;  %v9602_v24 = vrot.slane %v1287_v38, 9  ;;  %v16503_v11 = vld [vmem:[#allocation11_spill] sm:$0xff] }
  0x6d   : > { %v12342_v31 = vsel %vm12207_vm7, %v1393_v48, %v1394_v7  ;;  %v12346_v4 = vsel %vm12207_vm7, %v9600_v18, %v1398_v35  ;;  %v16500_v7 = vld [vmem:[#allocation8_spill] sm:$0xff]  ;;  %v1412_v48 = vrot.slane %v12087_v0, 5  ;;  %v9603_v42 = vrot.slane %v1288_v22, 9 }
  0x6e   : > { %v1408_v46 = vrot.slane %v16500_v7, 5  ;;  %v1290_v7 = vld [vmem:[%s11857_s11 + $0xb4] sm:$0xe]  ;;  %v1426_v22 = vrot.slane %v12128_v55, 5  ;;  %v1429_v13 = vrot.slane %v16503_v11, 5  ;;  %v16505_v11 = vcombine.low %v11974_v57, %v11980_v63 }
  0x6f   : > { %10679 = vmatmul.mubr.msk.bf16.gmra.mrb[4].mxu0 %vm769_vm3, %v9561_v44  ;;  %v1407_v44 = vrot.slane %v1405_v34, 4  ;;  %v1419_v34 = vrot.slane %v12112_v53, 5  ;;  %v12379_v38 = vsel %vm12207_vm7, %v9602_v24, %v1412_v48  ;;  %v1414_v27 = vrot.slane %v1412_v48, 4 }
  0x70   : > { %10682 = vmatprep.mubr.msk.bf16.mxu0 %vm769_vm3, %v9562_v37  ;;  %v1289_v37 = vld [vmem:[%s11857_s11 + $0xa8] sm:$0xe]  ;;  %v9605_v28 = vrot.slane %v1290_v7, 9  ;;  %v1433_v24 = vrot.slane %v12150_v20, 5  ;;  %v16508_v57 = vcombine.low %v12032_v19, %v12035_v26  ;;  %v16509_v63 = vcombine.low %v12049_v51, %v12055_v1  ;;  %v1275_v19 = vld [vmem:[%s11857_s11] sm:$0xe] }
  0x71   : > { %v12371_v35 = vsel %vm12207_vm7, %v1407_v44, %v1408_v46  ;;  %v12384_v18 = vsel %vm12207_vm7, %v9603_v42, %v1419_v34  ;;  %v1421_v44 = vrot.slane %v1419_v34, 4  ;;  %v9604_v46 = vrot.slane %v1289_v37, 9  ;;  %v11769_v26 = vld [vmem:[%s11857_s11 + $0x8] sm:$0x1] }
  0x72   : > { %v12389_v60 = vsel %vm12207_vm7, %v1414_v27, %v1415_v9  ;;  %v1428_v34 = vrot.slane %v1426_v22, 4  ;;  %v1434_v7 = vsel %vm12207_vm7, %v9605_v28, %v1433_v24  ;;  %v16506_v28 = vcombine.low %v11995_v23, %v11998_v30 }
  0x73   : > { %v9619_v48 = vcombine.low %v12379_v38, %v12389_v60  ;;  %v1423_v42 = vsel %vm12207_vm7, %v1421_v44, %v1422_v47  ;;  %v1427_v37 = vsel %vm12207_vm7, %v9604_v46, %v1426_v22  ;;  %v1435_v60 = vrot.slane %v1433_v24, 4  ;;  %v1277_v46 = vld [vmem:[%s11857_s11 + $0x18] sm:$0xe] }
  0x74   : > { %v9620_v9 = vcombine.low %v12384_v18, %v1423_v42  ;;  %v1436_v47 = vrot.slane %v12154_v40, 5  ;;  %v1430_v36 = vsel %vm12207_vm7, %v1428_v34, %v1429_v13  ;;  %v16507_v40 = vcombine.low %v12011_v50, %v12017_v56  ;;  %v11768_v50 = vld [vmem:[%s11857_s11 + $0x4] sm:$0xf] }
  0x75   : > { %v9621_v41 = vcombine.low %v1427_v37, %v1430_v36  ;;  %v16510_v23 = vcombine.low %v12063_v17, %v12070_v29  ;;  %v16511_v30 = vcombine.low %v12081_v58, %v12087_v0  ;;  %v1328_v56 = vrot.slane %v11768_v50, 5  ;;  %v11770_v0 = vld [vmem:[%s11857_s11 + $0x1c] sm:$0xf] }
  0x76   : > { %v1437_v18 = vsel %vm12207_vm7, %v1435_v60, %v1436_v47  ;;  %v1331_v13 = vrot.slane %v11769_v26, 5  ;;  %v9590_v51 = vrot.slane %v1275_v19, 9  ;;  %v16512_v27 = vcombine.low %v12100_v43, %v12112_v53  ;;  %v11771_v43 = vld [vmem:[%s11857_s11 + $0x20] sm:$0x1]  ;;  %v11726_v47 = vld [vmem:[%s11857_s11 + $0x54] sm:$0xff]  }
  0x77   : > { %10683 = vmatmul.mubr.msk.bf16.gmra.mrb[8].mxu0 %vm769_vm3, %v16504_v2  ;;  %v9622_v38 = vcombine.low %v1434_v7, %v1437_v18  ;;  %v1330_v1 = vrot.slane %v1328_v56, 4  ;;  %v16513_v17 = vcombine.low %v12120_v8, %v12128_v55  ;;  %v1342_v44 = vrot.slane %v11770_v0, 5  ;;  %v9752_v7 = vld [vmem:[%s16371_s1 + $0x8] sm:$0x3]  ;;  %v12575_v19 = vld [vmem:[%s11857_s11 + $0x10] sm:$0xf] }
  0x78   : > { %10686 = vmatprep.mubr.msk.bf16.mxu0 %vm769_vm3, %v16505_v11  ;;  %v1329_v29 = vsel %vm12207_vm7, %v9590_v51, %v1328_v56  ;;  %v9592_v24 = vrot.slane %v1277_v46, 9  ;;  %v1345_v53 = vrot.slane %v11771_v43, 5  ;;  %v16514_v37 = vcombine.low %v12147_v49, %v12150_v20  ;;  %v12561_v18 = vld [vmem:[%s11857_s11 + $0x68] sm:$0x1]  ;;  %v11728_v56 = vld [vmem:[%s11857_s11 + $0x6c] sm:$0xff]   ;;  %v11735_v51 = vld [vmem:[%s11857_s11 + $0xc0] sm:$0xff]  }
  0x79   : > { %v1332_v58 = vsel %vm12207_vm7, %v1330_v1, %v1331_v13  ;;  %v1344_v42 = vrot.slane %v1342_v44, 4  ;;  %v1896_v2 = vsel %vm818_vm0, %v12249_v25, 0  ;;  %v16515_v49 = vcombine.low %v12222_v62, %v12226_v16  ;;  %v9707_v13 = vld [vmem:[%s11857_s11 + $0x18] sm:$0xf]  ;;  %v12591_v0 = vld [vmem:[%s11857_s11 + $0x80] sm:$0x1] }
  0x7a   : > { %v9607_v22 = vcombine.low %v1329_v29, %v1332_v58  ;;  %v1343_v8 = vsel %vm12207_vm7, %v9592_v24, %v1342_v44  ;;  %v16516_v20 = vcombine.low %v12236_v39, %v12253_v59  ;;  %v16517_v25 = vcombine.low %v12260_v21, %v12276_v6  ;;  %v12588_v58 = vld [vmem:[%s11857_s11 + $0x7c] sm:$0xf] }
  0x7b   : > { %v1346_v55 = vsel %vm12207_vm7, %v1344_v42, %v1345_v53  ;;  %v16518_v16 = vcombine.low %v12266_v45, %v12285_v10  ;;  %v16519_v62 = vcombine.low %v12289_v12, %v12304_v32  ;;  %v16520_v39 = vcombine.low %v12298_v3, %v12312_v14  ;;  %v11721_v10 = vld [vmem:[%s11857_s11 + $0x18] sm:$0xff]   ;;  %v11722_v12 = vld [vmem:[%s11857_s11 + $0x24] sm:$0xff]   ;;  %v11723_v32 = vld [vmem:[%s11857_s11 + $0x30] sm:$0xff]  }
  0x7c   : > { %v9609_v34 = vcombine.low %v1343_v8, %v1346_v55  ;;  %v16521_v59 = vcombine.low %v12319_v33, %v12329_v61  ;;  %v16522_v45 = vcombine.low %v12324_v15, %v12342_v31  ;;  %v16523_v21 = vcombine.low %v12346_v4, %v12362_v5  ;;  %v11720_v61 = vld [vmem:[%s11857_s11 + $0xc] sm:$0xff]   ;;  %v12525_v3 = vld [vmem:[%s16371_s1 + $0xa] sm:$0x3]  ;;  %v11724_v14 = vld [vmem:[%s11857_s11 + $0x3c] sm:$0xff]  }
  0x7d   : > { %v16524_v6 = vcombine.low %v12357_v52, %v12371_v35  ;;  %v2622_v15 = vsel %vm818_vm0, %v9752_v7, 0  ;;  %v12535_v33 = vld [vmem:[%s11857_s11 + $0x4c] sm:$0xf]  ;;  %v12538_v31 = vld [vmem:[%s11857_s11 + $0x50] sm:$0x1]  ;;  %v2153_v29 = vshrl.u32 %v12575_v19, 16 }
  0x7e   : > { %v9790_v4 = vld [vmem:[%s11857_s11 + $0x48] sm:$0xe]  ;;  %v2918_v52 = vrot.slane %v12535_v33, 5  ;;  %v2921_v5 = vrot.slane %v12538_v31, 5  ;;  %v2164_v44 = vshrl.u32 %v9707_v13, 16  ;;  %v2167_v46 = vshll.u32 %v9707_v13, 16 }
  0x7f   : > { %10687 = vmatmul.mubr.msk.bf16.gmra.mrb[12].mxu0 %vm769_vm3, %v16506_v28  ;;  %v9806_v35 = vrot.slane %v9790_v4, 9  ;;  %v2946_v24 = vrot.slane %v12588_v58, 5  ;;  %v2949_v42 = vrot.slane %v12591_v0, 5  ;;  %v12598_v43 = vld [vmem:[%s11857_s11 + $0x1c] sm:$0xf] }
  0x80   : > { %10690 = vmatprep.mubr.msk.bf16.mxu0 %vm769_vm3, %v16507_v40  ;;  %v2935_v40 = vrot.slane %v12561_v18, 5  ;;  %v11729_v55 = vld [vmem:[%s11857_s11 + $0x78] sm:$0xff]  }
  0x81   : > { %v12547_v60 = vsel %vm12207_vm7, %v9806_v35, %v2918_v52  ;;  %v2948_v8 = vrot.slane %v2946_v24, 4  ;;  %v12633_v4 = vld [vmem:[%s11857_s11 + $0x98] sm:$0x1]  ;;  %v9796_v35 = vld [vmem:[%s11857_s11 + $0x90] sm:$0xe] }
  0x87   : > { %10691 = vmatmul.mubr.msk.bf16.gmra.mrb[16].mxu0 %vm769_vm3, %v16508_v57 }
  0x88   : > { %10694 = vmatprep.mubr.msk.bf16.mxu0 %vm769_vm3, %v16509_v63 }
  0x8f   : > { %10695 = vmatmul.mubr.msk.bf16.gmra.mrb[20].mxu0 %vm769_vm3, %v16510_v23  ;;  %v11727_v23 = vld [vmem:[%s11857_s11 + $0x60] sm:$0xff]  }
  0x90   : > { %10698 = vmatprep.mubr.msk.bf16.mxu0 %vm769_vm3, %v16511_v30  ;;  %v9704_v30 = vld [vmem:[%s11857_s11 + $0xc] sm:$0xf] }
  0x91   : > { %v2140_v1 = vshrl.u32 %v9704_v30, 16 }
  0x97   : > { %10699 = vmatmul.mubr.msk.bf16.gmra.mrb[24].mxu0 %vm769_vm3, %v16512_v27  ;;  %v2143_v27 = vshll.u32 %v9704_v30, 16 }
  0x98   : > { %10702 = vmatprep.mubr.msk.bf16.mxu0 %vm769_vm3, %v16513_v17  ;;  %v2149_v17 = vshll.u32 %v12575_v19, 16 }
  0x9f   : > { %10703 = vmatmul.mubr.msk.bf16.gmra.mrb[28].mxu0 %vm769_vm3, %v16514_v37  ;;  %v2142_v37 = vrot.slane %v2140_v1, 4  ;;  %v9713_v1 = vld [vmem:[%s11857_s11 + $0x30] sm:$0xf] }
  0xa0   : > { %10708 = vmatprep.mubr.msk.bf16.mxu0 %vm769_vm3, %v9607_v22  ;;  %v9794_v22 = vld [vmem:[%s11857_s11 + $0x78] sm:$0xe] }
  0xa1   : > { %v9810_v53 = vrot.slane %v9794_v22, 9 }
  0xa7   : > { %10709 = vmatmul.mubr.msk.bf16.vlgmr.msra.gmra.mrb[0].mxu0 %vm769_vm3, %v16515_v49  ;;  %v2155_v49 = vrot.slane %v2153_v29, 4  ;;  %v11732_v29 = vld [vmem:[%s11857_s11 + $0x9c] sm:$0xff]  }
  0xa8   : > { %10741 = vmatpush3.bf16.msra.mxu0 %v1896_v2  ;;  %10712 = vmatprep.mubr.msk.bf16.mxu0 %vm769_vm3, %v9609_v34  ;;  %v12602_v34 = vld [vmem:[%s11857_s11 + $0x14] sm:$0x1]  ;;  %v2145_v2 = vrot.slane %v2143_v27, 5 }
  0xa9   : > { %11670 = vmatprep.subr.msk.bf16.mxu0 %vm818_vm0, %v9752_v7  ;;  %v12604_v7 = vrot.slane %v2149_v17, 5  ;;  %v12647_v27 = vld [vmem:[%s11857_s11 + $0x34] sm:$0xf] }
  0xaf   : > { %10713 = vmatmul.mubr.msk.bf16.gmra.mrb[4].mxu0 %vm769_vm3, %v16516_v20  ;;  %v12608_v20 = vsel %vm12207_vm7, %v9810_v53, %v2946_v24 }
  0xb0   : > { %10716 = vmatprep.mubr.msk.bf16.mxu0 %vm769_vm3, %v16517_v25  ;;  %16526 = vst [vmem:[#allocation5_spill] sm:$0xff] %v12608_v20  ;;  %v11730_v25 = vld [vmem:[%s11857_s11 + $0x84] sm:$0xff]  }
  0xb7   : > { %10717 = vmatmul.mubr.msk.bf16.gmra.mrb[8].mxu0 %vm769_vm3, %v16518_v16  ;;  %v2166_v16 = vrot.slane %v2164_v44, 4 }
  0xb8   : > { %10720 = vmatprep.mubr.msk.bf16.mxu0 %vm769_vm3, %v16519_v62  ;;  %v2169_v62 = vrot.slane %v2167_v46, 5 }
  0xbf   : > { %10721 = vmatmul.mubr.msk.bf16.gmra.mrb[12].mxu0 %vm769_vm3, %v16520_v39  ;;  %v2173_v39 = vshll.u32 %v12598_v43, 16 }
  0xc0   : > { %10724 = vmatprep.mubr.msk.bf16.mxu0 %vm769_vm3, %v16521_v59  ;;  %v12614_v59 = vsel %vm12207_vm7, %v2948_v8, %v2949_v42  ;;  %v12728_v8 = vld [vmem:[%s11857_s11 + $0xc4] sm:$0xf] }
  0xc1   : > { %16527 = vst [vmem:[#allocation6_spill] sm:$0xff] %v12614_v59 }
  0xc7   : > { %10725 = vmatmul.mubr.msk.bf16.gmra.mrb[16].mxu0 %vm769_vm3, %v16522_v45  ;;  %v2177_v45 = vshrl.u32 %v12598_v43, 16 }
  0xc8   : > { %10728 = vmatprep.mubr.msk.bf16.mxu0 %vm769_vm3, %v16523_v21 }
  0xcf   : > { %10729 = vmatmul.mubr.msk.bf16.gmra.mrb[20].mxu0 %vm769_vm3, %v16524_v6  ;;  %v2159_v6 = vshll.u32 %v12602_v34, 16 }
  0xd0   : > { %10732 = vmatprep.mubr.msk.bf16.mxu0 %vm769_vm3, %v9619_v48  ;;  %v2920_v48 = vrot.slane %v2918_v52, 4  ;;  %v2170_v52 = vor.u32 %v2169_v62, %v2166_v16  ;;  %v2221_v16 = vshll.u32 %v12647_v27, 16 }
  0xd1   : > { %v2161_v46 = vrot.slane %v2159_v6, 5  ;;  %v12675_v6 = vld [vmem:[%s11857_s11 + $0xb0] sm:$0x1] }
  0xd2   : > { %v12552_v11 = vsel %vm12207_vm7, %v2920_v48, %v2921_v5  ;;  %v12636_v5 = vrot.slane %v2173_v39, 5  ;;  %v12654_v22 = vrot.slane %v2170_v52, 4  ;;  %v2225_v39 = vshrl.u32 %v12647_v27, 16  ;;  %v9798_v52 = vld [vmem:[%s11857_s11 + $0xa8] sm:$0xe] }
  0xd7   : > { %10733 = vmatmul.mubr.msk.bf16.gmra.mrb[24].mxu0 %vm769_vm3, %v9620_v9  ;;  %v11725_v9 = vld [vmem:[%s11857_s11 + $0x48] sm:$0xff]  }
  0xd8   : > { %10736 = vmatprep.mubr.msk.bf16.mxu0 %vm769_vm3, %v9621_v41  ;;  %v12558_v41 = vld [vmem:[%s11857_s11 + $0x64] sm:$0xf] }
  0xd9   : > { %v2932_v28 = vrot.slane %v12558_v41, 5 }
  0xdb   : > { %v2934_v63 = vrot.slane %v2932_v28, 4 }
  0xdd   : > { %v12579_v26 = vsel %vm12207_vm7, %v2934_v63, %v2935_v40  ;;  %v9812_v40 = vrot.slane %v9796_v35, 9 }
  0xde   : > { %16525 = vst [vmem:[#allocation4_spill] sm:$0xff] %v12579_v26 }
  0xdf   : > { %10737 = vmatmul.mubr.msk.bf16.gmra.mrb[28].mxu0 %vm769_vm3, %v9622_v38  ;;  %v9792_v38 = vld [vmem:[%s11857_s11 + $0x60] sm:$0xe] }
  0xe0   : > { %10742 = vmatprep.mubr.msk.bf16.mxu0 %vm769_vm3, %v11720_v61  ;;  %v9808_v57 = vrot.slane %v9792_v38, 9  ;;  %v12621_v61 = vld [vmem:[%s11857_s11 + $0x20] sm:$0x1] }
  0xe1   : > { %v2183_v63 = vshll.u32 %v12621_v61, 16 }
  0xe2   : > { %v12571_v50 = vsel %vm12207_vm7, %v9808_v57, %v2932_v28  ;;  %v11731_v57 = vld [vmem:[%s11857_s11 + $0x90] sm:$0xff]  }
  0xe7   : > { %10743 = vmatmul.mubr.msk.bf16.vlgmr.msra.gmra.mrb[0].mxu0 %vm769_vm3, %v11721_v10  ;;  %v9710_v10 = vld [vmem:[%s11857_s11 + $0x24] sm:$0xf] }
  0xe8   : > { %10775 = vmatpush3.bf16.msra.mxu0 %v2622_v15  ;;  %10746 = vmatprep.mubr.msk.bf16.mxu0 %vm769_vm3, %v11722_v12  ;;  %v2146_v12 = vor.u32 %v2145_v2, %v2142_v37  ;;  %v2156_v15 = vor.u32 %v2155_v49, %v12604_v7  ;;  %v2188_v38 = vshrl.u32 %v9710_v10, 16  ;;  %v2191_v28 = vshll.u32 %v9710_v10, 16 }
  0xe9   : > { %11671 = vmatprep.subr.msk.bf16.mxu0 %vm818_vm0, %v12525_v3  ;;  %v2212_v49 = vshrl.u32 %v9713_v1, 16 }
  0xea   : > { %v2157_v44 = vrot.slane %v2156_v15, 4  ;;  %v2190_v53 = vrot.slane %v2188_v38, 4  ;;  %v2193_v37 = vrot.slane %v2191_v28, 5  ;;  %v12681_v15 = vrot.slane %v2183_v63, 5  ;;  %v9716_v28 = vld [vmem:[%s11857_s11 + $0x3c] sm:$0xf] }
  0xec   : > { %v2194_v38 = vor.u32 %v2193_v37, %v2190_v53  ;;  %v2236_v37 = vshrl.u32 %v9716_v28, 16 }
  0xef   : > { %10747 = vmatmul.mubr.msk.bf16.gmra.mrb[4].mxu0 %vm769_vm3, %v11723_v32  ;;  %v12627_v32 = vld [vmem:[%s11857_s11 + $0x28] sm:$0xf] }
  0xf0   : > { %10750 = vmatprep.mubr.msk.bf16.mxu0 %vm769_vm3, %v11724_v14  ;;  %v12630_v14 = vld [vmem:[%s11857_s11 + $0x94] sm:$0xf]  ;;  %v2201_v13 = vshrl.u32 %v12627_v32, 16 }
  0xf1   : > { %v2960_v48 = vrot.slane %v12630_v14, 5 }
  0xf2   : > { %v2203_v62 = vrot.slane %v2201_v13, 4 }
  0xf3   : > { %v2962_v30 = vrot.slane %v2960_v48, 4  ;;  %v12651_v17 = vsel %vm12207_vm7, %v9812_v40, %v2960_v48  ;;  %v2977_v48 = vrot.slane %v12675_v6, 5  ;;  %v9814_v40 = vrot.slane %v9798_v52, 9 }
  0xf4   : > { %16528 = vst [vmem:[#allocation7_spill] sm:$0xff] %v12651_v17 }
  0xf7   : > { %10751 = vmatmul.mubr.msk.bf16.gmra.mrb[8].mxu0 %vm769_vm3, %v11725_v9  ;;  %v2963_v9 = vrot.slane %v12633_v4, 5 }
  0xf8   : > { %10754 = vmatprep.mubr.msk.bf16.mxu0 %vm769_vm3, %v11726_v47  ;;  %v2179_v47 = vrot.slane %v2177_v45, 4  ;;  %v12672_v45 = vld [vmem:[%s11857_s11 + $0xac] sm:$0xf] }
  0xf9   : > { %v12658_v24 = vsel %vm12207_vm7, %v2962_v30, %v2963_v9  ;;  %v2974_v35 = vrot.slane %v12672_v45, 5  ;;  %v2162_v9 = vsel %vm11892_vm4, %v2157_v44, %v2161_v46  ;;  %v2227_v44 = vrot.slane %v2225_v39, 4 }
  0xfa   : > { %16529 = vst [vmem:[#allocation8_spill] sm:$0xff] %v12658_v24  ;;  %v2180_v42 = vor.u32 %v2179_v47, %v12636_v5 }
  0xfb   : > { %v2976_v30 = vrot.slane %v2974_v35, 4  ;;  %v12704_v46 = vsel %vm12207_vm7, %v9814_v40, %v2974_v35  ;;  %v2195_v35 = vrot.slane %v2194_v38, 4  ;;  %v12731_v38 = vld [vmem:[%s11857_s11 + $0xc8] sm:$0x1] }
  0xfc   : > { %v12688_v47 = vrot.slane %v2180_v42, 4  ;;  %16531 = vst [vmem:[#allocation9_spill] sm:$0xff] %v12704_v46  ;;  %v11734_v42 = vld [vmem:[%s11857_s11 + $0xb4] sm:$0xff]   ;;  %v2269_v46 = vshll.u32 %v12535_v33, 16 }
  0xfd   : > { %v12710_v52 = vsel %vm12207_vm7, %v2976_v30, %v2977_v48 }
  0xfe   : > { %16532 = vst [vmem:[#allocation10_spill] sm:$0xff] %v12710_v52 }
  0xff   : > { %10755 = vmatmul.mubr.msk.bf16.gmra.mrb[12].mxu0 %vm769_vm3, %v11727_v23  ;;  %v2197_v23 = vshll.u32 %v12627_v32, 16 }
 0x100   : > { %10758 = vmatprep.mubr.msk.bf16.mxu0 %vm769_vm3, %v11728_v56  ;;  %v2147_v56 = vrot.slane %v2146_v12, 4 }
 0x101   : > { %v12666_v2 = vrot.slane %v2197_v23, 5  ;;  %v12693_v23 = vld [vmem:[%s11857_s11 + $0x40] sm:$0xf] }
 0x102   : > { %v2152_v12 = vsel %vm11892_vm4, %v2147_v56, %v12604_v7  ;;  %v11733_v56 = vld [vmem:[%s11857_s11 + $0xa8] sm:$0xff]   ;;  %v2249_v39 = vshrl.u32 %v12693_v23, 16 }
 0x103   : > { %v2204_v13 = vor.u32 %v2203_v62, %v12666_v2  ;;  %v9753_v53 = vcombine.low %v2152_v12, %v2162_v9  ;;  %v2245_v62 = vshll.u32 %v12693_v23, 16 }
 0x107   : > { %10759 = vmatmul.mubr.msk.bf16.gmra.mrb[16].mxu0 %vm769_vm3, %v11729_v55  ;;  %v12664_v55 = vld [vmem:[%s11857_s11 + $0x2c] sm:$0x1] }
 0x108   : > { %10762 = vmatprep.mubr.msk.bf16.mxu0 %vm769_vm3, %v11730_v25  ;;  %v2215_v25 = vshll.u32 %v9713_v1, 16  ;;  %v2207_v7 = vshll.u32 %v12664_v55, 16  ;;  %v12698_v1 = vld [vmem:[%s11857_s11 + $0x38] sm:$0x1] }
 0x109   : > { %v2231_v48 = vshll.u32 %v12698_v1, 16 }
 0x10a   : > { %v2217_v63 = vrot.slane %v2215_v25, 5  ;;  %v9719_v25 = vld [vmem:[%s11857_s11 + $0x48] sm:$0xf]  ;;  %v2209_v9 = vrot.slane %v2207_v7, 5  ;;  %v2238_v7 = vrot.slane %v2236_v37, 4 }
 0x10b   : > { %v2260_v30 = vshrl.u32 %v9719_v25, 16  ;;  %v2263_v12 = vshll.u32 %v9719_v25, 16  ;;  %v12756_v25 = vld [vmem:[%s11857_s11 + $0x58] sm:$0xf] }
 0x10f   : > { %10763 = vmatmul.mubr.msk.bf16.gmra.mrb[20].mxu0 %vm769_vm3, %v11731_v57  ;;  %v2214_v57 = vrot.slane %v2212_v49, 4  ;;  %v2239_v49 = vshll.u32 %v9716_v28, 16 }
 0x110   : > { %10766 = vmatprep.mubr.msk.bf16.mxu0 %vm769_vm3, %v11732_v29  ;;  %v12700_v29 = vrot.slane %v2221_v16, 5  ;;  %v2176_v16 = vsel %vm11892_vm4, %v12654_v22, %v12636_v5  ;;  %v2186_v5 = vsel %vm11892_vm4, %v12688_v47, %v12681_v15  ;;  %v2205_v22 = vrot.slane %v2204_v13, 4  ;;  %v12738_v47 = vld [vmem:[%s11857_s11 + $0x44] sm:$0x1] }
 0x111   : > { %v2218_v28 = vor.u32 %v2217_v63, %v2214_v57  ;;  %v2241_v57 = vrot.slane %v2239_v49, 5  ;;  %v9800_v63 = vld [vmem:[%s11857_s11 + $0xc0] sm:$0xe]  ;;  %v2991_v15 = vrot.slane %v12731_v38, 5  ;;  %v12740_v13 = vrot.slane %v2245_v62, 5 }
 0x112   : > { %v2228_v40 = vor.u32 %v2227_v44, %v12700_v29  ;;  %v2251_v44 = vrot.slane %v2249_v39, 4  ;;  %v9816_v21 = vrot.slane %v9800_v63, 9  ;;  %v12748_v49 = vrot.slane %v2231_v48, 5  ;;  %v9722_v39 = vld [vmem:[%s11857_s11 + $0x54] sm:$0xf] }
 0x113   : > { %v12746_v37 = vrot.slane %v2218_v28, 4  ;;  %v2210_v52 = vsel %vm11892_vm4, %v2205_v22, %v2209_v9  ;;  %v2273_v62 = vshrl.u32 %v12535_v33, 16  ;;  %v2255_v28 = vshll.u32 %v12738_v47, 16 }
 0x114   : > { %v2252_v9 = vor.u32 %v2251_v44, %v12740_v13  ;;  %v2262_v22 = vrot.slane %v2260_v30, 4  ;;  %v2265_v33 = vrot.slane %v2263_v12, 5  ;;  %v12777_v30 = vrot.slane %v2269_v46, 5 }
 0x115   : > { %v2275_v12 = vrot.slane %v2273_v62, 4  ;;  %v2224_v44 = vsel %vm11892_vm4, %v12746_v37, %v12700_v29  ;;  %v12797_v37 = vld [vmem:[%s11857_s11 + $0x70] sm:$0xf] }
 0x116   : > { %v2253_v62 = vrot.slane %v2252_v9, 4  ;;  %v2321_v9 = vshrl.u32 %v12558_v41, 16 }
 0x117   : > { %10767 = vmatmul.mubr.msk.bf16.gmra.mrb[24].mxu0 %vm769_vm3, %v11733_v56  ;;  %v2988_v56 = vrot.slane %v12728_v8, 5 }
 0x118   : > { %10770 = vmatprep.mubr.msk.bf16.mxu0 %vm769_vm3, %v11734_v42  ;;  %v2200_v42 = vsel %vm11892_vm4, %v2195_v35, %v12666_v2  ;;  %v12762_v2 = vrot.slane %v2228_v40, 4  ;;  %v2242_v35 = vor.u32 %v2241_v57, %v2238_v7  ;;  %v2293_v40 = vshll.u32 %v12756_v25, 16 }
 0x119   : > { %v2990_v36 = vrot.slane %v2988_v56, 4  ;;  %v12760_v63 = vsel %vm12207_vm7, %v9816_v21, %v2988_v56  ;;  %v2284_v21 = vshrl.u32 %v9722_v39, 16  ;;  %v2287_v56 = vshll.u32 %v9722_v39, 16 }
 0x11a   : > { %16533 = vst [vmem:[#allocation11_spill] sm:$0xff] %v12760_v63  ;;  %v2297_v7 = vshrl.u32 %v12756_v25, 16  ;;  %v3092_v57 = vsel %vm818_vm0, %v12525_v3, 0  ;;  %v9725_v3 = vld [vmem:[%s11857_s11 + $0x60] sm:$0xf]  ;;  %v2243_v46 = vrot.slane %v2242_v35, 4  ;;  %v2266_v39 = vor.u32 %v2265_v33, %v2262_v22 }
 0x11b   : > { %v12767_v48 = vsel %vm12207_vm7, %v2990_v36, %v2991_v15  ;;  %v9754_v36 = vcombine.low %v2176_v16, %v2186_v5  ;;  %v9755_v15 = vcombine.low %v2200_v42, %v2210_v52  ;;  %v2257_v16 = vrot.slane %v2255_v28, 5  ;;  %v12789_v5 = vld [vmem:[%s11857_s11 + $0x5c] sm:$0x1]  ;;  %v9728_v52 = vld [vmem:[%s11857_s11 + $0x6c] sm:$0xf] }
 0x11c   : > { %16534 = vst [vmem:[#allocation3_spill] sm:$0xff] %v12767_v48  ;;  %v2286_v42 = vrot.slane %v2284_v21, 4  ;;  %v2289_v24 = vrot.slane %v2287_v56, 5  ;;  %v12794_v48 = vrot.slane %v2293_v40, 5  ;;  %v2299_v29 = vrot.slane %v2297_v7, 4 }
 0x11d   : > { %v2276_v63 = vor.u32 %v2275_v12, %v12777_v30  ;;  %v2311_v28 = vshll.u32 %v9725_v3, 16  ;;  %v2317_v35 = vshll.u32 %v12558_v41, 16  ;;  %v2335_v22 = vshll.u32 %v9728_v52, 16  ;;  %v9731_v41 = vld [vmem:[%s11857_s11 + $0x78] sm:$0xf] }
 0x11e   : > { %v2248_v33 = vsel %vm11892_vm4, %v2243_v46, %v12740_v13  ;;  %v2258_v21 = vsel %vm11892_vm4, %v2253_v62, %v2257_v16  ;;  %v2341_v56 = vshll.u32 %v12797_v37, 16  ;;  %v2345_v40 = vshrl.u32 %v12797_v37, 16 }
 0x11f   : > { %10771 = vmatmul.mubr.msk.bf16.gmra.mrb[28].mxu0 %vm769_vm3, %v11735_v51  ;;  %v2234_v51 = vsel %vm11892_vm4, %v12762_v2, %v12748_v49  ;;  %v2303_v49 = vshll.u32 %v12789_v5, 16  ;;  %v2308_v2 = vshrl.u32 %v9725_v3, 16  ;;  %v2267_v7 = vrot.slane %v2266_v39, 4 }
 0x120   : > { %10776 = vmatprep.mubr.msk.bf16.mxu0 %vm769_vm3, %v9753_v53  ;;  %v2279_v53 = vshll.u32 %v12538_v31, 16  ;;  %v2332_v31 = vshrl.u32 %v9728_v52, 16  ;;  %v2290_v3 = vor.u32 %v2289_v24, %v2286_v42  ;;  %v2300_v17 = vor.u32 %v2299_v29, %v12794_v48  ;;  %v12815_v52 = vld [vmem:[%s16371_s1 + $0xc] sm:$0x3]  ;;  %v12822_v29 = vld [vmem:[%s11857_s11 + $0x74] sm:$0x1] }
 0x121   : > { %v2277_v13 = vrot.slane %v2276_v63, 4  ;;  %v2305_v16 = vrot.slane %v2303_v49, 5  ;;  %v2310_v46 = vrot.slane %v2308_v2, 4  ;;  %v2313_v62 = vrot.slane %v2311_v28, 5 }
 0x122   : > { %v2281_v12 = vrot.slane %v2279_v53, 5  ;;  %v12819_v39 = vrot.slane %v2317_v35, 5  ;;  %v2323_v24 = vrot.slane %v2321_v9, 4  ;;  %v2334_v53 = vrot.slane %v2332_v31, 4 }
 0x123   : > { %v2337_v42 = vrot.slane %v2335_v22, 5  ;;  %v12824_v59 = vrot.slane %v2341_v56, 5  ;;  %v2347_v20 = vrot.slane %v2345_v40, 4  ;;  %v2356_v26 = vshrl.u32 %v9731_v41, 16  ;;  %v9734_v40 = vld [vmem:[%s11857_s11 + $0x84] sm:$0xf] }
 0x124   : > { %v2359_v63 = vshll.u32 %v9731_v41, 16  ;;  %v2369_v49 = vshrl.u32 %v12588_v58, 16  ;;  %v9756_v2 = vcombine.low %v2224_v44, %v2234_v51  ;;  %v9757_v28 = vcombine.low %v2248_v33, %v2258_v21 }
 0x125   : > { %v2272_v35 = vsel %vm11892_vm4, %v2267_v7, %v12777_v30  ;;  %v2282_v9 = vsel %vm11892_vm4, %v2277_v13, %v2281_v12  ;;  %v2314_v31 = vor.u32 %v2313_v62, %v2310_v46  ;;  %v2324_v22 = vor.u32 %v2323_v24, %v12819_v39 }
 0x126   : > { %v2327_v56 = vshll.u32 %v12561_v18, 16  ;;  %v2348_v44 = vor.u32 %v2347_v20, %v12824_v59  ;;  %v2358_v51 = vrot.slane %v2356_v26, 4  ;;  %v2361_v33 = vrot.slane %v2359_v63, 5  ;;  %v9737_v63 = vld [vmem:[%s11857_s11 + $0x90] sm:$0xf] }
 0x127   : > { %10777 = vmatmul.mubr.msk.bf16.vlgmr.msra.gmra.mrb[0].mxu0 %vm769_vm3, %v9754_v36  ;;  %v2291_v36 = vrot.slane %v2290_v3, 4  ;;  %v12840_v3 = vld [vmem:[%s11857_s11 + $0x88] sm:$0xf]  ;;  %v2371_v18 = vrot.slane %v2369_v49, 4  ;;  %v2380_v12 = vshrl.u32 %v9734_v40, 16  ;;  %v2383_v41 = vshll.u32 %v9734_v40, 16 }
 0x128   : > { %10809 = vmatpush3.bf16.msra.mxu0 %v3092_v57  ;;  %10780 = vmatprep.mubr.msk.bf16.mxu0 %vm769_vm3, %v9755_v15  ;;  %v2301_v57 = vrot.slane %v2300_v17, 4  ;;  %v2365_v15 = vshll.u32 %v12588_v58, 16  ;;  %v2351_v17 = vshll.u32 %v12822_v29, 16  ;;  %v2338_v58 = vor.u32 %v2337_v42, %v2334_v53  ;;  %v12858_v49 = vld [vmem:[%s11857_s11 + $0x8c] sm:$0x1] }
 0x129   : > { %11672 = vmatprep.subr.msk.bf16.mxu0 %vm818_vm0, %v12815_v52  ;;  %v2296_v30 = vsel %vm11892_vm4, %v2291_v36, %v12794_v48  ;;  %v2389_v20 = vshll.u32 %v12840_v3, 16  ;;  %v2393_v26 = vshrl.u32 %v12840_v3, 16  ;;  %v2315_v13 = vrot.slane %v2314_v31, 4 }
 0x12a   : > { %v2306_v21 = vsel %vm11892_vm4, %v2301_v57, %v2305_v16  ;;  %v12848_v7 = vrot.slane %v2365_v15, 5  ;;  %v2325_v48 = vrot.slane %v2324_v22, 4  ;;  %v2329_v46 = vrot.slane %v2327_v56, 5 }
 0x12b   : > { %v2353_v62 = vrot.slane %v2351_v17, 5  ;;  %v2339_v16 = vrot.slane %v2338_v58, 4  ;;  %v2349_v24 = vrot.slane %v2348_v44, 4  ;;  %v2362_v53 = vor.u32 %v2361_v33, %v2358_v51 }
 0x12c   : > { %v2375_v42 = vshll.u32 %v12591_v0, 16  ;;  %v9758_v36 = vcombine.low %v2272_v35, %v2282_v9  ;;  %v9759_v57 = vcombine.low %v2296_v30, %v2306_v21  ;;  %v2372_v15 = vor.u32 %v2371_v18, %v12848_v7  ;;  %v9740_v35 = vld [vmem:[%s11857_s11 + $0x9c] sm:$0xf]  ;;  %v12869_v9 = vld [vmem:[%s11857_s11 + $0xa0] sm:$0xf] }
 0x12d   : > { %v12860_v31 = vrot.slane %v2389_v20, 5  ;;  %v2395_v22 = vrot.slane %v2393_v26, 4  ;;  %v2320_v56 = vsel %vm11892_vm4, %v2315_v13, %v12819_v39  ;;  %v2330_v17 = vsel %vm11892_vm4, %v2325_v48, %v2329_v46 }
 0x12e   : > { %v2404_v0 = vshrl.u32 %v9737_v63, 16  ;;  %v2407_v40 = vshll.u32 %v9737_v63, 16  ;;  %v2344_v58 = vsel %vm11892_vm4, %v2339_v16, %v12824_v59  ;;  %v2354_v44 = vsel %vm11892_vm4, %v2349_v24, %v2353_v62 }
 0x12f   : > { %10781 = vmatmul.mubr.msk.bf16.gmra.mrb[4].mxu0 %vm769_vm3, %v9756_v2  ;;  %v2382_v2 = vrot.slane %v2380_v12, 4  ;;  %v2363_v51 = vrot.slane %v2362_v53, 4  ;;  %v2377_v33 = vrot.slane %v2375_v42, 5  ;;  %v2373_v30 = vrot.slane %v2372_v15, 4 }
 0x130   : > { %10784 = vmatprep.mubr.msk.bf16.mxu0 %vm769_vm3, %v9757_v28  ;;  %v2385_v28 = vrot.slane %v2383_v41, 5  ;;  %v2399_v39 = vshll.u32 %v12858_v49, 16  ;;  %v2413_v21 = vshll.u32 %v12630_v14, 16  ;;  %v2417_v18 = vshrl.u32 %v12630_v14, 16 }
 0x131   : > { %v2428_v12 = vshrl.u32 %v9740_v35, 16  ;;  %v2431_v41 = vshll.u32 %v9740_v35, 16  ;;  %v2437_v20 = vshll.u32 %v12869_v9, 16  ;;  %v2441_v59 = vshrl.u32 %v12869_v9, 16 }
 0x132   : > { %v2386_v26 = vor.u32 %v2385_v28, %v2382_v2  ;;  %v2396_v13 = vor.u32 %v2395_v22, %v12860_v31  ;;  %v2406_v48 = vrot.slane %v2404_v0, 4  ;;  %v2409_v46 = vrot.slane %v2407_v40, 5  ;;  %v9743_v22 = vld [vmem:[%s11857_s11 + $0xa8] sm:$0xf] }
 0x133   : > { %v9760_v62 = vcombine.low %v2320_v56, %v2330_v17  ;;  %v9761_v16 = vcombine.low %v2344_v58, %v2354_v44  ;;  %v2368_v14 = vsel %vm11892_vm4, %v2363_v51, %v12848_v7  ;;  %v2378_v24 = vsel %vm11892_vm4, %v2373_v30, %v2377_v33  ;;  %v9746_v33 = vld [vmem:[%s11857_s11 + $0xb4] sm:$0xf]  ;;  %v12900_v30 = vld [vmem:[%s11857_s11 + $0xb8] sm:$0xf] }
 0x134   : > { %v2401_v53 = vrot.slane %v2399_v39, 5  ;;  %v12889_v42 = vrot.slane %v2413_v21, 5  ;;  %v2419_v63 = vrot.slane %v2417_v18, 4  ;;  %v2433_v15 = vrot.slane %v2431_v41, 5 }
 0x135   : > { %v2439_v2 = vrot.slane %v2437_v20, 5  ;;  %v2443_v28 = vrot.slane %v2441_v59, 4  ;;  %v2387_v56 = vrot.slane %v2386_v26, 4  ;;  %v2397_v17 = vrot.slane %v2396_v13, 4 }
 0x136   : > { %v2410_v0 = vor.u32 %v2409_v46, %v2406_v48  ;;  %v2423_v7 = vshll.u32 %v12633_v4, 16  ;;  %v9762_v35 = vcombine.low %v2368_v14, %v2378_v24  ;;  %v2420_v58 = vor.u32 %v2419_v63, %v12889_v42 }
 0x137   : > { %10785 = vmatmul.mubr.msk.bf16.gmra.mrb[8].mxu0 %vm769_vm3, %v9758_v36  ;;  %v12892_v36 = vld [vmem:[%s11857_s11 + $0xa4] sm:$0x1]  ;;  %v2452_v44 = vshrl.u32 %v9743_v22, 16  ;;  %v2455_v51 = vshll.u32 %v9743_v22, 16  ;;  %v2444_v21 = vor.u32 %v2443_v28, %v2439_v2  ;;  %v2461_v18 = vshll.u32 %v12672_v45, 16 }
 0x138   : > { %10788 = vmatprep.mubr.msk.bf16.mxu0 %vm769_vm3, %v9759_v57  ;;  %v2430_v57 = vrot.slane %v2428_v12, 4  ;;  %v2447_v40 = vshll.u32 %v12892_v36, 16  ;;  %v2465_v12 = vshrl.u32 %v12672_v45, 16  ;;  %v2392_v4 = vsel %vm11892_vm4, %v2387_v56, %v12860_v31 }
 0x139   : > { %v2402_v41 = vsel %vm11892_vm4, %v2397_v17, %v2401_v53  ;;  %v2411_v20 = vrot.slane %v2410_v0, 4  ;;  %v2425_v59 = vrot.slane %v2423_v7, 5  ;;  %v2476_v26 = vshrl.u32 %v9746_v33, 16  ;;  %v9749_v17 = vld [vmem:[%s11857_s11 + $0xc0] sm:$0xf] }
 0x13a   : > { %v2434_v39 = vor.u32 %v2433_v15, %v2430_v57  ;;  %v2479_v13 = vshll.u32 %v9746_v33, 16  ;;  %v2485_v48 = vshll.u32 %v12900_v30, 16  ;;  %v2489_v46 = vshrl.u32 %v12900_v30, 16 }
 0x13b   : > { %v2449_v45 = vrot.slane %v2447_v40, 5  ;;  %v2457_v14 = vrot.slane %v2455_v51, 5  ;;  %v2445_v63 = vrot.slane %v2444_v21, 4  ;;  %v2463_v31 = vrot.slane %v2461_v18, 5 }
 0x13c   : > { %v2435_v24 = vrot.slane %v2434_v39, 4  ;;  %v2467_v57 = vrot.slane %v2465_v12, 4  ;;  %v9763_v15 = vcombine.low %v2392_v4, %v2402_v41  ;;  %v2478_v53 = vrot.slane %v2476_v26, 4 }
 0x13d   : > { %v2481_v28 = vrot.slane %v2479_v13, 5  ;;  %v2487_v22 = vrot.slane %v2485_v48, 5  ;;  %v2491_v56 = vrot.slane %v2489_v46, 4  ;;  %v2416_v0 = vsel %vm11892_vm4, %v2411_v20, %v12889_v42 }
 0x13e   : > { %v2450_v51 = vsel %vm11892_vm4, %v2445_v63, %v2449_v45  ;;  %v2468_v33 = vor.u32 %v2467_v57, %v2463_v31  ;;  %v2471_v39 = vshll.u32 %v12675_v6, 16  ;;  %v2500_v42 = vshrl.u32 %v9749_v17, 16 }
 0x13f   : > { %10789 = vmatmul.mubr.msk.bf16.gmra.mrb[12].mxu0 %vm769_vm3, %v9760_v62  ;;  %v2421_v62 = vrot.slane %v2420_v58, 4  ;;  %v12920_v58 = vld [vmem:[%s11857_s11 + $0xbc] sm:$0x1]  ;;  %v2503_v21 = vshll.u32 %v9749_v17, 16  ;;  %v2509_v18 = vshll.u32 %v12728_v8, 16  ;;  %v2513_v12 = vshrl.u32 %v12728_v8, 16 }
 0x140   : > { %10792 = vmatprep.mubr.msk.bf16.mxu0 %vm769_vm3, %v9761_v16  ;;  %v2454_v16 = vrot.slane %v2452_v44, 4  ;;  %v2440_v44 = vsel %vm11892_vm4, %v2435_v24, %v2439_v2  ;;  %v2482_v4 = vor.u32 %v2481_v28, %v2478_v53  ;;  %v2492_v41 = vor.u32 %v2491_v56, %v2487_v22  ;;  %v9785_v17 = vld [vmem:[%s11857_s11 + $0xc] sm:$0xe] }
 0x141   : > { %v2426_v7 = vsel %vm11892_vm4, %v2421_v62, %v2425_v59  ;;  %v9765_v2 = vcombine.low %v2440_v44, %v2450_v51  ;;  %v2469_v26 = vrot.slane %v2468_v33, 4  ;;  %v2473_v13 = vrot.slane %v2471_v39, 5 }
 0x142   : > { %v2458_v40 = vor.u32 %v2457_v14, %v2454_v16  ;;  %v9764_v20 = vcombine.low %v2416_v0, %v2426_v7  ;;  %v2502_v48 = vrot.slane %v2500_v42, 4  ;;  %v2505_v46 = vrot.slane %v2503_v21, 5 }
 0x143   : > { %v2511_v6 = vrot.slane %v2509_v18, 5  ;;  %v2515_v62 = vrot.slane %v2513_v12, 4  ;;  %v2483_v45 = vrot.slane %v2482_v4, 4  ;;  %v2493_v16 = vrot.slane %v2492_v41, 4  ;;  %v9786_v18 = vld [vmem:[%s11857_s11 + $0x18] sm:$0xe] }
 0x144   : > { %v2459_v59 = vrot.slane %v2458_v40, 4  ;;  %v2474_v24 = vsel %vm11892_vm4, %v2469_v26, %v2473_v13  ;;  %v2506_v63 = vor.u32 %v2505_v46, %v2502_v48  ;;  %v2883_v56 = vrot.slane %v12575_v19, 5  ;;  %v9787_v12 = vld [vmem:[%s11857_s11 + $0x24] sm:$0xe] }
 0x145   : > { %v2516_v57 = vor.u32 %v2515_v62, %v2511_v6  ;;  %v2488_v53 = vsel %vm11892_vm4, %v2483_v45, %v2487_v22  ;;  %v9801_v51 = vrot.slane %v9785_v17, 9  ;;  %v2890_v39 = vrot.slane %v12598_v43, 5  ;;  %v9789_v62 = vld [vmem:[%s11857_s11 + $0x3c] sm:$0xe] }
 0x146   : > { %v2464_v8 = vsel %vm11892_vm4, %v2459_v59, %v2463_v31  ;;  %v2507_v7 = vrot.slane %v2506_v63, 4  ;;  %v2885_v33 = vrot.slane %v2883_v56, 4  ;;  %v9803_v59 = vrot.slane %v9787_v12, 9 }
 0x147   : > { %10793 = vmatmul.mubr.msk.bf16.gmra.mrb[16].mxu0 %vm769_vm3, %v9762_v35  ;;  %v2495_v35 = vshll.u32 %v12920_v58, 16  ;;  %v9766_v31 = vcombine.low %v2464_v8, %v2474_v24  ;;  %v2517_v40 = vrot.slane %v2516_v57, 4  ;;  %v2884_v42 = vsel %vm12207_vm7, %v9801_v51, %v2883_v56  ;;  %v9791_v56 = vld [vmem:[%s11857_s11 + $0x54] sm:$0xe] }
 0x148   : > { %10796 = vmatprep.mubr.msk.bf16.mxu0 %vm769_vm3, %v9763_v15  ;;  %v2519_v15 = vshll.u32 %v12731_v38, 16  ;;  %v2886_v38 = vrot.slane %v12602_v34, 5  ;;  %v2512_v22 = vsel %vm11892_vm4, %v2507_v7, %v2511_v6  ;;  %v2897_v34 = vrot.slane %v12627_v32, 5  ;;  %v9788_v6 = vld [vmem:[%s11857_s11 + $0x30] sm:$0xe] }
 0x149   : > { %v2497_v14 = vrot.slane %v2495_v35, 5  ;;  %v9802_v35 = vrot.slane %v9786_v18, 9  ;;  %v2900_v26 = vrot.slane %v12664_v55, 5  ;;  %v2904_v48 = vrot.slane %v12647_v27, 5  ;;  %v9795_v18 = vld [vmem:[%s11857_s11 + $0x84] sm:$0xe] }
 0x14a   : > { %v2521_v44 = vrot.slane %v2519_v15, 5  ;;  %v2887_v21 = vsel %vm12207_vm7, %v2885_v33, %v2886_v38  ;;  %v2899_v43 = vrot.slane %v2897_v34, 4  ;;  %v2898_v46 = vsel %vm12207_vm7, %v9803_v59, %v2897_v34  ;;  %v9793_v33 = vld [vmem:[%s11857_s11 + $0x6c] sm:$0xe] }
 0x14b   : > { %v2498_v28 = vsel %vm11892_vm4, %v2493_v16, %v2497_v14  ;;  %v9818_v41 = vcombine.low %v2884_v42, %v2887_v21  ;;  %v2891_v32 = vsel %vm12207_vm7, %v9802_v35, %v2890_v39  ;;  %v2911_v55 = vrot.slane %v12693_v23, 5 }
 0x14c   : > { %v9767_v0 = vcombine.low %v2488_v53, %v2498_v28  ;;  %v2522_v19 = vsel %vm11892_vm4, %v2517_v40, %v2521_v44  ;;  %v9804_v14 = vrot.slane %v9788_v6, 9  ;;  %v2906_v8 = vrot.slane %v2904_v48, 4  ;;  %v12983_v53 = vld [vmem:[%s16371_s1 + $0xe] sm:$0x3] }
 0x14d   : > { %v9768_v4 = vcombine.low %v2512_v22, %v2522_v19  ;;  %v2907_v24 = vrot.slane %v12698_v1, 5  ;;  %v3451_v27 = vsel %vm818_vm0, %v12815_v52, 0  ;;  %v9805_v63 = vrot.slane %v9789_v62, 9  ;;  %v16541_v62 = vld [vmem:[#allocation7_spill] sm:$0xff] }
 0x14e   : > { %v2913_v57 = vrot.slane %v2911_v55, 4  ;;  %v2914_v15 = vrot.slane %v12738_v47, 5  ;;  %v2905_v23 = vsel %vm12207_vm7, %v9804_v14, %v2904_v48  ;;  %v2925_v28 = vrot.slane %v12756_v25, 5 }
 0x14f   : > { %10797 = vmatmul.mubr.msk.bf16.gmra.mrb[20].mxu0 %vm769_vm3, %v9764_v20  ;;  %v2892_v20 = vrot.slane %v2890_v39, 4  ;;  %v2908_v1 = vsel %vm12207_vm7, %v2906_v8, %v2907_v24  ;;  %v2912_v47 = vsel %vm12207_vm7, %v9805_v63, %v2911_v55  ;;  %v2928_v40 = vrot.slane %v12789_v5, 5  ;;  %v16544_v24 = vld [vmem:[#allocation9_spill] sm:$0xff] }
 0x150   : > { %10800 = vmatprep.mubr.msk.bf16.mxu0 %vm769_vm3, %v9765_v2  ;;  %v2893_v2 = vrot.slane %v12621_v61, 5  ;;  %v2901_v61 = vsel %vm12207_vm7, %v2899_v43, %v2900_v26  ;;  %v2915_v52 = vsel %vm12207_vm7, %v2913_v57, %v2914_v15  ;;  %v9821_v17 = vcombine.low %v2905_v23, %v2908_v1  ;;  %v16539_v26 = vld [vmem:[#allocation6_spill] sm:$0xff]  ;;  %v16547_v57 = vld [vmem:[#allocation11_spill] sm:$0xff] }
 0x151   : > { %v9820_v16 = vcombine.low %v2898_v46, %v2901_v61  ;;  %v2927_v7 = vrot.slane %v2925_v28, 4  ;;  %v2939_v51 = vrot.slane %v12797_v37, 5  ;;  %v9809_v22 = vrot.slane %v9793_v33, 9  ;;  %v9799_v46 = vld [vmem:[%s11857_s11 + $0xb4] sm:$0xe]  ;;  %v16548_v15 = vld [vmem:[#allocation3_spill] sm:$0xff] }
 0x152   : > { %v2894_v13 = vsel %vm12207_vm7, %v2892_v20, %v2893_v2  ;;  %v2942_v39 = vrot.slane %v12822_v29, 5  ;;  %v16535_v5 = vcombine.low %v12547_v60, %v12552_v11  ;;  %v2953_v21 = vrot.slane %v12840_v3, 5  ;;  %v16536_v60 = vld [vmem:[#allocation4_spill] sm:$0xff]  ;;  %v9797_v20 = vld [vmem:[%s11857_s11 + $0x9c] sm:$0xe]  ;;  %v11737_v1 = vld [vmem:[%s11857_s11 + $0x24] sm:$0xff]  }
 0x153   : > { %v9819_v45 = vcombine.low %v2891_v32, %v2894_v13  ;;  %v2929_v25 = vsel %vm12207_vm7, %v2927_v7, %v2928_v40  ;;  %v2941_v19 = vrot.slane %v2939_v51, 4  ;;  %v2940_v42 = vsel %vm12207_vm7, %v9809_v22, %v2939_v51  ;;  %v11741_v51 = vld [vmem:[%s11857_s11 + $0x54] sm:$0xff]  }
 0x154   : > { %v9811_v12 = vrot.slane %v9795_v18, 9  ;;  %v2955_v29 = vrot.slane %v2953_v21, 4  ;;  %v16537_v11 = vcombine.low %v12571_v50, %v16536_v60  ;;  %v2967_v35 = vrot.slane %v12869_v9, 5  ;;  %v16538_v50 = vld [vmem:[#allocation5_spill] sm:$0xff] }
 0x155   : > { %v2943_v37 = vsel %vm12207_vm7, %v2941_v19, %v2942_v39  ;;  %v9813_v59 = vrot.slane %v9797_v20, 9  ;;  %v2970_v43 = vrot.slane %v12892_v36, 5  ;;  %v16540_v32 = vcombine.low %v16538_v50, %v16539_v26  ;;  %v13105_v39 = vld [vmem:[%s11857_s11 + $0x70] sm:$0xf]  ;;  %v11744_v60 = vld [vmem:[%s11857_s11 + $0x78] sm:$0xff]  }
 0x156   : > { %v9826_v34 = vcombine.low %v2940_v42, %v2943_v37  ;;  %v2981_v48 = vrot.slane %v12900_v30, 5  ;;  %v9815_v61 = vrot.slane %v9799_v46, 9  ;;  %v2984_v55 = vrot.slane %v12920_v58, 5  ;;  %v11736_v58 = vld [vmem:[%s11857_s11 + $0x18] sm:$0xff]   ;;  %v10003_v42 = vld [vmem:[%s11857_s11 + $0x6c] sm:$0xe] }
 0x157   : > { %10801 = vmatmul.mubr.msk.bf16.gmra.mrb[24].mxu0 %vm769_vm3, %v9766_v31  ;;  %v9822_v31 = vcombine.low %v2912_v47, %v2915_v52  ;;  %v2968_v13 = vsel %vm12207_vm7, %v9813_v59, %v2967_v35  ;;  %v16549_v23 = vcombine.low %v16547_v57, %v16548_v15  ;;  %v11738_v47 = vld [vmem:[%s11857_s11 + $0x30] sm:$0xff]   ;;  %v4177_v52 = vsel %vm818_vm0, %v12983_v53, 0  ;;  %v13138_v50 = vld [vmem:[%s11857_s11 + $0x8c] sm:$0x1]  ;;  %v13145_v46 = vld [vmem:[%s11857_s11 + $0x28] sm:$0xf] }
 0x158   : > { %10804 = vmatprep.mubr.msk.bf16.mxu0 %vm769_vm3, %v9767_v0  ;;  %v9807_v0 = vrot.slane %v9791_v56, 9  ;;  %v2983_v6 = vrot.slane %v2981_v48, 4  ;;  %v2982_v14 = vsel %vm12207_vm7, %v9815_v61, %v2981_v48  ;;  %v11739_v56 = vld [vmem:[%s11857_s11 + $0x3c] sm:$0xff]   ;;  %v4487_v37 = vrot.slane %v13105_v39, 5 }
 0x159   : > { %v10019_v18 = vrot.slane %v10003_v42, 9  ;;  %v4504_v48 = vrot.slane %v13138_v50, 5  ;;  %v3732_v57 = vshrl.u32 %v13145_v46, 16 }
 0x15a   : > { %v2926_v44 = vsel %vm12207_vm7, %v9807_v0, %v2925_v28  ;;  %v2985_v30 = vsel %vm12207_vm7, %v2983_v6, %v2984_v55  ;;  %v13072_v28 = vld [vmem:[%s16371_s1 + $0x10] sm:$0x3]  ;;  %v10001_v0 = vld [vmem:[%s11857_s11 + $0x54] sm:$0xe]  ;;  %v11745_v55 = vld [vmem:[%s11857_s11 + $0x84] sm:$0xff]  }
 0x15b   : > { %v9824_v38 = vcombine.low %v2926_v44, %v2929_v25  ;;  %v9832_v8 = vcombine.low %v2982_v14, %v2985_v30  ;;  %v10017_v44 = vrot.slane %v10001_v0, 9  ;;  %v13177_v0 = vld [vmem:[%s11857_s11 + $0xa0] sm:$0xf]  ;;  %v3734_v42 = vrot.slane %v3732_v57, 4 }
 0x15f   : > { %10805 = vmatmul.mubr.msk.bf16.gmra.mrb[28].mxu0 %vm769_vm3, %v9768_v4  ;;  %v2956_v4 = vrot.slane %v12858_v49, 5  ;;  %v2969_v49 = vrot.slane %v2967_v35, 4  ;;  %v11751_v35 = vld [vmem:[%s11857_s11 + $0xcc] sm:$0xff]  }
 0x160   : > { %10810 = vmatprep.mubr.msk.bf16.mxu0 %vm769_vm3, %v9818_v41  ;;  %v2954_v41 = vsel %vm12207_vm7, %v9811_v12, %v2953_v21  ;;  %v11743_v12 = vld [vmem:[%s11857_s11 + $0x6c] sm:$0xff]  }
 0x161   : > { %v2957_v3 = vsel %vm12207_vm7, %v2955_v29, %v2956_v4  ;;  %v2971_v9 = vsel %vm12207_vm7, %v2969_v49, %v2970_v43  ;;  %v9915_v29 = vld [vmem:[%s11857_s11 + $0x18] sm:$0xf]  ;;  %v13118_v4 = vsel %vm12207_vm7, %v10019_v18, %v4487_v37  ;;  %v13135_v43 = vld [vmem:[%s11857_s11 + $0x88] sm:$0xf] }
 0x162   : > { %v9828_v2 = vcombine.low %v2954_v41, %v2957_v3  ;;  %v9830_v36 = vcombine.low %v2968_v13, %v2971_v9  ;;  %v9918_v3 = vld [vmem:[%s11857_s11 + $0x24] sm:$0xf]  ;;  %v3695_v20 = vshrl.u32 %v9915_v29, 16  ;;  %v4501_v9 = vrot.slane %v13135_v43, 5 }
 0x163   : > { %v3719_v26 = vshrl.u32 %v9918_v3, 16  ;;  %v10005_v13 = vld [vmem:[%s11857_s11 + $0x84] sm:$0xe] }
 0x164   : > { %v3697_v61 = vrot.slane %v3695_v20, 4  ;;  %v4503_v6 = vrot.slane %v4501_v9, 4 }
 0x167   : > { %10811 = vmatmul.mubr.msk.bf16.vlgmr.msra.gmra.mrb[0].mxu0 %vm769_vm3, %v9819_v45  ;;  %v16542_v45 = vld [vmem:[#allocation8_spill] sm:$0xff] }
 0x168   : > { %10843 = vmatpush3.bf16.msra.mxu0 %v3451_v27  ;;  %10814 = vmatprep.mubr.msk.bf16.mxu0 %vm769_vm3, %v9820_v16  ;;  %v16543_v16 = vcombine.low %v16541_v62, %v16542_v45  ;;  %v16545_v27 = vld [vmem:[#allocation10_spill] sm:$0xff]  ;;  %v13149_v62 = vld [vmem:[%s11857_s11 + $0x20] sm:$0x1] }
 0x169   : > { %11673 = vmatprep.subr.msk.bf16.mxu0 %vm818_vm0, %v12983_v53  ;;  %v16546_v63 = vcombine.low %v16544_v24, %v16545_v27  ;;  %v13082_v53 = vld [vmem:[%s11857_s11 + $0x58] sm:$0xf]  ;;  %v3721_v24 = vrot.slane %v3719_v26, 4  ;;  %v11748_v26 = vld [vmem:[%s11857_s11 + $0xa8] sm:$0xff]  }
 0x16a   : > { %v4473_v7 = vrot.slane %v13082_v53, 5 }
 0x16c   : > { %v4475_v25 = vrot.slane %v4473_v7, 4  ;;  %v13094_v33 = vsel %vm12207_vm7, %v10017_v44, %v4473_v7  ;;  %v13180_v7 = vld [vmem:[%s11857_s11 + $0xa4] sm:$0x1] }
 0x16f   : > { %10815 = vmatmul.mubr.msk.bf16.gmra.mrb[4].mxu0 %vm769_vm3, %v9821_v17  ;;  %v11740_v17 = vld [vmem:[%s11857_s11 + $0x48] sm:$0xff]  }
 0x170   : > { %10818 = vmatprep.mubr.msk.bf16.mxu0 %vm769_vm3, %v9822_v31  ;;  %v13085_v31 = vld [vmem:[%s11857_s11 + $0x5c] sm:$0x1] }
 0x171   : > { %v4476_v40 = vrot.slane %v13085_v31, 5 }
 0x173   : > { %v13099_v22 = vsel %vm12207_vm7, %v4475_v25, %v4476_v40  ;;  %v10007_v25 = vld [vmem:[%s11857_s11 + $0x9c] sm:$0xe] }
 0x174   : > { %v10023_v18 = vrot.slane %v10007_v25, 9 }
 0x177   : > { %10819 = vmatmul.mubr.msk.bf16.gmra.mrb[8].mxu0 %vm769_vm3, %v16535_v5  ;;  %v13108_v5 = vld [vmem:[%s11857_s11 + $0x74] sm:$0x1] }
 0x178   : > { %10822 = vmatprep.mubr.msk.bf16.mxu0 %vm769_vm3, %v9824_v38  ;;  %v11742_v38 = vld [vmem:[%s11857_s11 + $0x60] sm:$0xff]   ;;  %v4490_v21 = vrot.slane %v13108_v5, 5 }
 0x17f   : > { %10823 = vmatmul.mubr.msk.bf16.gmra.mrb[12].mxu0 %vm769_vm3, %v16537_v11  ;;  %v13122_v11 = vld [vmem:[%s11857_s11 + $0x1c] sm:$0xf] }
 0x180   : > { %10826 = vmatprep.mubr.msk.bf16.mxu0 %vm769_vm3, %v9826_v34  ;;  %v4489_v34 = vrot.slane %v4487_v37, 4  ;;  %v3704_v59 = vshll.u32 %v13122_v11, 16  ;;  %v3708_v49 = vshrl.u32 %v13122_v11, 16 }
 0x182   : > { %v13126_v41 = vsel %vm12207_vm7, %v4489_v34, %v4490_v21  ;;  %v3710_v14 = vrot.slane %v3708_v49, 4  ;;  %v11747_v34 = vld [vmem:[%s11857_s11 + $0x9c] sm:$0xff]  }
 0x183   : > { %16550 = vst [vmem:[#allocation4_spill] sm:$0xff] %v13126_v41  ;;  %v13364_v41 = vld [vmem:[%s11857_s11 + $0x80] sm:$0x1] }
 0x187   : > { %10827 = vmatmul.mubr.msk.bf16.gmra.mrb[16].mxu0 %vm769_vm3, %v16540_v32  ;;  %v3722_v32 = vshll.u32 %v9918_v3, 16 }
 0x188   : > { %10830 = vmatprep.mubr.msk.bf16.mxu0 %vm769_vm3, %v9828_v2  ;;  %v3698_v2 = vshll.u32 %v9915_v29, 16 }
 0x189   : > { %v3724_v27 = vrot.slane %v3722_v32, 5 }
 0x18a   : > { %v3700_v45 = vrot.slane %v3698_v2, 5  ;;  %v9924_v2 = vld [vmem:[%s11857_s11 + $0x3c] sm:$0xf] }
 0x18b   : > { %v3725_v40 = vor.u32 %v3724_v27, %v3721_v24  ;;  %v3770_v24 = vshll.u32 %v9924_v2, 16 }
 0x18f   : > { %10831 = vmatmul.mubr.msk.bf16.gmra.mrb[20].mxu0 %vm769_vm3, %v16543_v16  ;;  %v13151_v16 = vrot.slane %v3704_v59, 5  ;;  %v13194_v59 = vld [vmem:[%s11857_s11 + $0x40] sm:$0xf] }
 0x190   : > { %10834 = vmatprep.mubr.msk.bf16.mxu0 %vm769_vm3, %v9830_v36  ;;  %v10021_v36 = vrot.slane %v10005_v13, 9  ;;  %v3776_v27 = vshll.u32 %v13194_v59, 16  ;;  %v3780_v57 = vshrl.u32 %v13194_v59, 16 }
 0x192   : > { %v13155_v30 = vsel %vm12207_vm7, %v10021_v36, %v4501_v9  ;;  %v13201_v9 = vrot.slane %v3725_v40, 4  ;;  %v10009_v40 = vld [vmem:[%s11857_s11 + $0xb4] sm:$0xe] }
 0x193   : > { %16551 = vst [vmem:[#allocation5_spill] sm:$0xff] %v13155_v30 }
 0x197   : > { %10835 = vmatmul.mubr.msk.bf16.gmra.mrb[24].mxu0 %vm769_vm3, %v16546_v63  ;;  %v3728_v63 = vshll.u32 %v13145_v46, 16 }
 0x198   : > { %10838 = vmatprep.mubr.msk.bf16.mxu0 %vm769_vm3, %v9832_v8  ;;  %v11746_v8 = vld [vmem:[%s11857_s11 + $0x90] sm:$0xff]  }
 0x199   : > { %v13183_v44 = vrot.slane %v3728_v63, 5 }
 0x19b   : > { %v3735_v36 = vor.u32 %v3734_v42, %v13183_v44 }
 0x19d   : > { %v13235_v42 = vrot.slane %v3735_v36, 4  ;;  %v11750_v36 = vld [vmem:[%s11857_s11 + $0xc0] sm:$0xff]  }
 0x19f   : > { %10839 = vmatmul.mubr.msk.bf16.gmra.mrb[28].mxu0 %vm769_vm3, %v16549_v23  ;;  %v3714_v23 = vshll.u32 %v13149_v62, 16 }
 0x1a0   : > { %10844 = vmatprep.mubr.msk.bf16.mxu0 %vm769_vm3, %v11736_v58  ;;  %v13161_v58 = vsel %vm12207_vm7, %v4503_v6, %v4504_v48 }
 0x1a1   : > { %16552 = vst [vmem:[#allocation6_spill] sm:$0xff] %v13161_v58  ;;  %v3716_v13 = vrot.slane %v3714_v23, 5  ;;  %v13219_v23 = vld [vmem:[%s11857_s11 + $0xb8] sm:$0xf] }
 0x1a2   : > { %v4529_v25 = vrot.slane %v13219_v23, 5 }
 0x1a7   : > { %10845 = vmatmul.mubr.msk.bf16.vlgmr.msra.gmra.mrb[0].mxu0 %vm769_vm3, %v11737_v1  ;;  %v13168_v1 = vld [vmem:[%s11857_s11 + $0x2c] sm:$0x1] }
 0x1a8   : > { %10877 = vmatpush3.bf16.msra.mxu0 %v4177_v52  ;;  %10848 = vmatprep.mubr.msk.bf16.mxu0 %vm769_vm3, %v11738_v47  ;;  %v9921_v47 = vld [vmem:[%s11857_s11 + $0x30] sm:$0xf]  ;;  %v3701_v52 = vor.u32 %v3700_v45, %v3697_v61  ;;  %v13211_v45 = vld [vmem:[%s11857_s11 + $0x38] sm:$0x1] }
 0x1a9   : > { %11674 = vmatprep.subr.msk.bf16.mxu0 %vm818_vm0, %v13072_v28  ;;  %v3743_v37 = vshrl.u32 %v9921_v47, 16  ;;  %v3746_v21 = vshll.u32 %v9921_v47, 16  ;;  %v13222_v47 = vld [vmem:[%s11857_s11 + $0xbc] sm:$0x1] }
 0x1aa   : > { %v3702_v3 = vrot.slane %v3701_v52, 4 }
 0x1ab   : > { %v3745_v61 = vrot.slane %v3743_v37, 4  ;;  %v3748_v6 = vrot.slane %v3746_v21, 5  ;;  %v9927_v21 = vld [vmem:[%s11857_s11 + $0x48] sm:$0xf] }
 0x1ac   : > { %v3707_v52 = vsel %vm11892_vm4, %v3702_v3, %v13151_v16  ;;  %v11749_v3 = vld [vmem:[%s11857_s11 + $0xb4] sm:$0xff]  }
 0x1ad   : > { %v3749_v37 = vor.u32 %v3748_v6, %v3745_v61  ;;  %v3791_v6 = vshrl.u32 %v9927_v21, 16 }
 0x1af   : > { %10849 = vmatmul.mubr.msk.bf16.gmra.mrb[4].mxu0 %vm769_vm3, %v11739_v56  ;;  %v3711_v56 = vor.u32 %v3710_v14, %v13151_v16  ;;  %v3762_v16 = vshll.u32 %v13211_v45, 16 }
 0x1b0   : > { %10852 = vmatprep.mubr.msk.bf16.mxu0 %vm769_vm3, %v11740_v17  ;;  %v13174_v17 = vld [vmem:[%s11857_s11 + $0x34] sm:$0xf] }
 0x1b1   : > { %v3752_v29 = vshll.u32 %v13174_v17, 16  ;;  %v3756_v20 = vshrl.u32 %v13174_v17, 16  ;;  %v3712_v32 = vrot.slane %v3711_v56, 4 }
 0x1b3   : > { %v13213_v14 = vrot.slane %v3752_v29, 5  ;;  %v3758_v63 = vrot.slane %v3756_v20, 4  ;;  %v13240_v29 = vld [vmem:[%s11857_s11 + $0x4c] sm:$0xf] }
 0x1b5   : > { %v3759_v20 = vor.u32 %v3758_v63, %v13213_v14  ;;  %v3800_v63 = vshll.u32 %v13240_v29, 16 }
 0x1b7   : > { %10853 = vmatmul.mubr.msk.bf16.gmra.mrb[8].mxu0 %vm769_vm3, %v11741_v51  ;;  %v4515_v51 = vrot.slane %v13177_v0, 5 }
 0x1b8   : > { %10856 = vmatprep.mubr.msk.bf16.mxu0 %vm769_vm3, %v11742_v38  ;;  %v4518_v38 = vrot.slane %v13180_v7, 5 }
 0x1b9   : > { %v13198_v49 = vsel %vm12207_vm7, %v10023_v18, %v4515_v51  ;;  %v10025_v18 = vrot.slane %v10009_v40, 9 }
 0x1ba   : > { %16553 = vst [vmem:[#allocation7_spill] sm:$0xff] %v13198_v49 }
 0x1bf   : > { %10857 = vmatmul.mubr.msk.bf16.gmra.mrb[12].mxu0 %vm769_vm3, %v11743_v12  ;;  %v3738_v12 = vshll.u32 %v13168_v1, 16 }
 0x1c0   : > { %10860 = vmatprep.mubr.msk.bf16.mxu0 %vm769_vm3, %v11744_v60  ;;  %v4517_v60 = vrot.slane %v4515_v51, 4  ;;  %v4532_v51 = vrot.slane %v13222_v47, 5 }
 0x1c1   : > { %v13228_v56 = vrot.slane %v3738_v12, 5  ;;  %v3772_v12 = vrot.slane %v3770_v24, 5  ;;  %v9930_v24 = vld [vmem:[%s11857_s11 + $0x54] sm:$0xf] }
 0x1c2   : > { %v13205_v48 = vsel %vm12207_vm7, %v4517_v60, %v4518_v38  ;;  %v3717_v38 = vsel %vm11892_vm4, %v3712_v32, %v3716_v13  ;;  %v4531_v60 = vrot.slane %v4529_v25, 4  ;;  %v3782_v32 = vrot.slane %v3780_v57, 4 }
 0x1c3   : > { %16554 = vst [vmem:[#allocation8_spill] sm:$0xff] %v13205_v48  ;;  %v13251_v13 = vsel %vm12207_vm7, %v10025_v18, %v4529_v25  ;;  %v9964_v61 = vcombine.low %v3707_v52, %v3717_v38  ;;  %v3804_v57 = vshrl.u32 %v13240_v29, 16  ;;  %v3750_v25 = vrot.slane %v3749_v37, 4  ;;  %v13278_v37 = vld [vmem:[%s11857_s11 + $0xd4] sm:$0x1] }
 0x1c4   : > { %16555 = vst [vmem:[#allocation9_spill] sm:$0xff] %v13251_v13  ;;  %v13257_v40 = vsel %vm12207_vm7, %v4531_v60, %v4532_v51  ;;  %v3764_v38 = vrot.slane %v3762_v16, 5  ;;  %v3815_v60 = vshrl.u32 %v9930_v24, 16  ;;  %v3793_v16 = vrot.slane %v3791_v6, 4 }
 0x1c5   : > { %16556 = vst [vmem:[#allocation10_spill] sm:$0xff] %v13257_v40  ;;  %v3818_v52 = vshll.u32 %v9930_v24, 16  ;;  %v3824_v13 = vshll.u32 %v13082_v53, 16  ;;  %v13303_v24 = vld [vmem:[%s11857_s11 + $0x64] sm:$0xf] }
 0x1c7   : > { %10861 = vmatmul.mubr.msk.bf16.gmra.mrb[16].mxu0 %vm769_vm3, %v11745_v55  ;;  %v13275_v55 = vld [vmem:[%s11857_s11 + $0xd0] sm:$0xf] }
 0x1c8   : > { %10864 = vmatprep.mubr.msk.bf16.mxu0 %vm769_vm3, %v11746_v8  ;;  %v3767_v8 = vshrl.u32 %v9924_v2, 16  ;;  %v13245_v2 = vld [vmem:[%s11857_s11 + $0x44] sm:$0x1] }
 0x1c9   : > { %v3786_v51 = vshll.u32 %v13245_v2, 16 }
 0x1cf   : > { %10865 = vmatmul.mubr.msk.bf16.gmra.mrb[20].mxu0 %vm769_vm3, %v11747_v34  ;;  %v3769_v34 = vrot.slane %v3767_v8, 4  ;;  %v3794_v8 = vshll.u32 %v9927_v21, 16 }
 0x1d0   : > { %10868 = vmatprep.mubr.msk.bf16.mxu0 %vm769_vm3, %v11748_v26  ;;  %v13247_v26 = vrot.slane %v3776_v27, 5  ;;  %v3731_v27 = vsel %vm11892_vm4, %v13201_v9, %v13183_v44  ;;  %v3741_v44 = vsel %vm11892_vm4, %v13235_v42, %v13228_v56  ;;  %v3760_v9 = vrot.slane %v3759_v20, 4  ;;  %v13285_v42 = vld [vmem:[%s11857_s11 + $0x50] sm:$0x1] }
 0x1d1   : > { %v3773_v21 = vor.u32 %v3772_v12, %v3769_v34  ;;  %v3796_v34 = vrot.slane %v3794_v8, 5  ;;  %v10011_v12 = vld [vmem:[%s11857_s11 + $0xcc] sm:$0xe]  ;;  %v4546_v56 = vrot.slane %v13278_v37, 5  ;;  %v13287_v20 = vrot.slane %v3800_v63, 5 }
 0x1d2   : > { %v3783_v18 = vor.u32 %v3782_v32, %v13247_v26  ;;  %v3806_v32 = vrot.slane %v3804_v57, 4  ;;  %v10027_v15 = vrot.slane %v10011_v12, 9  ;;  %v13295_v8 = vrot.slane %v3786_v51, 5  ;;  %v9933_v57 = vld [vmem:[%s11857_s11 + $0x60] sm:$0xf] }
 0x1d3   : > { %v13293_v6 = vrot.slane %v3773_v21, 4  ;;  %v3765_v40 = vsel %vm11892_vm4, %v3760_v9, %v3764_v38  ;;  %v3828_v63 = vshrl.u32 %v13082_v53, 16  ;;  %v3810_v21 = vshll.u32 %v13285_v42, 16 }
 0x1d4   : > { %v3807_v38 = vor.u32 %v3806_v32, %v13287_v20  ;;  %v3817_v9 = vrot.slane %v3815_v60, 4  ;;  %v3820_v53 = vrot.slane %v3818_v52, 5  ;;  %v13324_v60 = vrot.slane %v3824_v13, 5 }
 0x1d5   : > { %v3830_v52 = vrot.slane %v3828_v63, 4  ;;  %v3779_v32 = vsel %vm11892_vm4, %v13293_v6, %v13247_v26  ;;  %v13344_v6 = vld [vmem:[%s11857_s11 + $0x7c] sm:$0xf] }
 0x1d6   : > { %v3808_v63 = vrot.slane %v3807_v38, 4  ;;  %v3876_v38 = vshrl.u32 %v13105_v39, 16 }
 0x1d7   : > { %10869 = vmatmul.mubr.msk.bf16.gmra.mrb[24].mxu0 %vm769_vm3, %v11749_v3  ;;  %v4543_v3 = vrot.slane %v13275_v55, 5 }
 0x1d8   : > { %10872 = vmatprep.mubr.msk.bf16.mxu0 %vm769_vm3, %v11750_v36  ;;  %v3755_v36 = vsel %vm11892_vm4, %v3750_v25, %v13213_v14  ;;  %v13309_v14 = vrot.slane %v3783_v18, 4  ;;  %v3797_v25 = vor.u32 %v3796_v34, %v3793_v16  ;;  %v3848_v18 = vshll.u32 %v13303_v24, 16 }
 0x1d9   : > { %v4545_v19 = vrot.slane %v4543_v3, 4  ;;  %v13307_v12 = vsel %vm12207_vm7, %v10027_v15, %v4543_v3  ;;  %v3839_v15 = vshrl.u32 %v9933_v57, 16  ;;  %v3842_v3 = vshll.u32 %v9933_v57, 16 }
 0x1da   : > { %16557 = vst [vmem:[#allocation11_spill] sm:$0xff] %v13307_v12  ;;  %v3852_v16 = vshrl.u32 %v13303_v24, 16  ;;  %v4647_v34 = vsel %vm818_vm0, %v13072_v28, 0  ;;  %v9936_v28 = vld [vmem:[%s11857_s11 + $0x6c] sm:$0xf]  ;;  %v3798_v13 = vrot.slane %v3797_v25, 4  ;;  %v3821_v57 = vor.u32 %v3820_v53, %v3817_v9 }
 0x1db   : > { %v13314_v51 = vsel %vm12207_vm7, %v4545_v19, %v4546_v56  ;;  %v9965_v19 = vcombine.low %v3731_v27, %v3741_v44  ;;  %v9966_v56 = vcombine.low %v3755_v36, %v3765_v40  ;;  %v3812_v27 = vrot.slane %v3810_v21, 5  ;;  %v13336_v44 = vld [vmem:[%s11857_s11 + $0x68] sm:$0x1]  ;;  %v9939_v40 = vld [vmem:[%s11857_s11 + $0x78] sm:$0xf] }
 0x1dc   : > { %16558 = vst [vmem:[#allocation3_spill] sm:$0xff] %v13314_v51  ;;  %v3841_v36 = vrot.slane %v3839_v15, 4  ;;  %v3844_v48 = vrot.slane %v3842_v3, 5  ;;  %v13341_v51 = vrot.slane %v3848_v18, 5  ;;  %v3854_v26 = vrot.slane %v3852_v16, 4 }
 0x1dd   : > { %v3831_v12 = vor.u32 %v3830_v52, %v13324_v60  ;;  %v3866_v21 = vshll.u32 %v9936_v28, 16  ;;  %v3872_v25 = vshll.u32 %v13105_v39, 16  ;;  %v3890_v9 = vshll.u32 %v9939_v40, 16  ;;  %v9942_v39 = vld [vmem:[%s11857_s11 + $0x84] sm:$0xf] }
 0x1de   : > { %v3803_v53 = vsel %vm11892_vm4, %v3798_v13, %v13287_v20  ;;  %v3813_v15 = vsel %vm11892_vm4, %v3808_v63, %v3812_v27  ;;  %v3896_v3 = vshll.u32 %v13344_v6, 16  ;;  %v3900_v18 = vshrl.u32 %v13344_v6, 16 }
 0x1df   : > { %10873 = vmatmul.mubr.msk.bf16.gmra.mrb[28].mxu0 %vm769_vm3, %v11751_v35  ;;  %v3789_v35 = vsel %vm11892_vm4, %v13309_v14, %v13295_v8  ;;  %v3858_v8 = vshll.u32 %v13336_v44, 16  ;;  %v3863_v14 = vshrl.u32 %v9936_v28, 16  ;;  %v3822_v16 = vrot.slane %v3821_v57, 4 }
 0x1e0   : > { %10878 = vmatprep.mubr.msk.bf16.mxu0 %vm769_vm3, %v9964_v61  ;;  %v3834_v61 = vshll.u32 %v13085_v31, 16  ;;  %v3887_v31 = vshrl.u32 %v9939_v40, 16  ;;  %v3845_v28 = vor.u32 %v3844_v48, %v3841_v36  ;;  %v3855_v49 = vor.u32 %v3854_v26, %v13341_v51 }
 0x1e1   : > { %v3832_v40 = vrot.slane %v3831_v12, 4  ;;  %v3860_v58 = vrot.slane %v3858_v8, 5  ;;  %v3865_v30 = vrot.slane %v3863_v14, 4  ;;  %v3868_v20 = vrot.slane %v3866_v21, 5 }
 0x1e2   : > { %v3836_v52 = vrot.slane %v3834_v61, 5  ;;  %v13361_v27 = vrot.slane %v3872_v25, 5  ;;  %v3878_v13 = vrot.slane %v3876_v38, 4  ;;  %v3889_v63 = vrot.slane %v3887_v31, 4 }
 0x1e3   : > { %v3892_v57 = vrot.slane %v3890_v9, 5  ;;  %v13366_v48 = vrot.slane %v3896_v3, 5  ;;  %v3902_v61 = vrot.slane %v3900_v18, 4  ;;  %v3914_v12 = vshll.u32 %v9942_v39, 16  ;;  %v9945_v3 = vld [vmem:[%s11857_s11 + $0x90] sm:$0xf] }
 0x1e4   : > { %v3846_v36 = vrot.slane %v3845_v28, 4  ;;  %v3856_v26 = vrot.slane %v3855_v49, 4  ;;  %v9967_v8 = vcombine.low %v3779_v32, %v3789_v35  ;;  %v9968_v14 = vcombine.low %v3803_v53, %v3813_v15  ;;  %v13380_v18 = vld [vmem:[%s11857_s11 + $0x94] sm:$0xf] }
 0x1e5   : > { %v3827_v21 = vsel %vm11892_vm4, %v3822_v16, %v13324_v60  ;;  %v3837_v25 = vsel %vm11892_vm4, %v3832_v40, %v3836_v52  ;;  %v3869_v38 = vor.u32 %v3868_v20, %v3865_v30  ;;  %v3879_v31 = vor.u32 %v3878_v13, %v13361_v27 }
 0x1e6   : > { %v3882_v9 = vshll.u32 %v13108_v5, 16  ;;  %v3906_v49 = vshll.u32 %v13364_v41, 16  ;;  %v3903_v32 = vor.u32 %v3902_v61, %v13366_v48  ;;  %v3916_v53 = vrot.slane %v3914_v12, 5 }
 0x1e7   : > { %10879 = vmatmul.mubr.msk.bf16.vlgmr.msra.gmra.mrb[0].mxu0 %vm769_vm3, %v9965_v19  ;;  %v3911_v19 = vshrl.u32 %v9942_v39, 16  ;;  %v3851_v60 = vsel %vm11892_vm4, %v3846_v36, %v13341_v51  ;;  %v3861_v30 = vsel %vm11892_vm4, %v3856_v26, %v3860_v58  ;;  %v3935_v16 = vshrl.u32 %v9945_v3, 16 }
 0x1e8   : > { %10911 = vmatpush3.bf16.msra.mxu0 %v4647_v34  ;;  %10882 = vmatprep.mubr.msk.bf16.mxu0 %vm769_vm3, %v9966_v56  ;;  %v3920_v34 = vshll.u32 %v13135_v43, 16  ;;  %v3924_v56 = vshrl.u32 %v13135_v43, 16  ;;  %v3893_v43 = vor.u32 %v3892_v57, %v3889_v63  ;;  %v3938_v52 = vshll.u32 %v9945_v3, 16 }
 0x1e9   : > { %v3913_v35 = vrot.slane %v3911_v19, 4  ;;  %v3944_v28 = vshll.u32 %v13380_v18, 16  ;;  %v3948_v39 = vshrl.u32 %v13380_v18, 16  ;;  %v3870_v40 = vrot.slane %v3869_v38, 4  ;;  %v9948_v19 = vld [vmem:[%s11857_s11 + $0x9c] sm:$0xf] }
 0x1ea   : > { %v13388_v15 = vrot.slane %v3920_v34, 5  ;;  %v3926_v5 = vrot.slane %v3924_v56, 4  ;;  %v3880_v51 = vrot.slane %v3879_v31, 4  ;;  %v3884_v20 = vrot.slane %v3882_v9, 5  ;;  %v13398_v34 = vld [vmem:[%s11857_s11 + $0x98] sm:$0x1] }
 0x1eb   : > { %v3908_v13 = vrot.slane %v3906_v49, 5  ;;  %v3894_v58 = vrot.slane %v3893_v43, 4  ;;  %v3904_v63 = vrot.slane %v3903_v32, 4  ;;  %v3917_v57 = vor.u32 %v3916_v53, %v3913_v35 }
 0x1ec   : > { %v3930_v61 = vshll.u32 %v13138_v50, 16  ;;  %v9969_v12 = vcombine.low %v3827_v21, %v3837_v25  ;;  %v9970_v36 = vcombine.low %v3851_v60, %v3861_v30  ;;  %v3927_v26 = vor.u32 %v3926_v5, %v13388_v15  ;;  %v9951_v21 = vld [vmem:[%s11857_s11 + $0xa8] sm:$0xf]  ;;  %v13409_v25 = vld [vmem:[%s11857_s11 + $0xac] sm:$0xf] }
 0x1ed   : > { %v3937_v56 = vrot.slane %v3935_v16, 4  ;;  %v3950_v38 = vrot.slane %v3948_v39, 4  ;;  %v3875_v31 = vsel %vm11892_vm4, %v3870_v40, %v13361_v27  ;;  %v3885_v9 = vsel %vm11892_vm4, %v3880_v51, %v3884_v20 }
 0x1ee   : > { %v3959_v50 = vshrl.u32 %v9948_v19, 16  ;;  %v3962_v49 = vshll.u32 %v9948_v19, 16  ;;  %v3899_v3 = vsel %vm11892_vm4, %v3894_v58, %v13366_v48  ;;  %v3909_v43 = vsel %vm11892_vm4, %v3904_v63, %v3908_v13  ;;  %v13432_v19 = vld [vmem:[%s11857_s11 + $0xb0] sm:$0x1] }
 0x1ef   : > { %10883 = vmatmul.mubr.msk.bf16.gmra.mrb[4].mxu0 %vm769_vm3, %v9967_v8  ;;  %v3940_v8 = vrot.slane %v3938_v52, 5  ;;  %v3918_v32 = vrot.slane %v3917_v57, 4  ;;  %v3932_v35 = vrot.slane %v3930_v61, 5  ;;  %v3928_v53 = vrot.slane %v3927_v26, 4 }
 0x1f0   : > { %10886 = vmatprep.mubr.msk.bf16.mxu0 %vm769_vm3, %v9968_v14  ;;  %v13400_v14 = vrot.slane %v3944_v28, 5  ;;  %v3954_v27 = vshll.u32 %v13398_v34, 16  ;;  %v3968_v60 = vshll.u32 %v13177_v0, 16  ;;  %v3972_v30 = vshrl.u32 %v13177_v0, 16 }
 0x1f1   : > { %v3983_v5 = vshrl.u32 %v9951_v21, 16  ;;  %v3986_v16 = vshll.u32 %v9951_v21, 16  ;;  %v3992_v52 = vshll.u32 %v13409_v25, 16  ;;  %v3996_v48 = vshrl.u32 %v13409_v25, 16 }
 0x1f2   : > { %v3941_v28 = vor.u32 %v3940_v8, %v3937_v56  ;;  %v3951_v39 = vor.u32 %v3950_v38, %v13400_v14  ;;  %v3961_v40 = vrot.slane %v3959_v50, 4  ;;  %v3964_v51 = vrot.slane %v3962_v49, 5  ;;  %v9954_v8 = vld [vmem:[%s11857_s11 + $0xb4] sm:$0xf] }
 0x1f3   : > { %v9971_v20 = vcombine.low %v3875_v31, %v3885_v9  ;;  %v9972_v13 = vcombine.low %v3899_v3, %v3909_v43  ;;  %v3923_v0 = vsel %vm11892_vm4, %v3918_v32, %v13388_v15  ;;  %v3933_v58 = vsel %vm11892_vm4, %v3928_v53, %v3932_v35  ;;  %v9957_v32 = vld [vmem:[%s11857_s11 + $0xc0] sm:$0xf]  ;;  %v13440_v35 = vld [vmem:[%s11857_s11 + $0xc4] sm:$0xf] }
 0x1f4   : > { %v3956_v63 = vrot.slane %v3954_v27, 5  ;;  %v13429_v57 = vrot.slane %v3968_v60, 5  ;;  %v3974_v61 = vrot.slane %v3972_v30, 4  ;;  %v3994_v26 = vrot.slane %v3992_v52, 5 }
 0x1f5   : > { %v3998_v56 = vrot.slane %v3996_v48, 4  ;;  %v3942_v38 = vrot.slane %v3941_v28, 4  ;;  %v3952_v31 = vrot.slane %v3951_v39, 4  ;;  %v3965_v9 = vor.u32 %v3964_v51, %v3961_v40 }
 0x1f6   : > { %v3978_v15 = vshll.u32 %v13180_v7, 16  ;;  %v4002_v50 = vshll.u32 %v13432_v19, 16  ;;  %v9973_v49 = vcombine.low %v3923_v0, %v3933_v58  ;;  %v3975_v21 = vor.u32 %v3974_v61, %v13429_v57 }
 0x1f7   : > { %10887 = vmatmul.mubr.msk.bf16.gmra.mrb[8].mxu0 %vm769_vm3, %v9969_v12  ;;  %v3985_v12 = vrot.slane %v3983_v5, 4  ;;  %v4007_v3 = vshrl.u32 %v9954_v8, 16  ;;  %v4010_v43 = vshll.u32 %v9954_v8, 16  ;;  %v3999_v27 = vor.u32 %v3998_v56, %v3994_v26 }
 0x1f8   : > { %10890 = vmatprep.mubr.msk.bf16.mxu0 %vm769_vm3, %v9970_v36  ;;  %v3988_v36 = vrot.slane %v3986_v16, 5  ;;  %v4016_v60 = vshll.u32 %v13219_v23, 16  ;;  %v4020_v30 = vshrl.u32 %v13219_v23, 16  ;;  %v3947_v7 = vsel %vm11892_vm4, %v3942_v38, %v13400_v14  ;;  %v9960_v38 = vld [vmem:[%s11857_s11 + $0xcc] sm:$0xf] }
 0x1f9   : > { %v3957_v5 = vsel %vm11892_vm4, %v3952_v31, %v3956_v63  ;;  %v3966_v16 = vrot.slane %v3965_v9, 4  ;;  %v3980_v52 = vrot.slane %v3978_v15, 5  ;;  %v4031_v48 = vshrl.u32 %v9957_v32, 16 }
 0x1fa   : > { %v3989_v53 = vor.u32 %v3988_v36, %v3985_v12  ;;  %v4034_v28 = vshll.u32 %v9957_v32, 16  ;;  %v4040_v39 = vshll.u32 %v13440_v35, 16  ;;  %v4044_v40 = vshrl.u32 %v13440_v35, 16 }
 0x1fb   : > { %v3976_v51 = vrot.slane %v3975_v21, 4  ;;  %v4004_v23 = vrot.slane %v4002_v50, 5  ;;  %v4000_v58 = vrot.slane %v3999_v27, 4  ;;  %v4018_v14 = vrot.slane %v4016_v60, 5  ;;  %v13460_v50 = vld [vmem:[%s11857_s11 + $0xc8] sm:$0x1] }
 0x1fc   : > { %v3990_v0 = vrot.slane %v3989_v53, 4  ;;  %v4022_v61 = vrot.slane %v4020_v30, 4  ;;  %v9974_v12 = vcombine.low %v3947_v7, %v3957_v5  ;;  %v4033_v63 = vrot.slane %v4031_v48, 4 }
 0x1fd   : > { %v4036_v36 = vrot.slane %v4034_v28, 5  ;;  %v4042_v56 = vrot.slane %v4040_v39, 5  ;;  %v4046_v8 = vrot.slane %v4044_v40, 4  ;;  %v3971_v31 = vsel %vm11892_vm4, %v3966_v16, %v13429_v57 }
 0x1fe   : > { %v3981_v9 = vsel %vm11892_vm4, %v3976_v51, %v3980_v52  ;;  %v3995_v21 = vsel %vm11892_vm4, %v3990_v0, %v3994_v26  ;;  %v4026_v32 = vshll.u32 %v13222_v47, 16  ;;  %v4055_v57 = vshrl.u32 %v9960_v38, 16 }
 0x1ff   : > { %10891 = vmatmul.mubr.msk.bf16.gmra.mrb[12].mxu0 %vm769_vm3, %v9971_v20  ;;  %v4009_v20 = vrot.slane %v4007_v3, 4  ;;  %v4005_v3 = vsel %vm11892_vm4, %v4000_v58, %v4004_v23  ;;  %v4058_v53 = vshll.u32 %v9960_v38, 16  ;;  %v4064_v27 = vshll.u32 %v13275_v55, 16 }
 0x200   : > { %10894 = vmatprep.mubr.msk.bf16.mxu0 %vm769_vm3, %v9972_v13  ;;  %v4012_v13 = vrot.slane %v4010_v43, 5  ;;  %v4023_v43 = vor.u32 %v4022_v61, %v4018_v14  ;;  %v4068_v60 = vshrl.u32 %v13275_v55, 16  ;;  %v4037_v30 = vor.u32 %v4036_v36, %v4033_v63 }
 0x201   : > { %v4047_v7 = vor.u32 %v4046_v8, %v4042_v56  ;;  %v9975_v5 = vcombine.low %v3971_v31, %v3981_v9  ;;  %v9976_v26 = vcombine.low %v3995_v21, %v4005_v3  ;;  %v4028_v48 = vrot.slane %v4026_v32, 5  ;;  %v9996_v8 = vld [vmem:[%s11857_s11 + $0x18] sm:$0xe] }
 0x202   : > { %v4013_v15 = vor.u32 %v4012_v13, %v4009_v20  ;;  %v4024_v52 = vrot.slane %v4023_v43, 4  ;;  %v4057_v28 = vrot.slane %v4055_v57, 4  ;;  %v4060_v39 = vrot.slane %v4058_v53, 5  ;;  %v9997_v53 = vld [vmem:[%s11857_s11 + $0x24] sm:$0xe] }
 0x203   : > { %v4066_v47 = vrot.slane %v4064_v27, 5  ;;  %v4070_v40 = vrot.slane %v4068_v60, 4  ;;  %v4038_v51 = vrot.slane %v4037_v30, 4  ;;  %v4048_v23 = vrot.slane %v4047_v7, 4  ;;  %v9998_v27 = vld [vmem:[%s11857_s11 + $0x30] sm:$0xe] }
 0x204   : > { %v4014_v16 = vrot.slane %v4013_v15, 4  ;;  %v4029_v13 = vsel %vm11892_vm4, %v4024_v52, %v4028_v48  ;;  %v4061_v0 = vor.u32 %v4060_v39, %v4057_v28  ;;  %v4074_v61 = vshll.u32 %v13278_v37, 16  ;;  %v9999_v39 = vld [vmem:[%s11857_s11 + $0x3c] sm:$0xe] }
 0x205   : > { %v4071_v58 = vor.u32 %v4070_v40, %v4066_v47  ;;  %v4438_v36 = vrot.slane %v13122_v11, 5  ;;  %v10012_v21 = vrot.slane %v9996_v8, 9  ;;  %v4441_v37 = vrot.slane %v13149_v62, 5 }
 0x206   : > { %v4019_v55 = vsel %vm11892_vm4, %v4014_v16, %v4018_v14  ;;  %v4062_v31 = vrot.slane %v4061_v0, 4  ;;  %v4076_v15 = vrot.slane %v4074_v61, 5  ;;  %v4445_v43 = vrot.slane %v13145_v46, 5 }
 0x207   : > { %10895 = vmatmul.mubr.msk.bf16.gmra.mrb[16].mxu0 %vm769_vm3, %v9973_v49  ;;  %v4050_v49 = vshll.u32 %v13460_v50, 16  ;;  %v9977_v14 = vcombine.low %v4019_v55, %v4029_v13  ;;  %v4072_v9 = vrot.slane %v4071_v58, 4  ;;  %v4440_v3 = vrot.slane %v4438_v36, 4 }
 0x208   : > { %10898 = vmatprep.mubr.msk.bf16.mxu0 %vm769_vm3, %v9974_v12  ;;  %v4043_v12 = vsel %vm11892_vm4, %v4038_v51, %v4042_v56  ;;  %v4067_v56 = vsel %vm11892_vm4, %v4062_v31, %v4066_v47  ;;  %v4439_v32 = vsel %vm12207_vm7, %v10012_v21, %v4438_v36  ;;  %v4452_v62 = vrot.slane %v13174_v17, 5  ;;  %v10000_v47 = vld [vmem:[%s11857_s11 + $0x48] sm:$0xe] }
 0x209   : > { %v4052_v20 = vrot.slane %v4050_v49, 5  ;;  %v4077_v11 = vsel %vm11892_vm4, %v4072_v9, %v4076_v15  ;;  %v4442_v57 = vsel %vm12207_vm7, %v4440_v3, %v4441_v37  ;;  %v10013_v7 = vrot.slane %v9997_v53, 9  ;;  %v10004_v15 = vld [vmem:[%s11857_s11 + $0x78] sm:$0xe] }
 0x20a   : > { %v9979_v60 = vcombine.low %v4067_v56, %v4077_v11  ;;  %v10029_v30 = vcombine.low %v4439_v32, %v4442_v57  ;;  %v4447_v49 = vrot.slane %v4445_v43, 4  ;;  %v4454_v46 = vrot.slane %v4452_v62, 4  ;;  %v10006_v32 = vld [vmem:[%s11857_s11 + $0x90] sm:$0xe] }
 0x20b   : > { %v4053_v63 = vsel %vm11892_vm4, %v4048_v23, %v4052_v20  ;;  %v4455_v16 = vrot.slane %v13211_v45, 5  ;;  %v4446_v17 = vsel %vm12207_vm7, %v10013_v7, %v4445_v43  ;;  %v4459_v48 = vrot.slane %v13194_v59, 5 }
 0x20c   : > { %v9978_v38 = vcombine.low %v4043_v12, %v4053_v63  ;;  %v4466_v45 = vrot.slane %v13240_v29, 5  ;;  %v10015_v23 = vrot.slane %v9999_v39, 9  ;;  %v4462_v55 = vrot.slane %v13245_v2, 5  ;;  %v16565_v39 = vld [vmem:[#allocation7_spill] sm:$0xff] }
 0x20d   : > { %v4461_v20 = vrot.slane %v4459_v48, 4  ;;  %v10016_v13 = vrot.slane %v10000_v47, 9  ;;  %v4469_v59 = vrot.slane %v13285_v42, 5  ;;  %v4480_v12 = vrot.slane %v13303_v24, 5  ;;  %v10002_v42 = vld [vmem:[%s11857_s11 + $0x60] sm:$0xe] }
 0x20e   : > { %v4468_v0 = vrot.slane %v4466_v45, 4  ;;  %v4460_v58 = vsel %vm12207_vm7, %v10015_v23, %v4459_v48  ;;  %v10018_v8 = vrot.slane %v10002_v42, 9  ;;  %v4494_v24 = vrot.slane %v13344_v6, 5  ;;  %v16568_v23 = vld [vmem:[#allocation9_spill] sm:$0xff]  ;;  %v13610_v42 = vld [vmem:[%s16374_s4 + $0x8] sm:$0xf] }
 0x20f   : > { %10899 = vmatmul.mubr.msk.bf16.gmra.mrb[20].mxu0 %vm769_vm3, %v9975_v5  ;;  %v4448_v5 = vrot.slane %v13168_v1, 5  ;;  %v4456_v1 = vsel %vm12207_vm7, %v4454_v46, %v4455_v16  ;;  %v4463_v29 = vsel %vm12207_vm7, %v4461_v20, %v4462_v55  ;;  %v4467_v61 = vsel %vm12207_vm7, %v10016_v13, %v4466_v45  ;;  %v16566_v45 = vld [vmem:[#allocation8_spill] sm:$0xff]  ;;  %v16569_v20 = vld [vmem:[#allocation10_spill] sm:$0xff]  ;;  %v16572_v13 = vld [vmem:[#allocation3_spill] sm:$0xff] }
 0x210   : > { %10902 = vmatprep.mubr.msk.bf16.mxu0 %vm769_vm3, %v9976_v26  ;;  %v10014_v26 = vrot.slane %v9998_v27, 9  ;;  %v4470_v2 = vsel %vm12207_vm7, %v4468_v0, %v4469_v59  ;;  %v10032_v63 = vcombine.low %v4460_v58, %v4463_v29  ;;  %v4481_v31 = vsel %vm12207_vm7, %v10018_v8, %v4480_v12  ;;  %v6038_v59 = vld [vmem:[%s16374_s4] sm:$0xf]  ;;  %v4978_v29 = vld [vmem:[#allocation2 + $0x8] sm:$0x1] }
 0x211   : > { %v4449_v52 = vsel %vm12207_vm7, %v4447_v49, %v4448_v5  ;;  %v10033_v36 = vcombine.low %v4467_v61, %v4470_v2  ;;  %v10020_v3 = vrot.slane %v10004_v15, 9  ;;  %v4496_v37 = vrot.slane %v4494_v24, 4  ;;  %11675 = vmatprep.subr.msk.bf16.mxu1 %vm6088_vm8, %v6038_v59  ;;  %v4981_v2 = vld [vmem:[#allocation2 + $0x14] sm:$0x1]  ;;  %v4999_v15 = vld [vmem:[#allocation2 + $0x5c] sm:$0x1] }
 0x212   : > { %v4453_v28 = vsel %vm12207_vm7, %v10014_v26, %v4452_v62  ;;  %v10030_v40 = vcombine.low %v4446_v17, %v4449_v52  ;;  %v4497_v56 = vrot.slane %v13364_v41, 5  ;;  %v4508_v43 = vrot.slane %v13380_v18, 5  ;;  %v16563_v26 = vld [vmem:[#allocation6_spill] sm:$0xff]  ;;  %v10010_v52 = vld [vmem:[%s11857_s11 + $0xc0] sm:$0xe] }
 0x213   : > { %v10031_v51 = vcombine.low %v4453_v28, %v4456_v1  ;;  %v4495_v11 = vsel %vm12207_vm7, %v10020_v3, %v4494_v24  ;;  %v10022_v53 = vrot.slane %v10006_v32, 9  ;;  %v4511_v62 = vrot.slane %v13398_v34, 5  ;;  %v5008_v32 = vld [vmem:[#allocation2 + $0x80] sm:$0x1] }
 0x214   : > { %v4498_v6 = vsel %vm12207_vm7, %v4496_v37, %v4497_v56  ;;  %v4510_v41 = vrot.slane %v4508_v43, 4  ;;  %v4525_v5 = vrot.slane %v13432_v19, 5  ;;  %v10026_v28 = vrot.slane %v10010_v52, 9  ;;  %v5005_v56 = vld [vmem:[#allocation2 + $0x74] sm:$0x1] }
 0x215   : > { %v10037_v57 = vcombine.low %v4495_v11, %v4498_v6  ;;  %v4509_v27 = vsel %vm12207_vm7, %v10022_v53, %v4508_v43  ;;  %v4539_v19 = vrot.slane %v13460_v50, 5  ;;  %v16567_v47 = vcombine.low %v16565_v39, %v16566_v45  ;;  %v16571_v50 = vld [vmem:[#allocation11_spill] sm:$0xff] }
 0x216   : > { %v4512_v18 = vsel %vm12207_vm7, %v4510_v41, %v4511_v62  ;;  %v16570_v55 = vcombine.low %v16568_v23, %v16569_v20  ;;  %v16573_v0 = vcombine.low %v16571_v50, %v16572_v13  ;;  %v6090_v54 = vsel %vm6088_vm8, %v6038_v59, 0  ;;  %v5011_v43 = vld [vmem:[#allocation2 + $0x8c] sm:$0x1]  ;;  %v5017_v41 = vld [vmem:[#allocation2 + $0xa4] sm:$0x1] }
 0x217   : > { %10903 = vmatmul.mubr.msk.bf16.gmra.mrb[24].mxu0 %vm769_vm3, %v9977_v14  ;;  %v4482_v14 = vrot.slane %v4480_v12, 4  ;;  %v10039_v7 = vcombine.low %v4509_v27, %v4512_v18  ;;  %10945 = vmatpush3.bf16.msra.mxu1 %v6090_v54  ;;  %v16574_v58 = vmov 0  ;;  %v4979_v61 = vsel %vm13599_vm11, 0, %v4978_v29  ;;  %v5014_v62 = vld [vmem:[#allocation2 + $0x98] sm:$0x1] }
 0x218   : > { %10906 = vmatprep.mubr.msk.bf16.mxu0 %vm769_vm3, %v9978_v38  ;;  %v4483_v38 = vrot.slane %v13336_v44, 5  ;;  %v16559_v44 = vcombine.low %v13094_v33, %v13099_v22  ;;  %v16560_v33 = vld [vmem:[#allocation4_spill] sm:$0xff]  ;;  %v16575_v58 = vsel %vm13599_vm11, 4294967295, %v16574_v58  ;;  %4980 = vst [vmem:[#allocation2 + $0x8] sm:$0x1] %v4979_v61  ;;  %v4982_v12 = vsel %vm13599_vm11, 0, %v4981_v2  ;;  %11676 = vmatprep.subr.msk.bf16.mxu1 %vm6088_vm8, %v13610_v42 }
 0x219   : > { %v16561_v22 = vcombine.low %v13118_v4, %v16560_v33  ;;  %v16562_v4 = vld [vmem:[#allocation5_spill] sm:$0xff]  ;;  %16576 = vst [vmem:[#allocation4_spill] sm:$0xff] %v16575_v58  ;;  %4983 = vst [vmem:[#allocation2 + $0x14] sm:$0x1] %v4982_v12  ;;  %v5000_v3 = vsel %vm13599_vm11, 0, %v4999_v15  ;;  %v5006_v11 = vsel %vm13599_vm11, 0, %v5005_v56 }
 0x21a   : > { %v4484_v9 = vsel %vm12207_vm7, %v4482_v14, %v4483_v38  ;;  %v16564_v46 = vcombine.low %v16562_v4, %v16563_v26  ;;  %v4993_v38 = vld [vmem:[#allocation2 + $0x44] sm:$0x1]  ;;  %5001 = vst [vmem:[#allocation2 + $0x5c] sm:$0x1] %v5000_v3  ;;  %5007 = vst [vmem:[#allocation2 + $0x74] sm:$0x1] %v5006_v11 }
 0x21b   : > { %v10035_v21 = vcombine.low %v4481_v31, %v4484_v9  ;;  %v4990_v31 = vld [vmem:[#allocation2 + $0x38] sm:$0x1]  ;;  %v4994_v9 = vsel %vm13599_vm11, 0, %v4993_v38  ;;  %v5009_v53 = vsel %vm13599_vm11, 0, %v5008_v32  ;;  %v5018_v33 = vsel %vm13599_vm11, 0, %v5017_v41 }
 0x21c   : > { %v4991_v24 = vsel %vm13599_vm11, 0, %v4990_v31  ;;  %4995 = vst [vmem:[#allocation2 + $0x44] sm:$0x1] %v4994_v9  ;;  %5010 = vst [vmem:[#allocation2 + $0x80] sm:$0x1] %v5009_v53  ;;  %v6354_v15 = vsel %vm6088_vm8, %v13610_v42, 0 }
 0x21d   : > { %4992 = vst [vmem:[#allocation2 + $0x38] sm:$0x1] %v4991_v24  ;;  %5019 = vst [vmem:[#allocation2 + $0xa4] sm:$0x1] %v5018_v33  ;;  %v5023_v27 = vld [vmem:[#allocation2 + $0xbc] sm:$0x1] }
 0x21e   : > { %v5020_v18 = vld [vmem:[#allocation2 + $0xb0] sm:$0x1]  ;;  %v10111_v56 = vld [vmem:[%s16374_s4 + $0x4] sm:$0xf]  ;;  %vm8864_vm0 = vcmask 1042434  }
 0x21f   : > { %10907 = vmatmul.mubr.msk.bf16.gmra.mrb[28].mxu0 %vm769_vm3, %v9979_v60  ;;  %v4522_v60 = vrot.slane %v13409_v25, 5  ;;  %v4536_v25 = vrot.slane %v13440_v35, 5 }
 0x220   : > { %10912 = vmatprep.mubr.msk.bf16.mxu0 %vm769_vm3, %v10029_v30  ;;  %v10008_v30 = vld [vmem:[%s11857_s11 + $0xa8] sm:$0xe]  ;;  %v5178_v39 = vld [vmem:[#allocation2 + $0x14] sm:$0x1]  ;;  %s11784_s11 = smov 8  }
 0x221   : > { %v10024_v49 = vrot.slane %v10008_v30, 9  ;;  %v4524_v34 = vrot.slane %v4522_v60, 4  ;;  %v4538_v1 = vrot.slane %v4536_v25, 4  ;;  %v5021_v30 = vsel %vm13599_vm11, 0, %v5020_v18 }
 0x222   : > { %5022 = vst [vmem:[#allocation2 + $0xb0] sm:$0x1] %v5021_v30 }
 0x223   : > { %v4523_v16 = vsel %vm12207_vm7, %v10024_v49, %v4522_v60  ;;  %v4526_v17 = vsel %vm12207_vm7, %v4524_v34, %v4525_v5  ;;  %v5024_v60 = vsel %vm13599_vm11, 0, %v5023_v27  ;;  %v13650_v34 = vld [vmem:[%s16373_s3] ss:$0 sm:$0xff] }
 0x224   : > { %v10041_v48 = vcombine.low %v4523_v16, %v4526_v17  ;;  %5025 = vst [vmem:[#allocation2 + $0xbc] sm:$0x1] %v5024_v60  ;;  %v5187_v59 = vld [vmem:[#allocation2 + $0x38] sm:$0x1]  ;;  %v5196_v60 = vld [vmem:[#allocation2 + $0x5c] sm:$0x1] }
 0x227   : > { %10913 = vmatmul.mubr.msk.bf16.vlgmr.msra.gmra.mrb[0].mxu0 %vm769_vm3, %v10030_v40  ;;  %v4537_v40 = vsel %vm12207_vm7, %v10026_v28, %v4536_v25 }
 0x228   : > { %10916 = vmatprep.mubr.msk.bf16.mxu0 %vm769_vm3, %v10031_v51  ;;  %v4540_v51 = vsel %vm12207_vm7, %v4538_v1, %v4539_v19  ;;  %v5175_v19 = vld [vmem:[#allocation2 + $0x8] sm:$0x1]  ;;  %vm9422_vm7 = vcmask 261120  }
 0x229   : > { %v10043_v35 = vcombine.low %v4537_v40, %v4540_v51  ;;  %v5241_v13 = vshll.u32 %v5175_v19, 16 }
 0x22b   : > { %v13684_v42 = vrot.slane %v5241_v13, 5 }
 0x22f   : > { %10917 = vmatmul.mubr.msk.bf16.gmra.mrb[4].mxu0 %vm769_vm3, %v10032_v63  ;;  %v4987_v63 = vld [vmem:[#allocation2 + $0x2c] sm:$0x1] }
 0x230   : > { %10920 = vmatprep.mubr.msk.bf16.mxu0 %vm769_vm3, %v10033_v36  ;;  %v4984_v36 = vld [vmem:[#allocation2 + $0x20] sm:$0x1]  ;;  %v4988_v8 = vsel %vm13599_vm11, 0, %v4987_v63 }
 0x231   : > { %v4985_v14 = vsel %vm13599_vm11, 0, %v4984_v36  ;;  %4989 = vst [vmem:[#allocation2 + $0x2c] sm:$0x1] %v4988_v8 }
 0x232   : > { %4986 = vst [vmem:[#allocation2 + $0x20] sm:$0x1] %v4985_v14 }
 0x237   : > { %10921 = vmatmul.mubr.msk.bf16.gmra.mrb[8].mxu0 %vm769_vm3, %v16559_v44  ;;  %v5002_v44 = vld [vmem:[#allocation2 + $0x68] sm:$0x1] }
 0x238   : > { %10924 = vmatprep.mubr.msk.bf16.mxu0 %vm769_vm3, %v10035_v21  ;;  %v4996_v21 = vld [vmem:[#allocation2 + $0x50] sm:$0x1]  ;;  %v5003_v6 = vsel %vm13599_vm11, 0, %v5002_v44  ;;  %v5184_v23 = vld [vmem:[#allocation2 + $0x2c] sm:$0x1] }
 0x239   : > { %v4997_v37 = vsel %vm13599_vm11, 0, %v4996_v21  ;;  %5004 = vst [vmem:[#allocation2 + $0x68] sm:$0x1] %v5003_v6  ;;  %v5181_v40 = vld [vmem:[#allocation2 + $0x20] sm:$0x1]  ;;  %v5313_v38 = vshll.u32 %v5184_v23, 16 }
 0x23a   : > { %4998 = vst [vmem:[#allocation2 + $0x50] sm:$0x1] %v4997_v37  ;;  %v5289_v12 = vshll.u32 %v5181_v40, 16  ;;  %v5337_v21 = vshll.u32 %v5187_v59, 16  ;;  %v5190_v44 = vld [vmem:[#allocation2 + $0x44] sm:$0x1] }
 0x23b   : > { %v13691_v41 = vrot.slane %v5313_v38, 5  ;;  %v5361_v18 = vshll.u32 %v5190_v44, 16 }
 0x23c   : > { %v13689_v53 = vrot.slane %v5289_v12, 5  ;;  %v13694_v27 = vrot.slane %v5337_v21, 5  ;;  %v5214_v12 = vld [vmem:[#allocation2 + $0xa4] sm:$0x1] }
 0x23d   : > { %v13712_v13 = vrot.slane %v5361_v18, 5 }
 0x23f   : > { %10925 = vmatmul.mubr.msk.bf16.gmra.mrb[12].mxu0 %vm769_vm3, %v16561_v22  ;;  %v5015_v22 = vsel %vm13599_vm11, 0, %v5014_v62 }
 0x240   : > { %10928 = vmatprep.mubr.msk.bf16.mxu0 %vm769_vm3, %v10037_v57  ;;  %v5012_v57 = vsel %vm13599_vm11, 0, %v5011_v43  ;;  %5016 = vst [vmem:[#allocation2 + $0x98] sm:$0x1] %v5015_v22 }
 0x241   : > { %5013 = vst [vmem:[#allocation2 + $0x8c] sm:$0x1] %v5012_v57  ;;  %v5193_v62 = vld [vmem:[#allocation2 + $0x50] sm:$0x1] }
 0x247   : > { %10929 = vmatmul.mubr.msk.bf16.gmra.mrb[16].mxu0 %vm769_vm3, %v16564_v46 }
 0x248   : > { %10932 = vmatprep.mubr.msk.bf16.mxu0 %vm769_vm3, %v10039_v7  ;;  %v13645_v7 = vld [vmem:[%s16372_s2] ss:$0 sm:$0xff] }
 0x24f   : > { %10933 = vmatmul.mubr.msk.bf16.gmra.mrb[20].mxu0 %vm769_vm3, %v16567_v47 }
 0x250   : > { %10936 = vmatprep.mubr.msk.bf16.mxu0 %vm769_vm3, %v10041_v48 }
 0x257   : > { %10937 = vmatmul.mubr.msk.bf16.gmra.mrb[24].mxu0 %vm769_vm3, %v16570_v55 }
 0x258   : > { %10940 = vmatprep.mubr.msk.bf16.mxu0 %vm769_vm3, %v10043_v35 }
 0x25f   : > { %10941 = vmatmul.mubr.msk.bf16.gmra.mrb[28].mxu0 %vm769_vm3, %v16573_v0  ;;  %v5265_v0 = vshll.u32 %v5178_v39, 16 }
 0x261   : > { %v13686_v43 = vrot.slane %v5265_v0, 5 }
 0x2fa   : > { %v10914_v49 = vpop.f32.mrb[0].mxu0 }
 0x2fb   : > { %v4851_v5 = vmul.f32 %v10914_v49, %v13645_v7  ;;  %v4683_v4 = vpop.f32.mrb[1].mxu0 }
 0x2fc   : > { %v4849_v26 = vmul.f32 %v13645_v7, %v4683_v4  ;;  %v10915_v46 = vpop.f32.mrb[2].mxu0  ;;  %v5199_v4 = vld [vmem:[#allocation2 + $0x68] sm:$0x1] }
 0x2fd   : > { %v4890_v16 = vadd.f32 %v13650_v34, %v4851_v5  ;;  %v4852_v17 = vmul.f32 %v10915_v46, %v13645_v7  ;;  %v4686_v25 = vpop.f32.mrb[3].mxu0 }
 0x2fe   : > { %v4888_v52 = vadd.f32 %v13650_v34, %v4849_v26  ;;  %v4850_v48 = vmul.f32 %v13645_v7, %v4686_v25  ;;  %v5202_v26 = vld [vmem:[#allocation2 + $0x74] sm:$0x1] }
 0x2ff   : > { %v4922_v28 = vmax.f32 %v4890_v16, 0.0  ;;  %v4891_v1 = vadd.f32 %v13650_v34, %v4852_v17  ;;  %v5457_v23 = vshll.u32 %v5202_v26, 16 }
 0x300   : > { %v4920_v45 = vmax.f32 %v4888_v52, 0.0  ;;  %v4889_v47 = vadd.f32 %v13650_v34, %v4850_v48  ;;  %v5385_v52 = vshll.u32 %v5193_v62, 16  ;;  %v5208_v48 = vld [vmem:[#allocation2 + $0x8c] sm:$0x1] }
 0x301   : > { %v10302_v51 = vpack.c.bf16 %v4922_v28, %v4922_v28  ;;  %v4923_v35 = vmax.f32 %v4891_v1, 0.0  ;;  %v5505_v0 = vshll.u32 %v5208_v48, 16  ;;  %v13727_v21 = vrot.slane %v5457_v23, 5 }
 0x302   : > { %v10300_v20 = vpack.c.bf16 %v4920_v45, %v4920_v45  ;;  %v4921_v55 = vmax.f32 %v4889_v47, 0.0  ;;  %v10918_v50 = vpop.f32.mrb[4].mxu0 }
 0x303   : > { %5143 = vst.msk [vmem:[#allocation2 + $0xc] sm:$0xf] %vm4969_vm12, %v10302_v51  ;;  %v13661_v54 = vpack.c.bf16 %v4923_v35, %v4922_v28  ;;  %v10303_v29 = vpack.c.bf16 %v4923_v35, %v4923_v35  ;;  %v4855_v61 = vmul.f32 %v10918_v50, %v13645_v7  ;;  %v4699_v2 = vpop.f32.mrb[5].mxu0  ;;  %v5433_v35 = vshll.u32 %v5199_v4, 16 }
 0x304   : > { %5141 = vst.msk [vmem:[#allocation2] sm:$0xf] %vm4969_vm12, %v10300_v20  ;;  %v13665_v63 = vpack.c.bf16 %v4921_v55, %v4920_v45  ;;  %v10301_v36 = vpack.c.bf16 %v4921_v55, %v4921_v55  ;;  %v4853_v8 = vmul.f32 %v13645_v7, %v4699_v2  ;;  %v10919_v14 = vpop.f32.mrb[6].mxu0  ;;  %v5409_v45 = vshll.u32 %v5196_v60, 16  ;;  %v5205_v20 = vld [vmem:[#allocation2 + $0x80] sm:$0x1] }
 0x305   : > { %5144 = vst.msk [vmem:[#allocation2 + $0x10] sm:$0xf] %vm4969_vm12, %v10303_v29  ;;  %v4894_v31 = vadd.f32 %v13650_v34, %v4855_v61  ;;  %v4856_v9 = vmul.f32 %v10919_v14, %v13645_v7  ;;  %v4702_v24 = vpop.f32.mrb[7].mxu0  ;;  %v13718_v61 = vsel %vm6088_vm8, %v10111_v56, 0  ;;  %v13720_v2 = vrot.slane %v5385_v52, 5 }
 0x306   : > { %16577 = vst [vmem:[#allocation5_spill] sm:$0xff] %v13665_v63  ;;  %5142 = vst.msk [vmem:[#allocation2 + $0x4] sm:$0xf] %vm4969_vm12, %v10301_v36  ;;  %v4892_v3 = vadd.f32 %v13650_v34, %v4853_v8  ;;  %v4854_v37 = vmul.f32 %v13645_v7, %v4702_v24  ;;  %10946 = vmatprep.mubr.msk.bf16.mxu1 %vm6039_vm13, %v13665_v63  ;;  %v13723_v14 = vrot.slane %v5409_v45, 5  ;;  %v5481_v38 = vshll.u32 %v5205_v20, 16 }
 0x307   : > { %v4926_v11 = vmax.f32 %v4894_v31, 0.0  ;;  %v4895_v6 = vadd.f32 %v13650_v34, %v4856_v9  ;;  %10947 = vmatmul.mubr.msk.bf16.vlgmr.msra.gmra.mrb[0].mxu1 %vm6039_vm13, %v13661_v54  ;;  %v5211_v31 = vld [vmem:[#allocation2 + $0x98] sm:$0x1]  ;;  %v13729_v44 = vrot.slane %v5505_v0, 5  ;;  %v5217_v52 = vld [vmem:[#allocation2 + $0xb0] sm:$0x1] }
 0x308   : > { %v4924_v32 = vmax.f32 %v4892_v3, 0.0  ;;  %v4893_v57 = vadd.f32 %v13650_v34, %v4854_v37  ;;  %10979 = vmatpush3.bf16.msra.mxu1 %v6354_v15  ;;  %v13725_v15 = vrot.slane %v5433_v35, 5  ;;  %v5529_v18 = vshll.u32 %v5211_v31, 16 }
 0x309   : > { %v10306_v33 = vpack.c.bf16 %v4926_v11, %v4926_v11  ;;  %v4927_v22 = vmax.f32 %v4895_v6, 0.0  ;;  %11677 = vmatprep.subr.msk.bf16.mxu1 %vm6088_vm8, %v10111_v56  ;;  %v5220_v6 = vld [vmem:[#allocation2 + $0xbc] sm:$0x1]  ;;  %v13739_v4 = vrot.slane %v5481_v38, 5  ;;  %v5577_v0 = vshll.u32 %v5217_v52, 16 }
 0x30a   : > { %v10304_v30 = vpack.c.bf16 %v4924_v32, %v4924_v32  ;;  %v4925_v49 = vmax.f32 %v4893_v57, 0.0  ;;  %v10922_v5 = vpop.f32.mrb[8].mxu0  ;;  %v5601_v48 = vshll.u32 %v5220_v6, 16  ;;  %v13749_v45 = vld [vmem:[#allocation2 + $0xc] sm:$0xf]  ;;  %v13756_v23 = vrot.slane %v5529_v18, 5 }
 0x30b   : > { %5147 = vst.msk [vmem:[#allocation2 + $0x24] sm:$0xf] %vm4969_vm12, %v10306_v33  ;;  %v13697_v46 = vpack.c.bf16 %v4927_v22, %v4926_v11  ;;  %v10307_v16 = vpack.c.bf16 %v4927_v22, %v4927_v22  ;;  %v4859_v17 = vmul.f32 %v10922_v5, %v13645_v7  ;;  %v4715_v25 = vpop.f32.mrb[9].mxu0  ;;  %v5553_v11 = vshll.u32 %v5214_v12, 16 }
 0x30c   : > { %5145 = vst.msk [vmem:[#allocation2 + $0x18] sm:$0xf] %vm4969_vm12, %v10304_v30  ;;  %v13701_v28 = vpack.c.bf16 %v4925_v49, %v4924_v32  ;;  %v10305_v1 = vpack.c.bf16 %v4925_v49, %v4925_v49  ;;  %v4857_v19 = vmul.f32 %v13645_v7, %v4715_v25  ;;  %v10923_v39 = vpop.f32.mrb[10].mxu0  ;;  %v5173_v25 = vld [vmem:[#allocation2] sm:$0xf]  ;;  %v5246_v12 = vshrl.u32 %v13749_v45, 16 }
 0x30d   : > { %5148 = vst.msk [vmem:[#allocation2 + $0x28] sm:$0xf] %vm4969_vm12, %v10307_v16  ;;  %v4898_v47 = vadd.f32 %v13650_v34, %v4859_v17  ;;  %v4860_v40 = vmul.f32 %v10923_v39, %v13645_v7  ;;  %v4718_v51 = vpop.f32.mrb[11].mxu0  ;;  %v5174_v22 = vld [vmem:[#allocation2 + $0x4] sm:$0xf] }
 0x30e   : > { %5146 = vst.msk [vmem:[#allocation2 + $0x1c] sm:$0xf] %vm4969_vm12, %v10305_v1  ;;  %v4896_v55 = vadd.f32 %v13650_v34, %v4857_v19  ;;  %v4858_v50 = vmul.f32 %v13645_v7, %v4718_v51  ;;  %10950 = vmatprep.mubr.msk.bf16.mxu1 %vm6039_vm13, %v13701_v28  ;;  %v5231_v39 = vshll.u32 %v5174_v22, 16  ;;  %v5235_v35 = vshrl.u32 %v5174_v22, 16 }
 0x30f   : > { %v4930_v59 = vmax.f32 %v4898_v47, 0.0  ;;  %v4899_v29 = vadd.f32 %v13650_v34, %v4860_v40  ;;  %10951 = vmatmul.mubr.msk.bf16.gmra.mrb[4].mxu1 %vm6039_vm13, %v13697_v46  ;;  %v13751_v47 = vrot.slane %v5553_v11, 5 }
 0x310   : > { %v4928_v36 = vmax.f32 %v4896_v55, 0.0  ;;  %v4897_v8 = vadd.f32 %v13650_v34, %v4858_v50  ;;  %v5222_v50 = vshrl.u32 %v5173_v25, 16 }
 0x311   : > { %v10310_v9 = vpack.c.bf16 %v4930_v59, %v4930_v59  ;;  %v4931_v24 = vmax.f32 %v4899_v29, 0.0 }
 0x312   : > { %v10308_v3 = vpack.c.bf16 %v4928_v36, %v4928_v36  ;;  %v4929_v37 = vmax.f32 %v4897_v8, 0.0  ;;  %v10926_v56 = vpop.f32.mrb[12].mxu0 }
 0x313   : > { %5151 = vst.msk [vmem:[#allocation2 + $0x3c] sm:$0xf] %vm4969_vm12, %v10310_v9  ;;  %v13732_v32 = vpack.c.bf16 %v4931_v24, %v4930_v59  ;;  %v10311_v57 = vpack.c.bf16 %v4931_v24, %v4931_v24  ;;  %v4863_v62 = vmul.f32 %v10926_v56, %v13645_v7  ;;  %v4731_v33 = vpop.f32.mrb[13].mxu0  ;;  %v5225_v9 = vshll.u32 %v5173_v25, 16  ;;  %v13775_v25 = vld [vmem:[#allocation2 + $0x14] sm:$0x1] }
 0x314   : > { %5149 = vst.msk [vmem:[#allocation2 + $0x30] sm:$0xf] %vm4969_vm12, %v10308_v3  ;;  %v13736_v60 = vpack.c.bf16 %v4929_v37, %v4928_v36  ;;  %v10309_v30 = vpack.c.bf16 %v4929_v37, %v4929_v37  ;;  %v4861_v49 = vmul.f32 %v13645_v7, %v4731_v33  ;;  %v10927_v5 = vpop.f32.mrb[14].mxu0  ;;  %v13760_v36 = vrot.slane %v5601_v48, 5  ;;  %v5177_v3 = vld [vmem:[#allocation2 + $0x10] sm:$0xf] }
 0x315   : > { %5152 = vst.msk [vmem:[#allocation2 + $0x40] sm:$0xf] %vm4969_vm12, %v10311_v57  ;;  %v4902_v26 = vadd.f32 %v13650_v34, %v4863_v62  ;;  %v4864_v16 = vmul.f32 %v10927_v5, %v13645_v7  ;;  %v4734_v17 = vpop.f32.mrb[15].mxu0  ;;  %v13762_v24 = vrot.slane %v5231_v39, 5  ;;  %v5237_v57 = vrot.slane %v5235_v35, 4 }
 0x316   : > { %5150 = vst.msk [vmem:[#allocation2 + $0x34] sm:$0xf] %vm4969_vm12, %v10309_v30  ;;  %v4900_v1 = vadd.f32 %v13650_v34, %v4861_v49  ;;  %v4862_v19 = vmul.f32 %v13645_v7, %v4734_v17  ;;  %10954 = vmatprep.mubr.msk.bf16.mxu1 %vm6039_vm13, %v13736_v60  ;;  %v5224_v30 = vrot.slane %v5222_v50, 4  ;;  %v5259_v17 = vshrl.u32 %v5177_v3, 16 }
 0x317   : > { %v4934_v40 = vmax.f32 %v4902_v26, 0.0  ;;  %v4903_v51 = vadd.f32 %v13650_v34, %v4864_v16  ;;  %10955 = vmatmul.mubr.msk.bf16.gmra.mrb[8].mxu1 %vm6039_vm13, %v13732_v32  ;;  %v5255_v16 = vshll.u32 %v5177_v3, 16  ;;  %v13787_v35 = vrot.slane %v5577_v0, 5 }
 0x318   : > { %v4932_v20 = vmax.f32 %v4900_v1, 0.0  ;;  %v4901_v55 = vadd.f32 %v13650_v34, %v4862_v19  ;;  %v5227_v1 = vrot.slane %v5225_v9, 5  ;;  %v5249_v19 = vshll.u32 %v13749_v45, 16 }
 0x319   : > { %v10314_v59 = vpack.c.bf16 %v4934_v40, %v4934_v40  ;;  %v4935_v29 = vmax.f32 %v4903_v51, 0.0  ;;  %v5238_v51 = vor.u32 %v5237_v57, %v13762_v24  ;;  %v5248_v50 = vrot.slane %v5246_v12, 4 }
 0x31a   : > { %v10312_v8 = vpack.c.bf16 %v4932_v20, %v4932_v20  ;;  %v4933_v38 = vmax.f32 %v4901_v55, 0.0  ;;  %v10930_v31 = vpop.f32.mrb[16].mxu0  ;;  %v5261_v45 = vrot.slane %v5259_v17, 4 }
 0x31b   : > { %5155 = vst.msk [vmem:[#allocation2 + $0x54] sm:$0xf] %vm4969_vm12, %v10314_v59  ;;  %v13765_v37 = vpack.c.bf16 %v4935_v29, %v4934_v40  ;;  %v10315_v56 = vpack.c.bf16 %v4935_v29, %v4935_v29  ;;  %v4867_v11 = vmul.f32 %v10930_v31, %v13645_v7  ;;  %v4747_v6 = vpop.f32.mrb[17].mxu0  ;;  %v5179_v31 = vld [vmem:[#allocation2 + $0x18] sm:$0xf] }
 0x31c   : > { %5153 = vst.msk [vmem:[#allocation2 + $0x48] sm:$0xf] %vm4969_vm12, %v10312_v8  ;;  %v13769_v62 = vpack.c.bf16 %v4933_v38, %v4932_v20  ;;  %v10313_v33 = vpack.c.bf16 %v4933_v38, %v4933_v38  ;;  %v4865_v22 = vmul.f32 %v13645_v7, %v4747_v6  ;;  %v10931_v18 = vpop.f32.mrb[18].mxu0  ;;  %v13791_v38 = vrot.slane %v5255_v16, 5  ;;  %v5188_v59 = vld [vmem:[#allocation2 + $0x3c] sm:$0xf] }
 0x31d   : > { %16578 = vst [vmem:[#allocation6_spill] sm:$0xff] %v13765_v37  ;;  %5156 = vst.msk [vmem:[#allocation2 + $0x58] sm:$0xf] %vm4969_vm12, %v10315_v56  ;;  %v4906_v49 = vadd.f32 %v13650_v34, %v4867_v11  ;;  %v4868_v5 = vmul.f32 %v10931_v18, %v13645_v7  ;;  %v4750_v26 = vpop.f32.mrb[19].mxu0  ;;  %v5228_v11 = vor.u32 %v5227_v1, %v5224_v30  ;;  %v5251_v6 = vrot.slane %v5249_v19, 5 }
 0x31e   : > { %16579 = vst [vmem:[#allocation7_spill] sm:$0xff] %v13769_v62  ;;  %5154 = vst.msk [vmem:[#allocation2 + $0x4c] sm:$0xf] %vm4969_vm12, %v10313_v33  ;;  %v4904_v52 = vadd.f32 %v13650_v34, %v4865_v22  ;;  %v4866_v48 = vmul.f32 %v13645_v7, %v4750_v26  ;;  %10958 = vmatprep.mubr.msk.bf16.mxu1 %vm6039_vm13, %v13769_v62  ;;  %v5239_v22 = vrot.slane %v5238_v51, 4  ;;  %v5180_v18 = vld [vmem:[#allocation2 + $0x1c] sm:$0xf] }
 0x31f   : > { %v4938_v39 = vmax.f32 %v4906_v49, 0.0  ;;  %v4907_v40 = vadd.f32 %v13650_v34, %v4868_v5  ;;  %10959 = vmatmul.mubr.msk.bf16.gmra.mrb[12].mxu1 %vm6039_vm13, %v13765_v37  ;;  %v5270_v30 = vshrl.u32 %v5179_v31, 16  ;;  %v5262_v1 = vor.u32 %v5261_v45, %v13791_v38 }
 0x320   : > { %v4936_v20 = vmax.f32 %v4904_v52, 0.0  ;;  %v4905_v55 = vadd.f32 %v13650_v34, %v4866_v48  ;;  %v5273_v19 = vshll.u32 %v5179_v31, 16  ;;  %v5279_v51 = vshll.u32 %v5180_v18, 16 }
 0x321   : > { %v10318_v29 = vpack.c.bf16 %v4938_v39, %v4938_v39  ;;  %v4939_v8 = vmax.f32 %v4907_v40, 0.0  ;;  %v5252_v45 = vor.u32 %v5251_v6, %v5248_v50 }
 0x322   : > { %v10316_v9 = vpack.c.bf16 %v4936_v20, %v4936_v20  ;;  %v4937_v3 = vmax.f32 %v4905_v55, 0.0  ;;  %v10934_v56 = vpop.f32.mrb[20].mxu0 }
 0x323   : > { %5159 = vst.msk [vmem:[#allocation2 + $0x6c] sm:$0xf] %vm4969_vm12, %v10318_v29  ;;  %v13794_v0 = vpack.c.bf16 %v4939_v8, %v4938_v39  ;;  %v10319_v57 = vpack.c.bf16 %v4939_v8, %v4939_v8  ;;  %v4871_v12 = vmul.f32 %v10934_v56, %v13645_v7  ;;  %v4763_v33 = vpop.f32.mrb[21].mxu0  ;;  %v5229_v8 = vrot.slane %v5228_v11, 4 }
 0x324   : > { %5157 = vst.msk [vmem:[#allocation2 + $0x60] sm:$0xf] %vm4969_vm12, %v10316_v9  ;;  %v13798_v49 = vpack.c.bf16 %v4937_v3, %v4936_v20  ;;  %v10317_v5 = vpack.c.bf16 %v4937_v3, %v4937_v3  ;;  %v4869_v26 = vmul.f32 %v13645_v7, %v4763_v33  ;;  %v10935_v16 = vpop.f32.mrb[22].mxu0  ;;  %v5283_v20 = vshrl.u32 %v5180_v18, 16 }
 0x325   : > { %16580 = vst [vmem:[#allocation8_spill] sm:$0xff] %v13794_v0  ;;  %5160 = vst.msk [vmem:[#allocation2 + $0x70] sm:$0xf] %vm4969_vm12, %v10319_v57  ;;  %v4910_v17 = vadd.f32 %v13650_v34, %v4871_v12  ;;  %v4872_v52 = vmul.f32 %v10935_v16, %v13645_v7  ;;  %v4766_v48 = vpop.f32.mrb[23].mxu0  ;;  %v5244_v3 = vsel %vm11892_vm4, %v5239_v22, %v13684_v42  ;;  %v5272_v56 = vrot.slane %v5270_v30, 4 }
 0x326   : > { %16581 = vst [vmem:[#allocation9_spill] sm:$0xff] %v13798_v49  ;;  %5158 = vst.msk [vmem:[#allocation2 + $0x64] sm:$0xf] %vm4969_vm12, %v10317_v5  ;;  %v4908_v39 = vadd.f32 %v13650_v34, %v4869_v26  ;;  %v4870_v40 = vmul.f32 %v13645_v7, %v4766_v48  ;;  %10962 = vmatprep.mubr.msk.bf16.mxu1 %vm6039_vm13, %v13798_v49  ;;  %v5263_v33 = vrot.slane %v5262_v1, 4  ;;  %v5275_v18 = vrot.slane %v5273_v19, 5 }
 0x327   : > { %v4942_v55 = vmax.f32 %v4910_v17, 0.0  ;;  %v4911_v29 = vadd.f32 %v13650_v34, %v4872_v52  ;;  %10963 = vmatmul.mubr.msk.bf16.gmra.mrb[16].mxu1 %vm6039_vm13, %v13794_v0  ;;  %v13817_v17 = vrot.slane %v5279_v51, 5  ;;  %v5285_v52 = vrot.slane %v5283_v20, 4  ;;  %v5192_v58 = vld [vmem:[#allocation2 + $0x4c] sm:$0xf] }
 0x328   : > { %v4940_v31 = vmax.f32 %v4908_v39, 0.0  ;;  %v4909_v9 = vadd.f32 %v13650_v34, %v4870_v40  ;;  %v5253_v42 = vrot.slane %v5252_v45, 4  ;;  %v5234_v39 = vsel %vm11892_vm4, %v5229_v8, %v13762_v24  ;;  %v5182_v40 = vld [vmem:[#allocation2 + $0x24] sm:$0xf] }
 0x329   : > { %v10322_v57 = vpack.c.bf16 %v4942_v55, %v4942_v55  ;;  %v4943_v12 = vmax.f32 %v4911_v29, 0.0  ;;  %v13833_v29 = vcombine.low %v5234_v39, %v5244_v3  ;;  %v5268_v45 = vsel %vm11892_vm4, %v5263_v33, %v13686_v43 }
 0x32a   : > { %v10320_v5 = vpack.c.bf16 %v4940_v31, %v4940_v31  ;;  %v4941_v26 = vmax.f32 %v4909_v9, 0.0  ;;  %v10938_v16 = vpop.f32.mrb[24].mxu0  ;;  %v5276_v8 = vor.u32 %v5275_v18, %v5272_v56  ;;  %v5286_v9 = vor.u32 %v5285_v52, %v13817_v17 }
 0x32b   : > { %5163 = vst.msk [vmem:[#allocation2 + $0x84] sm:$0xf] %vm4969_vm12, %v10322_v57  ;;  %v13820_v50 = vpack.c.bf16 %v4943_v12, %v4942_v55  ;;  %v10323_v11 = vpack.c.bf16 %v4943_v12, %v4943_v12  ;;  %v4875_v6 = vmul.f32 %v10938_v16, %v13645_v7  ;;  %v4779_v48 = vpop.f32.mrb[25].mxu0  ;;  %16584 = vst [vmem:[#allocation3_spill] sm:$0xff] %v13833_v29  ;;  %v5183_v57 = vld [vmem:[#allocation2 + $0x28] sm:$0xf] }
 0x32c   : > { %5161 = vst.msk [vmem:[#allocation2 + $0x78] sm:$0xf] %vm4969_vm12, %v10320_v5  ;;  %v13824_v22 = vpack.c.bf16 %v4941_v26, %v4940_v31  ;;  %v10321_v30 = vpack.c.bf16 %v4941_v26, %v4941_v26  ;;  %v4873_v1 = vmul.f32 %v13645_v7, %v4779_v48  ;;  %v10939_v19 = vpop.f32.mrb[26].mxu0  ;;  %v5258_v43 = vsel %vm11892_vm4, %v5253_v42, %v13791_v38 }
 0x32d   : > { %16582 = vst [vmem:[#allocation10_spill] sm:$0xff] %v13820_v50  ;;  %5164 = vst.msk [vmem:[#allocation2 + $0x88] sm:$0xf] %vm4969_vm12, %v10323_v11  ;;  %v4914_v51 = vadd.f32 %v13650_v34, %v4875_v6  ;;  %v4876_v20 = vmul.f32 %v10939_v19, %v13645_v7  ;;  %v4782_v55 = vpop.f32.mrb[27].mxu0  ;;  %v5294_v33 = vshrl.u32 %v5182_v40, 16  ;;  %v13851_v16 = vcombine.low %v5258_v43, %v5268_v45 }
 0x32e   : > { %16583 = vst [vmem:[#allocation11_spill] sm:$0xff] %v13824_v22  ;;  %5162 = vst.msk [vmem:[#allocation2 + $0x7c] sm:$0xf] %vm4969_vm12, %v10321_v30  ;;  %v4912_v31 = vadd.f32 %v13650_v34, %v4873_v1  ;;  %v4874_v24 = vmul.f32 %v13645_v7, %v4782_v55  ;;  %10966 = vmatprep.mubr.msk.bf16.mxu1 %vm6039_vm13, %v13824_v22  ;;  %v5297_v56 = vshll.u32 %v5182_v40, 16  ;;  %v5303_v11 = vshll.u32 %v5183_v57, 16 }
 0x32f   : > { %v4946_v12 = vmax.f32 %v4914_v51, 0.0  ;;  %v4915_v3 = vadd.f32 %v13650_v34, %v4876_v20  ;;  %10967 = vmatmul.mubr.msk.bf16.gmra.mrb[20].mxu1 %vm6039_vm13, %v13820_v50  ;;  %16585 = vst [vmem:[#allocation12_spill] sm:$0xff] %v13851_v16  ;;  %v5307_v6 = vshrl.u32 %v5183_v57, 16  ;;  %v13853_v19 = vrot.slane %v5276_v8, 4 }
 0x330   : > { %v4944_v5 = vmax.f32 %v4912_v31, 0.0  ;;  %v4913_v26 = vadd.f32 %v13650_v34, %v4874_v24  ;;  %v13855_v39 = vrot.slane %v5286_v9, 4  ;;  %v5296_v40 = vrot.slane %v5294_v33, 4  ;;  %v5185_v9 = vld [vmem:[#allocation2 + $0x30] sm:$0xf] }
 0x331   : > { %v10326_v18 = vpack.c.bf16 %v4946_v12, %v4946_v12  ;;  %v4947_v52 = vmax.f32 %v4915_v3, 0.0  ;;  %v5299_v8 = vrot.slane %v5297_v56, 5  ;;  %v13868_v43 = vrot.slane %v5303_v11, 5 }
 0x332   : > { %v10324_v48 = vpack.c.bf16 %v4944_v5, %v4944_v5  ;;  %v4945_v30 = vmax.f32 %v4913_v26, 0.0  ;;  %v10942_v1 = vpop.f32.mrb[28].mxu0  ;;  %v5309_v33 = vrot.slane %v5307_v6, 4  ;;  %v5186_v26 = vld [vmem:[#allocation2 + $0x34] sm:$0xf] }
 0x333   : > { %5167 = vst.msk [vmem:[#allocation2 + $0x9c] sm:$0xf] %vm4969_vm12, %v10326_v18  ;;  %v13858_v38 = vpack.c.bf16 %v4947_v52, %v4946_v12  ;;  %v10327_v42 = vpack.c.bf16 %v4947_v52, %v4947_v52  ;;  %v4879_v51 = vmul.f32 %v10942_v1, %v13645_v7  ;;  %v4795_v20 = vpop.f32.mrb[29].mxu0 }
 0x334   : > { %5165 = vst.msk [vmem:[#allocation2 + $0x90] sm:$0xf] %vm4969_vm12, %v10324_v48  ;;  %v13862_v55 = vpack.c.bf16 %v4945_v30, %v4944_v5  ;;  %v10325_v45 = vpack.c.bf16 %v4945_v30, %v4945_v30  ;;  %v4877_v31 = vmul.f32 %v13645_v7, %v4795_v20  ;;  %v10943_v24 = vpop.f32.mrb[30].mxu0  ;;  %v5321_v48 = vshll.u32 %v5185_v9, 16  ;;  %v5189_v30 = vld [vmem:[#allocation2 + $0x40] sm:$0xf] }
 0x335   : > { %16586 = vst [vmem:[#allocation13_spill] sm:$0xff] %v13858_v38  ;;  %5168 = vst.msk [vmem:[#allocation2 + $0xa0] sm:$0xf] %vm4969_vm12, %v10327_v42  ;;  %v4918_v57 = vadd.f32 %v13650_v34, %v4879_v51  ;;  %v4880_v12 = vmul.f32 %v10943_v24, %v13645_v7  ;;  %v4798_v3 = vpop.f32.mrb[31].mxu0  ;;  %v5327_v51 = vshll.u32 %v5186_v26, 16  ;;  %v5331_v20 = vshrl.u32 %v5186_v26, 16 }
 0x336   : > { %16587 = vst [vmem:[#allocation14_spill] sm:$0xff] %v13862_v55  ;;  %5166 = vst.msk [vmem:[#allocation2 + $0x94] sm:$0xf] %vm4969_vm12, %v10325_v45  ;;  %v4916_v5 = vadd.f32 %v13650_v34, %v4877_v31  ;;  %v4878_v18 = vmul.f32 %v13645_v7, %v4798_v3  ;;  %10970 = vmatprep.mubr.msk.bf16.mxu1 %vm6039_vm13, %v13862_v55  ;;  %v5318_v7 = vshrl.u32 %v5185_v9, 16  ;;  %v5355_v52 = vshrl.u32 %v5189_v30, 16 }
 0x337   : > { %v4950_v11 = vmax.f32 %v4918_v57, 0.0  ;;  %v4919_v6 = vadd.f32 %v13650_v34, %v4880_v12  ;;  %10971 = vmatmul.mubr.msk.bf16.gmra.mrb[24].mxu1 %vm6039_vm13, %v13858_v38  ;;  %v5300_v24 = vor.u32 %v5299_v8, %v5296_v40  ;;  %v5310_v3 = vor.u32 %v5309_v33, %v13868_v43  ;;  %v5195_v55 = vld [vmem:[#allocation2 + $0x58] sm:$0xf] }
 0x338   : > { %v4948_v1 = vmax.f32 %v4916_v5, 0.0  ;;  %v4917_v42 = vadd.f32 %v13650_v34, %v4878_v18  ;;  %v5351_v12 = vshll.u32 %v5189_v30, 16  ;;  %v5320_v38 = vrot.slane %v5318_v7, 4  ;;  %v5191_v18 = vld [vmem:[#allocation2 + $0x48] sm:$0xf] }
 0x339   : > { %v10330_v45 = vpack.c.bf16 %v4950_v11, %v4950_v11  ;;  %v4951_v31 = vmax.f32 %v4919_v6, 0.0  ;;  %v5323_v34 = vrot.slane %v5321_v48, 5  ;;  %v13894_v8 = vrot.slane %v5327_v51, 5  ;;  %v5194_v6 = vld [vmem:[#allocation2 + $0x54] sm:$0xf] }
 0x33a   : > { %v10328_v57 = vpack.c.bf16 %v4948_v1, %v4948_v1  ;;  %v4949_v56 = vmax.f32 %v4917_v42, 0.0  ;;  %v5333_v33 = vrot.slane %v5331_v20, 4  ;;  %v5342_v30 = vshrl.u32 %v5188_v59, 16  ;;  %v5197_v51 = vld [vmem:[#allocation2 + $0x60] sm:$0xf] }
 0x33b   : > { %5171 = vst.msk [vmem:[#allocation2 + $0xb4] sm:$0xf] %vm4969_vm12, %v10330_v45  ;;  %v13889_v9 = vpack.c.bf16 %v4951_v31, %v4950_v11  ;;  %v10331_v5 = vpack.c.bf16 %v4951_v31, %v4951_v31  ;;  %v5345_v42 = vshll.u32 %v5188_v59, 16  ;;  %v5375_v45 = vshll.u32 %v5192_v58, 16 }
 0x33c   : > { %5169 = vst.msk [vmem:[#allocation2 + $0xa8] sm:$0xf] %vm4969_vm12, %v10328_v57  ;;  %v13892_v26 = vpack.c.bf16 %v4949_v56, %v4948_v1  ;;  %v10329_v40 = vpack.c.bf16 %v4949_v56, %v4949_v56  ;;  %v5379_v11 = vshrl.u32 %v5192_v58, 16  ;;  %v5301_v7 = vrot.slane %v5300_v24, 4  ;;  %v5198_v58 = vld [vmem:[#allocation2 + $0x64] sm:$0xf] }
 0x33d   : > { %16588 = vst [vmem:[#allocation15_spill] sm:$0xff] %v13889_v9  ;;  %5172 = vst.msk [vmem:[#allocation2 + $0xb8] sm:$0xf] %vm4969_vm12, %v10331_v5  ;;  %v5311_v48 = vrot.slane %v5310_v3, 4  ;;  %v13900_v56 = vrot.slane %v5351_v12, 5  ;;  %v5357_v1 = vrot.slane %v5355_v52, 4  ;;  %v5324_v20 = vor.u32 %v5323_v34, %v5320_v38 }
 0x33e   : > { %16589 = vst [vmem:[#allocation16_spill] sm:$0xff] %v13892_v26  ;;  %5170 = vst.msk [vmem:[#allocation2 + $0xac] sm:$0xf] %vm4969_vm12, %v10329_v40  ;;  %10974 = vmatprep.mubr.msk.bf16.mxu1 %vm6039_vm13, %v13892_v26  ;;  %v5366_v31 = vshrl.u32 %v5191_v18, 16  ;;  %v5369_v59 = vshll.u32 %v5191_v18, 16  ;;  %v5390_v57 = vshrl.u32 %v5194_v6, 16  ;;  %v5334_v12 = vor.u32 %v5333_v33, %v13894_v8 }
 0x33f   : > { %10975 = vmatmul.mubr.msk.bf16.gmra.mrb[28].mxu1 %vm6039_vm13, %v13889_v9  ;;  %v13906_v5 = vrot.slane %v5375_v45, 5  ;;  %v5381_v40 = vrot.slane %v5379_v11, 4  ;;  %v5393_v24 = vshll.u32 %v5194_v6, 16  ;;  %v5399_v3 = vshll.u32 %v5195_v55, 16 }
 0x340   : > { %10980 = vmatprep.mubr.msk.bf16.mxu1 %vm6039_vm13, %v13833_v29  ;;  %v5344_v52 = vrot.slane %v5342_v30, 4  ;;  %v5347_v26 = vrot.slane %v5345_v42, 5  ;;  %v5403_v50 = vshrl.u32 %v5195_v55, 16  ;;  %v5358_v9 = vor.u32 %v5357_v1, %v13900_v56 }
 0x341   : > { %v5414_v38 = vshrl.u32 %v5197_v51, 16  ;;  %v5417_v34 = vshll.u32 %v5197_v51, 16  ;;  %v5423_v18 = vshll.u32 %v5198_v58, 16  ;;  %v5368_v22 = vrot.slane %v5366_v31, 4 }
 0x342   : > { %v5371_v0 = vrot.slane %v5369_v59, 5  ;;  %v5392_v49 = vrot.slane %v5390_v57, 4  ;;  %v5427_v37 = vshrl.u32 %v5198_v58, 16  ;;  %v5382_v45 = vor.u32 %v5381_v40, %v13906_v5 }
 0x343   : > { %v5395_v29 = vrot.slane %v5393_v24, 5  ;;  %v13911_v11 = vrot.slane %v5399_v3, 5  ;;  %v5405_v6 = vrot.slane %v5403_v50, 4  ;;  %v16590_v55 = vsel %vm11892_vm4, %v13855_v39, %v13689_v53  ;;  %v5200_v50 = vld [vmem:[#allocation2 + $0x6c] sm:$0xf] }
 0x344   : > { %v16591_v33 = vsel %vm11892_vm4, %v13853_v19, %v13817_v17  ;;  %v5306_v42 = vsel %vm11892_vm4, %v5301_v7, %v13868_v43  ;;  %v13928_v1 = vrot.slane %v5423_v18, 5  ;;  %v5429_v51 = vrot.slane %v5427_v37, 4  ;;  %v10162_v17 = vld [vmem:[%s16374_s4 + $0x10] sm:$0xf] }
 0x345   : > { %v13923_v30 = vcombine.low %v16591_v33, %v16590_v55  ;;  %v5316_v31 = vsel %vm11892_vm4, %v5311_v48, %v13691_v41  ;;  %v5325_v53 = vrot.slane %v5324_v20, 4  ;;  %v5416_v39 = vrot.slane %v5414_v38, 4  ;;  %v5201_v37 = vld [vmem:[#allocation2 + $0x70] sm:$0xf] }
 0x346   : > { %v5419_v59 = vrot.slane %v5417_v34, 5  ;;  %v5335_v19 = vrot.slane %v5334_v12, 4  ;;  %v5348_v43 = vor.u32 %v5347_v26, %v5344_v52  ;;  %v5359_v7 = vrot.slane %v5358_v9, 4 }
 0x347   : > { %16592 = vst [vmem:[#allocation17_spill] sm:$0xff] %v13923_v30  ;;  %10981 = vmatmul.mubr.msk.bf16.vlgmr.msra.gmra.mrb[32].mxu1 %vm6039_vm13, %v13851_v16  ;;  %v5372_v57 = vor.u32 %v5371_v0, %v5368_v22  ;;  %v5383_v41 = vrot.slane %v5382_v45, 4  ;;  %v5396_v48 = vor.u32 %v5395_v29, %v5392_v49  ;;  %v5406_v20 = vor.u32 %v5405_v6, %v13911_v11  ;;  %v5203_v29 = vld [vmem:[#allocation2 + $0x78] sm:$0xf]  ;;  %v5204_v6 = vld [vmem:[#allocation2 + $0x7c] sm:$0xf] }
 0x348   : > { %11013 = vmatpush3.bf16.msra.mxu1 %v13718_v61  ;;  %10984 = vmatprep.mubr.msk.bf16.mxu1 %vm6039_vm13, %v13923_v30  ;;  %v5438_v58 = vshrl.u32 %v5200_v50, 16  ;;  %v13942_v40 = vcombine.low %v5306_v42, %v5316_v31  ;;  %v5430_v24 = vor.u32 %v5429_v51, %v13928_v1  ;;  %v5441_v3 = vshll.u32 %v5200_v50, 16 }
 0x349   : > { %11678 = vmatprep.subr.msk.bf16.mxu1 %vm6088_vm8, %v10162_v17  ;;  %v13947_v0 = vsel %vm6088_vm8, %v10162_v17, 0  ;;  %v5330_v61 = vsel %vm11892_vm4, %v5325_v53, %v13894_v8  ;;  %v5420_v22 = vor.u32 %v5419_v59, %v5416_v39  ;;  %v5447_v9 = vshll.u32 %v5201_v37, 16  ;;  %v5206_v17 = vld [vmem:[#allocation2 + $0x84] sm:$0xf] }
 0x34a   : > { %16593 = vst [vmem:[#allocation18_spill] sm:$0xff] %v13942_v40  ;;  %v5451_v49 = vshrl.u32 %v5201_v37, 16  ;;  %v5340_v26 = vsel %vm11892_vm4, %v5335_v19, %v13694_v27  ;;  %v5349_v12 = vrot.slane %v5348_v43, 4  ;;  %v5364_v52 = vsel %vm11892_vm4, %v5359_v7, %v13712_v13 }
 0x34b   : > { %v5373_v38 = vrot.slane %v5372_v57, 4  ;;  %v5388_v34 = vsel %vm11892_vm4, %v5383_v41, %v13720_v2  ;;  %v5397_v18 = vrot.slane %v5396_v48, 4  ;;  %v5407_v8 = vrot.slane %v5406_v20, 4  ;;  %v5207_v57 = vld [vmem:[#allocation2 + $0x88] sm:$0xf] }
 0x34c   : > { %v5440_v45 = vrot.slane %v5438_v58, 4  ;;  %v5431_v55 = vrot.slane %v5430_v24, 4  ;;  %v5443_v33 = vrot.slane %v5441_v3, 5  ;;  %v5462_v42 = vshrl.u32 %v5203_v29, 16  ;;  %v5209_v20 = vld [vmem:[#allocation2 + $0x90] sm:$0xf] }
 0x34d   : > { %v5465_v51 = vshll.u32 %v5203_v29, 16  ;;  %v13961_v50 = vcombine.low %v5330_v61, %v5340_v26  ;;  %v5421_v27 = vrot.slane %v5420_v22, 4  ;;  %v13963_v31 = vrot.slane %v5447_v9, 5 }
 0x34e   : > { %v5453_v53 = vrot.slane %v5451_v49, 4  ;;  %v5354_v13 = vsel %vm11892_vm4, %v5349_v12, %v13900_v56  ;;  %v5378_v2 = vsel %vm11892_vm4, %v5373_v38, %v13906_v5  ;;  %v5471_v39 = vshll.u32 %v5204_v6, 16  ;;  %v5213_v49 = vld [vmem:[#allocation2 + $0xa0] sm:$0xf] }
 0x34f   : > { %16594 = vst [vmem:[#allocation19_spill] sm:$0xff] %v13961_v50  ;;  %10985 = vmatmul.mubr.msk.bf16.gmra.mrb[36].mxu1 %vm6039_vm13, %v13942_v40  ;;  %v5475_v59 = vshrl.u32 %v5204_v6, 16  ;;  %v13975_v19 = vcombine.low %v5354_v13, %v5364_v52  ;;  %v13977_v43 = vcombine.low %v5378_v2, %v5388_v34  ;;  %v5402_v7 = vsel %vm11892_vm4, %v5397_v18, %v13911_v11  ;;  %v5216_v2 = vld [vmem:[#allocation2 + $0xac] sm:$0xf] }
 0x350   : > { %10988 = vmatprep.mubr.msk.bf16.mxu1 %vm6039_vm13, %v13961_v50  ;;  %v5412_v56 = vsel %vm11892_vm4, %v5407_v8, %v13723_v14  ;;  %v5436_v5 = vsel %vm11892_vm4, %v5431_v55, %v13725_v15  ;;  %v5444_v37 = vor.u32 %v5443_v33, %v5440_v45  ;;  %v13988_v41 = vrot.slane %v5462_v42, 4  ;;  %v5210_v14 = vld [vmem:[#allocation2 + $0x94] sm:$0xf]  ;;  %v5212_v8 = vld [vmem:[#allocation2 + $0x9c] sm:$0xf] }
 0x351   : > { %16595 = vst [vmem:[#allocation20_spill] sm:$0xff] %v13975_v19  ;;  %16596 = vst [vmem:[#allocation21_spill] sm:$0xff] %v13977_v43  ;;  %v13990_v48 = vrot.slane %v5465_v51, 5  ;;  %v5426_v58 = vsel %vm11892_vm4, %v5421_v27, %v13928_v1  ;;  %v5454_v11 = vor.u32 %v5453_v53, %v13963_v31  ;;  %v5486_v24 = vshrl.u32 %v5206_v17, 16  ;;  %v5215_v42 = vld [vmem:[#allocation2 + $0xa8] sm:$0xf] }
 0x352   : > { %v5489_v3 = vshll.u32 %v5206_v17, 16  ;;  %v13996_v61 = vrot.slane %v5471_v39, 5  ;;  %v5477_v22 = vrot.slane %v5475_v59, 4  ;;  %v5495_v9 = vshll.u32 %v5207_v57, 16  ;;  %v14201_v50 = vld [vmem:[#allocation2 + $0x70] sm:$0xf] }
 0x353   : > { %v5499_v15 = vshrl.u32 %v5207_v57, 16  ;;  %v13998_v29 = vcombine.low %v5402_v7, %v5412_v56  ;;  %v14000_v26 = vcombine.low %v5426_v58, %v5436_v5  ;;  %v5510_v12 = vshrl.u32 %v5209_v20, 16  ;;  %v5218_v56 = vld [vmem:[#allocation2 + $0xb4] sm:$0xf]  ;;  %16624 = vst [vmem:[#allocation48_spill] sm:$0xff] %v14201_v50 }
 0x354   : > { %v5513_v52 = vshll.u32 %v5209_v20, 16  ;;  %v14002_v38 = vrot.slane %v5444_v37, 4  ;;  %v5468_v1 = vor.u32 %v13990_v48, %v13988_v41  ;;  %v5519_v34 = vshll.u32 %v5210_v14, 16 }
 0x355   : > { %16597 = vst [vmem:[#allocation22_spill] sm:$0xff] %v13998_v29  ;;  %16598 = vst [vmem:[#allocation23_spill] sm:$0xff] %v14000_v26  ;;  %v5523_v18 = vshrl.u32 %v5210_v14, 16  ;;  %v14006_v45 = vrot.slane %v5454_v11, 4  ;;  %v5488_v6 = vrot.slane %v5486_v24, 4  ;;  %v5491_v55 = vrot.slane %v5489_v3, 5 }
 0x356   : > { %v5543_v33 = vshll.u32 %v5213_v49, 16  ;;  %v5478_v51 = vor.u32 %v5477_v22, %v13996_v61  ;;  %v14011_v27 = vrot.slane %v5495_v9, 5  ;;  %v5501_v53 = vrot.slane %v5499_v15, 4  ;;  %v5219_v22 = vld [vmem:[#allocation2 + $0xb8] sm:$0xf] }
 0x357   : > { %10989 = vmatmul.mubr.msk.bf16.gmra.mrb[40].mxu1 %vm6039_vm13, %v13975_v19  ;;  %v5547_v13 = vshrl.u32 %v5213_v49, 16  ;;  %v5512_v39 = vrot.slane %v5510_v12, 4  ;;  %v5515_v59 = vrot.slane %v5513_v52, 5  ;;  %v5534_v17 = vshrl.u32 %v5212_v8, 16 }
 0x358   : > { %10992 = vmatprep.mubr.msk.bf16.mxu1 %vm6039_vm13, %v13977_v43  ;;  %v5537_v7 = vshll.u32 %v5212_v8, 16  ;;  %v14015_v57 = vrot.slane %v5519_v34, 5  ;;  %v5525_v5 = vrot.slane %v5523_v18, 4  ;;  %v5558_v37 = vshrl.u32 %v5215_v42, 16 }
 0x359   : > { %v5561_v41 = vshll.u32 %v5215_v42, 16  ;;  %v14017_v48 = vrot.slane %v5543_v33, 5  ;;  %v5549_v20 = vrot.slane %v5547_v13, 4  ;;  %v5567_v58 = vshll.u32 %v5216_v2, 16 }
 0x35a   : > { %v5571_v11 = vshrl.u32 %v5216_v2, 16  ;;  %v5479_v24 = vrot.slane %v5478_v51, 4  ;;  %v5492_v3 = vor.u32 %v5491_v55, %v5488_v6  ;;  %v5502_v14 = vor.u32 %v5501_v53, %v14011_v27 }
 0x35b   : > { %v5582_v9 = vshrl.u32 %v5218_v56, 16  ;;  %v5536_v15 = vrot.slane %v5534_v17, 4  ;;  %v5539_v49 = vrot.slane %v5537_v7, 5  ;;  %v14020_v12 = vrot.slane %v5567_v58, 5 }
 0x35c   : > { %v5573_v52 = vrot.slane %v5571_v11, 4  ;;  %v5526_v34 = vor.u32 %v5525_v5, %v14015_v57  ;;  %v5560_v18 = vrot.slane %v5558_v37, 4  ;;  %v5563_v8 = vrot.slane %v5561_v41, 5 }
 0x35d   : > { %v5585_v33 = vshll.u32 %v5218_v56, 16  ;;  %v5516_v42 = vor.u32 %v5515_v59, %v5512_v39  ;;  %v5550_v13 = vor.u32 %v5549_v20, %v14017_v48  ;;  %v5591_v2 = vshll.u32 %v5219_v22, 16 }
 0x35e   : > { %v5595_v51 = vshrl.u32 %v5219_v22, 16  ;;  %v5469_v6 = vrot.slane %v5468_v1, 4  ;;  %v5574_v55 = vor.u32 %v5573_v52, %v14020_v12  ;;  %v5584_v53 = vrot.slane %v5582_v9, 4  ;;  %v14042_v22 = vld [vmem:[#allocation2 + $0xc] sm:$0xf] }
 0x35f   : > { %10993 = vmatmul.mubr.msk.bf16.gmra.mrb[44].mxu1 %vm6039_vm13, %v13998_v29  ;;  %v5587_v17 = vrot.slane %v5585_v33, 5  ;;  %v5503_v7 = vrot.slane %v5502_v14, 4  ;;  %v5540_v5 = vor.u32 %v5539_v49, %v5536_v15  ;;  %v14029_v37 = vrot.slane %v5591_v2, 5  ;;  %16599 = vst [vmem:[#allocation24_spill] sm:$0xff] %v14042_v22  ;;  %v14078_v2 = vld [vmem:[#allocation2 + $0x18] sm:$0xf] }
 0x360   : > { %10996 = vmatprep.mubr.msk.bf16.mxu1 %vm6039_vm13, %v14000_v26  ;;  %v5597_v39 = vrot.slane %v5595_v51, 4  ;;  %v5460_v59 = vsel %vm11892_vm4, %v14006_v45, %v13727_v21  ;;  %v5484_v1 = vsel %vm11892_vm4, %v5479_v24, %v13739_v4  ;;  %v5527_v56 = vrot.slane %v5526_v34, 4  ;;  %v14048_v24 = vld [vmem:[#allocation2 + $0x10] sm:$0xf]  ;;  %16603 = vst [vmem:[#allocation28_spill] sm:$0xff] %v14078_v2 }
 0x361   : > { %v5564_v41 = vor.u32 %v5563_v8, %v5560_v18  ;;  %v5450_v20 = vsel %vm11892_vm4, %v14002_v38, %v13963_v31  ;;  %v5493_v58 = vrot.slane %v5492_v3, 4  ;;  %v5517_v11 = vrot.slane %v5516_v42, 4  ;;  %16600 = vst [vmem:[#allocation25_spill] sm:$0xff] %v14048_v24  ;;  %v14195_v26 = vld [vmem:[#allocation2 + $0x6c] sm:$0xf] }
 0x362   : > { %v5551_v14 = vrot.slane %v5550_v13, 4  ;;  %v5474_v21 = vsel %vm11892_vm4, %v5469_v6, %v13996_v61  ;;  %v5575_v45 = vrot.slane %v5574_v55, 4  ;;  %v5588_v9 = vor.u32 %v5587_v17, %v5584_v53  ;;  %v14089_v6 = vld [vmem:[#allocation2 + $0x1c] sm:$0xf]  ;;  %16623 = vst [vmem:[#allocation47_spill] sm:$0xff] %v14195_v26 }
 0x363   : > { %v5598_v4 = vor.u32 %v5597_v39, %v14029_v37  ;;  %v14050_v15 = vcombine.low %v5450_v20, %v5460_v59  ;;  %v14052_v49 = vcombine.low %v5474_v21, %v5484_v1  ;;  %v5508_v31 = vsel %vm11892_vm4, %v5503_v7, %v13729_v44  ;;  %16606 = vst [vmem:[#allocation31_spill] sm:$0xff] %v14089_v6  ;;  %v14106_v59 = vld [vmem:[#allocation2 + $0x28] sm:$0xf]  ;;  %v14116_v20 = vld [vmem:[#allocation2 + $0x34] sm:$0xf] }
 0x364   : > { %v5541_v38 = vrot.slane %v5540_v5, 4  ;;  %v5532_v3 = vsel %vm11892_vm4, %v5527_v56, %v13756_v23  ;;  %v5565_v61 = vrot.slane %v5564_v41, 4  ;;  %v5655_v52 = vshrl.u32 %v14042_v22, 16  ;;  %16610 = vst [vmem:[#allocation34_spill] sm:$0xff] %v14106_v59  ;;  %16613 = vst [vmem:[#allocation37_spill] sm:$0xff] %v14116_v20 }
 0x365   : > { %16601 = vst [vmem:[#allocation26_spill] sm:$0xff] %v14050_v15  ;;  %16602 = vst [vmem:[#allocation27_spill] sm:$0xff] %v14052_v49  ;;  %v5658_v34 = vshll.u32 %v14042_v22, 16  ;;  %v5498_v18 = vsel %vm11892_vm4, %v5493_v58, %v14011_v27  ;;  %v5522_v8 = vsel %vm11892_vm4, %v5517_v11, %v14015_v57  ;;  %v5556_v44 = vsel %vm11892_vm4, %v5551_v14, %v13751_v47  ;;  %v14127_v21 = vld [vmem:[#allocation2 + $0x3c] sm:$0xf] }
 0x366   : > { %v5664_v33 = vshll.u32 %v14048_v24, 16  ;;  %v5580_v23 = vsel %vm11892_vm4, %v5575_v45, %v13787_v35  ;;  %v5589_v42 = vrot.slane %v5588_v9, 4  ;;  %v5599_v13 = vrot.slane %v5598_v4, 4  ;;  %v14091_v35 = vld [vmem:[#allocation2 + $0x24] sm:$0xf]  ;;  %16614 = vst [vmem:[#allocation38_spill] sm:$0xff] %v14127_v21 }
 0x367   : > { %10997 = vmatmul.mubr.msk.bf16.gmra.mrb[48].mxu1 %vm6039_vm13, %v14050_v15  ;;  %v5668_v27 = vshrl.u32 %v14048_v24, 16  ;;  %v14082_v57 = vcombine.low %v5498_v18, %v5508_v31  ;;  %v14084_v47 = vcombine.low %v5522_v8, %v5532_v3  ;;  %v5546_v51 = vsel %vm11892_vm4, %v5541_v38, %v14017_v48  ;;  %16607 = vst [vmem:[#allocation32_spill] sm:$0xff] %v14091_v35  ;;  %v14108_v48 = vld [vmem:[#allocation2 + $0x30] sm:$0xf]  ;;  %v14133_v38 = vld [vmem:[#allocation2 + $0x40] sm:$0xf] }
 0x368   : > { %11000 = vmatprep.mubr.msk.bf16.mxu1 %vm6039_vm13, %v14052_v49  ;;  %v16608_v55 = vshll.u32 %v13775_v25, 16  ;;  %v14097_v17 = vcombine.low %v5546_v51, %v5556_v44  ;;  %v5570_v7 = vsel %vm11892_vm4, %v5565_v61, %v14020_v12  ;;  %v14102_v5 = vrot.slane %v5655_v52, 4  ;;  %16611 = vst [vmem:[#allocation35_spill] sm:$0xff] %v14108_v48  ;;  %16615 = vst [vmem:[#allocation39_spill] sm:$0xff] %v14133_v38  ;;  %v14146_v44 = vld [vmem:[#allocation2 + $0x48] sm:$0xf] }
 0x369   : > { %16604 = vst [vmem:[#allocation29_spill] sm:$0xff] %v14082_v57  ;;  %16605 = vst [vmem:[#allocation30_spill] sm:$0xff] %v14084_v47  ;;  %v14104_v39 = vrot.slane %v5658_v34, 5  ;;  %v14110_v1 = vcombine.low %v5570_v7, %v5580_v23  ;;  %v14112_v56 = vrot.slane %v5664_v33, 5  ;;  %v5679_v25 = vshrl.u32 %v14078_v2, 16 }
 0x36a   : > { %v14095_v53 = vrot.slane %v16608_v55, 5  ;;  %16609 = vst [vmem:[#allocation33_spill] sm:$0xff] %v14097_v17  ;;  %v5682_v41 = vshll.u32 %v14078_v2, 16  ;;  %v5594_v12 = vsel %vm11892_vm4, %v5589_v42, %v14029_v37  ;;  %v5604_v58 = vsel %vm11892_vm4, %v5599_v13, %v13760_v36  ;;  %16617 = vst [vmem:[#allocation41_spill] sm:$0xff] %v14146_v44  ;;  %v14157_v51 = vld [vmem:[#allocation2 + $0x54] sm:$0xf] }
 0x36b   : > { %16612 = vst [vmem:[#allocation36_spill] sm:$0xff] %v14110_v1  ;;  %v14124_v11 = vrot.slane %v5668_v27, 4  ;;  %v5688_v14 = vshll.u32 %v14089_v6, 16  ;;  %v5692_v45 = vshrl.u32 %v14089_v6, 16  ;;  %v5703_v9 = vshrl.u32 %v14091_v35, 16  ;;  %16619 = vst [vmem:[#allocation43_spill] sm:$0xff] %v14157_v51 }
 0x36c   : > { %v5706_v4 = vshll.u32 %v14091_v35, 16  ;;  %v5712_v31 = vshll.u32 %v14106_v59, 16  ;;  %v5716_v37 = vshrl.u32 %v14106_v59, 16  ;;  %v5727_v36 = vshrl.u32 %v14108_v48, 16  ;;  %v14155_v27 = vld [vmem:[#allocation2 + $0x4c] sm:$0xf] }
 0x36d   : > { %v5730_v3 = vshll.u32 %v14108_v48, 16  ;;  %v5736_v61 = vshll.u32 %v14116_v20, 16  ;;  %v14139_v52 = vcombine.low %v5594_v12, %v5604_v58  ;;  %v14141_v34 = vrot.slane %v5679_v25, 4  ;;  %16618 = vst [vmem:[#allocation42_spill] sm:$0xff] %v14155_v27  ;;  %v14169_v12 = vld [vmem:[#allocation2 + $0x58] sm:$0xf] }
 0x36e   : > { %v14143_v18 = vrot.slane %v5682_v41, 5  ;;  %v5740_v8 = vshrl.u32 %v14116_v20, 16  ;;  %v14150_v33 = vrot.slane %v5688_v14, 5  ;;  %v5751_v23 = vshrl.u32 %v14127_v21, 16  ;;  %16620 = vst [vmem:[#allocation44_spill] sm:$0xff] %v14169_v12 }
 0x36f   : > { %16616 = vst [vmem:[#allocation40_spill] sm:$0xff] %v14139_v52  ;;  %11001 = vmatmul.mubr.msk.bf16.gmra.mrb[52].mxu1 %vm6039_vm13, %v14082_v57  ;;  %v5754_v42 = vshll.u32 %v14127_v21, 16  ;;  %v5760_v13 = vshll.u32 %v14133_v38, 16  ;;  %v14161_v55 = vrot.slane %v5692_v45, 4  ;;  %v14163_v7 = vrot.slane %v5703_v9, 4 }
 0x370   : > { %11004 = vmatprep.mubr.msk.bf16.mxu1 %vm6039_vm13, %v14084_v47  ;;  %v14165_v25 = vrot.slane %v5706_v4, 5  ;;  %v14167_v41 = vrot.slane %v5712_v31, 5  ;;  %v14171_v58 = vrot.slane %v5716_v37, 4  ;;  %v14173_v14 = vrot.slane %v5727_v36, 4  ;;  %v14179_v15 = vld [vmem:[#allocation2 + $0x60] sm:$0xf] }
 0x371   : > { %v14175_v57 = vrot.slane %v5730_v3, 5  ;;  %v14177_v49 = vrot.slane %v5736_v61, 5  ;;  %16621 = vst [vmem:[#allocation45_spill] sm:$0xff] %v14179_v15  ;;  %v14181_v45 = vrot.slane %v5740_v8, 4  ;;  %v5764_v9 = vshrl.u32 %v14133_v38, 16 }
 0x372   : > { %v5775_v4 = vshrl.u32 %v14146_v44, 16  ;;  %v5778_v31 = vshll.u32 %v14146_v44, 16  ;;  %v14186_v47 = vld [vmem:[#allocation2 + $0x64] sm:$0xf]  ;;  %v14188_v37 = vrot.slane %v5751_v23, 4  ;;  %v14190_v36 = vrot.slane %v5754_v42, 5 }
 0x373   : > { %16622 = vst [vmem:[#allocation46_spill] sm:$0xff] %v14186_v47  ;;  %v14192_v3 = vrot.slane %v5760_v13, 5  ;;  %v5784_v61 = vshll.u32 %v14155_v27, 16  ;;  %v5788_v8 = vshrl.u32 %v14155_v27, 16  ;;  %v5799_v29 = vshrl.u32 %v14157_v51, 16 }
 0x374   : > { %v5802_v43 = vshll.u32 %v14157_v51, 16  ;;  %v5808_v19 = vshll.u32 %v14169_v12, 16  ;;  %v5812_v23 = vshrl.u32 %v14169_v12, 16  ;;  %v5823_v42 = vshrl.u32 %v14179_v15, 16  ;;  %v14213_v27 = vld [vmem:[#allocation2 + $0x78] sm:$0xf] }
 0x375   : > { %v5826_v13 = vshll.u32 %v14179_v15, 16  ;;  %v5832_v40 = vshll.u32 %v14186_v47, 16  ;;  %v14207_v30 = vrot.slane %v5764_v9, 4  ;;  %v14209_v16 = vrot.slane %v5775_v4, 4  ;;  %16625 = vst [vmem:[#allocation49_spill] sm:$0xff] %v14213_v27 }
 0x376   : > { %v5836_v44 = vshrl.u32 %v14186_v47, 16  ;;  %v5847_v51 = vshrl.u32 %v14195_v26, 16  ;;  %v14217_v12 = vrot.slane %v5778_v31, 5  ;;  %v14219_v21 = vrot.slane %v5784_v61, 5  ;;  %v14223_v38 = vld [vmem:[#allocation2 + $0x7c] sm:$0xf] }
 0x377   : > { %11005 = vmatmul.mubr.msk.bf16.gmra.mrb[56].mxu1 %vm6039_vm13, %v14097_v17  ;;  %v5850_v15 = vshll.u32 %v14195_v26, 16  ;;  %v5856_v9 = vshll.u32 %v14201_v50, 16  ;;  %16626 = vst [vmem:[#allocation50_spill] sm:$0xff] %v14223_v38  ;;  %v14225_v4 = vld [vmem:[#allocation2 + $0x84] sm:$0xf]  ;;  %v14229_v47 = vrot.slane %v5788_v8, 4 }
 0x378   : > { %16627 = vst [vmem:[#allocation51_spill] sm:$0xff] %v14225_v4  ;;  %11008 = vmatprep.mubr.msk.bf16.mxu1 %vm6039_vm13, %v14110_v1  ;;  %v14231_v48 = vrot.slane %v5799_v29, 4  ;;  %v14233_v17 = vrot.slane %v5802_v43, 5  ;;  %v14235_v31 = vrot.slane %v5808_v19, 5  ;;  %v14237_v61 = vld [vmem:[#allocation2 + $0x88] sm:$0xf] }
 0x379   : > { %16628 = vst [vmem:[#allocation52_spill] sm:$0xff] %v14237_v61  ;;  %v14239_v26 = vrot.slane %v5812_v23, 4  ;;  %v14241_v20 = vrot.slane %v5823_v42, 4  ;;  %v14243_v35 = vrot.slane %v5826_v13, 5  ;;  %v14245_v59 = vrot.slane %v5832_v40, 5 }
 0x37a   : > { %v14247_v2 = vld [vmem:[#allocation2 + $0x90] sm:$0xf]  ;;  %v14249_v8 = vrot.slane %v5836_v44, 4  ;;  %v14251_v29 = vrot.slane %v5847_v51, 4  ;;  %v5860_v43 = vshrl.u32 %v14201_v50, 16  ;;  %v5871_v19 = vshrl.u32 %v14213_v27, 16 }
 0x37b   : > { %16629 = vst [vmem:[#allocation53_spill] sm:$0xff] %v14245_v59  ;;  %16630 = vst [vmem:[#allocation54_spill] sm:$0xff] %v14247_v2  ;;  %v14255_v1 = vld [vmem:[#allocation2 + $0x94] sm:$0xf]  ;;  %v14257_v23 = vrot.slane %v5850_v15, 5  ;;  %v14259_v42 = vrot.slane %v5856_v9, 5 }
 0x37c   : > { %16631 = vst [vmem:[#allocation55_spill] sm:$0xff] %v14249_v8  ;;  %16632 = vst [vmem:[#allocation56_spill] sm:$0xff] %v14251_v29  ;;  %v5874_v13 = vshll.u32 %v14213_v27, 16  ;;  %v5880_v40 = vshll.u32 %v14223_v38, 16  ;;  %v14263_v6 = vld [vmem:[#allocation2 + $0x9c] sm:$0xf] }
 0x37d   : > { %16633 = vst [vmem:[#allocation57_spill] sm:$0xff] %v14255_v1  ;;  %16634 = vst [vmem:[#allocation58_spill] sm:$0xff] %v14257_v23  ;;  %v5884_v44 = vshrl.u32 %v14223_v38, 16  ;;  %v5895_v51 = vshrl.u32 %v14225_v4, 16  ;;  %v5898_v50 = vshll.u32 %v14225_v4, 16  ;;  %v5904_v22 = vshll.u32 %v14237_v61, 16 }
 0x37e   : > { %16635 = vst [vmem:[#allocation59_spill] sm:$0xff] %v14259_v42  ;;  %16636 = vst [vmem:[#allocation60_spill] sm:$0xff] %v14263_v6  ;;  %v14269_v24 = vld [vmem:[#allocation2 + $0xa0] sm:$0xf]  ;;  %v5908_v15 = vshrl.u32 %v14237_v61, 16  ;;  %v5919_v9 = vshrl.u32 %v14247_v2, 16 }
 0x37f   : > { %16637 = vst [vmem:[#allocation61_spill] sm:$0xff] %v14269_v24  ;;  %v5922_v27 = vshll.u32 %v14247_v2, 16  ;;  %v5928_v62 = vshll.u32 %v14255_v1, 16  ;;  %v14275_v42 = vrot.slane %v5860_v43, 4  ;;  %v14277_v23 = vrot.slane %v5871_v19, 4  ;;  %11009 = vmatmul.mubr.msk.bf16.gmra.mrb[60].mxu1 %vm6039_vm13, %v14139_v52 }
 0x380   : > { %v5932_v38 = vshrl.u32 %v14255_v1, 16  ;;  %v5943_v4 = vshrl.u32 %v14263_v6, 16  ;;  %v14283_v29 = vrot.slane %v5874_v13, 5  ;;  %v14285_v61 = vrot.slane %v5880_v40, 5  ;;  %v14289_v59 = vld [vmem:[#allocation2 + $0xa8] sm:$0xf]  ;;  %11014 = vmatprep.mubr.msk.bf16.mxu1 %vm6039_vm13, %v13665_v63 }
 0x381   : > { %16638 = vst [vmem:[#allocation62_spill] sm:$0xff] %v14277_v23  ;;  %v5946_v8 = vshll.u32 %v14263_v6, 16  ;;  %v5952_v2 = vshll.u32 %v14269_v24, 16  ;;  %16641 = vst [vmem:[#allocation65_spill] sm:$0xff] %v14289_v59  ;;  %v14293_v43 = vrot.slane %v5884_v44, 4  ;;  %v14295_v19 = vrot.slane %v5895_v51, 4 }
 0x382   : > { %16639 = vst [vmem:[#allocation63_spill] sm:$0xff] %v14283_v29  ;;  %16640 = vst [vmem:[#allocation64_spill] sm:$0xff] %v14285_v61  ;;  %v14297_v1 = vrot.slane %v5898_v50, 5  ;;  %v14299_v52 = vrot.slane %v5904_v22, 5  ;;  %v14301_v13 = vld [vmem:[#allocation2 + $0xac] sm:$0xf] }
 0x383   : > { %16642 = vst [vmem:[#allocation66_spill] sm:$0xff] %v14301_v13  ;;  %v14303_v40 = vrot.slane %v5908_v15, 4  ;;  %v14305_v6 = vrot.slane %v5919_v9, 4  ;;  %v14307_v61 = vrot.slane %v5922_v27, 5  ;;  %v14309_v29 = vrot.slane %v5928_v62, 5 }
 0x384   : > { %v14311_v23 = vld [vmem:[#allocation2 + $0xb4] sm:$0xf]  ;;  %v14313_v44 = vrot.slane %v5932_v38, 4  ;;  %v14315_v51 = vrot.slane %v5943_v4, 4  ;;  %v5956_v50 = vshrl.u32 %v14269_v24, 16  ;;  %v5967_v22 = vshrl.u32 %v14289_v59, 16 }
 0x385   : > { %16643 = vst [vmem:[#allocation67_spill] sm:$0xff] %v14309_v29  ;;  %16644 = vst [vmem:[#allocation68_spill] sm:$0xff] %v14311_v23  ;;  %v14319_v63 = vld [vmem:[#allocation2 + $0xb8] sm:$0xf]  ;;  %v14321_v15 = vrot.slane %v5946_v8, 5  ;;  %v14323_v9 = vrot.slane %v5952_v2, 5  ;;  %v5661_v24 = vor.u32 %v14104_v39, %v14102_v5  ;;  %v5671_v2 = vor.u32 %v14124_v11, %v14112_v56 }
 0x386   : > { %16645 = vst [vmem:[#allocation69_spill] sm:$0xff] %v14313_v44  ;;  %16646 = vst [vmem:[#allocation70_spill] sm:$0xff] %v14315_v51  ;;  %v5970_v27 = vshll.u32 %v14289_v59, 16  ;;  %v5976_v62 = vshll.u32 %v14301_v13, 16  ;;  %v5639_v29 = vld [vmem:[#allocation2 + $0x20] sm:$0x1]  ;;  %v5685_v59 = vor.u32 %v14143_v18, %v14141_v34  ;;  %v5719_v34 = vor.u32 %v14171_v58, %v14167_v41 }
 0x387   : > { %16647 = vst [vmem:[#allocation71_spill] sm:$0xff] %v14321_v15  ;;  %16648 = vst [vmem:[#allocation72_spill] sm:$0xff] %v14323_v9  ;;  %v5980_v38 = vshrl.u32 %v14301_v13, 16  ;;  %v5991_v4 = vshrl.u32 %v14311_v23, 16  ;;  %v5640_v51 = vld [vmem:[#allocation2 + $0x2c] sm:$0x1]  ;;  %v5709_v9 = vor.u32 %v14165_v25, %v14163_v7  ;;  %11015 = vmatmul.mubr.msk.bf16.vlgmr.msra.gmra.mrb[32].mxu1 %vm6039_vm13, %v13661_v54 }
 0x388   : > { %v5994_v44 = vshll.u32 %v14311_v23, 16  ;;  %v6000_v8 = vshll.u32 %v14319_v63, 16  ;;  %v11782_v15 = vmov 0   ;;  %v14342_v5 = vld [vmem:[%s16374_s4 + $0xc] sm:$0xf]  ;;  %v5662_v39 = vrot.slane %v5661_v24, 4  ;;  %11047 = vmatpush3.bf16.msra.mxu1 %v13947_v0  ;;  %11018 = vmatprep.mubr.msk.bf16.mxu1 %vm6039_vm13, %v13701_v28 }
 0x389   : > { %4970 = vst.msk [vmem:[#allocation2 + $0xc0] sm:$0xf] %vm4969_vm12, %v11782_v15  ;;  %4971 = vst.msk [vmem:[#allocation2 + $0xc4] sm:$0xf] %vm4969_vm12, %v11782_v15  ;;  %v5695_v23 = vor.u32 %v14161_v55, %v14150_v33  ;;  %v5698_v13 = vshll.u32 %v5639_v29, 16  ;;  %v5672_v11 = vrot.slane %v5671_v2, 4  ;;  %11679 = vmatprep.subr.msk.bf16.mxu1 %vm6088_vm8, %v14342_v5 }
 0x38a   : > { %v5686_v15 = vrot.slane %v5685_v59, 4  ;;  %v5722_v18 = vshll.u32 %v5640_v51, 16  ;;  %v5667_v24 = vsel %vm11892_vm4, %v5662_v39, %v14112_v56  ;;  %v5710_v25 = vrot.slane %v5709_v9, 4  ;;  %v5641_v51 = vld [vmem:[#allocation2 + $0x38] sm:$0x1] }
 0x38b   : > { %v5696_v55 = vrot.slane %v5695_v23, 4  ;;  %v5700_v7 = vrot.slane %v5698_v13, 5  ;;  %v5677_v59 = vsel %vm11892_vm4, %v5672_v11, %v14095_v53  ;;  %v5720_v58 = vrot.slane %v5719_v34, 4 }
 0x38c   : > { %v5691_v0 = vsel %vm11892_vm4, %v5686_v15, %v14150_v33  ;;  %v5724_v29 = vrot.slane %v5722_v18, 5  ;;  %v14366_v2 = vcombine.low %v5667_v24, %v5677_v59  ;;  %v5715_v23 = vsel %vm11892_vm4, %v5710_v25, %v14167_v41 }
 0x38d   : > { %v5701_v56 = vsel %vm11892_vm4, %v5696_v55, %v5700_v7  ;;  %v5733_v13 = vor.u32 %v14175_v57, %v14173_v14  ;;  %v6004_v53 = vshrl.u32 %v14319_v63, 16  ;;  %v5743_v39 = vor.u32 %v14181_v45, %v14177_v49  ;;  %v5642_v55 = vld [vmem:[#allocation2 + $0x44] sm:$0x1] }
 0x38e   : > { %v14376_v9 = vcombine.low %v5691_v0, %v5701_v56  ;;  %v5725_v33 = vsel %vm11892_vm4, %v5720_v58, %v5724_v29  ;;  %v5746_v34 = vshll.u32 %v5641_v51, 16  ;;  %v5757_v41 = vor.u32 %v14190_v36, %v14188_v37  ;;  %v5643_v0 = vld [vmem:[#allocation2 + $0x50] sm:$0x1]  ;;  %v5644_v29 = vld [vmem:[#allocation2 + $0x5c] sm:$0x1] }
 0x38f   : > { %v14382_v11 = vcombine.low %v5715_v23, %v5725_v33  ;;  %v5734_v15 = vrot.slane %v5733_v13, 4  ;;  %v14386_v18 = vrot.slane %v5956_v50, 4  ;;  %v14388_v57 = vrot.slane %v5967_v22, 4  ;;  %11019 = vmatmul.mubr.msk.bf16.gmra.mrb[36].mxu1 %vm6039_vm13, %v13697_v46 }
 0x390   : > { %v14390_v14 = vrot.slane %v5970_v27, 5  ;;  %v14392_v24 = vrot.slane %v5976_v62, 5  ;;  %v14394_v7 = vrot.slane %v5980_v38, 4  ;;  %v5744_v25 = vrot.slane %v5743_v39, 4  ;;  %11022 = vmatprep.mubr.msk.bf16.mxu1 %vm6039_vm13, %v13736_v60 }
 0x391   : > { %v5739_v45 = vsel %vm11892_vm4, %v5734_v15, %v14177_v49  ;;  %v5748_v59 = vrot.slane %v5746_v34, 5  ;;  %v14401_v37 = vrot.slane %v5991_v4, 4  ;;  %v14403_v36 = vrot.slane %v5994_v44, 5  ;;  %v5645_v15 = vld [vmem:[#allocation2 + $0x68] sm:$0x1] }
 0x392   : > { %v14405_v50 = vrot.slane %v6000_v8, 5  ;;  %v14407_v22 = vrot.slane %v6004_v53, 4  ;;  %v5758_v27 = vrot.slane %v5757_v41, 4  ;;  %v5767_v62 = vor.u32 %v14207_v30, %v14192_v3 }
 0x393   : > { %v5749_v49 = vsel %vm11892_vm4, %v5744_v25, %v5748_v59  ;;  %v5770_v38 = vshll.u32 %v5642_v55, 16  ;;  %v5781_v44 = vor.u32 %v14217_v12, %v14209_v16  ;;  %v5791_v4 = vor.u32 %v14229_v47, %v14219_v21 }
 0x394   : > { %v14415_v58 = vcombine.low %v5739_v45, %v5749_v49  ;;  %v5794_v8 = vshll.u32 %v5643_v0, 16  ;;  %v5763_v51 = vsel %vm11892_vm4, %v5758_v27, %v14192_v3  ;;  %v5768_v56 = vrot.slane %v5767_v62, 4  ;;  %v16651_v49 = vld [vmem:[#allocation56_spill] sm:$0xff]  ;;  %v16652_v27 = vld [vmem:[#allocation58_spill] sm:$0xff] }
 0x395   : > { %v5772_v23 = vrot.slane %v5770_v38, 5  ;;  %v5805_v30 = vor.u32 %v14233_v17, %v14231_v48  ;;  %v5782_v13 = vrot.slane %v5781_v44, 4  ;;  %v5792_v53 = vrot.slane %v5791_v4, 4  ;;  %v16653_v38 = vld [vmem:[#allocation59_spill] sm:$0xff] }
 0x396   : > { %v5796_v33 = vrot.slane %v5794_v8, 5  ;;  %v5815_v16 = vor.u32 %v14239_v26, %v14235_v31  ;;  %v5818_v39 = vshll.u32 %v5644_v29, 16  ;;  %v5829_v3 = vor.u32 %v14243_v35, %v14241_v20  ;;  %v5646_v26 = vld [vmem:[#allocation2 + $0x74] sm:$0x1]  ;;  %v16649_v35 = vld [vmem:[#allocation53_spill] sm:$0xff]  ;;  %v16650_v20 = vld [vmem:[#allocation55_spill] sm:$0xff] }
 0x397   : > { %v5773_v47 = vsel %vm11892_vm4, %v5768_v56, %v5772_v23  ;;  %v5806_v12 = vrot.slane %v5805_v30, 4  ;;  %v5787_v17 = vsel %vm11892_vm4, %v5782_v13, %v14219_v21  ;;  %11023 = vmatmul.mubr.msk.bf16.gmra.mrb[40].mxu1 %vm6039_vm13, %v13732_v32  ;;  %v5839_v0 = vor.u32 %v16650_v20, %v16649_v35  ;;  %v16654_v4 = vld [vmem:[#allocation7_spill] sm:$0xff]  ;;  %v16655_v56 = vld [vmem:[#allocation62_spill] sm:$0xff] }
 0x398   : > { %v14432_v34 = vcombine.low %v5763_v51, %v5773_v47  ;;  %v5797_v48 = vsel %vm11892_vm4, %v5792_v53, %v5796_v33  ;;  %v5816_v41 = vrot.slane %v5815_v16, 4  ;;  %v5820_v25 = vrot.slane %v5818_v39, 5  ;;  %11026 = vmatprep.mubr.msk.bf16.mxu1 %vm6039_vm13, %v16654_v4  ;;  %v5647_v51 = vld [vmem:[#allocation2 + $0x80] sm:$0x1]  ;;  %v16656_v23 = vld [vmem:[#allocation63_spill] sm:$0xff]  ;;  %v16658_v39 = vld [vmem:[#allocation64_spill] sm:$0xff] }
 0x399   : > { %v14439_v55 = vcombine.low %v5787_v17, %v5797_v48  ;;  %v5811_v45 = vsel %vm11892_vm4, %v5806_v12, %v14235_v31  ;;  %v5830_v59 = vrot.slane %v5829_v3, 4  ;;  %v5842_v21 = vshll.u32 %v5645_v15, 16 }
 0x39a   : > { %v5853_v62 = vor.u32 %v16652_v27, %v16651_v49  ;;  %v5863_v44 = vor.u32 %v14275_v42, %v16653_v38  ;;  %v5821_v31 = vsel %vm11892_vm4, %v5816_v41, %v5820_v25  ;;  %v5866_v29 = vshll.u32 %v5646_v26, 16  ;;  %v5648_v41 = vld [vmem:[#allocation2 + $0x8c] sm:$0x1] }
 0x39b   : > { %v5835_v8 = vsel %vm11892_vm4, %v5830_v59, %v16649_v35  ;;  %v5877_v30 = vor.u32 %v16656_v23, %v16655_v56  ;;  %v14461_v13 = vcombine.low %v5811_v45, %v5821_v31  ;;  %v5840_v53 = vrot.slane %v5839_v0, 4  ;;  %v5649_v45 = vld [vmem:[#allocation2 + $0x98] sm:$0x1]  ;;  %v5650_v31 = vld [vmem:[#allocation2 + $0xa4] sm:$0x1]  ;;  %v16665_v23 = vld [vmem:[#allocation71_spill] sm:$0xff] }
 0x39c   : > { %v5844_v33 = vrot.slane %v5842_v21, 5  ;;  %v5854_v42 = vrot.slane %v5853_v62, 4  ;;  %v5864_v16 = vrot.slane %v5863_v44, 4  ;;  %v5868_v47 = vrot.slane %v5866_v29, 5  ;;  %v16662_v62 = vld [vmem:[#allocation69_spill] sm:$0xff]  ;;  %v16664_v56 = vld [vmem:[#allocation70_spill] sm:$0xff] }
 0x39d   : > { %16657 = vst [vmem:[#allocation53_spill] sm:$0xff] %v14461_v13  ;;  %v5878_v12 = vrot.slane %v5877_v30, 4  ;;  %v5887_v15 = vor.u32 %v14293_v43, %v16658_v39  ;;  %v5890_v48 = vshll.u32 %v5647_v51, 16  ;;  %v5901_v26 = vor.u32 %v14297_v1, %v14295_v19  ;;  %v16661_v19 = vld [vmem:[#allocation67_spill] sm:$0xff]  ;;  %v16750_v13 = vld [vmem:[#allocation29_spill] sm:$0xff] }
 0x39e   : > { %v5845_v3 = vsel %vm11892_vm4, %v5840_v53, %v5844_v33  ;;  %v5859_v17 = vsel %vm11892_vm4, %v5854_v42, %v16653_v38  ;;  %v5869_v59 = vsel %vm11892_vm4, %v5864_v16, %v5868_v47  ;;  %v5911_v49 = vor.u32 %v14303_v40, %v14299_v52 }
 0x39f   : > { %v14472_v25 = vcombine.low %v5835_v8, %v5845_v3  ;;  %v5883_v43 = vsel %vm11892_vm4, %v5878_v12, %v16658_v39  ;;  %v5888_v35 = vrot.slane %v5887_v15, 4  ;;  %v14479_v20 = vcombine.low %v5859_v17, %v5869_v59  ;;  %v16663_v8 = vld [vmem:[#allocation6_spill] sm:$0xff]  ;;  %v16668_v12 = vld [vmem:[#allocation72_spill] sm:$0xff]  ;;  %v5651_v17 = vld [vmem:[#allocation2 + $0xb0] sm:$0x1] }
 0x3a0   : > { %v5892_v0 = vrot.slane %v5890_v48, 5  ;;  %v5902_v21 = vrot.slane %v5901_v26, 4  ;;  %v5914_v27 = vshll.u32 %v5648_v41, 16  ;;  %v5925_v1 = vor.u32 %v14307_v61, %v14305_v6  ;;  %11027 = vmatmul.mubr.msk.bf16.gmra.mrb[44].mxu1 %vm6039_vm13, %v16663_v8  ;;  %v16666_v6 = vld [vmem:[#allocation9_spill] sm:$0xff] }
 0x3a1   : > { %16659 = vst [vmem:[#allocation55_spill] sm:$0xff] %v14472_v25  ;;  %16660 = vst [vmem:[#allocation56_spill] sm:$0xff] %v14479_v20  ;;  %v5935_v38 = vor.u32 %v16662_v62, %v16661_v19  ;;  %v5938_v44 = vshll.u32 %v5649_v45, 16  ;;  %v5912_v40 = vrot.slane %v5911_v49, 4  ;;  %v5949_v30 = vor.u32 %v16665_v23, %v16664_v56  ;;  %11030 = vmatprep.mubr.msk.bf16.mxu1 %vm6039_vm13, %v16666_v6  ;;  %v5652_v26 = vld [vmem:[#allocation2 + $0xbc] sm:$0x1] }
 0x3a2   : > { %v5893_v29 = vsel %vm11892_vm4, %v5888_v35, %v5892_v0  ;;  %v5907_v51 = vsel %vm11892_vm4, %v5902_v21, %v14299_v52  ;;  %v5916_v53 = vrot.slane %v5914_v27, 5  ;;  %v5926_v33 = vrot.slane %v5925_v1, 4  ;;  %v16671_v62 = vld [vmem:[#allocation8_spill] sm:$0xff]  ;;  %v16676_v23 = vld [vmem:[#allocation10_spill] sm:$0xff]  ;;  %v16747_v20 = vld [vmem:[#allocation23_spill] sm:$0xff] }
 0x3a3   : > { %v14498_v61 = vcombine.low %v5883_v43, %v5893_v29  ;;  %v5936_v42 = vrot.slane %v5935_v38, 4  ;;  %v5940_v16 = vrot.slane %v5938_v44, 5  ;;  %v5950_v47 = vrot.slane %v5949_v30, 4  ;;  %v16677_v30 = vld [vmem:[#allocation14_spill] sm:$0xff] }
 0x3a4   : > { %v5959_v39 = vor.u32 %v14386_v18, %v16668_v12  ;;  %v5962_v15 = vshll.u32 %v5650_v31, 16  ;;  %v5917_v52 = vsel %vm11892_vm4, %v5912_v40, %v5916_v53  ;;  %v5931_v3 = vsel %vm11892_vm4, %v5926_v33, %v16661_v19  ;;  %v16678_v53 = vld [vmem:[#allocation13_spill] sm:$0xff]  ;;  %v16679_v33 = vld [vmem:[#allocation16_spill] sm:$0xff] }
 0x3a5   : > { %16667 = vst [vmem:[#allocation58_spill] sm:$0xff] %v14498_v61  ;;  %v5973_v48 = vor.u32 %v14390_v14, %v14388_v57  ;;  %v5983_v41 = vor.u32 %v14394_v7, %v14392_v24  ;;  %v14511_v45 = vcombine.low %v5907_v51, %v5917_v52  ;;  %v5941_v18 = vsel %vm11892_vm4, %v5936_v42, %v5940_v16  ;;  %v16681_v42 = vld [vmem:[#allocation24_spill] sm:$0xff] }
 0x3a6   : > { %v5955_v59 = vsel %vm11892_vm4, %v5950_v47, %v16668_v12  ;;  %v5960_v43 = vrot.slane %v5959_v39, 4  ;;  %v14518_v35 = vcombine.low %v5931_v3, %v5941_v18  ;;  %v5964_v0 = vrot.slane %v5962_v15, 5  ;;  %v16682_v47 = vld [vmem:[#allocation15_spill] sm:$0xff]  ;;  %v16684_v39 = vld [vmem:[#allocation28_spill] sm:$0xff]  ;;  %v16685_v3 = vld [vmem:[#allocation34_spill] sm:$0xff] }
 0x3a7   : > { %16669 = vst [vmem:[#allocation59_spill] sm:$0xff] %v14511_v45  ;;  %v5974_v21 = vrot.slane %v5973_v48, 4  ;;  %v5984_v49 = vrot.slane %v5983_v41, 4  ;;  %v5986_v57 = vshll.u32 %v5651_v17, 16  ;;  %v5997_v14 = vor.u32 %v14403_v36, %v14401_v37  ;;  %v16673_v37 = vld [vmem:[#allocation11_spill] sm:$0xff]  ;;  %v16686_v17 = vld [vmem:[#allocation32_spill] sm:$0xff] }
 0x3a8   : > { %16670 = vst [vmem:[#allocation7_spill] sm:$0xff] %v14518_v35  ;;  %v6007_v7 = vor.u32 %v14407_v22, %v14405_v50  ;;  %v6010_v27 = vshll.u32 %v5652_v26, 16  ;;  %v5965_v1 = vsel %vm11892_vm4, %v5960_v43, %v5964_v0  ;;  %11031 = vmatmul.mubr.msk.bf16.gmra.mrb[48].mxu1 %vm6039_vm13, %v16671_v62  ;;  %v16683_v12 = vld [vmem:[#allocation31_spill] sm:$0xff]  ;;  %v6978_v52 = vsel %vm6088_vm8, %v14342_v5, 0  ;;  %v10212_v41 = vld [vmem:[%s16374_s4 + $0x18] sm:$0xf] }
 0x3a9   : > { %v5979_v19 = vsel %vm11892_vm4, %v5974_v21, %v14392_v24  ;;  %v14531_v38 = vcombine.low %v5955_v59, %v5965_v1  ;;  %v5988_v44 = vrot.slane %v5986_v57, 5  ;;  %v5998_v31 = vrot.slane %v5997_v14, 4  ;;  %11034 = vmatprep.mubr.msk.bf16.mxu1 %vm6039_vm13, %v16673_v37  ;;  %v16687_v26 = vld [vmem:[#allocation37_spill] sm:$0xff]  ;;  %v16688_v18 = vld [vmem:[#allocation35_spill] sm:$0xff]  ;;  %v16690_v43 = vld [vmem:[#allocation38_spill] sm:$0xff] }
 0x3aa   : > { %v6008_v29 = vrot.slane %v6007_v7, 4  ;;  %v6012_v36 = vrot.slane %v6010_v27, 5  ;;  %v14564_v15 = vcombine.low %v16684_v39, %v16683_v12  ;;  %v14570_v48 = vcombine.low %v16686_v17, %v16685_v3  ;;  %v16689_v59 = vld [vmem:[#allocation39_spill] sm:$0xff]  ;;  %v16691_v21 = vld [vmem:[#allocation42_spill] sm:$0xff]  ;;  %v16693_v14 = vld [vmem:[#allocation44_spill] sm:$0xff] }
 0x3ab   : > { %16672 = vst [vmem:[#allocation62_spill] sm:$0xff] %v14531_v38  ;;  %v5989_v22 = vsel %vm11892_vm4, %v5984_v49, %v5988_v44  ;;  %v6003_v51 = vsel %vm11892_vm4, %v5998_v31, %v14405_v50  ;;  %v16680_v50 = vld [vmem:[#allocation25_spill] sm:$0xff]  ;;  %v14582_v5 = vcombine.low %v16688_v18, %v16687_v26  ;;  %v14586_v0 = vcombine.low %v16690_v43, %v16689_v59  ;;  %v16694_v7 = vld [vmem:[#allocation43_spill] sm:$0xff]  ;;  %v16707_v3 = vld [vmem:[#allocation50_spill] sm:$0xff] }
 0x3ac   : > { %v14540_v24 = vcombine.low %v5979_v19, %v5989_v22  ;;  %v6013_v40 = vsel %vm11892_vm4, %v6008_v29, %v6012_v36  ;;  %v14556_v16 = vcombine.low %v16681_v42, %v16680_v50  ;;  %v16692_v49 = vld [vmem:[#allocation41_spill] sm:$0xff]  ;;  %v14598_v27 = vcombine.low %v16694_v7, %v16693_v14  ;;  %v16699_v29 = vld [vmem:[#allocation46_spill] sm:$0xff]  ;;  %v16709_v18 = vld [vmem:[#allocation52_spill] sm:$0xff] }
 0x3ad   : > { %v14544_v56 = vcombine.low %v6003_v51, %v6013_v40  ;;  %v14594_v57 = vcombine.low %v16692_v49, %v16691_v21  ;;  %v16700_v36 = vld [vmem:[#allocation45_spill] sm:$0xff]  ;;  %v16701_v51 = vld [vmem:[#allocation48_spill] sm:$0xff]  ;;  %v16702_v40 = vld [vmem:[#allocation47_spill] sm:$0xff]  ;;  %vm9437_vm12 = vcmask 916480  }
 0x3ae   : > { %16674 = vst [vmem:[#allocation63_spill] sm:$0xff] %v14540_v24  ;;  %v14614_v22 = vcombine.low %v16700_v36, %v16699_v29  ;;  %v14618_v50 = vcombine.low %v16702_v40, %v16701_v51  ;;  %v16708_v17 = vld [vmem:[#allocation49_spill] sm:$0xff]  ;;  %v16710_v59 = vld [vmem:[#allocation51_spill] sm:$0xff]  ;;  %v16716_v36 = vld [vmem:[#allocation54_spill] sm:$0xff] }
 0x3af   : > { %16675 = vst [vmem:[#allocation64_spill] sm:$0xff] %v14544_v56  ;;  %v14634_v26 = vcombine.low %v16708_v17, %v16707_v3  ;;  %v14638_v43 = vcombine.low %v16710_v59, %v16709_v18  ;;  %v16715_v29 = vld [vmem:[#allocation57_spill] sm:$0xff]  ;;  %v16718_v3 = vld [vmem:[#allocation60_spill] sm:$0xff]  ;;  %v16746_v35 = vld [vmem:[#allocation22_spill] sm:$0xff] }
 0x3b0   : > { %11035 = vmatmul.mubr.msk.bf16.gmra.mrb[52].mxu1 %vm6039_vm13, %v16676_v23  ;;  %v14654_v51 = vcombine.low %v16716_v36, %v16715_v29  ;;  %v16717_v40 = vld [vmem:[#allocation61_spill] sm:$0xff]  ;;  %v16723_v29 = vld [vmem:[#allocation66_spill] sm:$0xff] }
 0x3b1   : > { %11038 = vmatprep.mubr.msk.bf16.mxu1 %vm6039_vm13, %v16677_v30  ;;  %v14658_v17 = vcombine.low %v16718_v3, %v16717_v40  ;;  %v16724_v36 = vld [vmem:[#allocation65_spill] sm:$0xff]  ;;  %v16725_v40 = vld [vmem:[#allocation68_spill] sm:$0xff] }
 0x3b2   : > { %v14678_v3 = vcombine.low %v16725_v40, %v14319_v63  ;;  %v16730_v40 = vld [vmem:[#allocation5_spill] sm:$0xff] }
 0x3b8   : > { %11039 = vmatmul.mubr.msk.bf16.gmra.mrb[56].mxu1 %vm6039_vm13, %v16678_v53 }
 0x3b9   : > { %11042 = vmatprep.mubr.msk.bf16.mxu1 %vm6039_vm13, %v16679_v33 }
 0x3c0   : > { %11043 = vmatmul.mubr.msk.bf16.gmra.mrb[60].mxu1 %vm6039_vm13, %v16682_v47 }
 0x3c1   : > { %11048 = vmatprep.mubr.msk.bf16.mxu1 %vm6039_vm13, %v14556_v16 }
 0x3c8   : > { %11049 = vmatmul.mubr.msk.bf16.vlgmr.msra.gmra.mrb[64].mxu1 %vm6039_vm13, %v14564_v15 }
 0x3c9   : > { %11081 = vmatpush3.bf16.msra.mxu1 %v6978_v52  ;;  %11052 = vmatprep.mubr.msk.bf16.mxu1 %vm6039_vm13, %v14570_v48 }
 0x3ca   : > { %11680 = vmatprep.subr.msk.bf16.mxu1 %vm6088_vm8, %v10212_v41 }
 0x3d0   : > { %11053 = vmatmul.mubr.msk.bf16.gmra.mrb[68].mxu1 %vm6039_vm13, %v14582_v5 }
 0x3d1   : > { %11056 = vmatprep.mubr.msk.bf16.mxu1 %vm6039_vm13, %v14586_v0 }
 0x3d8   : > { %11057 = vmatmul.mubr.msk.bf16.gmra.mrb[72].mxu1 %vm6039_vm13, %v14594_v57 }
 0x3d9   : > { %11060 = vmatprep.mubr.msk.bf16.mxu1 %vm6039_vm13, %v14598_v27 }
 0x3da   : > { %v14604_v1 = vpop.f32.mrb[0].mxu1 }
 0x3db   : > { %16695 = vst [vmem:[#allocation67_spill] sm:$0xff] %v14604_v1  ;;  %v14606_v19 = vpop.f32.mrb[1].mxu1 }
 0x3dc   : > { %16696 = vst [vmem:[#allocation69_spill] sm:$0xff] %v14606_v19  ;;  %v14608_v44 = vpop.f32.mrb[2].mxu1  ;;  %v16745_v19 = vld [vmem:[#allocation21_spill] sm:$0xff] }
 0x3dd   : > { %16697 = vst [vmem:[#allocation6_spill] sm:$0xff] %v14608_v44  ;;  %v14610_v31 = vpop.f32.mrb[3].mxu1 }
 0x3de   : > { %16698 = vst [vmem:[#allocation70_spill] sm:$0xff] %v14610_v31  ;;  %v16742_v31 = vld [vmem:[#allocation18_spill] sm:$0xff] }
 0x3e0   : > { %11061 = vmatmul.mubr.msk.bf16.gmra.mrb[76].mxu1 %vm6039_vm13, %v14614_v22 }
 0x3e1   : > { %11064 = vmatprep.mubr.msk.bf16.mxu1 %vm6039_vm13, %v14618_v50 }
 0x3e2   : > { %v14624_v42 = vpop.f32.mrb[4].mxu1 }
 0x3e3   : > { %16703 = vst [vmem:[#allocation71_spill] sm:$0xff] %v14624_v42  ;;  %v14626_v12 = vpop.f32.mrb[5].mxu1  ;;  %v16741_v42 = vld [vmem:[#allocation17_spill] sm:$0xff] }
 0x3e4   : > { %16704 = vst [vmem:[#allocation9_spill] sm:$0xff] %v14626_v12  ;;  %v14628_v39 = vpop.f32.mrb[6].mxu1  ;;  %v7146_v12 = vsel %vm6088_vm8, %v10212_v41, 0 }
 0x3e5   : > { %16705 = vst [vmem:[#allocation72_spill] sm:$0xff] %v14628_v39  ;;  %v14630_v52 = vpop.f32.mrb[7].mxu1 }
 0x3e6   : > { %16706 = vst [vmem:[#allocation8_spill] sm:$0xff] %v14630_v52 }
 0x3e8   : > { %11065 = vmatmul.mubr.msk.bf16.gmra.mrb[80].mxu1 %vm6039_vm13, %v14634_v26 }
 0x3e9   : > { %11068 = vmatprep.mubr.msk.bf16.mxu1 %vm6039_vm13, %v14638_v43 }
 0x3ea   : > { %v14644_v21 = vpop.f32.mrb[8].mxu1 }
 0x3eb   : > { %16711 = vst [vmem:[#allocation11_spill] sm:$0xff] %v14644_v21  ;;  %v14646_v49 = vpop.f32.mrb[9].mxu1 }
 0x3ec   : > { %16712 = vst [vmem:[#allocation10_spill] sm:$0xff] %v14646_v49  ;;  %v14648_v14 = vpop.f32.mrb[10].mxu1 }
 0x3ed   : > { %16713 = vst [vmem:[#allocation14_spill] sm:$0xff] %v14648_v14  ;;  %v14650_v7 = vpop.f32.mrb[11].mxu1  ;;  %v14674_v14 = vcombine.low %v16724_v36, %v16723_v29 }
 0x3ee   : > { %16714 = vst [vmem:[#allocation13_spill] sm:$0xff] %v14650_v7 }
 0x3f0   : > { %11069 = vmatmul.mubr.msk.bf16.gmra.mrb[84].mxu1 %vm6039_vm13, %v14654_v51 }
 0x3f1   : > { %11072 = vmatprep.mubr.msk.bf16.mxu1 %vm6039_vm13, %v14658_v17 }
 0x3f2   : > { %v14664_v18 = vpop.f32.mrb[12].mxu1 }
 0x3f3   : > { %16719 = vst [vmem:[#allocation16_spill] sm:$0xff] %v14664_v18  ;;  %v14666_v59 = vpop.f32.mrb[13].mxu1  ;;  %v14684_v18 = vld [vmem:[#allocation2 + $0xc0] sm:$0xf] }
 0x3f4   : > { %16720 = vst [vmem:[#allocation25_spill] sm:$0xff] %v14666_v59  ;;  %v14668_v49 = vpop.f32.mrb[14].mxu1  ;;  %v14686_v59 = vld [vmem:[#allocation2 + $0xc4] sm:$0xf] }
 0x3f5   : > { %16721 = vst [vmem:[#allocation24_spill] sm:$0xff] %v14668_v49  ;;  %v14670_v7 = vpop.f32.mrb[15].mxu1  ;;  %v14694_v29 = vcombine.low %v14684_v18, %v14686_v59 }
 0x3f6   : > { %16722 = vst [vmem:[#allocation15_spill] sm:$0xff] %v14670_v7 }
 0x3f8   : > { %11073 = vmatmul.mubr.msk.bf16.gmra.mrb[88].mxu1 %vm6039_vm13, %v14674_v14 }
 0x3f9   : > { %11076 = vmatprep.mubr.msk.bf16.mxu1 %vm6039_vm13, %v14678_v3 }
 0x3fa   : > { %v14688_v49 = vpop.f32.mrb[16].mxu1 }
 0x3fb   : > { %16726 = vst [vmem:[#allocation31_spill] sm:$0xff] %v14688_v49  ;;  %v14690_v7 = vpop.f32.mrb[17].mxu1 }
 0x3fc   : > { %16727 = vst [vmem:[#allocation28_spill] sm:$0xff] %v14690_v7  ;;  %v14696_v63 = vpop.f32.mrb[18].mxu1 }
 0x3fd   : > { %16728 = vst [vmem:[#allocation34_spill] sm:$0xff] %v14696_v63  ;;  %v14698_v36 = vpop.f32.mrb[19].mxu1 }
 0x3fe   : > { %16729 = vst [vmem:[#allocation32_spill] sm:$0xff] %v14698_v36  ;;  %v10211_v36 = vld [vmem:[%s16374_s4 + $0x14] sm:$0xf] }
 0x400   : > { %11077 = vmatmul.mubr.msk.bf16.gmra.mrb[92].mxu1 %vm6039_vm13, %v14694_v29 }
 0x401   : > { %11082 = vmatprep.mubr.msk.bf16.mxu1 %vm6039_vm13, %v16730_v40 }
 0x402   : > { %v14704_v21 = vpop.f32.mrb[20].mxu1 }
 0x403   : > { %16731 = vst [vmem:[#allocation37_spill] sm:$0xff] %v14704_v21  ;;  %v14706_v52 = vpop.f32.mrb[21].mxu1 }
 0x404   : > { %16732 = vst [vmem:[#allocation35_spill] sm:$0xff] %v14706_v52  ;;  %v14708_v49 = vpop.f32.mrb[22].mxu1 }
 0x405   : > { %16733 = vst [vmem:[#allocation39_spill] sm:$0xff] %v14708_v49  ;;  %v14710_v7 = vpop.f32.mrb[23].mxu1 }
 0x406   : > { %16734 = vst [vmem:[#allocation38_spill] sm:$0xff] %v14710_v7 }
 0x408   : > { %11083 = vmatmul.mubr.msk.bf16.vlgmr.msra.gmra.mrb[64].mxu1 %vm6039_vm13, %v13661_v54 }
 0x409   : > { %11115 = vmatpush3.bf16.msra.mxu1 %v7146_v12  ;;  %11086 = vmatprep.mubr.msk.bf16.mxu1 %vm6039_vm13, %v13701_v28 }
 0x40a   : > { %11681 = vmatprep.subr.msk.bf16.mxu1 %vm6088_vm8, %v10211_v36  ;;  %v14721_v52 = vpop.f32.mrb[24].mxu1 }
 0x40b   : > { %16735 = vst [vmem:[#allocation42_spill] sm:$0xff] %v14721_v52  ;;  %v14723_v49 = vpop.f32.mrb[25].mxu1  ;;  %v16740_v52 = vld [vmem:[#allocation12_spill] sm:$0xff] }
 0x40c   : > { %v14725_v7 = vpop.f32.mrb[26].mxu1 }
 0x40d   : > { %16736 = vst [vmem:[#allocation41_spill] sm:$0xff] %v14725_v7  ;;  %v14727_v41 = vpop.f32.mrb[27].mxu1  ;;  %v14769_v7 = vld [vmem:[%s16374_s4 + $0x1c] sm:$0xf] }
 0x410   : > { %11087 = vmatmul.mubr.msk.bf16.gmra.mrb[68].mxu1 %vm6039_vm13, %v13697_v46 }
 0x411   : > { %11090 = vmatprep.mubr.msk.bf16.mxu1 %vm6039_vm13, %v13736_v60 }
 0x412   : > { %v14733_v12 = vpop.f32.mrb[28].mxu1 }
 0x413   : > { %v14735_v21 = vpop.f32.mrb[29].mxu1 }
 0x414   : > { %16737 = vst [vmem:[#allocation44_spill] sm:$0xff] %v14735_v21  ;;  %v14737_v63 = vpop.f32.mrb[30].mxu1  ;;  %v7310_v21 = vsel %vm6088_vm8, %v10211_v36, 0  ;;  %v16744_v36 = vld [vmem:[#allocation20_spill] sm:$0xff] }
 0x415   : > { %v14739_v39 = vpop.f32.mrb[31].mxu1 }
 0x416   : > { %16738 = vst [vmem:[#allocation43_spill] sm:$0xff] %v14739_v39  ;;  %v16739_v39 = vld [vmem:[#allocation3_spill] sm:$0xff] }
 0x418   : > { %11091 = vmatmul.mubr.msk.bf16.gmra.mrb[72].mxu1 %vm6039_vm13, %v13732_v32 }
 0x419   : > { %11094 = vmatprep.mubr.msk.bf16.mxu1 %vm6039_vm13, %v16654_v4 }
 0x420   : > { %11095 = vmatmul.mubr.msk.bf16.gmra.mrb[76].mxu1 %vm6039_vm13, %v16663_v8 }
 0x421   : > { %11098 = vmatprep.mubr.msk.bf16.mxu1 %vm6039_vm13, %v16666_v6 }
 0x428   : > { %11099 = vmatmul.mubr.msk.bf16.gmra.mrb[80].mxu1 %vm6039_vm13, %v16671_v62 }
 0x429   : > { %11102 = vmatprep.mubr.msk.bf16.mxu1 %vm6039_vm13, %v16673_v37 }
 0x430   : > { %11103 = vmatmul.mubr.msk.bf16.gmra.mrb[84].mxu1 %vm6039_vm13, %v16676_v23 }
 0x431   : > { %11106 = vmatprep.mubr.msk.bf16.mxu1 %vm6039_vm13, %v16677_v30 }
 0x438   : > { %11107 = vmatmul.mubr.msk.bf16.gmra.mrb[88].mxu1 %vm6039_vm13, %v16678_v53 }
 0x439   : > { %11110 = vmatprep.mubr.msk.bf16.mxu1 %vm6039_vm13, %v16679_v33 }
 0x440   : > { %11111 = vmatmul.mubr.msk.bf16.gmra.mrb[92].mxu1 %vm6039_vm13, %v16682_v47 }
 0x441   : > { %11116 = vmatprep.mubr.msk.bf16.mxu1 %vm6039_vm13, %v16739_v39  ;;  %v16743_v39 = vld [vmem:[#allocation19_spill] sm:$0xff] }
 0x448   : > { %11117 = vmatmul.mubr.msk.bf16.vlgmr.msra.gmra.mrb[96].mxu1 %vm6039_vm13, %v16740_v52  ;;  %v14788_v52 = vld [vmem:[%s16375_s5] ss:$0 sm:$0xff] }
 0x449   : > { %11149 = vmatpush3.bf16.msra.mxu1 %v7310_v21  ;;  %11120 = vmatprep.mubr.msk.bf16.mxu1 %vm6039_vm13, %v16741_v42 }
 0x44a   : > { %11682 = vmatprep.subr.msk.bf16.mxu1 %vm6088_vm8, %v14769_v7 }
 0x450   : > { %11121 = vmatmul.mubr.msk.bf16.gmra.mrb[100].mxu1 %vm6039_vm13, %v16742_v31  ;;  %v14794_v31 = vld [vmem:[%s16376_s6] ss:$0 sm:$0xff] }
 0x451   : > { %11124 = vmatprep.mubr.msk.bf16.mxu1 %vm6039_vm13, %v16743_v39 }
 0x458   : > { %11125 = vmatmul.mubr.msk.bf16.gmra.mrb[104].mxu1 %vm6039_vm13, %v16744_v36 }
 0x459   : > { %11128 = vmatprep.mubr.msk.bf16.mxu1 %vm6039_vm13, %v16745_v19 }
 0x45a   : > { %v11016_v42 = vpop.f32.mrb[32].mxu1 }
 0x45b   : > { %v8077_v21 = vmul.f32 %v11016_v42, %v14788_v52  ;;  %v6554_v44 = vpop.f32.mrb[33].mxu1 }
 0x45c   : > { %v8075_v39 = vmul.f32 %v14788_v52, %v6554_v44  ;;  %v11017_v36 = vpop.f32.mrb[34].mxu1 }
 0x45d   : > { %v8078_v1 = vmul.f32 %v11017_v36, %v14788_v52  ;;  %v6557_v19 = vpop.f32.mrb[35].mxu1  ;;  %v8109_v56 = vadd.f32 %v14794_v31, %v8077_v21 }
 0x45e   : > { %v8076_v24 = vmul.f32 %v14788_v52, %v6557_v19  ;;  %v8107_v38 = vadd.f32 %v14794_v31, %v8075_v39 }
 0x45f   : > { %v8110_v42 = vadd.f32 %v14794_v31, %v8078_v1  ;;  %v8141_v45 = vmax.f32 %v8109_v56, 0.0 }
 0x460   : > { %11129 = vmatmul.mubr.msk.bf16.gmra.mrb[108].mxu1 %vm6039_vm13, %v16746_v35  ;;  %v8108_v61 = vadd.f32 %v14794_v31, %v8076_v24  ;;  %v8139_v44 = vmax.f32 %v8107_v38, 0.0 }
 0x461   : > { %11132 = vmatprep.mubr.msk.bf16.mxu1 %vm6039_vm13, %v16747_v20  ;;  %8399 = vrot.lane.b32.xlu1 %v8141_v45, %s11783_s8  ;;  %v8142_v36 = vmax.f32 %v8110_v42, 0.0 }
 0x462   : > { %8395 = vrot.lane.b32.xlu0 %v8139_v44, %s11783_s8  ;;  %v11020_v21 = vpop.f32.mrb[36].mxu1  ;;  %v8140_v19 = vmax.f32 %v8108_v61, 0.0  ;;  %v16748_v44 = vld [vmem:[#allocation26_spill] sm:$0xff] }
 0x463   : > { %v8081_v39 = vmul.f32 %v11020_v21, %v14788_v52  ;;  %v6570_v1 = vpop.f32.mrb[37].mxu1  ;;  %v16749_v21 = vld [vmem:[#allocation27_spill] sm:$0xff] }
 0x464   : > { %v8079_v35 = vmul.f32 %v14788_v52, %v6570_v1  ;;  %v11021_v56 = vpop.f32.mrb[38].mxu1 }
 0x465   : > { %v8113_v24 = vadd.f32 %v14794_v31, %v8081_v39  ;;  %v8082_v25 = vmul.f32 %v11021_v56, %v14788_v52  ;;  %8401 = vrot.lane.b32.xlu1 %v8142_v36, %s11783_s8  ;;  %v6573_v20 = vpop.f32.mrb[39].mxu1 }
 0x466   : > { %v8080_v45 = vmul.f32 %v14788_v52, %v6573_v20  ;;  %8397 = vrot.lane.b32.xlu0 %v8140_v19, %s11783_s8  ;;  %v8111_v61 = vadd.f32 %v14794_v31, %v8079_v35 }
 0x467   : > { %v8145_v38 = vmax.f32 %v8113_v24, 0.0  ;;  %v8114_v42 = vadd.f32 %v14794_v31, %v8082_v25 }
 0x468   : > { %11133 = vmatmul.mubr.msk.bf16.gmra.mrb[112].mxu1 %vm6039_vm13, %v16748_v44  ;;  %v8112_v1 = vadd.f32 %v14794_v31, %v8080_v45  ;;  %v8143_v25 = vmax.f32 %v8111_v61, 0.0 }
 0x469   : > { %11136 = vmatprep.mubr.msk.bf16.mxu1 %vm6039_vm13, %v16749_v21  ;;  %v8146_v39 = vmax.f32 %v8114_v42, 0.0 }
 0x46a   : > { %8407 = vrot.lane.b32.xlu0 %v8145_v38, %s11783_s8  ;;  %v11024_v36 = vpop.f32.mrb[40].mxu1  ;;  %v8144_v44 = vmax.f32 %v8112_v1, 0.0 }
 0x46b   : > { %v8085_v56 = vmul.f32 %v11024_v36, %v14788_v52  ;;  %8409 = vrot.lane.b32.xlu1 %v8146_v39, %s11783_s8  ;;  %v6586_v19 = vpop.f32.mrb[41].mxu1  ;;  %v16751_v39 = vld [vmem:[#allocation30_spill] sm:$0xff] }
 0x46c   : > { %v8083_v24 = vmul.f32 %v14788_v52, %v6586_v19  ;;  %v11025_v20 = vpop.f32.mrb[42].mxu1 }
 0x46d   : > { %v8117_v35 = vadd.f32 %v14794_v31, %v8085_v56  ;;  %v8086_v21 = vmul.f32 %v11025_v20, %v14788_v52  ;;  %v6589_v42 = vpop.f32.mrb[43].mxu1 }
 0x46e   : > { %v8084_v45 = vmul.f32 %v14788_v52, %v6589_v42  ;;  %8403 = vrot.lane.b32.xlu0 %v8143_v25, %s11783_s8  ;;  %v8115_v61 = vadd.f32 %v14794_v31, %v8083_v24 }
 0x46f   : > { %v8149_v38 = vmax.f32 %v8117_v35, 0.0  ;;  %v8118_v36 = vadd.f32 %v14794_v31, %v8086_v21  ;;  %8405 = vrot.lane.b32.xlu1 %v8144_v44, %s11783_s8 }
 0x470   : > { %11137 = vmatmul.mubr.msk.bf16.gmra.mrb[116].mxu1 %vm6039_vm13, %v16750_v13  ;;  %v8116_v56 = vadd.f32 %v14794_v31, %v8084_v45  ;;  %v8147_v35 = vmax.f32 %v8115_v61, 0.0 }
 0x471   : > { %11140 = vmatprep.mubr.msk.bf16.mxu1 %vm6039_vm13, %v16751_v39  ;;  %v8150_v1 = vmax.f32 %v8118_v36, 0.0 }
 0x472   : > { %8415 = vrot.lane.b32.xlu0 %v8149_v38, %s11783_s8  ;;  %v8148_v21 = vmax.f32 %v8116_v56, 0.0 }
 0x473   : > { %v11028_v19 = vpop.f32.mrb[44].mxu1  ;;  %8417 = vrot.lane.b32.xlu1 %v8150_v1, %s11783_s8  ;;  %v16753_v1 = vld [vmem:[#allocation36_spill] sm:$0xff] }
 0x474   : > { %v8089_v25 = vmul.f32 %v11028_v19, %v14788_v52  ;;  %v6602_v20 = vpop.f32.mrb[45].mxu1  ;;  %v16752_v19 = vld [vmem:[#allocation33_spill] sm:$0xff] }
 0x475   : > { %v8087_v13 = vmul.f32 %v14788_v52, %v6602_v20  ;;  %v11029_v44 = vpop.f32.mrb[46].mxu1 }
 0x476   : > { %v8121_v24 = vadd.f32 %v14794_v31, %v8089_v25  ;;  %v8090_v42 = vmul.f32 %v11029_v44, %v14788_v52  ;;  %v6605_v36 = vpop.f32.mrb[47].mxu1  ;;  %8411 = vrot.lane.b32.xlu0 %v8147_v35, %s11783_s8 }
 0x477   : > { %v8088_v45 = vmul.f32 %v14788_v52, %v6605_v36  ;;  %8413 = vrot.lane.b32.xlu1 %v8148_v21, %s11783_s8  ;;  %v8119_v61 = vadd.f32 %v14794_v31, %v8087_v13 }
 0x478   : > { %v8153_v38 = vmax.f32 %v8121_v24, 0.0  ;;  %v8122_v39 = vadd.f32 %v14794_v31, %v8090_v42  ;;  %11141 = vmatmul.mubr.msk.bf16.gmra.mrb[120].mxu1 %vm6039_vm13, %v16752_v19 }
 0x479   : > { %11144 = vmatprep.mubr.msk.bf16.mxu1 %vm6039_vm13, %v16753_v1  ;;  %v8120_v25 = vadd.f32 %v14794_v31, %v8088_v45  ;;  %v8151_v24 = vmax.f32 %v8119_v61, 0.0 }
 0x47a   : > { %v8154_v56 = vmax.f32 %v8122_v39, 0.0  ;;  %8423 = vrot.lane.b32.xlu0 %v8153_v38, %s11783_s8 }
 0x47b   : > { %v11032_v20 = vpop.f32.mrb[48].mxu1  ;;  %v8152_v36 = vmax.f32 %v8120_v25, 0.0 }
 0x47c   : > { %v8093_v35 = vmul.f32 %v11032_v20, %v14788_v52  ;;  %8425 = vrot.lane.b32.xlu1 %v8154_v56, %s11783_s8  ;;  %v6618_v44 = vpop.f32.mrb[49].mxu1  ;;  %v16754_v20 = vld [vmem:[#allocation40_spill] sm:$0xff] }
 0x47d   : > { %v8091_v42 = vmul.f32 %v14788_v52, %v6618_v44  ;;  %v11033_v21 = vpop.f32.mrb[50].mxu1 }
 0x47e   : > { %v8125_v13 = vadd.f32 %v14794_v31, %v8093_v35  ;;  %v8094_v19 = vmul.f32 %v11033_v21, %v14788_v52  ;;  %v6621_v39 = vpop.f32.mrb[51].mxu1  ;;  %8419 = vrot.lane.b32.xlu0 %v8151_v24, %s11783_s8 }
 0x47f   : > { %v8092_v45 = vmul.f32 %v14788_v52, %v6621_v39  ;;  %v8123_v61 = vadd.f32 %v14794_v31, %v8091_v42 }
 0x480   : > { %v8157_v38 = vmax.f32 %v8125_v13, 0.0  ;;  %v8126_v1 = vadd.f32 %v14794_v31, %v8094_v19  ;;  %11145 = vmatmul.mubr.msk.bf16.gmra.mrb[124].mxu1 %vm6039_vm13, %v16754_v20  ;;  %8421 = vrot.lane.b32.xlu1 %v8152_v36, %s11783_s8 }
 0x481   : > { %11150 = vmatprep.mubr.msk.bf16.mxu1 %vm6039_vm13, %v16730_v40  ;;  %v8124_v25 = vadd.f32 %v14794_v31, %v8092_v45  ;;  %v8155_v21 = vmax.f32 %v8123_v61, 0.0  ;;  %v7476_v45 = vsel %vm6088_vm8, %v14769_v7, 0 }
 0x482   : > { %v8158_v56 = vmax.f32 %v8126_v1, 0.0  ;;  %8431 = vrot.lane.b32.xlu0 %v8157_v38, %s11783_s8  ;;  %v14884_v1 = vld [vmem:[%s16374_s4 + $0x20] sm:$0xf] }
 0x483   : > { %v11036_v35 = vpop.f32.mrb[52].mxu1  ;;  %v8156_v19 = vmax.f32 %v8124_v25, 0.0 }
 0x484   : > { %v8097_v44 = vmul.f32 %v11036_v35, %v14788_v52  ;;  %8433 = vrot.lane.b32.xlu1 %v8158_v56, %s11783_s8  ;;  %v6634_v24 = vpop.f32.mrb[53].mxu1 }
 0x485   : > { %v8095_v13 = vmul.f32 %v14788_v52, %v6634_v24  ;;  %v11037_v36 = vpop.f32.mrb[54].mxu1 }
 0x486   : > { %v8129_v42 = vadd.f32 %v14794_v31, %v8097_v44  ;;  %v8098_v40 = vmul.f32 %v11037_v36, %v14788_v52  ;;  %v6637_v39 = vpop.f32.mrb[55].mxu1  ;;  %8427 = vrot.lane.b32.xlu0 %v8155_v21, %s11783_s8 }
 0x487   : > { %v8096_v38 = vmul.f32 %v14788_v52, %v6637_v39  ;;  %v8127_v56 = vadd.f32 %v14794_v31, %v8095_v13 }
 0x488   : > { %v8161_v20 = vmax.f32 %v8129_v42, 0.0  ;;  %v8130_v61 = vadd.f32 %v14794_v31, %v8098_v40  ;;  %11151 = vmatmul.mubr.msk.bf16.vlgmr.msra.gmra.mrb[96].mxu1 %vm6039_vm13, %v13661_v54  ;;  %8429 = vrot.lane.b32.xlu1 %v8156_v19, %s11783_s8 }
 0x489   : > { %11183 = vmatpush3.bf16.msra.mxu1 %v7476_v45  ;;  %11154 = vmatprep.mubr.msk.bf16.mxu1 %vm6039_vm13, %v13701_v28  ;;  %v8128_v25 = vadd.f32 %v14794_v31, %v8096_v38  ;;  %v8159_v24 = vmax.f32 %v8127_v56, 0.0 }
 0x48a   : > { %v8162_v7 = vmax.f32 %v8130_v61, 0.0  ;;  %11683 = vmatprep.subr.msk.bf16.mxu1 %vm6088_vm8, %v14884_v1  ;;  %8439 = vrot.lane.b32.xlu0 %v8161_v20, %s11783_s8 }
 0x48b   : > { %v11040_v35 = vpop.f32.mrb[56].mxu1  ;;  %v8160_v36 = vmax.f32 %v8128_v25, 0.0 }
 0x48c   : > { %v8101_v44 = vmul.f32 %v11040_v35, %v14788_v52  ;;  %8441 = vrot.lane.b32.xlu1 %v8162_v7, %s11783_s8  ;;  %v6650_v54 = vpop.f32.mrb[57].mxu1 }
 0x48d   : > { %v8099_v21 = vmul.f32 %v14788_v52, %v6650_v54  ;;  %v11041_v13 = vpop.f32.mrb[58].mxu1 }
 0x48e   : > { %v8133_v28 = vadd.f32 %v14794_v31, %v8101_v44  ;;  %v8102_v19 = vmul.f32 %v11041_v13, %v14788_v52  ;;  %v6653_v42 = vpop.f32.mrb[59].mxu1  ;;  %8435 = vrot.lane.b32.xlu0 %v8159_v24, %s11783_s8 }
 0x48f   : > { %v8100_v40 = vmul.f32 %v14788_v52, %v6653_v42  ;;  %v8131_v38 = vadd.f32 %v14794_v31, %v8099_v21 }
 0x490   : > { %v8165_v39 = vmax.f32 %v8133_v28, 0.0  ;;  %v8134_v45 = vadd.f32 %v14794_v31, %v8102_v19  ;;  %11155 = vmatmul.mubr.msk.bf16.gmra.mrb[100].mxu1 %vm6039_vm13, %v13697_v46  ;;  %8437 = vrot.lane.b32.xlu1 %v8160_v36, %s11783_s8 }
 0x491   : > { %11158 = vmatprep.mubr.msk.bf16.mxu1 %vm6039_vm13, %v13736_v60  ;;  %v8132_v61 = vadd.f32 %v14794_v31, %v8100_v40  ;;  %v8163_v35 = vmax.f32 %v8131_v38, 0.0 }
 0x492   : > { %v8166_v20 = vmax.f32 %v8134_v45, 0.0  ;;  %8447 = vrot.lane.b32.xlu0 %v8165_v39, %s11783_s8 }
 0x493   : > { %v11044_v56 = vpop.f32.mrb[60].mxu1  ;;  %v8164_v54 = vmax.f32 %v8132_v61, 0.0 }
 0x494   : > { %v8105_v7 = vmul.f32 %v11044_v56, %v14788_v52  ;;  %8449 = vrot.lane.b32.xlu1 %v8166_v20, %s11783_s8  ;;  %v6666_v25 = vpop.f32.mrb[61].mxu1  ;;  %v6028_v56 = vshrl.u32 %v14686_v59, 16 }
 0x495   : > { %v8103_v46 = vmul.f32 %v14788_v52, %v6666_v25  ;;  %v11045_v44 = vpop.f32.mrb[62].mxu1  ;;  %v7770_v25 = vsel %vm6088_vm8, %v14884_v1, 0  ;;  %vm9425_vm8 = vcmask 392192  }
 0x496   : > { %v8137_v24 = vadd.f32 %v14794_v31, %v8105_v7  ;;  %v8106_v60 = vmul.f32 %v11045_v44, %v14788_v52  ;;  %v6669_v21 = vpop.f32.mrb[63].mxu1  ;;  %8443 = vrot.lane.b32.xlu0 %v8163_v35, %s11783_s8  ;;  %v6030_v7 = vrot.slane %v6028_v56, 4 }
 0x497   : > { %v8104_v13 = vmul.f32 %v14788_v52, %v6669_v21  ;;  %v8135_v19 = vadd.f32 %v14794_v31, %v8103_v46 }
 0x498   : > { %v8169_v36 = vmax.f32 %v8137_v24, 0.0  ;;  %v8138_v28 = vadd.f32 %v14794_v31, %v8106_v60  ;;  %11159 = vmatmul.mubr.msk.bf16.gmra.mrb[104].mxu1 %vm6039_vm13, %v13732_v32  ;;  %8445 = vrot.lane.b32.xlu1 %v8164_v54, %s11783_s8  ;;  %v6015_v32 = vshrl.u32 %v14684_v18, 16 }
 0x499   : > { %11162 = vmatprep.mubr.msk.bf16.mxu1 %vm6039_vm13, %v16654_v4  ;;  %v8136_v40 = vadd.f32 %v14794_v31, %v8104_v13  ;;  %v8167_v39 = vmax.f32 %v8135_v19, 0.0  ;;  %v6018_v4 = vshll.u32 %v14684_v18, 16 }
 0x49a   : > { %v8170_v42 = vmax.f32 %v8138_v28, 0.0  ;;  %8455 = vrot.lane.b32.xlu0 %v8169_v36, %s11783_s8 }
 0x49b   : > { %v8168_v45 = vmax.f32 %v8136_v40, 0.0  ;;  %v6020_v38 = vrot.slane %v6018_v4, 5 }
 0x49c   : > { %8457 = vrot.lane.b32.xlu1 %v8170_v42, %s11783_s8 }
 0x49e   : > { %8451 = vrot.lane.b32.xlu0 %v8167_v39, %s11783_s8 }
 0x4a0   : > { %11163 = vmatmul.mubr.msk.bf16.gmra.mrb[108].mxu1 %vm6039_vm13, %v16663_v8  ;;  %8453 = vrot.lane.b32.xlu1 %v8168_v45, %s11783_s8  ;;  %v6017_v8 = vrot.slane %v6015_v32, 4 }
 0x4a1   : > { %11166 = vmatprep.mubr.msk.bf16.mxu1 %vm6039_vm13, %v16666_v6  ;;  %v6024_v6 = vshll.u32 %v14686_v59, 16 }
 0x4a3   : > { %v6026_v61 = vrot.slane %v6024_v6, 5 }
 0x4a5   : > { %v6031_v35 = vor.u32 %v6030_v7, %v6026_v61 }
 0x4a7   : > { %v6032_v59 = vrot.slane %v6031_v35, 4 }
 0x4a8   : > { %11167 = vmatmul.mubr.msk.bf16.gmra.mrb[112].mxu1 %vm6039_vm13, %v16671_v62  ;;  %v4975_v62 = vld [vmem:[#allocation2 + $0xc8] sm:$0x1] }
 0x4a9   : > { %11170 = vmatprep.mubr.msk.bf16.mxu1 %vm6039_vm13, %v16673_v37  ;;  %v6021_v37 = vor.u32 %v6020_v38, %v6017_v8  ;;  %v4976_v20 = vsel %vm13599_vm11, 0, %v4975_v62 }
 0x4aa   : > { %4977 = vst [vmem:[#allocation2 + $0xc8] sm:$0x1] %v4976_v20 }
 0x4ab   : > { %v6022_v18 = vrot.slane %v6021_v37, 4 }
 0x4b0   : > { %11171 = vmatmul.mubr.msk.bf16.gmra.mrb[116].mxu1 %vm6039_vm13, %v16676_v23 }
 0x4b1   : > { %11174 = vmatprep.mubr.msk.bf16.mxu1 %vm6039_vm13, %v16677_v30  ;;  %v6027_v30 = vsel %vm11892_vm4, %v6022_v18, %v6026_v61 }
 0x4b8   : > { %11175 = vmatmul.mubr.msk.bf16.gmra.mrb[120].mxu1 %vm6039_vm13, %v16678_v53  ;;  %v5026_v53 = vld [vmem:[#allocation2 + $0xc8] sm:$0x1] }
 0x4b9   : > { %11178 = vmatprep.mubr.msk.bf16.mxu1 %vm6039_vm13, %v16679_v33  ;;  %v5027_v33 = vsel %vm13599_vm11, 0, %v5026_v53  ;;  %vm9434_vm11 = vcmask 785408  }
 0x4ba   : > { %5028 = vst [vmem:[#allocation2 + $0xc8] sm:$0x1] %v5027_v33 }
 0x4c0   : > { %11179 = vmatmul.mubr.msk.bf16.gmra.mrb[124].mxu1 %vm6039_vm13, %v16682_v47 }
 0x4c1   : > { %11184 = vmatprep.mubr.msk.bf16.mxu1 %vm6039_vm13, %v14556_v16  ;;  %v5653_v47 = vld [vmem:[#allocation2 + $0xc8] sm:$0x1] }
 0x4c2   : > { %v6034_v16 = vshll.u32 %v5653_v47, 16 }
 0x4c4   : > { %v6036_v46 = vrot.slane %v6034_v16, 5 }
 0x4c6   : > { %v6037_v44 = vsel %vm11892_vm4, %v6032_v59, %v6036_v46  ;;  %vm8876_vm4 = vcmask 1046534  }
 0x4c7   : > { %v14974_v1 = vcombine.low %v6027_v30, %v6037_v44 }
 0x4c8   : > { %11185 = vmatmul.mubr.msk.bf16.vlgmr.msra.gmra.mrb[96].mxu1 %vm6039_vm13, %v14564_v15 }
 0x4c9   : > { %11217 = vmatpush3.bf16.msra.mxu1 %v7770_v25  ;;  %11188 = vmatprep.mubr.msk.bf16.mxu1 %vm6039_vm13, %v14570_v48 }
 0x4d0   : > { %11189 = vmatmul.mubr.msk.bf16.gmra.mrb[100].mxu1 %vm6039_vm13, %v14582_v5 }
 0x4d1   : > { %11192 = vmatprep.mubr.msk.bf16.mxu1 %vm6039_vm13, %v14586_v0 }
 0x4d3   : > { %v14976_v15 = vpop.permute.xlu1 %8399 }
 0x4d4   : > { %v14978_v54 = vpop.permute.xlu0 %8395 }
 0x4d7   : > { %v14986_v5 = vpop.permute.xlu1 %8401 }
 0x4d8   : > { %11193 = vmatmul.mubr.msk.bf16.gmra.mrb[104].mxu1 %vm6039_vm13, %v14594_v57  ;;  %v14984_v48 = vpop.permute.xlu0 %8397 }
 0x4d9   : > { %11196 = vmatprep.mubr.msk.bf16.mxu1 %vm6039_vm13, %v14598_v27 }
 0x4db   : > { %v11084_v10 = vpop.f32.mrb[64].mxu1 }
 0x4dc   : > { %v8173_v24 = vmul.f32 %v11084_v10, %v14788_v52  ;;  %v7014_v0 = vpop.f32.mrb[65].mxu1  ;;  %v14990_v21 = vpop.permute.xlu0 %8407 }
 0x4dd   : > { %v8171_v60 = vmul.f32 %v14788_v52, %v7014_v0  ;;  %v11085_v13 = vpop.f32.mrb[66].mxu1  ;;  %v14994_v28 = vpop.permute.xlu1 %8409 }
 0x4de   : > { %v8205_v36 = vadd.f32 %v14794_v31, %v8173_v24  ;;  %v8174_v57 = vmul.f32 %v11085_v13, %v14788_v52  ;;  %v7017_v27 = vpop.f32.mrb[67].mxu1 }
 0x4df   : > { %v8172_v19 = vmul.f32 %v14788_v52, %v7017_v27  ;;  %v8203_v40 = vadd.f32 %v14794_v31, %v8171_v60 }
 0x4e0   : > { %v8237_v42 = vmax.f32 %v8205_v36, 0.0  ;;  %v8206_v39 = vadd.f32 %v14794_v31, %v8174_v57  ;;  %11197 = vmatmul.mubr.msk.bf16.gmra.mrb[108].mxu1 %vm6039_vm13, %v14614_v22  ;;  %v15003_v45 = vpop.permute.xlu0 %8403 }
 0x4e1   : > { %11200 = vmatprep.mubr.msk.bf16.mxu1 %vm6039_vm13, %v14618_v50  ;;  %v8204_v4 = vadd.f32 %v14794_v31, %v8172_v19  ;;  %v15006_v8 = vpop.permute.xlu1 %8405  ;;  %v8235_v6 = vmax.f32 %v8203_v40, 0.0 }
 0x4e2   : > { %v8238_v32 = vmax.f32 %v8206_v39, 0.0  ;;  %8527 = vrot.lane.b32.xlu0 %v8237_v42, %s11784_s11 }
 0x4e3   : > { %v11088_v38 = vpop.f32.mrb[68].mxu1  ;;  %v8236_v20 = vmax.f32 %v8204_v4, 0.0 }
 0x4e4   : > { %v8177_v62 = vmul.f32 %v11088_v38, %v14788_v52  ;;  %8529 = vrot.lane.b32.xlu1 %v8238_v32, %s11784_s11  ;;  %v7030_v22 = vpop.f32.mrb[69].mxu1  ;;  %v15012_v50 = vpop.permute.xlu0 %8415 }
 0x4e5   : > { %v8175_v37 = vmul.f32 %v14788_v52, %v7030_v22  ;;  %v11089_v23 = vpop.f32.mrb[70].mxu1  ;;  %v15016_v30 = vpop.permute.xlu1 %8417 }
 0x4e6   : > { %v8209_v61 = vadd.f32 %v14794_v31, %v8177_v62  ;;  %v8178_v18 = vmul.f32 %v11089_v23, %v14788_v52  ;;  %8523 = vrot.lane.b32.xlu0 %v8235_v6, %s11784_s11  ;;  %v7033_v56 = vpop.f32.mrb[71].mxu1 }
 0x4e7   : > { %v8176_v53 = vmul.f32 %v14788_v52, %v7033_v56  ;;  %v8207_v7 = vadd.f32 %v14794_v31, %v8175_v37 }
 0x4e8   : > { %v8241_v33 = vmax.f32 %v8209_v61, 0.0  ;;  %v8210_v25 = vadd.f32 %v14794_v31, %v8178_v18  ;;  %11201 = vmatmul.mubr.msk.bf16.gmra.mrb[112].mxu1 %vm6039_vm13, %v14634_v26  ;;  %8525 = vrot.lane.b32.xlu1 %v8236_v20, %s11784_s11  ;;  %v15027_v35 = vpop.permute.xlu0 %8411 }
 0x4e9   : > { %11204 = vmatprep.mubr.msk.bf16.mxu1 %vm6039_vm13, %v14638_v43  ;;  %v8208_v59 = vadd.f32 %v14794_v31, %v8176_v53  ;;  %v15030_v16 = vpop.permute.xlu1 %8413  ;;  %v8239_v44 = vmax.f32 %v8207_v7, 0.0 }
 0x4ea   : > { %v8242_v47 = vmax.f32 %v8210_v25, 0.0  ;;  %8535 = vrot.lane.b32.xlu0 %v8241_v33, %s11784_s11 }
 0x4eb   : > { %v11092_v46 = vpop.f32.mrb[72].mxu1  ;;  %v8240_v60 = vmax.f32 %v8208_v59, 0.0 }
 0x4ec   : > { %v8181_v10 = vmul.f32 %v11092_v46, %v14788_v52  ;;  %8537 = vrot.lane.b32.xlu1 %v8242_v47, %s11784_s11  ;;  %v7046_v26 = vpop.f32.mrb[73].mxu1  ;;  %v15036_v0 = vpop.permute.xlu0 %8423 }
 0x4ed   : > { %v8179_v24 = vmul.f32 %v14788_v52, %v7046_v26  ;;  %v11093_v43 = vpop.f32.mrb[74].mxu1 }
 0x4ee   : > { %v8213_v13 = vadd.f32 %v14794_v31, %v8181_v10  ;;  %v8182_v36 = vmul.f32 %v11093_v43, %v14788_v52  ;;  %v15040_v57 = vpop.permute.xlu1 %8425  ;;  %8531 = vrot.lane.b32.xlu0 %v8239_v44, %s11784_s11  ;;  %v7049_v27 = vpop.f32.mrb[75].mxu1 }
 0x4ef   : > { %v8180_v19 = vmul.f32 %v14788_v52, %v7049_v27  ;;  %v8211_v40 = vadd.f32 %v14794_v31, %v8179_v24 }
 0x4f0   : > { %v8245_v42 = vmax.f32 %v8213_v13, 0.0  ;;  %v8214_v39 = vadd.f32 %v14794_v31, %v8182_v36  ;;  %11205 = vmatmul.mubr.msk.bf16.gmra.mrb[116].mxu1 %vm6039_vm13, %v14654_v51  ;;  %8533 = vrot.lane.b32.xlu1 %v8240_v60, %s11784_s11  ;;  %v15051_v32 = vpop.permute.xlu0 %8419 }
 0x4f1   : > { %11208 = vmatprep.mubr.msk.bf16.mxu1 %vm6039_vm13, %v14658_v17  ;;  %v8212_v38 = vadd.f32 %v14794_v31, %v8180_v19  ;;  %v8243_v22 = vmax.f32 %v8211_v40, 0.0 }
 0x4f2   : > { %v8246_v4 = vmax.f32 %v8214_v39, 0.0  ;;  %v15054_v6 = vpop.permute.xlu1 %8421  ;;  %8543 = vrot.lane.b32.xlu0 %v8245_v42, %s11784_s11 }
 0x4f3   : > { %v11096_v62 = vpop.f32.mrb[76].mxu1  ;;  %v8244_v61 = vmax.f32 %v8212_v38, 0.0 }
 0x4f4   : > { %v8185_v37 = vmul.f32 %v11096_v62, %v14788_v52  ;;  %8545 = vrot.lane.b32.xlu1 %v8246_v4, %s11784_s11  ;;  %v7062_v51 = vpop.f32.mrb[77].mxu1  ;;  %v15060_v20 = vpop.permute.xlu0 %8431  ;;  %v7997_v4 = vmul.f32 %v14788_v52, %v14723_v49 }
 0x4f5   : > { %v8183_v23 = vmul.f32 %v14788_v52, %v7062_v51  ;;  %v11097_v17 = vpop.f32.mrb[78].mxu1  ;;  %v7998_v51 = vmul.f32 %v14788_v52, %v14727_v41 }
 0x4f6   : > { %v8217_v18 = vadd.f32 %v14794_v31, %v8185_v37  ;;  %v8186_v56 = vmul.f32 %v11097_v17, %v14788_v52  ;;  %v15064_v53 = vpop.permute.xlu1 %8433  ;;  %8539 = vrot.lane.b32.xlu0 %v8243_v22, %s11784_s11  ;;  %v7065_v33 = vpop.f32.mrb[79].mxu1 }
 0x4f7   : > { %v8184_v7 = vmul.f32 %v14788_v52, %v7065_v33  ;;  %v8215_v47 = vadd.f32 %v14794_v31, %v8183_v23 }
 0x4f8   : > { %v8249_v25 = vmax.f32 %v8217_v18, 0.0  ;;  %v8218_v59 = vadd.f32 %v14794_v31, %v8186_v56  ;;  %11209 = vmatmul.mubr.msk.bf16.gmra.mrb[120].mxu1 %vm6039_vm13, %v14674_v14  ;;  %8541 = vrot.lane.b32.xlu1 %v8244_v61, %s11784_s11  ;;  %v15075_v46 = vpop.permute.xlu0 %8427  ;;  %v8035_v18 = vadd.f32 %v14794_v31, %v7997_v4  ;;  %v8003_v56 = vmul.f32 %v14733_v12, %v14788_v52 }
 0x4f9   : > { %11212 = vmatprep.mubr.msk.bf16.mxu1 %vm6039_vm13, %v14678_v3  ;;  %v8216_v10 = vadd.f32 %v14794_v31, %v8184_v7  ;;  %v8247_v43 = vmax.f32 %v8215_v47, 0.0  ;;  %v8036_v7 = vadd.f32 %v14794_v31, %v7998_v51 }
 0x4fa   : > { %v8250_v44 = vmax.f32 %v8218_v59, 0.0  ;;  %v15078_v26 = vpop.permute.xlu1 %8429  ;;  %8551 = vrot.lane.b32.xlu0 %v8249_v25, %s11784_s11  ;;  %v8004_v25 = vmul.f32 %v14737_v63, %v14788_v52  ;;  %v8041_v63 = vadd.f32 %v14794_v31, %v8003_v56 }
 0x4fb   : > { %v11100_v24 = vpop.f32.mrb[80].mxu1  ;;  %v8248_v27 = vmax.f32 %v8216_v10, 0.0 }
 0x4fc   : > { %v8189_v60 = vmul.f32 %v11100_v24, %v14788_v52  ;;  %8553 = vrot.lane.b32.xlu1 %v8250_v44, %s11784_s11  ;;  %v7078_v14 = vpop.f32.mrb[81].mxu1  ;;  %v15084_v36 = vpop.permute.xlu0 %8439 }
 0x4fd   : > { %v8187_v13 = vmul.f32 %v14788_v52, %v7078_v14  ;;  %v11101_v3 = vpop.f32.mrb[82].mxu1  ;;  %v8067_v14 = vmax.f32 %v8035_v18, 0.0 }
 0x4fe   : > { %v8221_v19 = vadd.f32 %v14794_v31, %v8189_v60  ;;  %v8190_v42 = vmul.f32 %v11101_v3, %v14788_v52  ;;  %v15088_v40 = vpop.permute.xlu1 %8441  ;;  %8547 = vrot.lane.b32.xlu0 %v8247_v43, %s11784_s11  ;;  %v7081_v39 = vpop.f32.mrb[83].mxu1 }
 0x4ff   : > { %v8188_v38 = vmul.f32 %v14788_v52, %v7081_v39  ;;  %v8219_v22 = vadd.f32 %v14794_v31, %v8187_v13  ;;  %v8042_v39 = vadd.f32 %v14794_v31, %v8004_v25 }
 0x500   : > { %v8253_v62 = vmax.f32 %v8221_v19, 0.0  ;;  %v8222_v37 = vadd.f32 %v14794_v31, %v8190_v42  ;;  %11213 = vmatmul.mubr.msk.bf16.gmra.mrb[124].mxu1 %vm6039_vm13, %v14694_v29  ;;  %8549 = vrot.lane.b32.xlu1 %v8248_v27, %s11784_s11  ;;  %v15103_v23 = vpop.permute.xlu0 %8435  ;;  %v8068_v42 = vmax.f32 %v8036_v7, 0.0 }
 0x501   : > { %11218 = vmatprep.mubr.msk.bf16.mxu1 %vm6039_vm13, %v14366_v2  ;;  %v8220_v17 = vadd.f32 %v14794_v31, %v8188_v38  ;;  %v8251_v33 = vmax.f32 %v8219_v22, 0.0 }
 0x502   : > { %v8254_v49 = vmax.f32 %v8222_v37, 0.0  ;;  %v15106_v61 = vpop.permute.xlu1 %8437  ;;  %8559 = vrot.lane.b32.xlu0 %v8253_v62, %s11784_s11 }
 0x503   : > { %v11104_v29 = vpop.f32.mrb[84].mxu1  ;;  %v8252_v10 = vmax.f32 %v8220_v17, 0.0 }
 0x504   : > { %v8193_v41 = vmul.f32 %v11104_v29, %v14788_v52  ;;  %8561 = vrot.lane.b32.xlu1 %v8254_v49, %s11784_s11  ;;  %v7094_v2 = vpop.f32.mrb[85].mxu1  ;;  %v15118_v59 = vpop.permute.xlu0 %8447  ;;  %v8073_v49 = vmax.f32 %v8041_v63, 0.0  ;;  %v8074_v29 = vmax.f32 %v8042_v39, 0.0 }
 0x505   : > { %v8191_v47 = vmul.f32 %v14788_v52, %v7094_v2  ;;  %v11105_v44 = vpop.f32.mrb[86].mxu1 }
 0x506   : > { %v8225_v24 = vadd.f32 %v14794_v31, %v8193_v41  ;;  %v8194_v12 = vmul.f32 %v11105_v44, %v14788_v52  ;;  %v15122_v43 = vpop.permute.xlu1 %8449  ;;  %8555 = vrot.lane.b32.xlu0 %v8251_v33, %s11784_s11  ;;  %v7097_v60 = vpop.f32.mrb[87].mxu1 }
 0x507   : > { %v8192_v13 = vmul.f32 %v14788_v52, %v7097_v60  ;;  %v8223_v27 = vadd.f32 %v14794_v31, %v8191_v47 }
 0x508   : > { %v8257_v3 = vmax.f32 %v8225_v24, 0.0  ;;  %v8226_v19 = vadd.f32 %v14794_v31, %v8194_v12  ;;  %11219 = vmatmul.mubr.msk.bf16.vlgmr.msra.gmra.mrb[96].mxu1 %vm6039_vm13, %v14376_v9  ;;  %8557 = vrot.lane.b32.xlu1 %v8252_v10, %s11784_s11  ;;  %v8444_v4 = vpop.permute.xlu0 %8443 }
 0x509   : > { %11222 = vmatprep.mubr.msk.bf16.mxu1 %vm6039_vm13, %v14382_v11  ;;  %v8224_v62 = vadd.f32 %v14794_v31, %v8192_v13  ;;  %v15137_v22 = vsel %vm769_vm3, %v8067_v14, %v8444_v4  ;;  %v8255_v17 = vmax.f32 %v8223_v27, 0.0 }
 0x50a   : > { %v8258_v38 = vmax.f32 %v8226_v19, 0.0  ;;  %v8446_v37 = vpop.permute.xlu1 %8445  ;;  %8567 = vrot.lane.b32.xlu0 %v8257_v3, %s11784_s11 }
 0x50b   : > { %v15141_v9 = vsel %vm769_vm3, %v8068_v42, %v8446_v37  ;;  %v11108_v51 = vpop.f32.mrb[88].mxu1  ;;  %v8256_v2 = vmax.f32 %v8224_v62, 0.0 }
 0x50c   : > { %v8197_v18 = vmul.f32 %v11108_v51, %v14788_v52  ;;  %8569 = vrot.lane.b32.xlu1 %v8258_v38, %s11784_s11  ;;  %v7110_v11 = vpop.f32.mrb[89].mxu1  ;;  %v8456_v33 = vpop.permute.xlu0 %8455 }
 0x50d   : > { %v8195_v56 = vmul.f32 %v14788_v52, %v7110_v11  ;;  %v11109_v41 = vpop.f32.mrb[90].mxu1  ;;  %v15148_v25 = vsel %vm769_vm3, %v8073_v49, %v8456_v33  ;;  %v16756_v11 = vld [vmem:[#allocation53_spill] sm:$0xff] }
 0x50e   : > { %v8229_v7 = vadd.f32 %v14794_v31, %v8197_v18  ;;  %v8198_v47 = vmul.f32 %v11109_v41, %v14788_v52  ;;  %v8458_v44 = vpop.permute.xlu1 %8457  ;;  %8563 = vrot.lane.b32.xlu0 %v8255_v17, %s11784_s11  ;;  %v7113_v10 = vpop.f32.mrb[91].mxu1 }
 0x50f   : > { %v15153_v24 = vsel %vm769_vm3, %v8074_v29, %v8458_v44  ;;  %v8196_v12 = vmul.f32 %v14788_v52, %v7113_v10  ;;  %v8227_v14 = vadd.f32 %v14794_v31, %v8195_v56  ;;  %v16761_v44 = vld [vmem:[#allocation7_spill] sm:$0xff]  ;;  %v16762_v10 = vld [vmem:[#allocation62_spill] sm:$0xff] }
 0x510   : > { %v8261_v60 = vmax.f32 %v8229_v7, 0.0  ;;  %v8230_v13 = vadd.f32 %v14794_v31, %v8198_v47  ;;  %11223 = vmatmul.mubr.msk.bf16.gmra.mrb[100].mxu1 %vm6039_vm13, %v14415_v58  ;;  %8565 = vrot.lane.b32.xlu1 %v8256_v2, %s11784_s11  ;;  %v16757_v2 = vld [vmem:[#allocation55_spill] sm:$0xff]  ;;  %v16759_v7 = vld [vmem:[#allocation58_spill] sm:$0xff] }
 0x511   : > { %11226 = vmatprep.mubr.msk.bf16.mxu1 %vm6039_vm13, %v14432_v34  ;;  %v8228_v3 = vadd.f32 %v14794_v31, %v8196_v12  ;;  %v8259_v19 = vmax.f32 %v8227_v14, 0.0  ;;  %v16760_v47 = vld [vmem:[#allocation59_spill] sm:$0xff] }
 0x512   : > { %v8262_v63 = vmax.f32 %v8230_v13, 0.0  ;;  %8575 = vrot.lane.b32.xlu0 %v8261_v60, %s11784_s11  ;;  %v16763_v12 = vld [vmem:[#allocation63_spill] sm:$0xff]  ;;  %v16764_v60 = vld [vmem:[#allocation64_spill] sm:$0xff] }
 0x513   : > { %v11112_v27 = vpop.f32.mrb[92].mxu1  ;;  %v8260_v38 = vmax.f32 %v8228_v3, 0.0  ;;  %v16765_v14 = vld [vmem:[#allocation67_spill] sm:$0xff] }
 0x514   : > { %v8201_v42 = vmul.f32 %v11112_v27, %v14788_v52  ;;  %8577 = vrot.lane.b32.xlu1 %v8262_v63, %s11784_s11  ;;  %v7126_v39 = vpop.f32.mrb[93].mxu1  ;;  %v7975_v13 = vmul.f32 %v16765_v14, %v14788_v52  ;;  %v16766_v63 = vld [vmem:[#allocation6_spill] sm:$0xff] }
 0x515   : > { %v8199_v4 = vmul.f32 %v14788_v52, %v7126_v39  ;;  %v11113_v58 = vpop.f32.mrb[94].mxu1  ;;  %v7976_v3 = vmul.f32 %v16766_v63, %v14788_v52 }
 0x516   : > { %v8233_v62 = vadd.f32 %v14794_v31, %v8201_v42  ;;  %v8202_v34 = vmul.f32 %v11113_v58, %v14788_v52  ;;  %8571 = vrot.lane.b32.xlu0 %v8259_v19, %s11784_s11  ;;  %v7129_v37 = vpop.f32.mrb[95].mxu1  ;;  %v8013_v27 = vadd.f32 %v14794_v31, %v7975_v13  ;;  %v16767_v19 = vld [vmem:[#allocation69_spill] sm:$0xff] }
 0x517   : > { %v8200_v51 = vmul.f32 %v14788_v52, %v7129_v37  ;;  %v8231_v17 = vadd.f32 %v14794_v31, %v8199_v4  ;;  %v7973_v42 = vmul.f32 %v14788_v52, %v16767_v19  ;;  %v8014_v39 = vadd.f32 %v14794_v31, %v7976_v3  ;;  %v16768_v4 = vld [vmem:[#allocation70_spill] sm:$0xff]  ;;  %v16773_v19 = vld [vmem:[#allocation11_spill] sm:$0xff] }
 0x518   : > { %v8265_v49 = vmax.f32 %v8233_v62, 0.0  ;;  %v8234_v18 = vadd.f32 %v14794_v31, %v8202_v34  ;;  %11227 = vmatmul.mubr.msk.bf16.gmra.mrb[104].mxu1 %vm6039_vm13, %v14439_v55  ;;  %8573 = vrot.lane.b32.xlu1 %v8260_v38, %s11784_s11  ;;  %v16758_v55 = vld [vmem:[#allocation56_spill] sm:$0xff]  ;;  %v7974_v58 = vmul.f32 %v14788_v52, %v16768_v4  ;;  %v15212_v38 = vpop.permute.xlu0 %8451  ;;  %v8045_v62 = vmax.f32 %v8013_v27, 0.0  ;;  %v16769_v34 = vld [vmem:[#allocation71_spill] sm:$0xff] }
 0x519   : > { %11230 = vmatprep.mubr.msk.bf16.mxu1 %vm6039_vm13, %v16756_v11  ;;  %v8232_v56 = vadd.f32 %v14794_v31, %v8200_v51  ;;  %v8263_v33 = vmax.f32 %v8231_v17, 0.0  ;;  %v7979_v37 = vmul.f32 %v16769_v34, %v14788_v52  ;;  %v15217_v51 = vpop.permute.xlu1 %8453 }
 0x51a   : > { %v8266_v29 = vmax.f32 %v8234_v18, 0.0  ;;  %8583 = vrot.lane.b32.xlu0 %v8265_v49, %s11784_s11  ;;  %v8046_v49 = vmax.f32 %v8014_v39, 0.0  ;;  %v8012_v17 = vadd.f32 %v14794_v31, %v7974_v58  ;;  %v16770_v18 = vld [vmem:[#allocation72_spill] sm:$0xff] }
 0x51b   : > { %v8264_v41 = vmax.f32 %v8232_v56, 0.0  ;;  %v7980_v11 = vmul.f32 %v16770_v18, %v14788_v52 }
 0x51c   : > { %8585 = vrot.lane.b32.xlu1 %v8266_v29, %s11784_s11  ;;  %v8749_v29 = vsel %vm769_vm3, %v8045_v62, %v14976_v15 }
 0x51d   : > { %v8018_v15 = vadd.f32 %v14794_v31, %v7980_v11  ;;  %v16775_v11 = vld [vmem:[#allocation10_spill] sm:$0xff] }
 0x51e   : > { %8579 = vrot.lane.b32.xlu0 %v8263_v33, %s11784_s11 }
 0x51f   : > { %v8050_v62 = vmax.f32 %v8018_v15, 0.0 }
 0x520   : > { %11231 = vmatmul.mubr.msk.bf16.gmra.mrb[108].mxu1 %vm6039_vm13, %v16757_v2  ;;  %8581 = vrot.lane.b32.xlu1 %v8264_v41, %s11784_s11  ;;  %v8017_v2 = vadd.f32 %v14794_v31, %v7979_v37 }
 0x521   : > { %11234 = vmatprep.mubr.msk.bf16.mxu1 %vm6039_vm13, %v16758_v55  ;;  %v16771_v55 = vld [vmem:[#allocation9_spill] sm:$0xff] }
 0x522   : > { %v8049_v27 = vmax.f32 %v8017_v2, 0.0 }
 0x524   : > { %v8753_v37 = vsel %vm769_vm3, %v8049_v27, %v14990_v21 }
 0x528   : > { %11235 = vmatmul.mubr.msk.bf16.gmra.mrb[112].mxu1 %vm6039_vm13, %v16759_v7  ;;  %v7977_v7 = vmul.f32 %v14788_v52, %v16771_v55 }
 0x529   : > { %11238 = vmatprep.mubr.msk.bf16.mxu1 %vm6039_vm13, %v16760_v47  ;;  %v8750_v47 = vsel %vm769_vm3, %v8046_v49, %v14986_v5 }
 0x52a   : > { %v8015_v5 = vadd.f32 %v14794_v31, %v7977_v7  ;;  %v16776_v7 = vld [vmem:[#allocation13_spill] sm:$0xff] }
 0x52c   : > { %v8047_v18 = vmax.f32 %v8015_v5, 0.0 }
 0x530   : > { %11239 = vmatmul.mubr.msk.bf16.gmra.mrb[116].mxu1 %vm6039_vm13, %v16761_v44 }
 0x531   : > { %11242 = vmatprep.mubr.msk.bf16.mxu1 %vm6039_vm13, %v16762_v10 }
 0x538   : > { %11243 = vmatmul.mubr.msk.bf16.gmra.mrb[120].mxu1 %vm6039_vm13, %v16763_v12  ;;  %v8044_v12 = vmax.f32 %v8012_v17, 0.0 }
 0x539   : > { %11246 = vmatprep.mubr.msk.bf16.mxu1 %vm6039_vm13, %v16764_v60  ;;  %v16772_v60 = vld [vmem:[#allocation8_spill] sm:$0xff] }
 0x53a   : > { %v7978_v14 = vmul.f32 %v14788_v52, %v16772_v60  ;;  %v8748_v39 = vsel %vm769_vm3, %v8044_v12, %v14984_v48 }
 0x540   : > { %11247 = vmatmul.mubr.msk.bf16.gmra.mrb[124].mxu1 %vm6039_vm13, %v14974_v1  ;;  %v8011_v1 = vadd.f32 %v14794_v31, %v7973_v42  ;;  %v7983_v42 = vmul.f32 %v16773_v19, %v14788_v52 }
 0x542   : > { %v8043_v41 = vmax.f32 %v8011_v1, 0.0  ;;  %v16774_v1 = vld [vmem:[#allocation14_spill] sm:$0xff]  ;;  %v8021_v48 = vadd.f32 %v14794_v31, %v7983_v42  ;;  %v16778_v42 = vld [vmem:[#allocation24_spill] sm:$0xff] }
 0x543   : > { %v7984_v34 = vmul.f32 %v16774_v1, %v14788_v52 }
 0x544   : > { %v8747_v13 = vsel %vm769_vm3, %v8043_v41, %v14978_v54  ;;  %v8016_v54 = vadd.f32 %v14794_v31, %v7978_v14  ;;  %v8053_v60 = vmax.f32 %v8021_v48, 0.0  ;;  %v15279_v14 = vld [vmem:[%s16375_s5] ss:$0 sm:$0xff] }
 0x545   : > { %v8022_v21 = vadd.f32 %v14794_v31, %v7984_v34 }
 0x546   : > { %v8048_v55 = vmax.f32 %v8016_v54, 0.0 }
 0x547   : > { %v8054_v5 = vmax.f32 %v8022_v21, 0.0  ;;  %v16780_v21 = vld [vmem:[#allocation31_spill] sm:$0xff] }
 0x549   : > { %v8758_v34 = vsel %vm769_vm3, %v8054_v5, %v15016_v30  ;;  %v7991_v30 = vmul.f32 %v15279_v14, %v16780_v21 }
 0x554   : > { %v8528_v56 = vpop.permute.xlu0 %8527 }
 0x555   : > { %v15225_v33 = vsel %vm6039_vm13, %v8749_v29, %v8528_v56  ;;  %v7981_v29 = vmul.f32 %v14788_v52, %v16775_v11  ;;  %v8754_v56 = vsel %vm769_vm3, %v8050_v62, %v14994_v28  ;;  %v16779_v11 = vld [vmem:[#allocation15_spill] sm:$0xff] }
 0x556   : > { %v8530_v44 = vpop.permute.xlu1 %8529 }
 0x557   : > { %v15233_v10 = vsel %vm6039_vm13, %v8750_v47, %v8530_v44  ;;  %v7982_v47 = vmul.f32 %v14788_v52, %v16776_v7  ;;  %v8751_v44 = vsel %vm769_vm3, %v8047_v18, %v15003_v45  ;;  %v8019_v28 = vadd.f32 %v14794_v31, %v7981_v29  ;;  %v15291_v31 = vld [vmem:[%s16376_s6] ss:$0 sm:$0xff] }
 0x558   : > { %v8524_v63 = vpop.permute.xlu0 %8523  ;;  %v8752_v52 = vsel %vm769_vm3, %v8048_v55, %v15006_v8 }
 0x559   : > { %v15241_v3 = vsel %vm6039_vm13, %v8747_v13, %v8524_v63  ;;  %v16777_v13 = vld [vmem:[#allocation16_spill] sm:$0xff]  ;;  %v8020_v19 = vadd.f32 %v15291_v31, %v7982_v47  ;;  %v8051_v54 = vmax.f32 %v8019_v28, 0.0  ;;  %v16781_v28 = vld [vmem:[#allocation34_spill] sm:$0xff] }
 0x55a   : > { %v8526_v4 = vpop.permute.xlu1 %8525  ;;  %v7987_v63 = vmul.f32 %v15279_v14, %v16777_v13 }
 0x55b   : > { %v15249_v58 = vsel %vm6039_vm13, %v8748_v39, %v8526_v4  ;;  %v7988_v39 = vmul.f32 %v15279_v14, %v16778_v42  ;;  %v8757_v4 = vsel %vm769_vm3, %v8053_v60, %v15012_v50  ;;  %v8052_v18 = vmax.f32 %v8020_v19, 0.0 }
 0x55c   : > { %v8536_v49 = vpop.permute.xlu0 %8535  ;;  %v8025_v1 = vadd.f32 %v15291_v31, %v7987_v63  ;;  %v7986_v50 = vmul.f32 %v15279_v14, %v16779_v11  ;;  %v8755_v29 = vsel %vm769_vm3, %v8051_v54, %v15027_v35  ;;  %v7992_v35 = vmul.f32 %v15279_v14, %v16781_v28 }
 0x55d   : > { %v15257_v17 = vsel %vm6039_vm13, %v8753_v37, %v8536_v49  ;;  %v8026_v48 = vadd.f32 %v15291_v31, %v7988_v39  ;;  %v8756_v7 = vsel %vm769_vm3, %v8052_v18, %v15030_v16  ;;  %v16782_v16 = vld [vmem:[#allocation28_spill] sm:$0xff]  ;;  %v16784_v18 = vld [vmem:[#allocation37_spill] sm:$0xff] }
 0x55e   : > { %v8538_v41 = vpop.permute.xlu1 %8537  ;;  %v8057_v55 = vmax.f32 %v8025_v1, 0.0  ;;  %v8024_v60 = vadd.f32 %v15291_v31, %v7986_v50  ;;  %v7989_v5 = vmul.f32 %v15279_v14, %v16782_v16  ;;  %v16787_v16 = vld [vmem:[#allocation38_spill] sm:$0xff] }
 0x55f   : > { %v15265_v2 = vsel %vm6039_vm13, %v8754_v56, %v8538_v41 }
 0x560   : > { %v8532_v12 = vpop.permute.xlu0 %8531  ;;  %v8761_v13 = vsel %vm769_vm3, %v8057_v55, %v15036_v0  ;;  %v16783_v0 = vld [vmem:[#allocation32_spill] sm:$0xff]  ;;  %v16785_v55 = vld [vmem:[#allocation39_spill] sm:$0xff] }
 0x561   : > { %v15273_v15 = vsel %vm6039_vm13, %v8751_v44, %v8532_v12  ;;  %v8058_v12 = vmax.f32 %v8026_v48, 0.0  ;;  %v7990_v54 = vmul.f32 %v15279_v14, %v16783_v0  ;;  %v7995_v48 = vmul.f32 %v15279_v14, %v16784_v18  ;;  %v16788_v0 = vld [vmem:[#allocation42_spill] sm:$0xff] }
 0x562   : > { %v8534_v27 = vpop.permute.xlu1 %8533  ;;  %v7996_v21 = vmul.f32 %v15279_v14, %v16785_v55 }
 0x563   : > { %v15286_v45 = vsel %vm6039_vm13, %v8752_v52, %v8534_v27  ;;  %v8029_v27 = vadd.f32 %v15291_v31, %v7991_v30  ;;  %v8762_v19 = vsel %vm769_vm3, %v8058_v12, %v15040_v57 }
 0x564   : > { %v8544_v62 = vpop.permute.xlu0 %8543 }
 0x565   : > { %v15299_v8 = vsel %vm6039_vm13, %v8757_v4, %v8544_v62  ;;  %v8056_v4 = vmax.f32 %v8024_v60, 0.0  ;;  %v8030_v62 = vadd.f32 %v15291_v31, %v7992_v35  ;;  %v16786_v60 = vld [vmem:[#allocation35_spill] sm:$0xff] }
 0x566   : > { %v8546_v37 = vpop.permute.xlu1 %8545  ;;  %v7993_v28 = vmul.f32 %v15279_v14, %v16786_v60 }
 0x567   : > { %v15305_v49 = vsel %vm6039_vm13, %v8758_v34, %v8546_v37  ;;  %v8061_v34 = vmax.f32 %v8029_v27, 0.0  ;;  %v8027_v37 = vadd.f32 %v15291_v31, %v7989_v5  ;;  %v8760_v57 = vsel %vm769_vm3, %v8056_v4, %v15054_v6 }
 0x568   : > { %v8540_v56 = vpop.permute.xlu0 %8539  ;;  %v8033_v6 = vadd.f32 %v15291_v31, %v7995_v48  ;;  %v7994_v5 = vmul.f32 %v15279_v14, %v16787_v16 }
 0x569   : > { %v15313_v41 = vsel %vm6039_vm13, %v8755_v29, %v8540_v56  ;;  %v8062_v29 = vmax.f32 %v8030_v62, 0.0  ;;  %v8028_v56 = vadd.f32 %v15291_v31, %v7990_v54  ;;  %v8765_v30 = vsel %vm769_vm3, %v8061_v34, %v15060_v20 }
 0x56a   : > { %v8542_v47 = vpop.permute.xlu1 %8541  ;;  %v8059_v12 = vmax.f32 %v8027_v37, 0.0  ;;  %v8034_v20 = vadd.f32 %v15291_v31, %v7996_v21  ;;  %v8065_v62 = vmax.f32 %v8033_v6, 0.0  ;;  %v7999_v54 = vmul.f32 %v15279_v14, %v16788_v0 }
 0x56b   : > { %v15320_v44 = vsel %vm6039_vm13, %v8756_v7, %v8542_v47  ;;  %v8766_v35 = vsel %vm769_vm3, %v8062_v29, %v15064_v53  ;;  %v8060_v27 = vmax.f32 %v8028_v56, 0.0  ;;  %v8031_v53 = vadd.f32 %v15291_v31, %v7993_v28 }
 0x56c   : > { %v8552_v63 = vpop.permute.xlu0 %8551  ;;  %v8066_v48 = vmax.f32 %v8034_v20, 0.0  ;;  %v8769_v29 = vsel %vm769_vm3, %v8065_v62, %v15084_v36 }
 0x56d   : > { %v15328_v52 = vsel %vm6039_vm13, %v8761_v13, %v8552_v63  ;;  %v8764_v34 = vsel %vm769_vm3, %v8060_v27, %v15078_v26  ;;  %v8063_v21 = vmax.f32 %v8031_v53, 0.0  ;;  %v8037_v26 = vadd.f32 %v15291_v31, %v7999_v54 }
 0x56e   : > { %v8554_v42 = vpop.permute.xlu1 %8553 }
 0x56f   : > { %v15336_v39 = vsel %vm6039_vm13, %v8762_v19, %v8554_v42  ;;  %v8763_v19 = vsel %vm769_vm3, %v8059_v12, %v15075_v46  ;;  %v8032_v46 = vadd.f32 %v15291_v31, %v7994_v5  ;;  %v8767_v36 = vsel %vm769_vm3, %v8063_v21, %v15103_v23  ;;  %v16790_v23 = vld [vmem:[#allocation44_spill] sm:$0xff] }
 0x570   : > { %v15341_v1 = vpop.permute.xlu0 %8547  ;;  %v8001_v62 = vmul.f32 %v15279_v14, %v16790_v23 }
 0x571   : > { %v8064_v6 = vmax.f32 %v8032_v46, 0.0 }
 0x572   : > { %v8550_v11 = vpop.permute.xlu1 %8549 }
 0x573   : > { %v15349_v50 = vsel %vm6039_vm13, %v8760_v57, %v8550_v11  ;;  %v16789_v57 = vld [vmem:[#allocation41_spill] sm:$0xff]  ;;  %v8768_v27 = vsel %vm769_vm3, %v8064_v6, %v15106_v61 }
 0x574   : > { %v8560_v7 = vpop.permute.xlu0 %8559  ;;  %v8000_v11 = vmul.f32 %v15279_v14, %v16789_v57 }
 0x575   : > { %v15357_v47 = vsel %vm6039_vm13, %v8765_v30, %v8560_v7  ;;  %v8770_v30 = vsel %vm769_vm3, %v8066_v48, %v15088_v40 }
 0x576   : > { %v8562_v13 = vpop.permute.xlu1 %8561  ;;  %v8038_v60 = vadd.f32 %v15291_v31, %v8000_v11 }
 0x577   : > { %v15365_v63 = vsel %vm6039_vm13, %v8766_v35, %v8562_v13  ;;  %v8069_v13 = vmax.f32 %v8037_v26, 0.0 }
 0x578   : > { %v8556_v42 = vpop.permute.xlu0 %8555  ;;  %v8070_v16 = vmax.f32 %v8038_v60, 0.0 }
 0x579   : > { %v15373_v4 = vsel %vm6039_vm13, %v8763_v19, %v8556_v42  ;;  %v8773_v5 = vsel %vm769_vm3, %v8069_v13, %v15118_v59  ;;  %v8039_v59 = vadd.f32 %v15291_v31, %v8001_v62 }
 0x57a   : > { %v8558_v37 = vpop.permute.xlu1 %8557  ;;  %v8774_v53 = vsel %vm769_vm3, %v8070_v16, %v15122_v43 }
 0x57b   : > { %v15381_v18 = vsel %vm6039_vm13, %v8764_v34, %v8558_v37  ;;  %v8071_v57 = vmax.f32 %v8039_v59, 0.0 }
 0x57c   : > { %v8568_v56 = vpop.permute.xlu0 %8567 }
 0x57d   : > { %v15389_v55 = vsel %vm6039_vm13, %v8769_v29, %v8568_v56 }
 0x57e   : > { %v8570_v7 = vpop.permute.xlu1 %8569 }
 0x57f   : > { %v15395_v12 = vsel %vm6039_vm13, %v8770_v30, %v8570_v7 }
 0x580   : > { %v8564_v28 = vpop.permute.xlu0 %8563 }
 0x581   : > { %v15401_v35 = vsel %vm6039_vm13, %v8767_v36, %v8564_v28 }
 0x582   : > { %v8566_v20 = vpop.permute.xlu1 %8565 }
 0x583   : > { %v15406_v40 = vsel %vm6039_vm13, %v8768_v27, %v8566_v20 }
 0x584   : > { %v8576_v19 = vpop.permute.xlu0 %8575 }
 0x585   : > { %v15411_v42 = vsel %vm6039_vm13, %v8773_v5, %v8576_v19 }
 0x586   : > { %v8578_v0 = vpop.permute.xlu1 %8577 }
 0x587   : > { %v15418_v61 = vsel %vm6039_vm13, %v8774_v53, %v8578_v0 }
 0x588   : > { %v8572_v54 = vpop.permute.xlu0 %8571 }
 0x589   : > { %v15422_v34 = vsel %vm6039_vm13, %v15137_v22, %v8572_v54  ;;  %v8775_v22 = vsel %vm769_vm3, %v8071_v57, %v15212_v38 }
 0x58a   : > { %v8574_v37 = vpop.permute.xlu1 %8573 }
 0x58b   : > { %v15427_v48 = vsel %vm6039_vm13, %v15141_v9, %v8574_v37 }
 0x58c   : > { %v8584_v46 = vpop.permute.xlu0 %8583 }
 0x58d   : > { %v15431_v43 = vsel %vm6039_vm13, %v15148_v25, %v8584_v46 }
 0x58e   : > { %v8586_v11 = vpop.permute.xlu1 %8585 }
 0x58f   : > { %v15435_v29 = vsel %vm6039_vm13, %v15153_v24, %v8586_v11 }
 0x590   : > { %v8580_v56 = vpop.permute.xlu0 %8579 }
 0x591   : > { %v15440_v21 = vsel %vm6039_vm13, %v8775_v22, %v8580_v56 }
 0x5db   : > { %v11220_v9 = vpop.f32.mrb[96].mxu1 }
 0x5dc   : > { %v8269_v26 = vmul.f32 %v15279_v14, %v11220_v9  ;;  %v7806_v30 = vpop.f32.mrb[97].mxu1 }
 0x5dd   : > { %v8267_v25 = vmul.f32 %v15279_v14, %v7806_v30  ;;  %v11221_v7 = vpop.f32.mrb[98].mxu1 }
 0x5de   : > { %v8301_v6 = vadd.f32 %v15291_v31, %v8269_v26  ;;  %v8270_v60 = vmul.f32 %v15279_v14, %v11221_v7  ;;  %v7809_v24 = vpop.f32.mrb[99].mxu1 }
 0x5df   : > { %v8268_v36 = vmul.f32 %v15279_v14, %v7809_v24  ;;  %v8299_v38 = vadd.f32 %v15291_v31, %v8267_v25 }
 0x5e0   : > { %v8333_v28 = vmax.f32 %v8301_v6, 0.0  ;;  %v8302_v13 = vadd.f32 %v15291_v31, %v8270_v60 }
 0x5e1   : > { %v8300_v20 = vadd.f32 %v15291_v31, %v8268_v36  ;;  %v8331_v5 = vmax.f32 %v8299_v38, 0.0 }
 0x5e2   : > { %v8334_v27 = vmax.f32 %v8302_v13, 0.0  ;;  %8655 = vrot.lane.b32.xlu1 %v8333_v28, %s11785_s16 }
 0x5e3   : > { %v11224_v16 = vpop.f32.mrb[100].mxu1  ;;  %v8332_v0 = vmax.f32 %v8300_v20, 0.0 }
 0x5e4   : > { %v8273_v19 = vmul.f32 %v15279_v14, %v11224_v16  ;;  %8657 = vrot.lane.b32.xlu0 %v8334_v27, %s11785_s16  ;;  %v7822_v23 = vpop.f32.mrb[101].mxu1 }
 0x5e5   : > { %v8271_v62 = vmul.f32 %v15279_v14, %v7822_v23  ;;  %v11225_v53 = vpop.f32.mrb[102].mxu1 }
 0x5e6   : > { %v8305_v54 = vadd.f32 %v15291_v31, %v8273_v19  ;;  %v8274_v59 = vmul.f32 %v15279_v14, %v11225_v53  ;;  %8651 = vrot.lane.b32.xlu1 %v8331_v5, %s11785_s16  ;;  %v7825_v37 = vpop.f32.mrb[103].mxu1 }
 0x5e7   : > { %v8272_v46 = vmul.f32 %v15279_v14, %v7825_v37  ;;  %v8303_v11 = vadd.f32 %v15291_v31, %v8271_v62 }
 0x5e8   : > { %v8337_v57 = vmax.f32 %v8305_v54, 0.0  ;;  %v8306_v22 = vadd.f32 %v15291_v31, %v8274_v59  ;;  %8653 = vrot.lane.b32.xlu0 %v8332_v0, %s11785_s16 }
 0x5e9   : > { %v8304_v9 = vadd.f32 %v15291_v31, %v8272_v46  ;;  %v8335_v30 = vmax.f32 %v8303_v11, 0.0 }
 0x5ea   : > { %v8338_v56 = vmax.f32 %v8306_v22, 0.0  ;;  %8663 = vrot.lane.b32.xlu1 %v8337_v57, %s11785_s16 }
 0x5eb   : > { %v11228_v26 = vpop.f32.mrb[104].mxu1  ;;  %v8336_v60 = vmax.f32 %v8304_v9, 0.0 }
 0x5ec   : > { %v8277_v25 = vmul.f32 %v15279_v14, %v11228_v26  ;;  %8665 = vrot.lane.b32.xlu0 %v8338_v56, %s11785_s16  ;;  %v7838_v7 = vpop.f32.mrb[105].mxu1 }
 0x5ed   : > { %v11229_v6 = vpop.f32.mrb[106].mxu1  ;;  %v8275_v36 = vmul.f32 %v15279_v14, %v7838_v7 }
 0x5ee   : > { %v8309_v24 = vadd.f32 %v15291_v31, %v8277_v25  ;;  %v8278_v28 = vmul.f32 %v15279_v14, %v11229_v6  ;;  %8659 = vrot.lane.b32.xlu1 %v8335_v30, %s11785_s16  ;;  %v7841_v38 = vpop.f32.mrb[107].mxu1 }
 0x5ef   : > { %v8276_v13 = vmul.f32 %v15279_v14, %v7841_v38  ;;  %v8307_v16 = vadd.f32 %v15291_v31, %v8275_v36 }
 0x5f0   : > { %v8310_v27 = vadd.f32 %v15291_v31, %v8278_v28  ;;  %8661 = vrot.lane.b32.xlu0 %v8336_v60, %s11785_s16  ;;  %v8341_v20 = vmax.f32 %v8309_v24, 0.0 }
 0x5f1   : > { %v8308_v19 = vadd.f32 %v15291_v31, %v8276_v13  ;;  %v8339_v59 = vmax.f32 %v8307_v16, 0.0 }
 0x5f2   : > { %v8342_v5 = vmax.f32 %v8310_v27, 0.0 }
 0x5f3   : > { %v11232_v23 = vpop.f32.mrb[108].mxu1  ;;  %v8340_v37 = vmax.f32 %v8308_v19, 0.0 }
 0x5f4   : > { %v8281_v62 = vmul.f32 %v15279_v14, %v11232_v23  ;;  %8671 = vrot.lane.b32.xlu0 %v8341_v20, %s11785_s16  ;;  %8673 = vrot.lane.b32.xlu1 %v8342_v5, %s11785_s16  ;;  %v7854_v53 = vpop.f32.mrb[109].mxu1 }
 0x5f5   : > { %v8279_v0 = vmul.f32 %v15279_v14, %v7854_v53  ;;  %v11233_v54 = vpop.f32.mrb[110].mxu1 }
 0x5f6   : > { %v8313_v46 = vadd.f32 %v15291_v31, %v8281_v62  ;;  %v8282_v57 = vmul.f32 %v15279_v14, %v11233_v54  ;;  %v7857_v11 = vpop.f32.mrb[111].mxu1 }
 0x5f7   : > { %v8280_v22 = vmul.f32 %v15279_v14, %v7857_v11  ;;  %v8311_v9 = vadd.f32 %v15291_v31, %v8279_v0 }
 0x5f8   : > { %v8314_v56 = vadd.f32 %v15291_v31, %v8282_v57  ;;  %8667 = vrot.lane.b32.xlu0 %v8339_v59, %s11785_s16  ;;  %8669 = vrot.lane.b32.xlu1 %v8340_v37, %s11785_s16  ;;  %v8345_v26 = vmax.f32 %v8313_v46, 0.0 }
 0x5f9   : > { %v8312_v25 = vadd.f32 %v15291_v31, %v8280_v22  ;;  %v8343_v24 = vmax.f32 %v8311_v9, 0.0 }
 0x5fa   : > { %v8346_v30 = vmax.f32 %v8314_v56, 0.0 }
 0x5fb   : > { %v11236_v7 = vpop.f32.mrb[112].mxu1  ;;  %v8344_v28 = vmax.f32 %v8312_v25, 0.0 }
 0x5fc   : > { %v8285_v6 = vmul.f32 %v15279_v14, %v11236_v7  ;;  %8679 = vrot.lane.b32.xlu0 %v8345_v26, %s11785_s16  ;;  %8681 = vrot.lane.b32.xlu1 %v8346_v30, %s11785_s16  ;;  %v7870_v60 = vpop.f32.mrb[113].mxu1 }
 0x5fd   : > { %v11237_v36 = vpop.f32.mrb[114].mxu1  ;;  %v8283_v13 = vmul.f32 %v15279_v14, %v7870_v60 }
 0x5fe   : > { %v8317_v38 = vadd.f32 %v15291_v31, %v8285_v6  ;;  %v8286_v27 = vmul.f32 %v15279_v14, %v11237_v36  ;;  %v7873_v20 = vpop.f32.mrb[115].mxu1 }
 0x5ff   : > { %v8284_v16 = vmul.f32 %v15279_v14, %v7873_v20  ;;  %v8315_v23 = vadd.f32 %v15291_v31, %v8283_v13 }
 0x600   : > { %v8318_v5 = vadd.f32 %v15291_v31, %v8286_v27  ;;  %8675 = vrot.lane.b32.xlu0 %v8343_v24, %s11785_s16  ;;  %8677 = vrot.lane.b32.xlu1 %v8344_v28, %s11785_s16  ;;  %v8349_v19 = vmax.f32 %v8317_v38, 0.0 }
 0x601   : > { %v8316_v53 = vadd.f32 %v15291_v31, %v8284_v16  ;;  %v8347_v57 = vmax.f32 %v8315_v23, 0.0 }
 0x602   : > { %v8350_v62 = vmax.f32 %v8318_v5, 0.0 }
 0x603   : > { %v11240_v0 = vpop.f32.mrb[116].mxu1  ;;  %v8348_v11 = vmax.f32 %v8316_v53, 0.0 }
 0x604   : > { %v8289_v54 = vmul.f32 %v15279_v14, %v11240_v0  ;;  %8687 = vrot.lane.b32.xlu1 %v8349_v19, %s11785_s16  ;;  %8689 = vrot.lane.b32.xlu0 %v8350_v62, %s11785_s16  ;;  %v7886_v59 = vpop.f32.mrb[117].mxu1 }
 0x605   : > { %v8287_v37 = vmul.f32 %v15279_v14, %v7886_v59  ;;  %v11241_v46 = vpop.f32.mrb[118].mxu1 }
 0x606   : > { %v8321_v22 = vadd.f32 %v15291_v31, %v8289_v54  ;;  %v8290_v56 = vmul.f32 %v15279_v14, %v11241_v46  ;;  %v7889_v9 = vpop.f32.mrb[119].mxu1 }
 0x607   : > { %v8319_v26 = vadd.f32 %v15291_v31, %v8287_v37  ;;  %v8288_v30 = vmul.f32 %v15279_v14, %v7889_v9 }
 0x608   : > { %8683 = vrot.lane.b32.xlu1 %v8347_v57, %s11785_s16  ;;  %8685 = vrot.lane.b32.xlu0 %v8348_v11, %s11785_s16  ;;  %v8322_v7 = vadd.f32 %v15291_v31, %v8290_v56  ;;  %v8353_v6 = vmax.f32 %v8321_v22, 0.0 }
 0x609   : > { %v8351_v25 = vmax.f32 %v8319_v26, 0.0  ;;  %v8320_v60 = vadd.f32 %v15291_v31, %v8288_v30 }
 0x60a   : > { %v8354_v38 = vmax.f32 %v8322_v7, 0.0 }
 0x60b   : > { %v11244_v24 = vpop.f32.mrb[120].mxu1  ;;  %v8352_v27 = vmax.f32 %v8320_v60, 0.0 }
 0x60c   : > { %v8293_v36 = vmul.f32 %v15279_v14, %v11244_v24  ;;  %8695 = vrot.lane.b32.xlu0 %v8353_v6, %s11785_s16  ;;  %8691 = vrot.lane.b32.xlu1 %v8351_v25, %s11785_s16  ;;  %v7902_v28 = vpop.f32.mrb[121].mxu1 }
 0x60d   : > { %v11245_v13 = vpop.f32.mrb[122].mxu1  ;;  %v8291_v16 = vmul.f32 %v15279_v14, %v7902_v28 }
 0x60e   : > { %v8325_v20 = vadd.f32 %v15291_v31, %v8293_v36  ;;  %v8294_v5 = vmul.f32 %v15279_v14, %v11245_v13  ;;  %v7905_v19 = vpop.f32.mrb[123].mxu1 }
 0x60f   : > { %v8292_v23 = vmul.f32 %v15279_v14, %v7905_v19  ;;  %v8323_v0 = vadd.f32 %v15291_v31, %v8291_v16  ;;  %v16792_v16 = vld [vmem:[#allocation43_spill] sm:$0xff] }
 0x610   : > { %v8326_v62 = vadd.f32 %v15291_v31, %v8294_v5  ;;  %8697 = vrot.lane.b32.xlu1 %v8354_v38, %s11785_s16  ;;  %8693 = vrot.lane.b32.xlu0 %v8352_v27, %s11785_s16  ;;  %v8357_v53 = vmax.f32 %v8325_v20, 0.0  ;;  %v16791_v27 = vld [vmem:[#allocation25_spill] sm:$0xff]  ;;  %v8002_v5 = vmul.f32 %v15279_v14, %v16792_v16 }
 0x611   : > { %v8324_v59 = vadd.f32 %v15291_v31, %v8292_v23  ;;  %v8355_v22 = vmax.f32 %v8323_v0, 0.0  ;;  %v7985_v20 = vmul.f32 %v15279_v14, %v16791_v27 }
 0x612   : > { %v8358_v54 = vmax.f32 %v8326_v62, 0.0  ;;  %v8040_v23 = vadd.f32 %v15291_v31, %v8002_v5  ;;  %v8582_v62 = vpop.permute.xlu1 %8581 }
 0x613   : > { %v11248_v37 = vpop.f32.mrb[124].mxu1  ;;  %v8356_v56 = vmax.f32 %v8324_v59, 0.0  ;;  %v8023_v19 = vadd.f32 %v15291_v31, %v7985_v20 }
 0x614   : > { %8703 = vrot.lane.b32.xlu0 %v8357_v53, %s11785_s16  ;;  %8705 = vrot.lane.b32.xlu1 %v8358_v54, %s11785_s16  ;;  %v7918_v46 = vpop.f32.mrb[125].mxu1  ;;  %v8297_v9 = vmul.f32 %v15279_v14, %v11248_v37  ;;  %v8072_v0 = vmax.f32 %v8040_v23, 0.0 }
 0x615   : > { %v8295_v57 = vmul.f32 %v15279_v14, %v7918_v46  ;;  %v11249_v11 = vpop.f32.mrb[126].mxu1  ;;  %v8055_v53 = vmax.f32 %v8023_v19, 0.0 }
 0x616   : > { %v7921_v26 = vpop.f32.mrb[127].mxu1  ;;  %v8298_v25 = vmul.f32 %v15279_v14, %v11249_v11  ;;  %v8329_v24 = vadd.f32 %v15291_v31, %v8297_v9  ;;  %v8776_v46 = vsel %vm769_vm3, %v8072_v0, %v15217_v51 }
 0x617   : > { %v8327_v30 = vadd.f32 %v15291_v31, %v8295_v57  ;;  %v8296_v7 = vmul.f32 %v15279_v14, %v7921_v26  ;;  %v8759_v59 = vsel %vm769_vm3, %v8055_v53, %v15051_v32  ;;  %v15557_v57 = vsel %vm6039_vm13, %v8776_v46, %v8582_v62 }
 0x618   : > { %8699 = vrot.lane.b32.xlu0 %v8355_v22, %s11785_s16  ;;  %8701 = vrot.lane.b32.xlu1 %v8356_v56, %s11785_s16  ;;  %v8330_v36 = vadd.f32 %v15291_v31, %v8298_v25  ;;  %v8361_v38 = vmax.f32 %v8329_v24, 0.0  ;;  %v15554_v14 = vsel %vm6039_vm13, %v8759_v59, %v15341_v1  ;;  %vm8873_vm3 = vcmask 1045509  }
 0x619   : > { %v8359_v6 = vmax.f32 %v8327_v30, 0.0  ;;  %v8328_v60 = vadd.f32 %v15291_v31, %v8296_v7 }
 0x61a   : > { %v8362_v13 = vmax.f32 %v8330_v36, 0.0 }
 0x61b   : > { %v8360_v28 = vmax.f32 %v8328_v60, 0.0 }
 0x61c   : > { %8707 = vrot.lane.b32.xlu0 %v8359_v6, %s11785_s16 }
 0x61d   : > { %8709 = vrot.lane.b32.xlu1 %v8360_v28, %s11785_s16 }
 0x620   : > { %8711 = vrot.lane.b32.xlu0 %v8361_v38, %s11785_s16 }
 0x621   : > { %8713 = vrot.lane.b32.xlu1 %v8362_v13, %s11785_s16 }
 0x654   : > { %v8656_v54 = vpop.permute.xlu1 %8655 }
 0x655   : > { %v15548_v37 = vsel %vm8811_vm14, %v15225_v33, %v8656_v54 }
 0x656   : > { %v8658_v31 = vpop.permute.xlu0 %8657  ;;  %v8932_v33 = vrot.slane %v15548_v37, 1  ;;  %v8966_v22 = vrot.slane %v15548_v37, 2  ;;  %v9000_v51 = vrot.slane %v15548_v37, 3  ;;  %v9034_v1 = vrot.slane %v15548_v37, 4 }
 0x657   : > { %v15562_v32 = vsel %vm8811_vm14, %v15233_v10, %v8658_v31  ;;  %v9068_v9 = vrot.slane %v15548_v37, 5  ;;  %v9102_v26 = vrot.slane %v15548_v37, 6 }
 0x658   : > { %v8652_v56 = vpop.permute.xlu1 %8651  ;;  %v9352_v60 = vrot.slane %v15562_v32, 5 }
 0x659   : > { %v15573_v10 = vsel %vm8811_vm14, %v15241_v3, %v8652_v56 }
 0x65a   : > { %v8654_v24 = vpop.permute.xlu0 %8653  ;;  %v8897_v28 = vrot.slane %v15573_v10, 1  ;;  %v9067_v38 = vrot.slane %v15573_v10, 6  ;;  %v8931_v3 = vrot.slane %v15573_v10, 2  ;;  %v8965_v27 = vrot.slane %v15573_v10, 3 }
 0x65b   : > { %v15584_v13 = vsel %vm8811_vm14, %v15249_v58, %v8654_v24  ;;  %v8999_v20 = vrot.slane %v15573_v10, 4  ;;  %v9033_v16 = vrot.slane %v15573_v10, 5  ;;  %v9101_v19 = vrot.slane %v15573_v10, 7 }
 0x65c   : > { %v8664_v5 = vpop.permute.xlu1 %8663  ;;  %v9181_v23 = vrot.slane %v15584_v13, 1  ;;  %v9351_v59 = vrot.slane %v15584_v13, 6  ;;  %v9069_v56 = vsel %vm8861_vm15, %v9068_v9, %v9067_v38  ;;  %v8933_v6 = vsel %vm8861_vm15, %v8932_v33, %v8931_v3 }
 0x65d   : > { %v15595_v58 = vsel %vm8811_vm14, %v15257_v17, %v8664_v5  ;;  %v8898_v17 = vsel %vm8861_vm15, %v15548_v37, %v8897_v28  ;;  %v8967_v9 = vsel %vm8861_vm15, %v8966_v22, %v8965_v27  ;;  %v9001_v38 = vsel %vm8861_vm15, %v9000_v51, %v8999_v20 }
 0x65e   : > { %v8666_v46 = vpop.permute.xlu0 %8665  ;;  %v9072_v24 = vrot.slane %v15595_v58, 3  ;;  %v8901_v36 = vrot.slane %v15595_v58, 6  ;;  %v8935_v54 = vrot.slane %v15595_v58, 7  ;;  %v9004_v28 = vrot.slane %v15595_v58, 1 }
 0x65f   : > { %v15608_v5 = vsel %vm8811_vm14, %v15265_v2, %v8666_v46  ;;  %v9035_v7 = vsel %vm8861_vm15, %v9034_v1, %v9033_v16  ;;  %v9038_v0 = vrot.slane %v15595_v58, 2  ;;  %v9353_v33 = vsel %vm8861_vm15, %v9352_v60, %v9351_v59 }
 0x660   : > { %v8660_v11 = vpop.permute.xlu1 %8659  ;;  %v9356_v22 = vrot.slane %v15608_v5, 3  ;;  %v9103_v20 = vsel %vm8861_vm15, %v9102_v26, %v9101_v19 }
 0x661   : > { %v15615_v31 = vsel %vm8811_vm14, %v15273_v15, %v8660_v11 }
 0x662   : > { %v8968_v2 = vrot.slane %v15615_v31, 1  ;;  %v8662_v46 = vpop.permute.xlu0 %8661  ;;  %v9070_v15 = vrot.slane %v15615_v31, 4  ;;  %v8899_v11 = vrot.slane %v15615_v31, 7  ;;  %v9002_v27 = vrot.slane %v15615_v31, 2 }
 0x663   : > { %v15626_v3 = vsel %vm8811_vm14, %v15286_v45, %v8662_v46  ;;  %v9036_v1 = vrot.slane %v15615_v31, 3  ;;  %v9104_v60 = vrot.slane %v15615_v31, 5  ;;  %v8934_v30 = vsel %vm8864_vm0, %v15615_v31, %v8933_v6 }
 0x664   : > { %v9071_v59 = vsel %vm8864_vm0, %v9070_v15, %v9069_v56  ;;  %v9354_v46 = vrot.slane %v15626_v3, 4  ;;  %v8900_v51 = vsel %vm8864_vm0, %v8899_v11, %v8898_v17  ;;  %v8969_v62 = vsel %vm8864_vm0, %v8968_v2, %v8967_v9 }
 0x665   : > { %v9073_v17 = vsel %vm8867_vm1, %v9072_v24, %v9071_v59  ;;  %v8902_v6 = vsel %vm8867_vm1, %v8901_v36, %v8900_v51  ;;  %v8936_v9 = vsel %vm8867_vm1, %v8935_v54, %v8934_v30  ;;  %v9003_v45 = vsel %vm8864_vm0, %v9002_v27, %v9001_v38 }
 0x666   : > { %v8672_v25 = vpop.permute.xlu0 %8671  ;;  %v8674_v53 = vpop.permute.xlu1 %8673  ;;  %v9355_v30 = vsel %vm8864_vm0, %v9354_v46, %v9353_v33  ;;  %v15677_v38 = vsel %vm8864_vm0, %v9104_v60, %v9103_v20 }
 0x667   : > { %v15649_v56 = vsel %vm8811_vm14, %v15299_v8, %v8672_v25  ;;  %v15653_v15 = vsel %vm8811_vm14, %v15305_v49, %v8674_v53  ;;  %v9037_v8 = vsel %vm8864_vm0, %v9036_v1, %v9035_v7  ;;  %v8970_v53 = vsel %vm8867_vm1, %v15595_v58, %v8969_v62 }
 0x668   : > { %v9076_v2 = vrot.slane %v15649_v56, 1  ;;  %v8905_v11 = vrot.slane %v15649_v56, 4  ;;  %v8939_v49 = vrot.slane %v15649_v56, 5  ;;  %v8973_v36 = vrot.slane %v15649_v56, 6 }
 0x669   : > { %v9007_v7 = vrot.slane %v15649_v56, 7  ;;  %v9039_v1 = vsel %vm8867_vm1, %v9038_v0, %v9037_v8  ;;  %v9360_v59 = vrot.slane %v15653_v15, 1 }
 0x66a   : > { %v8668_v25 = vpop.permute.xlu0 %8667  ;;  %v8670_v19 = vpop.permute.xlu1 %8669 }
 0x66b   : > { %v15669_v54 = vsel %vm8811_vm14, %v15313_v41, %v8668_v25  ;;  %v15673_v24 = vsel %vm8811_vm14, %v15320_v44, %v8670_v19  ;;  %v9005_v41 = vsel %vm8867_vm1, %v9004_v28, %v9003_v45  ;;  %v9357_v44 = vsel %vm8867_vm1, %v9356_v22, %v9355_v30 }
 0x66c   : > { %v9074_v51 = vrot.slane %v15669_v54, 2  ;;  %v8903_v62 = vrot.slane %v15669_v54, 5  ;;  %v8937_v27 = vrot.slane %v15669_v54, 6  ;;  %v8971_v33 = vrot.slane %v15669_v54, 7 }
 0x66d   : > { %v9358_v26 = vrot.slane %v15673_v24, 2  ;;  %v9006_v28 = vsel %vm8870_vm2, %v15669_v54, %v9005_v41  ;;  %v9040_v22 = vrot.slane %v15669_v54, 1 }
 0x66e   : > { %v8680_v46 = vpop.permute.xlu0 %8679  ;;  %v8682_v19 = vpop.permute.xlu1 %8681  ;;  %v9075_v20 = vsel %vm8870_vm2, %v9074_v51, %v9073_v17  ;;  %v8904_v60 = vsel %vm8870_vm2, %v8903_v62, %v8902_v6  ;;  %v8938_v25 = vsel %vm8870_vm2, %v8937_v27, %v8936_v9  ;;  %v8972_v0 = vsel %vm8870_vm2, %v8971_v33, %v8970_v53 }
 0x66f   : > { %v15693_v16 = vsel %vm8811_vm14, %v15328_v52, %v8680_v46  ;;  %v15701_v45 = vsel %vm8811_vm14, %v15336_v39, %v8682_v19  ;;  %v9077_v17 = vsel %vm8873_vm3, %v9076_v2, %v9075_v20  ;;  %v8906_v6 = vsel %vm8873_vm3, %v8905_v11, %v8904_v60 }
 0x670   : > { %v9106_v9 = vrot.slane %v15595_v58, 4  ;;  %v9079_v52 = vrot.slane %v15693_v16, 7  ;;  %v8909_v8 = vrot.slane %v15693_v16, 2  ;;  %v8940_v53 = vsel %vm8873_vm3, %v8939_v49, %v8938_v25 }
 0x671   : > { %v8943_v30 = vrot.slane %v15693_v16, 3  ;;  %v8974_v27 = vsel %vm8873_vm3, %v8973_v36, %v8972_v0  ;;  %v8977_v39 = vrot.slane %v15693_v16, 4  ;;  %v15713_v2 = vsel %vm8873_vm3, %v9007_v7, %v9006_v28 }
 0x672   : > { %v8676_v51 = vpop.permute.xlu0 %8675  ;;  %v8678_v62 = vpop.permute.xlu1 %8677  ;;  %v9359_v11 = vsel %vm8870_vm2, %v9358_v26, %v9357_v44  ;;  %v9041_v41 = vsel %vm8870_vm2, %v9040_v22, %v9039_v1  ;;  %v9011_v44 = vrot.slane %v15693_v16, 5  ;;  %v9363_v28 = vrot.slane %v15701_v45, 7 }
 0x673   : > { %v15718_v33 = vsel %vm8811_vm14, %v15554_v14, %v8676_v51  ;;  %v15722_v49 = vsel %vm8811_vm14, %v15349_v50, %v8678_v62  ;;  %v9361_v46 = vsel %vm8873_vm3, %v9360_v59, %v9359_v11  ;;  %v9045_v50 = vrot.slane %v15693_v16, 6 }
 0x674   : > { %v9078_v36 = vsel %vm8876_vm4, %v15718_v33, %v9077_v17  ;;  %v8907_v7 = vrot.slane %v15718_v33, 3  ;;  %v8941_v19 = vrot.slane %v15718_v33, 4  ;;  %v8975_v26 = vrot.slane %v15718_v33, 5 }
 0x675   : > { %v9080_v14 = vsel %vm8879_vm5, %v9079_v52, %v9078_v36  ;;  %v9362_v1 = vsel %vm8876_vm4, %v15722_v49, %v9361_v46  ;;  %v9042_v0 = vsel %vm8873_vm3, %v15649_v56, %v9041_v41  ;;  %v9009_v51 = vrot.slane %v15718_v33, 6 }
 0x676   : > { %v8688_v20 = vpop.permute.xlu1 %8687  ;;  %v8690_v59 = vpop.permute.xlu0 %8689  ;;  %9095 = vrot.lane.b32.xlu1 %v9080_v14, %s11786_s17  ;;  %v8908_v60 = vsel %vm8876_vm4, %v8907_v7, %v8906_v6  ;;  %v8942_v25 = vsel %vm8876_vm4, %v8941_v19, %v8940_v53  ;;  %v8976_v53 = vsel %vm8876_vm4, %v8975_v26, %v8974_v27  ;;  %v9043_v62 = vrot.slane %v15718_v33, 7 }
 0x677   : > { %v15744_v22 = vsel %vm8811_vm14, %v15357_v47, %v8688_v20  ;;  %v15748_v17 = vsel %vm8811_vm14, %v15365_v63, %v8690_v59  ;;  %v8910_v52 = vsel %vm8879_vm5, %v8909_v8, %v8908_v60  ;;  %v8944_v6 = vsel %vm8879_vm5, %v8943_v30, %v8942_v25 }
 0x678   : > { %8925 = vrot.lane.b32.xlu0 %v8910_v52, %s11787_s18  ;;  %v15757_v47 = vsel %vm8879_vm5, %v9363_v28, %v9362_v1  ;;  %v8946_v11 = vrot.slane %v15744_v22, 1  ;;  %v8980_v63 = vrot.slane %v15744_v22, 2  ;;  %v9014_v8 = vrot.slane %v15744_v22, 3 }
 0x679   : > { %v9082_v46 = vrot.slane %v15744_v22, 5  ;;  %v9010_v60 = vsel %vm8876_vm4, %v9009_v51, %v15713_v2  ;;  %v9108_v59 = vrot.slane %v15669_v54, 3  ;;  %v9107_v2 = vsel %vm8867_vm1, %v9106_v9, %v15677_v38 }
 0x67a   : > { %v8684_v7 = vpop.permute.xlu1 %8683  ;;  %v8686_v19 = vpop.permute.xlu0 %8685  ;;  %8959 = vrot.lane.b32.xlu1 %v8944_v6, %s11788_s19  ;;  %v9189_v51 = vrot.slane %v15653_v15, 4 }
 0x67b   : > { %v15772_v1 = vsel %vm8811_vm14, %v15373_v4, %v8684_v7  ;;  %v15776_v20 = vsel %vm8811_vm14, %v15381_v18, %v8686_v19  ;;  %v9044_v7 = vsel %vm8876_vm4, %v9043_v62, %v9042_v0  ;;  %v9187_v62 = vrot.slane %v15673_v24, 5 }
 0x67c   : > { %v8911_v25 = vrot.slane %v15772_v1, 1  ;;  %v8945_v28 = vrot.slane %v15772_v1, 2  ;;  %v8979_v52 = vrot.slane %v15772_v1, 3  ;;  %v9013_v6 = vrot.slane %v15772_v1, 4 }
 0x67d   : > { %v9081_v4 = vrot.slane %v15772_v1, 6  ;;  %v9191_v0 = vrot.slane %v15722_v49, 3 }
 0x67e   : > { %v8696_v26 = vpop.permute.xlu0 %8695  ;;  %v8692_v27 = vpop.permute.xlu1 %8691 }
 0x67f   : > { %v15795_v36 = vsel %vm8811_vm14, %v15401_v35, %v8692_v27  ;;  %v15800_v18 = vsel %vm8811_vm14, %v15389_v55, %v8696_v26  ;;  %v8978_v35 = vsel %vm8879_vm5, %v8977_v39, %v8976_v53  ;;  %v9012_v53 = vsel %vm8879_vm5, %v9011_v44, %v9010_v60 }
 0x680   : > { %v8913_v14 = vrot.slane %v15795_v36, 7  ;;  %v8982_v19 = vrot.slane %v15795_v36, 1  ;;  %v9084_v41 = vrot.slane %v15795_v36, 4  ;;  %8993 = vrot.lane.b32.xlu1 %v8978_v35, %s11789_s20  ;;  %v9109_v60 = vsel %vm8870_vm2, %v9108_v59, %v9107_v2 }
 0x682   : > { %v8698_v55 = vpop.permute.xlu1 %8697  ;;  %v8694_v26 = vpop.permute.xlu0 %8693 }
 0x683   : > { %v15818_v30 = vsel %vm8811_vm14, %v15395_v12, %v8698_v55  ;;  %v15822_v39 = vsel %vm8811_vm14, %v15406_v40, %v8694_v26  ;;  %v9046_v40 = vsel %vm8879_vm5, %v9045_v50, %v9044_v7  ;;  %v9110_v55 = vrot.slane %v15649_v56, 2 }
 0x684   : > { %v9368_v35 = vrot.slane %v15822_v39, 4  ;;  %v9402_v44 = vrot.slane %v15822_v39, 5  ;;  %9027 = vrot.lane.b32.xlu1 %v9012_v53, %s11790_s21  ;;  %v9112_v26 = vrot.slane %v15718_v33, 1  ;;  %v9182_v50 = vsel %vm8861_vm15, %v15562_v32, %v9181_v23 }
 0x685   : > { %v9185_v7 = vrot.slane %v15608_v5, 6  ;;  %v16793_v53 = vrot.slane %v15626_v3, 7  ;;  %v9111_v12 = vsel %vm8873_vm3, %v9110_v55, %v9109_v60 }
 0x686   : > { %v8704_v38 = vpop.permute.xlu0 %8703  ;;  %v8706_v9 = vpop.permute.xlu1 %8705 }
 0x687   : > { %v15851_v27 = vsel %vm8811_vm14, %v15411_v42, %v8704_v38  ;;  %v15855_v59 = vsel %vm8811_vm14, %v15418_v61, %v8706_v9  ;;  %v9184_v2 = vsel %vm8864_vm0, %v16793_v53, %v9182_v50  ;;  %v9113_v42 = vsel %vm8876_vm4, %v9112_v26, %v9111_v12 }
 0x688   : > { %v9186_v23 = vsel %vm8867_vm1, %v9185_v7, %v9184_v2  ;;  %v9193_v61 = vrot.slane %v15701_v45, 2  ;;  %v16794_v9 = vrot.slane %v15584_v13, 2  ;;  %v16795_v50 = vrot.slane %v15562_v32, 1  ;;  %9061 = vrot.lane.b32.xlu1 %v9046_v40, %s11791_s22 }
 0x689   : > { %v9188_v38 = vsel %vm8870_vm2, %v9187_v62, %v9186_v23  ;;  %v9114_v7 = vsel %vm8879_vm5, %v15693_v16, %v9113_v42  ;;  %v9219_v26 = vrot.slane %v15608_v5, 7 }
 0x68a   : > { %v9217_v53 = vsel %vm8861_vm15, %v16795_v50, %v16794_v9  ;;  %v8700_v60 = vpop.permute.xlu0 %8699  ;;  %v8702_v55 = vpop.permute.xlu1 %8701  ;;  %v9190_v12 = vsel %vm8873_vm3, %v9189_v51, %v9188_v38  ;;  %v9221_v9 = vrot.slane %v15673_v24, 6  ;;  %v9223_v38 = vrot.slane %v15653_v15, 5 }
 0x68b   : > { %v9218_v62 = vsel %vm8864_vm0, %v15626_v3, %v9217_v53  ;;  %v15882_v2 = vsel %vm8811_vm14, %v15422_v34, %v8700_v60  ;;  %v15886_v23 = vsel %vm8811_vm14, %v15427_v48, %v8702_v55  ;;  %v9192_v40 = vsel %vm8876_vm4, %v9191_v0, %v9190_v12 }
 0x68c   : > { %v9194_v42 = vsel %vm8879_vm5, %v9193_v61, %v9192_v40  ;;  %v9220_v51 = vsel %vm8867_vm1, %v9219_v26, %v9218_v62  ;;  %v9225_v50 = vrot.slane %v15722_v49, 4  ;;  %v9227_v34 = vrot.slane %v15701_v45, 3  ;;  %9379 = vrot.lane.b32.xlu1 %v15757_v47, %s11786_s17 }
 0x68d   : > { %v9222_v53 = vsel %vm8870_vm2, %v9221_v9, %v9220_v51  ;;  %v9083_v48 = vsel %vm8861_vm15, %v9082_v46, %v9081_v4  ;;  %v9086_v0 = vrot.slane %v15800_v18, 3  ;;  %v9088_v12 = vrot.slane %v15882_v2, 2 }
 0x68e   : > { %v8708_v61 = vpop.permute.xlu0 %8707  ;;  %v9224_v60 = vsel %vm8873_vm3, %v9223_v38, %v9222_v53  ;;  %v9085_v55 = vsel %vm8864_vm0, %v9084_v41, %v9083_v48  ;;  %v9090_v62 = vrot.slane %v15851_v27, 1  ;;  %v16796_v40 = vrot.slane %v15584_v13, 3 }
 0x68f   : > { %v15912_v26 = vsel %vm8811_vm14, %v15440_v21, %v8708_v61  ;;  %v8710_v46 = vpop.permute.xlu1 %8709  ;;  %v9226_v4 = vsel %vm8876_vm4, %v9225_v50, %v9224_v60  ;;  %v9087_v47 = vsel %vm8867_vm1, %v9086_v0, %v9085_v55  ;;  %v16797_v9 = vrot.slane %v15562_v32, 2 }
 0x690   : > { %v15923_v41 = vsel %vm8811_vm14, %v15557_v57, %v8710_v46  ;;  %v9228_v38 = vsel %vm8879_vm5, %v9227_v34, %v9226_v4  ;;  %v9089_v21 = vsel %vm8870_vm2, %v9088_v12, %v9087_v47  ;;  %v16798_v53 = vrot.slane %v15626_v3, 1  ;;  %9129 = vrot.lane.b32.xlu1 %v9114_v7, %s11792_s23 }
 0x691   : > { %v9251_v51 = vsel %vm8861_vm15, %v16797_v9, %v16796_v40  ;;  %v9091_v48 = vsel %vm8873_vm3, %v9090_v62, %v9089_v21  ;;  %v9255_v61 = vrot.slane %v15673_v24, 7  ;;  %v9257_v60 = vrot.slane %v15653_v15, 6 }
 0x692   : > { %v9253_v50 = vsel %vm8864_vm0, %v16798_v53, %v9251_v51  ;;  %v8712_v57 = vpop.permute.xlu0 %8711  ;;  %v9092_v34 = vsel %vm8876_vm4, %v15912_v26, %v9091_v48  ;;  %v9259_v55 = vrot.slane %v15722_v49, 5  ;;  %v9261_v12 = vrot.slane %v15701_v45, 4 }
 0x693   : > { %v9254_v0 = vsel %vm8867_vm1, %v15608_v5, %v9253_v50  ;;  %v8912_v62 = vsel %vm8861_vm15, %v15744_v22, %v8911_v25  ;;  %v15946_v46 = vsel %vm8811_vm14, %v15431_v43, %v8712_v57  ;;  %v8714_v4 = vpop.permute.xlu1 %8713  ;;  %v8915_v40 = vrot.slane %v15800_v18, 6 }
 0x694   : > { %v9256_v7 = vsel %vm8870_vm2, %v9255_v61, %v9254_v0  ;;  %v8914_v47 = vsel %vm8864_vm0, %v8913_v14, %v8912_v62  ;;  %v15955_v9 = vsel %vm8811_vm14, %v15435_v29, %v8714_v4  ;;  %v9093_v51 = vrot.slane %v15946_v46, 7  ;;  %9209 = vrot.lane.b32.xlu1 %v9194_v42, %s11787_s18 }
 0x695   : > { %v9258_v25 = vsel %vm8873_vm3, %v9257_v60, %v9256_v7  ;;  %v8917_v43 = vrot.slane %v15882_v2, 5  ;;  %v8916_v53 = vsel %vm8867_vm1, %v8915_v40, %v8914_v47  ;;  %v8919_v50 = vrot.slane %v15851_v27, 4 }
 0x696   : > { %v9260_v21 = vsel %vm8876_vm4, %v9259_v55, %v9258_v25  ;;  %v8921_v14 = vrot.slane %v15912_v26, 3  ;;  %v9094_v48 = vsel %vm8879_vm5, %v9093_v51, %v9092_v34  ;;  %v8923_v61 = vrot.slane %v15946_v46, 2 }
 0x697   : > { %v9262_v29 = vsel %vm8879_vm5, %v9261_v12, %v9260_v21  ;;  %v8918_v0 = vsel %vm8870_vm2, %v8917_v43, %v8916_v53  ;;  %9097 = vrot.lane.b32.xlu0 %v9094_v48, %s11786_s17  ;;  %v16799_v57 = vrot.slane %v15584_v13, 4  ;;  %v16800_v55 = vrot.slane %v15562_v32, 3 }
 0x698   : > { %v8920_v60 = vsel %vm8873_vm3, %v8919_v50, %v8918_v0  ;;  %v9288_v42 = vrot.slane %v15608_v5, 1  ;;  %v9291_v34 = vrot.slane %v15653_v15, 7  ;;  %v16801_v4 = vrot.slane %v15626_v3, 2  ;;  %9243 = vrot.lane.b32.xlu1 %v9228_v38, %s11788_s19 }
 0x699   : > { %v9285_v62 = vsel %vm8861_vm15, %v16800_v55, %v16799_v57  ;;  %v8922_v12 = vsel %vm8876_vm4, %v8921_v14, %v8920_v60  ;;  %v9293_v47 = vrot.slane %v15722_v49, 6  ;;  %v9295_v40 = vrot.slane %v15701_v45, 5 }
 0x69a   : > { %v9287_v7 = vsel %vm8864_vm0, %v16801_v4, %v9285_v62  ;;  %v8924_v51 = vsel %vm8879_vm5, %v8923_v61, %v8922_v12  ;;  %v8947_v43 = vsel %vm8861_vm15, %v8946_v11, %v8945_v28  ;;  %v8949_v21 = vrot.slane %v15800_v18, 7 }
 0x69b   : > { %v9289_v25 = vsel %vm8867_vm1, %v9288_v42, %v9287_v7  ;;  %v8948_v50 = vsel %vm8864_vm0, %v15795_v36, %v8947_v43  ;;  %v8951_v14 = vrot.slane %v15882_v2, 6  ;;  %v8953_v48 = vrot.slane %v15851_v27, 5  ;;  %8927 = vrot.lane.b32.xlu0 %v8924_v51, %s11787_s18 }
 0x69c   : > { %v9290_v53 = vsel %vm8870_vm2, %v15673_v24, %v9289_v25  ;;  %v8950_v11 = vsel %vm8867_vm1, %v8949_v21, %v8948_v50  ;;  %v8955_v28 = vrot.slane %v15912_v26, 4  ;;  %v8957_v38 = vrot.slane %v15946_v46, 3  ;;  %9277 = vrot.lane.b32.xlu1 %v9262_v29, %s11789_s20 }
 0x69d   : > { %v9292_v0 = vsel %vm8873_vm3, %v9291_v34, %v9290_v53  ;;  %v8952_v60 = vsel %vm8870_vm2, %v8951_v14, %v8950_v11  ;;  %v16802_v57 = vrot.slane %v15584_v13, 5  ;;  %v16803_v55 = vrot.slane %v15562_v32, 4 }
 0x69e   : > { %v9294_v61 = vsel %vm8876_vm4, %v9293_v47, %v9292_v0  ;;  %v9322_v42 = vrot.slane %v15608_v5, 2  ;;  %v8954_v12 = vsel %vm8873_vm3, %v8953_v48, %v8952_v60  ;;  %v16804_v4 = vrot.slane %v15626_v3, 3 }
 0x69f   : > { %v9319_v62 = vsel %vm8861_vm15, %v16803_v55, %v16802_v57  ;;  %v9296_v34 = vsel %vm8879_vm5, %v9295_v40, %v9294_v61  ;;  %v9324_v47 = vrot.slane %v15673_v24, 1  ;;  %v8956_v51 = vsel %vm8876_vm4, %v8955_v28, %v8954_v12 }
 0x6a0   : > { %v9321_v7 = vsel %vm8864_vm0, %v16804_v4, %v9319_v62  ;;  %v9327_v43 = vrot.slane %v15722_v49, 7  ;;  %v9329_v21 = vrot.slane %v15701_v45, 6  ;;  %v8958_v40 = vsel %vm8879_vm5, %v8957_v38, %v8956_v51  ;;  %9311 = vrot.lane.b32.xlu1 %v9296_v34, %s11790_s21 }
 0x6a1   : > { %v9323_v25 = vsel %vm8867_vm1, %v9322_v42, %v9321_v7  ;;  %v8981_v50 = vsel %vm8861_vm15, %v8980_v63, %v8979_v52  ;;  %v8985_v29 = vrot.slane %v15882_v2, 7  ;;  %8961 = vrot.lane.b32.xlu0 %v8958_v40, %s11788_s19  ;;  %v8987_v0 = vrot.slane %v15851_v27, 6 }
 0x6a2   : > { %v9325_v53 = vsel %vm8870_vm2, %v9324_v47, %v9323_v25  ;;  %v8983_v48 = vsel %vm8864_vm0, %v8982_v19, %v8981_v50  ;;  %v8989_v11 = vrot.slane %v15912_v26, 5  ;;  %v8991_v52 = vrot.slane %v15946_v46, 4 }
 0x6a3   : > { %v9326_v14 = vsel %vm8873_vm3, %v15653_v15, %v9325_v53  ;;  %v8984_v63 = vsel %vm8867_vm1, %v15800_v18, %v8983_v48  ;;  %v16805_v38 = vrot.slane %v15584_v13, 7  ;;  %v16806_v61 = vrot.slane %v15562_v32, 6 }
 0x6a4   : > { %v9328_v28 = vsel %vm8876_vm4, %v9327_v43, %v9326_v14  ;;  %v8986_v57 = vsel %vm8870_vm2, %v8985_v29, %v8984_v63  ;;  %v16807_v55 = vrot.slane %v15626_v3, 5  ;;  %v9390_v42 = vrot.slane %v15608_v5, 4 }
 0x6a5   : > { %v9387_v60 = vsel %vm8861_vm15, %v16806_v61, %v16805_v38  ;;  %v9330_v19 = vsel %vm8879_vm5, %v9329_v21, %v9328_v28  ;;  %v8988_v12 = vsel %vm8873_vm3, %v8987_v0, %v8986_v57  ;;  %v9392_v4 = vrot.slane %v15673_v24, 3 }
 0x6a6   : > { %v9389_v62 = vsel %vm8864_vm0, %v16807_v55, %v9387_v60  ;;  %v9394_v7 = vrot.slane %v15653_v15, 2  ;;  %v9396_v47 = vrot.slane %v15722_v49, 1  ;;  %v8990_v34 = vsel %vm8876_vm4, %v8989_v11, %v8988_v12  ;;  %9345 = vrot.lane.b32.xlu1 %v9330_v19, %s11791_s22 }
 0x6a7   : > { %v9391_v51 = vsel %vm8867_vm1, %v9390_v42, %v9389_v62  ;;  %v9015_v25 = vsel %vm8861_vm15, %v9014_v8, %v9013_v6  ;;  %v9018_v43 = vrot.slane %v15800_v18, 1  ;;  %v8992_v21 = vsel %vm8879_vm5, %v8991_v52, %v8990_v34 }
 0x6a8   : > { %v9393_v40 = vsel %vm8870_vm2, %v9392_v4, %v9391_v51  ;;  %v16808_v53 = vrot.slane %v15795_v36, 2  ;;  %v9021_v29 = vrot.slane %v15851_v27, 7  ;;  %8995 = vrot.lane.b32.xlu0 %v8992_v21, %s11789_s20  ;;  %v9023_v6 = vrot.slane %v15912_v26, 6 }
 0x6a9   : > { %v9395_v14 = vsel %vm8873_vm3, %v9394_v7, %v9393_v40  ;;  %v9025_v48 = vrot.slane %v15946_v46, 5  ;;  %v16809_v28 = vrot.slane %v15776_v20, 7  ;;  %v16810_v63 = vrot.slane %v15748_v17, 6 }
 0x6aa   : > { %v9017_v50 = vsel %vm8864_vm0, %v16808_v53, %v9015_v25  ;;  %v9397_v0 = vsel %vm8876_vm4, %v9396_v47, %v9395_v14  ;;  %v9404_v38 = vrot.slane %v15818_v30, 4  ;;  %v9406_v57 = vrot.slane %v15886_v23, 3 }
 0x6ab   : > { %v9019_v8 = vsel %vm8867_vm1, %v9018_v43, %v9017_v50  ;;  %v9401_v52 = vsel %vm8861_vm15, %v16810_v63, %v16809_v28  ;;  %v9398_v61 = vsel %vm8879_vm5, %v15701_v45, %v9397_v0  ;;  %v9408_v42 = vrot.slane %v15855_v59, 2 }
 0x6ac   : > { %v9020_v11 = vsel %vm8870_vm2, %v15882_v2, %v9019_v8  ;;  %v9403_v19 = vsel %vm8864_vm0, %v9402_v44, %v9401_v52  ;;  %v9410_v12 = vrot.slane %v15923_v41, 1  ;;  %9413 = vrot.lane.b32.xlu1 %v9398_v61, %s11792_s23  ;;  %v16811_v47 = vrot.slane %v15772_v1, 5 }
 0x6ad   : > { %v9022_v60 = vsel %vm8873_vm3, %v9021_v29, %v9020_v11  ;;  %v9405_v62 = vsel %vm8867_vm1, %v9404_v38, %v9403_v19  ;;  %v16812_v44 = vrot.slane %v15744_v22, 4  ;;  %v9052_v51 = vrot.slane %v15800_v18, 2 }
 0x6ae   : > { %v9024_v55 = vsel %vm8876_vm4, %v9023_v6, %v9022_v60  ;;  %v9407_v7 = vsel %vm8870_vm2, %v9406_v57, %v9405_v62  ;;  %v16813_v43 = vrot.slane %v15795_v36, 3  ;;  %v9054_v40 = vrot.slane %v15882_v2, 1 }
 0x6af   : > { %v9026_v4 = vsel %vm8879_vm5, %v9025_v48, %v9024_v55  ;;  %v9049_v34 = vsel %vm8861_vm15, %v16812_v44, %v16811_v47  ;;  %v9409_v25 = vsel %vm8873_vm3, %v9408_v42, %v9407_v7  ;;  %v9057_v53 = vrot.slane %v15912_v26, 7 }
 0x6b0   : > { %9029 = vrot.lane.b32.xlu0 %v9026_v4, %s11790_s21  ;;  %v9051_v21 = vsel %vm8864_vm0, %v16813_v43, %v9049_v34  ;;  %v9411_v50 = vsel %vm8876_vm4, %v9410_v12, %v9409_v25  ;;  %v9059_v14 = vrot.slane %v15946_v46, 6  ;;  %v16814_v8 = vrot.slane %v15776_v20, 6 }
 0x6b1   : > { %v9053_v29 = vsel %vm8867_vm1, %v9052_v51, %v9051_v21  ;;  %v16815_v6 = vrot.slane %v15748_v17, 5  ;;  %v9412_v0 = vsel %vm8879_vm5, %v15955_v9, %v9411_v50  ;;  %v9370_v63 = vrot.slane %v15818_v30, 3 }
 0x6b2   : > { %v9055_v11 = vsel %vm8870_vm2, %v9054_v40, %v9053_v29  ;;  %9415 = vrot.lane.b32.xlu1 %v9412_v0, %s11792_s23  ;;  %v9372_v38 = vrot.slane %v15886_v23, 2  ;;  %v9374_v61 = vrot.slane %v15855_v59, 1  ;;  %v9377_v60 = vrot.slane %v15955_v9, 7 }
 0x6b3   : > { %v9367_v48 = vsel %vm8861_vm15, %v16815_v6, %v16814_v8  ;;  %v9056_v52 = vsel %vm8873_vm3, %v15851_v27, %v9055_v11  ;;  %v16816_v55 = vrot.slane %v15776_v20, 1  ;;  %v9199_v62 = vrot.slane %v15818_v30, 6 }
 0x6b4   : > { %v9369_v28 = vsel %vm8864_vm0, %v9368_v35, %v9367_v48  ;;  %v9058_v19 = vsel %vm8876_vm4, %v9057_v53, %v9056_v52  ;;  %v16817_v4 = vrot.slane %v15822_v39, 7  ;;  %v9201_v47 = vrot.slane %v15886_v23, 5 }
 0x6b5   : > { %v9371_v57 = vsel %vm8867_vm1, %v9370_v63, %v9369_v28  ;;  %v9196_v35 = vsel %vm8861_vm15, %v15748_v17, %v16816_v55  ;;  %v9060_v42 = vsel %vm8879_vm5, %v9059_v14, %v9058_v19  ;;  %v9203_v51 = vrot.slane %v15855_v59, 4 }
 0x6b6   : > { %v9373_v12 = vsel %vm8870_vm2, %v9372_v38, %v9371_v57  ;;  %v9198_v7 = vsel %vm8864_vm0, %v16817_v4, %v9196_v35  ;;  %9063 = vrot.lane.b32.xlu0 %v9060_v42, %s11791_s22  ;;  %v9205_v25 = vrot.slane %v15923_v41, 3  ;;  %v9207_v40 = vrot.slane %v15955_v9, 2 }
 0x6b7   : > { %v9375_v44 = vsel %vm8873_vm3, %v9374_v61, %v9373_v12  ;;  %v9200_v34 = vsel %vm8867_vm1, %v9199_v62, %v9198_v7  ;;  %v16818_v53 = vrot.slane %v15776_v20, 2  ;;  %v16819_v50 = vrot.slane %v15748_v17, 1 }
 0x6b8   : > { %v9376_v43 = vsel %vm8876_vm4, %v15923_v41, %v9375_v44  ;;  %v9202_v21 = vsel %vm8870_vm2, %v9201_v47, %v9200_v34  ;;  %v9233_v48 = vrot.slane %v15818_v30, 7  ;;  %v9235_v11 = vrot.slane %v15886_v23, 6 }
 0x6b9   : > { %v9231_v29 = vsel %vm8861_vm15, %v16819_v50, %v16818_v53  ;;  %v9378_v14 = vsel %vm8879_vm5, %v9377_v60, %v9376_v43  ;;  %v9204_v8 = vsel %vm8873_vm3, %v9203_v51, %v9202_v21  ;;  %v9237_v28 = vrot.slane %v15855_v59, 5 }
 0x6ba   : > { %v9232_v6 = vsel %vm8864_vm0, %v15822_v39, %v9231_v29  ;;  %v9206_v0 = vsel %vm8876_vm4, %v9205_v25, %v9204_v8  ;;  %v9239_v63 = vrot.slane %v15923_v41, 4  ;;  %9381 = vrot.lane.b32.xlu0 %v9378_v14, %s11786_s17  ;;  %v9241_v61 = vrot.slane %v15955_v9, 3 }
 0x6bb   : > { %v9208_v52 = vsel %vm8879_vm5, %v9207_v40, %v9206_v0  ;;  %v9234_v38 = vsel %vm8867_vm1, %v9233_v48, %v9232_v6  ;;  %v16820_v60 = vrot.slane %v15776_v20, 3  ;;  %v16821_v19 = vrot.slane %v15748_v17, 2 }
 0x6bc   : > { %v9236_v55 = vsel %vm8870_vm2, %v9235_v11, %v9234_v38  ;;  %v16822_v35 = vrot.slane %v15822_v39, 1  ;;  %v9269_v42 = vrot.slane %v15886_v23, 7  ;;  %v9271_v12 = vrot.slane %v15855_v59, 6 }
 0x6bd   : > { %v9265_v57 = vsel %vm8861_vm15, %v16821_v19, %v16820_v60  ;;  %v9238_v4 = vsel %vm8873_vm3, %v9237_v28, %v9236_v55  ;;  %v9273_v47 = vrot.slane %v15923_v41, 5  ;;  %v9275_v44 = vrot.slane %v15955_v9, 4 }
 0x6be   : > { %v9267_v62 = vsel %vm8864_vm0, %v16822_v35, %v9265_v57  ;;  %v9240_v34 = vsel %vm8876_vm4, %v9239_v63, %v9238_v4  ;;  %v16823_v25 = vrot.slane %v15776_v20, 4  ;;  %v16824_v43 = vrot.slane %v15748_v17, 3  ;;  %9211 = vrot.lane.b32.xlu0 %v9208_v52, %s11787_s18 }
 0x6bf   : > { %v9268_v7 = vsel %vm8867_vm1, %v15818_v30, %v9267_v62  ;;  %v9302_v40 = vrot.slane %v15818_v30, 1  ;;  %v9242_v53 = vsel %vm8879_vm5, %v9241_v61, %v9240_v34  ;;  %v16825_v29 = vrot.slane %v15822_v39, 2 }
 0x6c0   : > { %v9270_v51 = vsel %vm8870_vm2, %v9269_v42, %v9268_v7  ;;  %v9299_v21 = vsel %vm8861_vm15, %v16824_v43, %v16823_v25  ;;  %v9305_v8 = vrot.slane %v15855_v59, 7  ;;  %v9307_v0 = vrot.slane %v15923_v41, 6 }
 0x6c1   : > { %v9272_v50 = vsel %vm8873_vm3, %v9271_v12, %v9270_v51  ;;  %v9301_v14 = vsel %vm8864_vm0, %v16825_v29, %v9299_v21  ;;  %v9309_v11 = vrot.slane %v15955_v9, 5  ;;  %v16826_v52 = vrot.slane %v15776_v20, 5 }
 0x6c2   : > { %v9274_v6 = vsel %vm8876_vm4, %v9273_v47, %v9272_v50  ;;  %v9303_v48 = vsel %vm8867_vm1, %v9302_v40, %v9301_v14  ;;  %v16827_v38 = vrot.slane %v15748_v17, 4  ;;  %v9336_v60 = vrot.slane %v15818_v30, 2  ;;  %9245 = vrot.lane.b32.xlu0 %v9242_v53, %s11788_s19 }
 0x6c3   : > { %v9276_v28 = vsel %vm8879_vm5, %v9275_v44, %v9274_v6  ;;  %v9304_v63 = vsel %vm8870_vm2, %v15886_v23, %v9303_v48  ;;  %v16828_v57 = vrot.slane %v15822_v39, 3  ;;  %v9338_v35 = vrot.slane %v15886_v23, 1 }
 0x6c4   : > { %v9333_v61 = vsel %vm8861_vm15, %v16827_v38, %v16826_v52  ;;  %v9306_v19 = vsel %vm8873_vm3, %v9305_v8, %v9304_v63  ;;  %v9341_v62 = vrot.slane %v15923_v41, 7  ;;  %v9343_v4 = vrot.slane %v15955_v9, 6 }
 0x6c5   : > { %v9335_v55 = vsel %vm8864_vm0, %v16828_v57, %v9333_v61  ;;  %v9308_v42 = vsel %vm8876_vm4, %v9307_v0, %v9306_v19  ;;  %v16829_v7 = vrot.slane %v15772_v1, 7  ;;  %v16830_v47 = vrot.slane %v15744_v22, 6 }
 0x6c6   : > { %v9337_v12 = vsel %vm8867_vm1, %v9336_v60, %v9335_v55  ;;  %v9310_v34 = vsel %vm8879_vm5, %v9309_v11, %v9308_v42  ;;  %v16831_v25 = vrot.slane %v15795_v36, 5  ;;  %v9120_v21 = vrot.slane %v15800_v18, 4  ;;  %9279 = vrot.lane.b32.xlu0 %v9276_v28, %s11789_s20 }
 0x6c7   : > { %v9117_v44 = vsel %vm8861_vm15, %v16830_v47, %v16829_v7  ;;  %v9339_v51 = vsel %vm8870_vm2, %v9338_v35, %v9337_v12  ;;  %v9122_v53 = vrot.slane %v15882_v2, 3  ;;  %v9126_v50 = vrot.slane %v15912_v26, 1 }
 0x6c8   : > { %v9119_v43 = vsel %vm8864_vm0, %v16831_v25, %v9117_v44  ;;  %v9340_v40 = vsel %vm8873_vm3, %v15855_v59, %v9339_v51  ;;  %v9124_v8 = vrot.slane %v15851_v27, 2  ;;  %v16832_v6 = vrot.slane %v15548_v37, 7 }
 0x6c9   : > { %v9342_v29 = vsel %vm8876_vm4, %v9341_v62, %v9340_v40  ;;  %v9121_v14 = vsel %vm8867_vm1, %v9120_v21, %v9119_v43  ;;  %v16833_v63 = vrot.slane %v15615_v31, 6  ;;  %v9153_v61 = vrot.slane %v15626_v3, 6 }
 0x6ca   : > { %v8862_v48 = vsel %vm8861_vm15, %v16832_v6, %v15573_v10  ;;  %v9344_v0 = vsel %vm8879_vm5, %v9343_v4, %v9342_v29  ;;  %v9123_v11 = vsel %vm8870_vm2, %v9122_v53, %v9121_v14  ;;  %v9151_v37 = vrot.slane %v15562_v32, 7  ;;  %9313 = vrot.lane.b32.xlu0 %v9310_v34, %s11790_s21 }
 0x6cb   : > { %v8865_v52 = vsel %vm8864_vm0, %v16833_v63, %v8862_v48  ;;  %v9125_v38 = vsel %vm8873_vm3, %v9124_v8, %v9123_v11  ;;  %v8883_v28 = vrot.slane %v15795_v36, 6  ;;  %v8881_v19 = vrot.slane %v15744_v22, 7 }
 0x6cc   : > { %v9127_v60 = vsel %vm8876_vm4, %v9126_v50, %v9125_v38  ;;  %v9152_v31 = vsel %vm8861_vm15, %v9151_v37, %v15584_v13  ;;  %v9167_v3 = vrot.slane %v15822_v39, 6  ;;  %v8885_v55 = vrot.slane %v15800_v18, 5 }
 0x6cd   : > { %v9128_v10 = vsel %vm8879_vm5, %v15946_v46, %v9127_v60  ;;  %v16270_v57 = vsel %vm8864_vm0, %v9153_v61, %v9152_v31  ;;  %v8882_v32 = vsel %vm8861_vm15, %v8881_v19, %v15772_v1  ;;  %v9165_v35 = vrot.slane %v15748_v17, 7 }
 0x6ce   : > { %9347 = vrot.lane.b32.xlu0 %v9344_v0, %s11791_s22  ;;  %v8884_v36 = vsel %vm8864_vm0, %v8883_v28, %v8882_v32  ;;  %v8887_v22 = vrot.slane %v15882_v2, 4  ;;  %v8889_v62 = vrot.slane %v15851_v27, 3  ;;  %v8891_v42 = vrot.slane %v15912_v26, 2 }
 0x6cf   : > { %v8886_v13 = vsel %vm8867_vm1, %v8885_v55, %v8884_v36  ;;  %v8893_v39 = vrot.slane %v15946_v46, 1  ;;  %v9166_v18 = vsel %vm8861_vm15, %v9165_v35, %v15776_v20  ;;  %v9169_v17 = vrot.slane %v15818_v30, 5 }
 0x6d0   : > { %v8888_v1 = vsel %vm8870_vm2, %v8887_v22, %v8886_v13  ;;  %v9168_v4 = vsel %vm8864_vm0, %v9167_v3, %v9166_v18  ;;  %v9171_v2 = vrot.slane %v15886_v23, 4  ;;  %v9173_v46 = vrot.slane %v15855_v59, 3 }
 0x6d1   : > { %v8890_v12 = vsel %vm8873_vm3, %v8889_v62, %v8888_v1  ;;  %v9170_v26 = vsel %vm8867_vm1, %v9169_v17, %v9168_v4  ;;  %v9175_v7 = vrot.slane %v15923_v41, 2  ;;  %v9177_v47 = vrot.slane %v15955_v9, 1 }
 0x6d2   : > { %9131 = vrot.lane.b32.xlu0 %v9128_v10, %s11792_s23  ;;  %v8892_v27 = vsel %vm8876_vm4, %v8891_v42, %v8890_v12  ;;  %v9172_v30 = vsel %vm8870_vm2, %v9171_v2, %v9170_v26  ;;  %v8869_v59 = vrot.slane %v15669_v54, 4  ;;  %v8866_v41 = vrot.slane %v15595_v58, 5 }
 0x6d3   : > { %v16297_v20 = vsel %vm8879_vm5, %v8893_v39, %v8892_v27  ;;  %v9174_v23 = vsel %vm8873_vm3, %v9173_v46, %v9172_v30  ;;  %v8875_v40 = vrot.slane %v15718_v33, 2  ;;  %v8872_v9 = vrot.slane %v15649_v56, 3 }
 0x6d4   : > { %v9176_v44 = vsel %vm8876_vm4, %v9175_v7, %v9174_v23  ;;  %v8868_v43 = vsel %vm8867_vm1, %v8866_v41, %v8865_v52  ;;  %v8878_v14 = vrot.slane %v15693_v16, 1  ;;  %v9157_v60 = vrot.slane %v15673_v24, 4 }
 0x6d5   : > { %v16304_v34 = vsel %vm8879_vm5, %v9177_v47, %v9176_v44  ;;  %v8871_v21 = vsel %vm8870_vm2, %v8869_v59, %v8868_v43  ;;  %v9155_v10 = vrot.slane %v15608_v5, 5  ;;  %v9161_v3 = vrot.slane %v15722_v49, 2 }
 0x6d6   : > { %v8874_v50 = vsel %vm8873_vm3, %v8872_v9, %v8871_v21  ;;  %v9159_v55 = vrot.slane %v15653_v15, 3  ;;  %v9163_v24 = vrot.slane %v15701_v45, 1 }
 0x6d7   : > { %v8877_v29 = vsel %vm8876_vm4, %v8875_v40, %v8874_v50  ;;  %v9156_v28 = vsel %vm8867_vm1, %v9155_v10, %v16270_v57 }
 0x6d8   : > { %v8880_v58 = vsel %vm8879_vm5, %v8878_v14, %v8877_v29  ;;  %v9158_v31 = vsel %vm8870_vm2, %v9157_v60, %v9156_v28 }
 0x6d9   : > { %v9160_v35 = vsel %vm8873_vm3, %v9159_v55, %v9158_v31 }
 0x6da   : > { %v9162_v22 = vsel %vm8876_vm4, %v9161_v3, %v9160_v35 }
 0x6db   : > { %v9164_v13 = vsel %vm8879_vm5, %v9163_v24, %v9162_v22 }
 0x6e8   : > { %v9096_v51 = vpop.permute.xlu1 %9095 }
 0x6ea   : > { %v8926_v54 = vpop.permute.xlu0 %8925 }
 0x6eb   : > { %v9420_v6 = vsel %vm9419_vm6, %v8880_v58, %v8926_v54 }
 0x6ec   : > { %v8960_v25 = vpop.permute.xlu1 %8959 }
 0x6ed   : > { %v9423_v56 = vsel %vm9422_vm7, %v9420_v6, %v8960_v25 }
 0x6f2   : > { %v8994_v53 = vpop.permute.xlu1 %8993 }
 0x6f3   : > { %v9426_v48 = vsel %vm9425_vm8, %v9423_v56, %v8994_v53 }
 0x6f6   : > { %v9028_v8 = vpop.permute.xlu1 %9027 }
 0x6f7   : > { %v9429_v16 = vsel %vm9428_vm9, %v9426_v48, %v9028_v8 }
 0x6fa   : > { %v9062_v33 = vpop.permute.xlu1 %9061 }
 0x6fb   : > { %v9432_v11 = vsel %vm9431_vm10, %v9429_v16, %v9062_v33 }
 0x6fc   : > { %v9435_v63 = vsel %vm9434_vm11, %v9432_v11, %v9096_v51 }
 0x6fe   : > { %v9380_v0 = vpop.permute.xlu1 %9379 }
 0x702   : > { %v9130_v52 = vpop.permute.xlu1 %9129 }
 0x703   : > { %v9438_v38 = vsel %vm9437_vm12, %v9435_v63, %v9130_v52 }
 0x704   : > { %9454 = vst [vmem:[%s16325_s29] sm:$0xff] %v9438_v38 }
 0x706   : > { %v9210_v61 = vpop.permute.xlu1 %9209 }
 0x707   : > { %v9440_v62 = vsel %vm9419_vm6, %v9164_v13, %v9210_v61 }
 0x709   : > { %v9098_v37 = vpop.permute.xlu0 %9097 }
 0x70a   : > { %v9244_v19 = vpop.permute.xlu1 %9243 }
 0x70b   : > { %v9442_v42 = vsel %vm9422_vm7, %v9440_v62, %v9244_v19 }
 0x70d   : > { %v8928_v32 = vpop.permute.xlu0 %8927 }
 0x70e   : > { %v9278_v36 = vpop.permute.xlu1 %9277  ;;  %v9421_v47 = vsel %vm9419_vm6, %v16297_v20, %v8928_v32 }
 0x70f   : > { %v9444_v49 = vsel %vm9425_vm8, %v9442_v42, %v9278_v36 }
 0x712   : > { %v9312_v57 = vpop.permute.xlu1 %9311 }
 0x713   : > { %v8962_v5 = vpop.permute.xlu0 %8961  ;;  %v9446_v15 = vsel %vm9428_vm9, %v9444_v49, %v9312_v57 }
 0x714   : > { %v9424_v44 = vsel %vm9422_vm7, %v9421_v47, %v8962_v5 }
 0x718   : > { %v9346_v39 = vpop.permute.xlu1 %9345 }
 0x719   : > { %v9448_v18 = vsel %vm9431_vm10, %v9446_v15, %v9346_v39 }
 0x71a   : > { %v8996_v1 = vpop.permute.xlu0 %8995  ;;  %v9450_v17 = vsel %vm9434_vm11, %v9448_v18, %v9380_v0 }
 0x71b   : > { %v9427_v25 = vsel %vm9425_vm8, %v9424_v44, %v8996_v1 }
 0x71e   : > { %v9414_v12 = vpop.permute.xlu1 %9413 }
 0x71f   : > { %v9452_v45 = vsel %vm9437_vm12, %v9450_v17, %v9414_v12 }
 0x720   : > { %9455 = vst [vmem:[%s16325_s29 + $0x8] sm:$0xff] %v9452_v45 }
 0x722   : > { %v9030_v4 = vpop.permute.xlu0 %9029 }
 0x723   : > { %v9430_v41 = vsel %vm9428_vm9, %v9427_v25, %v9030_v4 }
 0x724   : > { %v9416_v9 = vpop.permute.xlu1 %9415 }
 0x728   : > { %v9064_v2 = vpop.permute.xlu0 %9063 }
 0x729   : > { %v9433_v40 = vsel %vm9431_vm10, %v9430_v41, %v9064_v2 }
 0x72a   : > { %v9436_v50 = vsel %vm9434_vm11, %v9433_v40, %v9098_v37 }
 0x72c   : > { %v9382_v27 = vpop.permute.xlu0 %9381 }
 0x730   : > { %v9212_v26 = vpop.permute.xlu0 %9211 }
 0x731   : > { %v9441_v23 = vsel %vm9419_vm6, %v16304_v34, %v9212_v26 }
 0x734   : > { %v9246_v46 = vpop.permute.xlu0 %9245 }
 0x735   : > { %v9443_v51 = vsel %vm9422_vm7, %v9441_v23, %v9246_v46 }
 0x738   : > { %v9280_v7 = vpop.permute.xlu0 %9279 }
 0x739   : > { %v9445_v59 = vsel %vm9425_vm8, %v9443_v51, %v9280_v7 }
 0x73c   : > { %v9314_v30 = vpop.permute.xlu0 %9313 }
 0x73d   : > { %v9447_v43 = vsel %vm9428_vm9, %v9445_v59, %v9314_v30 }
 0x740   : > { %v9348_v21 = vpop.permute.xlu0 %9347 }
 0x741   : > { %v9449_v20 = vsel %vm9431_vm10, %v9447_v43, %v9348_v21 }
 0x742   : > { %v9451_v34 = vsel %vm9434_vm11, %v9449_v20, %v9382_v27 }
 0x743   : > { %v9453_v53 = vsel %vm9437_vm12, %v9451_v34, %v9416_v9 }
 0x744   : > { %9457 = vst [vmem:[%s16325_s29 + $0x18] sm:$0xff] %v9453_v53  ;;  %v9132_v29 = vpop.permute.xlu0 %9131 }
 0x745   : > { %v9439_v14 = vsel %vm9437_vm12, %v9436_v50, %v9132_v29 }
 0x746   : > { %9456 = vst [vmem:[%s16325_s29 + $0x10] sm:$0xff] %v9439_v14 }
 0x747 PF: > { %s17_s24 = sadd.s32 1, %s11780_s24  }
 0x748   : > { %p14_p5 = scmp.ge.s32.totalorder %s17_s24, 4  }
 0x74a   :  { %16 = sbr.rel (!%p14_p5) target bundleno = 1 (0x1), region = 98 }

</bundles_post_ra>
